<compile_context>
chip_gen: v7x
topology: tpu7x:2x2x1
jax: 0.10.0
libtpu: 0.0.40
codegen_flags: <defaults>
</compile_context>

<pallas_src>
import math
from functools import partial

import jax
import jax.numpy as jnp
from jax.experimental import pallas as pl
from jax.experimental.pallas import tpu as pltpu


def _round_up(x, m):
    return ((x + m - 1) // m) * m


def _vmem_limit_bytes(default=112 * 1024 * 1024):
    """~3/4 of physical VMEM: ~96 MiB on v5e/v6e, ~48 MiB on v7x."""
    try:
        cap = int(pltpu.get_tpu_info().vmem_capacity_bytes)
        return int(min(default, cap * 3 // 4))
    except Exception:
        return 64 * 1024 * 1024


# ---------------------------------------------------------------------------
# Kernel 1: conv1 as an M-tiled matmul + bias + ReLU (K = 9 is FLOP-trivial).
# Patch rows arrive pre-ordered so the output array is ALREADY in the layout
# kernel 2 reads: row ((b*NB + n)*3 + r)*F1u*Gb + f1*Gb + g holds
# h1[b, t1 = 3*(n*bt2 + g) + r, f1, :], lane dim = Cp (odim padded to 128).
# ---------------------------------------------------------------------------
def _conv1_matmul_kernel(p_ref, w_ref, b_ref, o_ref):
    acc = jnp.dot(p_ref[...], w_ref[...], preferred_element_type=jnp.float32)
    o_ref[...] = jnp.maximum(acc + b_ref[...], 0.0).astype(o_ref.dtype)


def conv1_matmul(patches, w1p, b1p, *, block_m, vmem_limit):
    M, K = patches.shape
    Cp = w1p.shape[1]
    bm = _round_up(min(block_m, M), 8)
    Mp = _round_up(M, bm)
    if Mp != M:
        patches = jnp.pad(patches, ((0, Mp - M), (0, 0)))
    flops = 2 * Mp * K * Cp
    bytes_accessed = Mp * K * 2 + K * Cp * 2 + Cp * 4 + Mp * Cp * 2
    return pl.pallas_call(
        _conv1_matmul_kernel,
        out_shape=jax.ShapeDtypeStruct((Mp, Cp), jnp.bfloat16),
        grid=(Mp // bm,),
        in_specs=[
            pl.BlockSpec((bm, K), lambda i: (i, 0)),
            pl.BlockSpec((K, Cp), lambda i: (0, 0)),
            pl.BlockSpec((1, Cp), lambda i: (0, 0)),
        ],
        out_specs=pl.BlockSpec((bm, Cp), lambda i: (i, 0)),
        compiler_params=pltpu.CompilerParams(
            dimension_semantics=("parallel",),
            vmem_limit_bytes=vmem_limit),
        cost_estimate=pl.CostEstimate(flops=int(flops), transcendentals=0,
                                      bytes_accessed=int(bytes_accessed)),
    )(patches, w1p, b1p)


# ---------------------------------------------------------------------------
# Kernel 2: fused conv2 (+ReLU) -> (c,f) flatten -> Linear -> *sqrt(odim)+pe.
# ---------------------------------------------------------------------------
def _conv2_linear_pe_kernel(h_ref, w2_ref, b2_ref, wlin_ref, blin_ref,
                            pe_ref, o_ref, h2_s, *, bt2, Gb, F1u, F2, Cp,
                            xscale):
    """Per grid step (b, j):
       h_ref   : (3*F1u*Gb, Cp) bf16  h1 rows ordered (r, f1, g);
                                      t1 = 3*(t2_local + q) + r, g = t2+q.
       w2_ref  : (25, Cp, Cp)   bf16  conv2 tap (ki, kj) -> w2_ref[5*ki+kj]
       b2_ref  : (1, Cp)        f32
       wlin_ref: (F2*Cp, Npad)  bf16  row f2*Cp + c  ==  wlin[:, c*F2 + f2]
       blin_ref: (1, Npad)      f32
       pe_ref  : (bt2, Npad)    f32
       o_ref   : (bt2, Npad)    f32
       h2_s    : (bt2, F2*Cp)   bf16  VMEM scratch (staged conv2 activations)
    """
    for f2 in range(F2):
        acc = jnp.zeros((bt2, Cp), jnp.float32)
        for ki in range(5):                      # time taps: t1 = 3*(t2+q)+r
            q, r = divmod(ki, 3)
            for kj in range(5):                  # freq taps: f1 = 3*f2 + kj
                row0 = (r * F1u + 3 * f2 + kj) * Gb + q      # static offset
                lhs = h_ref[pl.ds(row0, bt2), :]             # (bt2, Cp)
                acc = acc + jnp.dot(lhs, w2_ref[5 * ki + kj],
                                    preferred_element_type=jnp.float32)
        h2 = jnp.maximum(acc + b2_ref[...], 0.0)             # (bt2, Cp) f32
        h2_s[:, pl.ds(f2 * Cp, Cp)] = h2.astype(jnp.bfloat16)
    out = jnp.dot(h2_s[...], wlin_ref[...],
                  preferred_element_type=jnp.float32)        # (bt2, Npad)
    o_ref[...] = ((out + blin_ref[...]) * xscale
                  + pe_ref[...]).astype(o_ref.dtype)


def conv2_linear_posenc(h1_rows, w2p, b2p, wlin2, blin_p, pe_pad, *,
                        B, NB, bt2, Gb, F1u, F2, Cp, Npad, xscale,
                        vmem_limit):
    rows_blk = 3 * F1u * Gb
    kern = partial(_conv2_linear_pe_kernel, bt2=bt2, Gb=Gb, F1u=F1u, F2=F2,
                   Cp=Cp, xscale=xscale)
    flops = 2 * B * NB * bt2 * F2 * Cp * (25 * Cp + Npad)
    bytes_accessed = (B * NB * rows_blk * Cp * 2 + w2p.size * 2
                      + wlin2.size * 2 + pe_pad.size * 4
                      + B * NB * bt2 * Npad * 4)
    # NOTE: w2p / wlin2 / bias block indices are constant over the grid, so
    # Pallas only DMAs them once (explicit pl.Buffered(1) skipped for compile
    # robustness).
    return pl.pallas_call(
        kern,
        out_shape=jax.ShapeDtypeStruct((B, NB * bt2, Npad), jnp.float32),
        grid=(B, NB),
        in_specs=[
            pl.BlockSpec((rows_blk, Cp), lambda b, j: (b * NB + j, 0)),
            pl.BlockSpec((25, Cp, Cp), lambda b, j: (0, 0, 0)),
            pl.BlockSpec((1, Cp), lambda b, j: (0, 0)),
            pl.BlockSpec((F2 * Cp, Npad), lambda b, j: (0, 0)),
            pl.BlockSpec((1, Npad), lambda b, j: (0, 0)),
            pl.BlockSpec((bt2, Npad), lambda b, j: (j, 0)),
        ],
        out_specs=pl.BlockSpec((None, bt2, Npad), lambda b, j: (b, j, 0)),
        scratch_shapes=[pltpu.VMEM((bt2, F2 * Cp), jnp.bfloat16)],
        compiler_params=pltpu.CompilerParams(
            dimension_semantics=("parallel", "parallel"),
            vmem_limit_bytes=vmem_limit),
        cost_estimate=pl.CostEstimate(flops=int(flops), transcendentals=0,
                                      bytes_accessed=int(bytes_accessed)),
    )(h1_rows, w2p, b2p, wlin2, blin_p, pe_pad)


# ---------------------------------------------------------------------------
# Plain-JAX glue (only small, channel-free tensors are touched here).
# ---------------------------------------------------------------------------
def sinusoidal_pe(offset, length, d_model):
    """wenet PositionalEncoding table slice, shape (1, length, d_model)."""
    pos = jnp.arange(offset, offset + length, dtype=jnp.float32)[:, None]
    div = jnp.exp(
        jnp.arange(0, d_model, 2, dtype=jnp.float32)
        * -(math.log(10000.0) / d_model))
    pe = jnp.zeros((length, d_model), dtype=jnp.float32)
    pe = pe.at[:, 0::2].set(jnp.sin(pos * div))
    pe = pe.at[:, 1::2].set(jnp.cos(pos * div))
    return pe[None]


def init_params(key, idim, odim):
    f_lin = ((idim - 1) // 2 - 2) // 3
    k1, k2, k3, k4, k5, k6 = jax.random.split(key, 6)
    scale = 0.05
    return {
        "w1": scale * jax.random.normal(k1, (odim, 1, 3, 3), jnp.float32),
        "b1": scale * jax.random.normal(k2, (odim,), jnp.float32),
        "w2": scale * jax.random.normal(k3, (odim, odim, 5, 5), jnp.float32),
        "b2": scale * jax.random.normal(k4, (odim,), jnp.float32),
        "wlin": scale * jax.random.normal(k5, (odim, odim * f_lin), jnp.float32),
        "blin": scale * jax.random.normal(k6, (odim,), jnp.float32),
    }


def conv2d_subsampling6_forward(x, x_mask, params, offset=0,
                                *, block_m=1024, block_t2=128):
    """x: (B, T, idim) f32, x_mask: (B, 1, T) bool."""
    B, T, idim = x.shape
    odim = params["b1"].shape[0]
    C = odim

    T1 = (T - 1) // 2                  # conv1 time length   (k=3, s=2)
    F1 = (idim - 1) // 2               # conv1 freq length
    T2 = (T1 - 2) // 3                 # conv2 time length   (k=5, s=3)
    F2 = (F1 - 2) // 3                 # conv2 freq length
    assert T2 >= 1 and F2 >= 1
    F1u = 3 * F2 + 2                   # conv1 freq positions conv2 consumes

    Cp = _round_up(C, 128)             # lane-padded channel dim
    Npad = _round_up(odim, 128)        # lane-padded model dim
    bt2 = _round_up(min(block_t2, _round_up(T2, 8)), 8)  # t2 rows per block
    NB = (T2 + bt2 - 1) // bt2         # time blocks
    Gb = _round_up(bt2 + 1, 8)         # t1-groups stored per block (+1 halo)
    rows_blk = 3 * F1u * Gb            # h1 rows per (batch, time-block)
    Mtot = B * NB * rows_blk
    xscale = math.sqrt(odim)
    vmem_limit = _vmem_limit_bytes()

    # ---- conv1 patches, built directly in the (b, n, r, f1, g, k) order the
    # fused conv2 kernel reads.  No channel factor => all this is cheap, and
    # nothing h1-sized is ever touched by XLA afterwards.
    T1_need = 3 * ((NB - 1) * bt2 + Gb)
    xb = x.astype(jnp.bfloat16)
    pad_t = max(0, 2 * T1_need + 2 - T)
    pad_f = max(0, 2 * F1u + 2 - idim)
    xp = jnp.pad(xb, ((0, 0), (0, pad_t), (0, pad_f)))
    pieces = [xp[:, i:i + 2 * T1_need:2, j:j + 2 * F1u:2]
              for i in range(3) for j in range(3)]
    p0 = jnp.stack(pieces, axis=-1)                    # (B, T1_need, F1u, 9)
    t1_idx = (3 * (jnp.arange(NB)[:, None, None] * bt2
                   + jnp.arange(Gb)[None, None, :])
              + jnp.arange(3)[None, :, None])          # (NB, 3, Gb)
    patches = p0[:, t1_idx]                            # (B, NB, 3, Gb, F1u, 9)
    patches = jnp.swapaxes(patches, 3, 4)              # (B, NB, 3, F1u, Gb, 9)
    patches = patches.reshape(Mtot, 9)

    w1p = params["w1"].transpose(2, 3, 1, 0).reshape(9, C)
    w1p = jnp.pad(w1p, ((0, 0), (0, Cp - C))).astype(jnp.bfloat16)
    b1p = jnp.pad(params["b1"], (0, Cp - C)).reshape(1, Cp).astype(jnp.float32)

    # ---- kernel 1: h1 rows land directly in kernel-2 layout (bf16, Cp lanes)
    h1_rows = conv1_matmul(patches, w1p, b1p, block_m=block_m,
                           vmem_limit=vmem_limit)

    # ---- conv2 / linear weights (tap-major, channel-padded layouts) --------
    w2p = params["w2"].transpose(2, 3, 1, 0)           # (5, 5, Cin, Cout)
    w2p = jnp.pad(w2p, ((0, 0), (0, 0), (0, Cp - C), (0, Cp - C)))
    w2p = w2p.reshape(25, Cp, Cp).astype(jnp.bfloat16)
    b2p = jnp.pad(params["b2"], (0, Cp - C)).reshape(1, Cp).astype(jnp.float32)
    wlin2 = params["wlin"].reshape(odim, C, F2).transpose(2, 1, 0)  # (F2,C,N)
    wlin2 = jnp.pad(wlin2, ((0, 0), (0, Cp - C), (0, Npad - odim)))
    wlin2 = wlin2.reshape(F2 * Cp, Npad).astype(jnp.bfloat16)
    blin_p = jnp.pad(params["blin"], (0, Npad - odim))
    blin_p = blin_p.reshape(1, Npad).astype(jnp.float32)

    pe_full = sinusoidal_pe(offset, NB * bt2, odim)    # (1, NB*bt2, odim)
    pe_pad = jnp.pad(pe_full[0], ((0, 0), (0, Npad - odim)))  # (NB*bt2, Npad)

    out_pad = conv2_linear_posenc(
        h1_rows, w2p, b2p, wlin2, blin_p, pe_pad,
        B=B, NB=NB, bt2=bt2, Gb=Gb, F1u=F1u, F2=F2, Cp=Cp, Npad=Npad,
        xscale=xscale, vmem_limit=vmem_limit)

    out = out_pad[:, :T2, :odim]
    pos_emb = pe_full[:, :T2, :]
    mask = x_mask[:, :, :-2:2][:, :, :-4:3]
    return out, pos_emb, mask


# ---------------------------------------------------------------------------
# Pure-XLA reference (mirrors the bf16-operand / f32-accumulate path)
# ---------------------------------------------------------------------------
def _reference_forward(x, x_mask, params, offset=0):
    odim = params["b1"].shape[0]
    xi = x.astype(jnp.bfloat16)[:, None, :, :]               # NCHW
    h1 = jax.lax.conv_general_dilated(
        xi, params["w1"].astype(jnp.bfloat16), (2, 2), "VALID",
        dimension_numbers=("NCHW", "OIHW", "NCHW"),
        preferred_element_type=jnp.float32)
    h1 = jnp.maximum(h1 + params["b1"][None, :, None, None], 0.0)
    h1 = h1.astype(jnp.bfloat16)
    h2 = jax.lax.conv_general_dilated(
        h1, params["w2"].astype(jnp.bfloat16), (3, 3), "VALID",
        dimension_numbers=("NCHW", "OIHW", "NCHW"),
        preferred_element_type=jnp.float32)
    h2 = jnp.maximum(h2 + params["b2"][None, :, None, None], 0.0)
    b, c, t, f = h2.shape
    feat = jnp.transpose(h2, (0, 2, 1, 3)).reshape(b, t, c * f)
    lin = jnp.dot(feat.astype(jnp.bfloat16),
                  params["wlin"].T.astype(jnp.bfloat16),
                  preferred_element_type=jnp.float32) + params["blin"]
    out = lin * math.sqrt(odim) + sinusoidal_pe(offset, t, odim)
    return out, x_mask[:, :, :-2:2][:, :, :-4:3]


if __name__ == "__main__":
    B, T, idim, odim = 2, 31, 23, 32
    key = jax.random.PRNGKey(0)
    kx, kp = jax.random.split(key)
    x = jax.random.normal(kx, (B, T, idim), jnp.float32)
    x_mask = jnp.ones((B, 1, T), dtype=bool)
    params = init_params(kp, idim, odim)

    fwd = jax.jit(conv2d_subsampling6_forward)
    out, pos_emb, mask = fwd(x, x_mask, params)
    jax.block_until_ready(out)
    jax.block_until_ready(pos_emb)
    jax.block_until_ready(mask)

    # shape sanity: expected subsampled time = ((T-1)//2 - 2)//3
    T2 = ((T - 1) // 2 - 2) // 3
    assert out.shape == (B, T2, odim), out.shape
    assert pos_emb.shape == (1, T2, odim), pos_emb.shape
    assert mask.shape == (B, 1, T2), mask.shape

    # numeric sanity vs XLA reference (same bf16-operand precision path)
    ref_out, ref_mask = _reference_forward(x, x_mask, params)
    max_err = float(jnp.max(jnp.abs(out - ref_out)))
    assert max_err < 2e-2, f"max abs error vs reference: {max_err}"
    assert bool(jnp.all(mask == ref_mask))

    print("KERNEL_OK")
</pallas_src>

<mosaic_0001>
module attributes {stable_mosaic.version = 11 : i64} {
  func.func @_conv1_matmul_kernel(%arg0: i32, %arg1: memref<1024x9xbf16, #tpu.memory_space<vmem>>, %arg2: memref<9x128xbf16, #tpu.memory_space<vmem>>, %arg3: memref<1x128xf32, #tpu.memory_space<vmem>>, %arg4: memref<1024x128xbf16, #tpu.memory_space<vmem>>) attributes {dimension_semantics = [#tpu.dimension_semantics<parallel>], iteration_bounds = array<i64: 2>, scalar_prefetch = 0 : i64, scratch_operands = 0 : i64, tpu.core_type = #tpu.core_type<tc>, window_params = [{transform_indices = @transform_0, window_bounds = array<i64: 1024, 9>}, {pipeline_mode = #tpu.pipeline_mode<synchronous>, transform_indices = @transform_1, window_bounds = array<i64: 9, 128>}, {pipeline_mode = #tpu.pipeline_mode<synchronous>, transform_indices = @transform_2, window_bounds = array<i64: 1, 128>}, {transform_indices = @transform_3, window_bounds = array<i64: 1024, 128>}]} {
    %c0 = arith.constant 0 : index
    %c0_0 = arith.constant 0 : index
    %0 = vector.load %arg1[%c0, %c0_0] : memref<1024x9xbf16, #tpu.memory_space<vmem>>, vector<1024x9xbf16>
    %c0_1 = arith.constant 0 : index
    %c0_2 = arith.constant 0 : index
    %1 = vector.load %arg2[%c0_1, %c0_2] : memref<9x128xbf16, #tpu.memory_space<vmem>>, vector<9x128xbf16>
    %cst = arith.constant dense<0.000000e+00> : vector<1024x128xf32>
    %2 = tpu.matmul %0, %1, %cst {dimension_numbers = #tpu.dot_dimension_numbers<[1], [0], [0], [1], [0, 0, 1, 1], [], []>} : vector<1024x9xbf16>, vector<9x128xbf16>, vector<1024x128xf32> -> vector<1024x128xf32>
    %c0_3 = arith.constant 0 : index
    %c0_4 = arith.constant 0 : index
    %3 = vector.load %arg3[%c0_3, %c0_4] : memref<1x128xf32, #tpu.memory_space<vmem>>, vector<1x128xf32>
    %4 = vector.broadcast %3 : vector<1x128xf32> to vector<1024x128xf32>
    %5 = arith.addf %2, %4 : vector<1024x128xf32>
    %cst_5 = arith.constant 0.000000e+00 : f32
    %6 = vector.broadcast %cst_5 : f32 to vector<1024x128xf32>
    %7 = arith.maximumf %5, %6 : vector<1024x128xf32>
    %8 = arith.truncf %7 : vector<1024x128xf32> to vector<1024x128xbf16>
    %c0_6 = arith.constant 0 : index
    %c0_7 = arith.constant 0 : index
    %9 = vector.load %arg4[%c0_6, %c0_7] : memref<1024x128xbf16, #tpu.memory_space<vmem>>, vector<1024x128xbf16>
    tpu.vector_store %arg4[%c0_6, %c0_7], %8 {strides = array<i32>} : memref<1024x128xbf16, #tpu.memory_space<vmem>>, vector<1024x128xbf16>,
    return
  }
  func.func @transform_0(%arg0: i32) -> (i32, i32) {
    %c0_i32 = arith.constant 0 : i32
    %c0_i32_0 = arith.constant 0 : i32
    return %arg0, %c0_i32 : i32, i32
  }
  func.func @transform_1(%arg0: i32) -> (i32, i32) {
    %c0_i32 = arith.constant 0 : i32
    %c0_i32_0 = arith.constant 0 : i32
    %c0_i32_1 = arith.constant 0 : i32
    return %c0_i32, %c0_i32_0 : i32, i32
  }
  func.func @transform_2(%arg0: i32) -> (i32, i32) {
    %c0_i32 = arith.constant 0 : i32
    %c0_i32_0 = arith.constant 0 : i32
    %c0_i32_1 = arith.constant 0 : i32
    return %c0_i32, %c0_i32_0 : i32, i32
  }
  func.func @transform_3(%arg0: i32) -> (i32, i32) {
    %c0_i32 = arith.constant 0 : i32
    %c0_i32_0 = arith.constant 0 : i32
    return %arg0, %c0_i32 : i32, i32
  }
}

module attributes {stable_mosaic.version = 11 : i64} {
  func.func @_conv2_linear_pe_kernel(%arg0: i32, %arg1: i32, %arg2: memref<528x128xbf16, #tpu.memory_space<vmem>>, %arg3: memref<25x128x128xbf16, #tpu.memory_space<vmem>>, %arg4: memref<1x128xf32, #tpu.memory_space<vmem>>, %arg5: memref<384x128xbf16, #tpu.memory_space<vmem>>, %arg6: memref<1x128xf32, #tpu.memory_space<vmem>>, %arg7: memref<8x128xf32, #tpu.memory_space<vmem>>, %arg8: memref<1x8x128xf32, #tpu.memory_space<vmem>>, %arg9: memref<8x384xbf16, #tpu.memory_space<vmem>>) attributes {dimension_semantics = [#tpu.dimension_semantics<parallel>, #tpu.dimension_semantics<parallel>], iteration_bounds = array<i64: 2, 1>, scalar_prefetch = 0 : i64, scratch_operands = 1 : i64, tpu.core_type = #tpu.core_type<tc>, window_params = [{transform_indices = @transform_0, window_bounds = array<i64: 528, 128>}, {pipeline_mode = #tpu.pipeline_mode<synchronous>, transform_indices = @transform_1, window_bounds = array<i64: 25, 128, 128>}, {pipeline_mode = #tpu.pipeline_mode<synchronous>, transform_indices = @transform_2, window_bounds = array<i64: 1, 128>}, {pipeline_mode = #tpu.pipeline_mode<synchronous>, transform_indices = @transform_3, window_bounds = array<i64: 384, 128>}, {pipeline_mode = #tpu.pipeline_mode<synchronous>, transform_indices = @transform_4, window_bounds = array<i64: 1, 128>}, {transform_indices = @transform_5, window_bounds = array<i64: 8, 128>}, {transform_indices = @transform_6, window_bounds = array<i64: 1, 8, 128>}]} {
    %cst = arith.constant 0.000000e+00 : f32
    %0 = vector.broadcast %cst : f32 to vector<8x128xf32>
    %c0 = arith.constant 0 : index
    %c0_0 = arith.constant 0 : index
    %1 = vector.load %arg2[%c0, %c0_0] : memref<528x128xbf16, #tpu.memory_space<vmem>>, vector<8x128xbf16>
    %c0_1 = arith.constant 0 : index
    %c0_2 = arith.constant 0 : index
    %c0_3 = arith.constant 0 : index
    %2 = vector.load %arg3[%c0_1, %c0_2, %c0_3] : memref<25x128x128xbf16, #tpu.memory_space<vmem>>, vector<1x128x128xbf16>
    %3 = vector.shape_cast %2 : vector<1x128x128xbf16> to vector<128x128xbf16>
    %cst_4 = arith.constant dense<0.000000e+00> : vector<8x128xf32>
    %4 = tpu.matmul %1, %3, %cst_4 {dimension_numbers = #tpu.dot_dimension_numbers<[1], [0], [0], [1], [0, 0, 1, 1], [], []>} : vector<8x128xbf16>, vector<128x128xbf16>, vector<8x128xf32> -> vector<8x128xf32>
    %5 = arith.addf %0, %4 : vector<8x128xf32>
    %c16 = arith.constant 16 : index
    %c0_5 = arith.constant 0 : index
    %6 = vector.load %arg2[%c16, %c0_5] : memref<528x128xbf16, #tpu.memory_space<vmem>>, vector<8x128xbf16>
    %c1 = arith.constant 1 : index
    %c0_6 = arith.constant 0 : index
    %c0_7 = arith.constant 0 : index
    %7 = vector.load %arg3[%c1, %c0_6, %c0_7] : memref<25x128x128xbf16, #tpu.memory_space<vmem>>, vector<1x128x128xbf16>
    %8 = vector.shape_cast %7 : vector<1x128x128xbf16> to vector<128x128xbf16>
    %cst_8 = arith.constant dense<0.000000e+00> : vector<8x128xf32>
    %9 = tpu.matmul %6, %8, %cst_8 {dimension_numbers = #tpu.dot_dimension_numbers<[1], [0], [0], [1], [0, 0, 1, 1], [], []>} : vector<8x128xbf16>, vector<128x128xbf16>, vector<8x128xf32> -> vector<8x128xf32>
    %10 = arith.addf %5, %9 : vector<8x128xf32>
    %c32 = arith.constant 32 : index
    %c0_9 = arith.constant 0 : index
    %11 = vector.load %arg2[%c32, %c0_9] : memref<528x128xbf16, #tpu.memory_space<vmem>>, vector<8x128xbf16>
    %c2 = arith.constant 2 : index
    %c0_10 = arith.constant 0 : index
    %c0_11 = arith.constant 0 : index
    %12 = vector.load %arg3[%c2, %c0_10, %c0_11] : memref<25x128x128xbf16, #tpu.memory_space<vmem>>, vector<1x128x128xbf16>
    %13 = vector.shape_cast %12 : vector<1x128x128xbf16> to vector<128x128xbf16>
    %cst_12 = arith.constant dense<0.000000e+00> : vector<8x128xf32>
    %14 = tpu.matmul %11, %13, %cst_12 {dimension_numbers = #tpu.dot_dimension_numbers<[1], [0], [0], [1], [0, 0, 1, 1], [], []>} : vector<8x128xbf16>, vector<128x128xbf16>, vector<8x128xf32> -> vector<8x128xf32>
    %15 = arith.addf %10, %14 : vector<8x128xf32>
    %c48 = arith.constant 48 : index
    %c0_13 = arith.constant 0 : index
    %16 = vector.load %arg2[%c48, %c0_13] : memref<528x128xbf16, #tpu.memory_space<vmem>>, vector<8x128xbf16>
    %c3 = arith.constant 3 : index
    %c0_14 = arith.constant 0 : index
    %c0_15 = arith.constant 0 : index
    %17 = vector.load %arg3[%c3, %c0_14, %c0_15] : memref<25x128x128xbf16, #tpu.memory_space<vmem>>, vector<1x128x128xbf16>
    %18 = vector.shape_cast %17 : vector<1x128x128xbf16> to vector<128x128xbf16>
    %cst_16 = arith.constant dense<0.000000e+00> : vector<8x128xf32>
    %19 = tpu.matmul %16, %18, %cst_16 {dimension_numbers = #tpu.dot_dimension_numbers<[1], [0], [0], [1], [0, 0, 1, 1], [], []>} : vector<8x128xbf16>, vector<128x128xbf16>, vector<8x128xf32> -> vector<8x128xf32>
    %20 = arith.addf %15, %19 : vector<8x128xf32>
    %c64 = arith.constant 64 : index
    %c0_17 = arith.constant 0 : index
    %21 = vector.load %arg2[%c64, %c0_17] : memref<528x128xbf16, #tpu.memory_space<vmem>>, vector<8x128xbf16>
    %c4 = arith.constant 4 : index
    %c0_18 = arith.constant 0 : index
    %c0_19 = arith.constant 0 : index
    %22 = vector.load %arg3[%c4, %c0_18, %c0_19] : memref<25x128x128xbf16, #tpu.memory_space<vmem>>, vector<1x128x128xbf16>
    %23 = vector.shape_cast %22 : vector<1x128x128xbf16> to vector<128x128xbf16>
    %cst_20 = arith.constant dense<0.000000e+00> : vector<8x128xf32>
    %24 = tpu.matmul %21, %23, %cst_20 {dimension_numbers = #tpu.dot_dimension_numbers<[1], [0], [0], [1], [0, 0, 1, 1], [], []>} : vector<8x128xbf16>, vector<128x128xbf16>, vector<8x128xf32> -> vector<8x128xf32>
    %25 = arith.addf %20, %24 : vector<8x128xf32>
    %c176 = arith.constant 176 : index
    %c0_21 = arith.constant 0 : index
    %26 = vector.load %arg2[%c176, %c0_21] : memref<528x128xbf16, #tpu.memory_space<vmem>>, vector<8x128xbf16>
    %c5 = arith.constant 5 : index
    %c0_22 = arith.constant 0 : index
    %c0_23 = arith.constant 0 : index
    %27 = vector.load %arg3[%c5, %c0_22, %c0_23] : memref<25x128x128xbf16, #tpu.memory_space<vmem>>, vector<1x128x128xbf16>
    %28 = vector.shape_cast %27 : vector<1x128x128xbf16> to vector<128x128xbf16>
    %cst_24 = arith.constant dense<0.000000e+00> : vector<8x128xf32>
    %29 = tpu.matmul %26, %28, %cst_24 {dimension_numbers = #tpu.dot_dimension_numbers<[1], [0], [0], [1], [0, 0, 1, 1], [], []>} : vector<8x128xbf16>, vector<128x128xbf16>, vector<8x128xf32> -> vector<8x128xf32>
    %30 = arith.addf %25, %29 : vector<8x128xf32>
    %c192 = arith.constant 192 : index
    %c0_25 = arith.constant 0 : index
    %31 = vector.load %arg2[%c192, %c0_25] : memref<528x128xbf16, #tpu.memory_space<vmem>>, vector<8x128xbf16>
    %c6 = arith.constant 6 : index
    %c0_26 = arith.constant 0 : index
    %c0_27 = arith.constant 0 : index
    %32 = vector.load %arg3[%c6, %c0_26, %c0_27] : memref<25x128x128xbf16, #tpu.memory_space<vmem>>, vector<1x128x128xbf16>
    %33 = vector.shape_cast %32 : vector<1x128x128xbf16> to vector<128x128xbf16>
    %cst_28 = arith.constant dense<0.000000e+00> : vector<8x128xf32>
    %34 = tpu.matmul %31, %33, %cst_28 {dimension_numbers = #tpu.dot_dimension_numbers<[1], [0], [0], [1], [0, 0, 1, 1], [], []>} : vector<8x128xbf16>, vector<128x128xbf16>, vector<8x128xf32> -> vector<8x128xf32>
    %35 = arith.addf %30, %34 : vector<8x128xf32>
    %c208 = arith.constant 208 : index
    %c0_29 = arith.constant 0 : index
    %36 = vector.load %arg2[%c208, %c0_29] : memref<528x128xbf16, #tpu.memory_space<vmem>>, vector<8x128xbf16>
    %c7 = arith.constant 7 : index
    %c0_30 = arith.constant 0 : index
    %c0_31 = arith.constant 0 : index
    %37 = vector.load %arg3[%c7, %c0_30, %c0_31] : memref<25x128x128xbf16, #tpu.memory_space<vmem>>, vector<1x128x128xbf16>
    %38 = vector.shape_cast %37 : vector<1x128x128xbf16> to vector<128x128xbf16>
    %cst_32 = arith.constant dense<0.000000e+00> : vector<8x128xf32>
    %39 = tpu.matmul %36, %38, %cst_32 {dimension_numbers = #tpu.dot_dimension_numbers<[1], [0], [0], [1], [0, 0, 1, 1], [], []>} : vector<8x128xbf16>, vector<128x128xbf16>, vector<8x128xf32> -> vector<8x128xf32>
    %40 = arith.addf %35, %39 : vector<8x128xf32>
    %c224 = arith.constant 224 : index
    %c0_33 = arith.constant 0 : index
    %41 = vector.load %arg2[%c224, %c0_33] : memref<528x128xbf16, #tpu.memory_space<vmem>>, vector<8x128xbf16>
    %c8 = arith.constant 8 : index
    %c0_34 = arith.constant 0 : index
    %c0_35 = arith.constant 0 : index
    %42 = vector.load %arg3[%c8, %c0_34, %c0_35] : memref<25x128x128xbf16, #tpu.memory_space<vmem>>, vector<1x128x128xbf16>
    %43 = vector.shape_cast %42 : vector<1x128x128xbf16> to vector<128x128xbf16>
    %cst_36 = arith.constant dense<0.000000e+00> : vector<8x128xf32>
    %44 = tpu.matmul %41, %43, %cst_36 {dimension_numbers = #tpu.dot_dimension_numbers<[1], [0], [0], [1], [0, 0, 1, 1], [], []>} : vector<8x128xbf16>, vector<128x128xbf16>, vector<8x128xf32> -> vector<8x128xf32>
    %45 = arith.addf %40, %44 : vector<8x128xf32>
    %c240 = arith.constant 240 : index
    %c0_37 = arith.constant 0 : index
    %46 = vector.load %arg2[%c240, %c0_37] : memref<528x128xbf16, #tpu.memory_space<vmem>>, vector<8x128xbf16>
    %c9 = arith.constant 9 : index
    %c0_38 = arith.constant 0 : index
    %c0_39 = arith.constant 0 : index
    %47 = vector.load %arg3[%c9, %c0_38, %c0_39] : memref<25x128x128xbf16, #tpu.memory_space<vmem>>, vector<1x128x128xbf16>
    %48 = vector.shape_cast %47 : vector<1x128x128xbf16> to vector<128x128xbf16>
    %cst_40 = arith.constant dense<0.000000e+00> : vector<8x128xf32>
    %49 = tpu.matmul %46, %48, %cst_40 {dimension_numbers = #tpu.dot_dimension_numbers<[1], [0], [0], [1], [0, 0, 1, 1], [], []>} : vector<8x128xbf16>, vector<128x128xbf16>, vector<8x128xf32> -> vector<8x128xf32>
    %50 = arith.addf %45, %49 : vector<8x128xf32>
    %c352 = arith.constant 352 : index
    %c0_41 = arith.constant 0 : index
    %51 = vector.load %arg2[%c352, %c0_41] : memref<528x128xbf16, #tpu.memory_space<vmem>>, vector<8x128xbf16>
    %c10 = arith.constant 10 : index
    %c0_42 = arith.constant 0 : index
    %c0_43 = arith.constant 0 : index
    %52 = vector.load %arg3[%c10, %c0_42, %c0_43] : memref<25x128x128xbf16, #tpu.memory_space<vmem>>, vector<1x128x128xbf16>
    %53 = vector.shape_cast %52 : vector<1x128x128xbf16> to vector<128x128xbf16>
    %cst_44 = arith.constant dense<0.000000e+00> : vector<8x128xf32>
    %54 = tpu.matmul %51, %53, %cst_44 {dimension_numbers = #tpu.dot_dimension_numbers<[1], [0], [0], [1], [0, 0, 1, 1], [], []>} : vector<8x128xbf16>, vector<128x128xbf16>, vector<8x128xf32> -> vector<8x128xf32>
    %55 = arith.addf %50, %54 : vector<8x128xf32>
    %c368 = arith.constant 368 : index
    %c0_45 = arith.constant 0 : index
    %56 = vector.load %arg2[%c368, %c0_45] : memref<528x128xbf16, #tpu.memory_space<vmem>>, vector<8x128xbf16>
    %c11 = arith.constant 11 : index
    %c0_46 = arith.constant 0 : index
    %c0_47 = arith.constant 0 : index
    %57 = vector.load %arg3[%c11, %c0_46, %c0_47] : memref<25x128x128xbf16, #tpu.memory_space<vmem>>, vector<1x128x128xbf16>
    %58 = vector.shape_cast %57 : vector<1x128x128xbf16> to vector<128x128xbf16>
    %cst_48 = arith.constant dense<0.000000e+00> : vector<8x128xf32>
    %59 = tpu.matmul %56, %58, %cst_48 {dimension_numbers = #tpu.dot_dimension_numbers<[1], [0], [0], [1], [0, 0, 1, 1], [], []>} : vector<8x128xbf16>, vector<128x128xbf16>, vector<8x128xf32> -> vector<8x128xf32>
    %60 = arith.addf %55, %59 : vector<8x128xf32>
    %c384 = arith.constant 384 : index
    %c0_49 = arith.constant 0 : index
    %61 = vector.load %arg2[%c384, %c0_49] : memref<528x128xbf16, #tpu.memory_space<vmem>>, vector<8x128xbf16>
    %c12 = arith.constant 12 : index
    %c0_50 = arith.constant 0 : index
    %c0_51 = arith.constant 0 : index
    %62 = vector.load %arg3[%c12, %c0_50, %c0_51] : memref<25x128x128xbf16, #tpu.memory_space<vmem>>, vector<1x128x128xbf16>
    %63 = vector.shape_cast %62 : vector<1x128x128xbf16> to vector<128x128xbf16>
    %cst_52 = arith.constant dense<0.000000e+00> : vector<8x128xf32>
    %64 = tpu.matmul %61, %63, %cst_52 {dimension_numbers = #tpu.dot_dimension_numbers<[1], [0], [0], [1], [0, 0, 1, 1], [], []>} : vector<8x128xbf16>, vector<128x128xbf16>, vector<8x128xf32> -> vector<8x128xf32>
    %65 = arith.addf %60, %64 : vector<8x128xf32>
    %c400 = arith.constant 400 : index
    %c0_53 = arith.constant 0 : index
    %66 = vector.load %arg2[%c400, %c0_53] : memref<528x128xbf16, #tpu.memory_space<vmem>>, vector<8x128xbf16>
    %c13 = arith.constant 13 : index
    %c0_54 = arith.constant 0 : index
    %c0_55 = arith.constant 0 : index
    %67 = vector.load %arg3[%c13, %c0_54, %c0_55] : memref<25x128x128xbf16, #tpu.memory_space<vmem>>, vector<1x128x128xbf16>
    %68 = vector.shape_cast %67 : vector<1x128x128xbf16> to vector<128x128xbf16>
    %cst_56 = arith.constant dense<0.000000e+00> : vector<8x128xf32>
    %69 = tpu.matmul %66, %68, %cst_56 {dimension_numbers = #tpu.dot_dimension_numbers<[1], [0], [0], [1], [0, 0, 1, 1], [], []>} : vector<8x128xbf16>, vector<128x128xbf16>, vector<8x128xf32> -> vector<8x128xf32>
    %70 = arith.addf %65, %69 : vector<8x128xf32>
    %c416 = arith.constant 416 : index
    %c0_57 = arith.constant 0 : index
    %71 = vector.load %arg2[%c416, %c0_57] : memref<528x128xbf16, #tpu.memory_space<vmem>>, vector<8x128xbf16>
    %c14 = arith.constant 14 : index
    %c0_58 = arith.constant 0 : index
    %c0_59 = arith.constant 0 : index
    %72 = vector.load %arg3[%c14, %c0_58, %c0_59] : memref<25x128x128xbf16, #tpu.memory_space<vmem>>, vector<1x128x128xbf16>
    %73 = vector.shape_cast %72 : vector<1x128x128xbf16> to vector<128x128xbf16>
    %cst_60 = arith.constant dense<0.000000e+00> : vector<8x128xf32>
    %74 = tpu.matmul %71, %73, %cst_60 {dimension_numbers = #tpu.dot_dimension_numbers<[1], [0], [0], [1], [0, 0, 1, 1], [], []>} : vector<8x128xbf16>, vector<128x128xbf16>, vector<8x128xf32> -> vector<8x128xf32>
    %75 = arith.addf %70, %74 : vector<8x128xf32>
    %c1_61 = arith.constant 1 : index
    %c0_62 = arith.constant 0 : index
    %76 = vector.load %arg2[%c1_61, %c0_62] : memref<528x128xbf16, #tpu.memory_space<vmem>>, vector<8x128xbf16>
    %c15 = arith.constant 15 : index
    %c0_63 = arith.constant 0 : index
    %c0_64 = arith.constant 0 : index
    %77 = vector.load %arg3[%c15, %c0_63, %c0_64] : memref<25x128x128xbf16, #tpu.memory_space<vmem>>, vector<1x128x128xbf16>
    %78 = vector.shape_cast %77 : vector<1x128x128xbf16> to vector<128x128xbf16>
    %cst_65 = arith.constant dense<0.000000e+00> : vector<8x128xf32>
    %79 = tpu.matmul %76, %78, %cst_65 {dimension_numbers = #tpu.dot_dimension_numbers<[1], [0], [0], [1], [0, 0, 1, 1], [], []>} : vector<8x128xbf16>, vector<128x128xbf16>, vector<8x128xf32> -> vector<8x128xf32>
    %80 = arith.addf %75, %79 : vector<8x128xf32>
    %c17 = arith.constant 17 : index
    %c0_66 = arith.constant 0 : index
    %81 = vector.load %arg2[%c17, %c0_66] : memref<528x128xbf16, #tpu.memory_space<vmem>>, vector<8x128xbf16>
    %c16_67 = arith.constant 16 : index
    %c0_68 = arith.constant 0 : index
    %c0_69 = arith.constant 0 : index
    %82 = vector.load %arg3[%c16_67, %c0_68, %c0_69] : memref<25x128x128xbf16, #tpu.memory_space<vmem>>, vector<1x128x128xbf16>
    %83 = vector.shape_cast %82 : vector<1x128x128xbf16> to vector<128x128xbf16>
    %cst_70 = arith.constant dense<0.000000e+00> : vector<8x128xf32>
    %84 = tpu.matmul %81, %83, %cst_70 {dimension_numbers = #tpu.dot_dimension_numbers<[1], [0], [0], [1], [0, 0, 1, 1], [], []>} : vector<8x128xbf16>, vector<128x128xbf16>, vector<8x128xf32> -> vector<8x128xf32>
    %85 = arith.addf %80, %84 : vector<8x128xf32>
    %c33 = arith.constant 33 : index
    %c0_71 = arith.constant 0 : index
    %86 = vector.load %arg2[%c33, %c0_71] : memref<528x128xbf16, #tpu.memory_space<vmem>>, vector<8x128xbf16>
    %c17_72 = arith.constant 17 : index
    %c0_73 = arith.constant 0 : index
    %c0_74 = arith.constant 0 : index
    %87 = vector.load %arg3[%c17_72, %c0_73, %c0_74] : memref<25x128x128xbf16, #tpu.memory_space<vmem>>, vector<1x128x128xbf16>
    %88 = vector.shape_cast %87 : vector<1x128x128xbf16> to vector<128x128xbf16>
    %cst_75 = arith.constant dense<0.000000e+00> : vector<8x128xf32>
    %89 = tpu.matmul %86, %88, %cst_75 {dimension_numbers = #tpu.dot_dimension_numbers<[1], [0], [0], [1], [0, 0, 1, 1], [], []>} : vector<8x128xbf16>, vector<128x128xbf16>, vector<8x128xf32> -> vector<8x128xf32>
    %90 = arith.addf %85, %89 : vector<8x128xf32>
    %c49 = arith.constant 49 : index
    %c0_76 = arith.constant 0 : index
    %91 = vector.load %arg2[%c49, %c0_76] : memref<528x128xbf16, #tpu.memory_space<vmem>>, vector<8x128xbf16>
    %c18 = arith.constant 18 : index
    %c0_77 = arith.constant 0 : index
    %c0_78 = arith.constant 0 : index
    %92 = vector.load %arg3[%c18, %c0_77, %c0_78] : memref<25x128x128xbf16, #tpu.memory_space<vmem>>, vector<1x128x128xbf16>
    %93 = vector.shape_cast %92 : vector<1x128x128xbf16> to vector<128x128xbf16>
    %cst_79 = arith.constant dense<0.000000e+00> : vector<8x128xf32>
    %94 = tpu.matmul %91, %93, %cst_79 {dimension_numbers = #tpu.dot_dimension_numbers<[1], [0], [0], [1], [0, 0, 1, 1], [], []>} : vector<8x128xbf16>, vector<128x128xbf16>, vector<8x128xf32> -> vector<8x128xf32>
    %95 = arith.addf %90, %94 : vector<8x128xf32>
    %c65 = arith.constant 65 : index
    %c0_80 = arith.constant 0 : index
    %96 = vector.load %arg2[%c65, %c0_80] : memref<528x128xbf16, #tpu.memory_space<vmem>>, vector<8x128xbf16>
    %c19 = arith.constant 19 : index
    %c0_81 = arith.constant 0 : index
    %c0_82 = arith.constant 0 : index
    %97 = vector.load %arg3[%c19, %c0_81, %c0_82] : memref<25x128x128xbf16, #tpu.memory_space<vmem>>, vector<1x128x128xbf16>
    %98 = vector.shape_cast %97 : vector<1x128x128xbf16> to vector<128x128xbf16>
    %cst_83 = arith.constant dense<0.000000e+00> : vector<8x128xf32>
    %99 = tpu.matmul %96, %98, %cst_83 {dimension_numbers = #tpu.dot_dimension_numbers<[1], [0], [0], [1], [0, 0, 1, 1], [], []>} : vector<8x128xbf16>, vector<128x128xbf16>, vector<8x128xf32> -> vector<8x128xf32>
    %100 = arith.addf %95, %99 : vector<8x128xf32>
    %c177 = arith.constant 177 : index
    %c0_84 = arith.constant 0 : index
    %101 = vector.load %arg2[%c177, %c0_84] : memref<528x128xbf16, #tpu.memory_space<vmem>>, vector<8x128xbf16>
    %c20 = arith.constant 20 : index
    %c0_85 = arith.constant 0 : index
    %c0_86 = arith.constant 0 : index
    %102 = vector.load %arg3[%c20, %c0_85, %c0_86] : memref<25x128x128xbf16, #tpu.memory_space<vmem>>, vector<1x128x128xbf16>
    %103 = vector.shape_cast %102 : vector<1x128x128xbf16> to vector<128x128xbf16>
    %cst_87 = arith.constant dense<0.000000e+00> : vector<8x128xf32>
    %104 = tpu.matmul %101, %103, %cst_87 {dimension_numbers = #tpu.dot_dimension_numbers<[1], [0], [0], [1], [0, 0, 1, 1], [], []>} : vector<8x128xbf16>, vector<128x128xbf16>, vector<8x128xf32> -> vector<8x128xf32>
    %105 = arith.addf %100, %104 : vector<8x128xf32>
    %c193 = arith.constant 193 : index
    %c0_88 = arith.constant 0 : index
    %106 = vector.load %arg2[%c193, %c0_88] : memref<528x128xbf16, #tpu.memory_space<vmem>>, vector<8x128xbf16>
    %c21 = arith.constant 21 : index
    %c0_89 = arith.constant 0 : index
    %c0_90 = arith.constant 0 : index
    %107 = vector.load %arg3[%c21, %c0_89, %c0_90] : memref<25x128x128xbf16, #tpu.memory_space<vmem>>, vector<1x128x128xbf16>
    %108 = vector.shape_cast %107 : vector<1x128x128xbf16> to vector<128x128xbf16>
    %cst_91 = arith.constant dense<0.000000e+00> : vector<8x128xf32>
    %109 = tpu.matmul %106, %108, %cst_91 {dimension_numbers = #tpu.dot_dimension_numbers<[1], [0], [0], [1], [0, 0, 1, 1], [], []>} : vector<8x128xbf16>, vector<128x128xbf16>, vector<8x128xf32> -> vector<8x128xf32>
    %110 = arith.addf %105, %109 : vector<8x128xf32>
    %c209 = arith.constant 209 : index
    %c0_92 = arith.constant 0 : index
    %111 = vector.load %arg2[%c209, %c0_92] : memref<528x128xbf16, #tpu.memory_space<vmem>>, vector<8x128xbf16>
    %c22 = arith.constant 22 : index
    %c0_93 = arith.constant 0 : index
    %c0_94 = arith.constant 0 : index
    %112 = vector.load %arg3[%c22, %c0_93, %c0_94] : memref<25x128x128xbf16, #tpu.memory_space<vmem>>, vector<1x128x128xbf16>
    %113 = vector.shape_cast %112 : vector<1x128x128xbf16> to vector<128x128xbf16>
    %cst_95 = arith.constant dense<0.000000e+00> : vector<8x128xf32>
    %114 = tpu.matmul %111, %113, %cst_95 {dimension_numbers = #tpu.dot_dimension_numbers<[1], [0], [0], [1], [0, 0, 1, 1], [], []>} : vector<8x128xbf16>, vector<128x128xbf16>, vector<8x128xf32> -> vector<8x128xf32>
    %115 = arith.addf %110, %114 : vector<8x128xf32>
    %c225 = arith.constant 225 : index
    %c0_96 = arith.constant 0 : index
    %116 = vector.load %arg2[%c225, %c0_96] : memref<528x128xbf16, #tpu.memory_space<vmem>>, vector<8x128xbf16>
    %c23 = arith.constant 23 : index
    %c0_97 = arith.constant 0 : index
    %c0_98 = arith.constant 0 : index
    %117 = vector.load %arg3[%c23, %c0_97, %c0_98] : memref<25x128x128xbf16, #tpu.memory_space<vmem>>, vector<1x128x128xbf16>
    %118 = vector.shape_cast %117 : vector<1x128x128xbf16> to vector<128x128xbf16>
    %cst_99 = arith.constant dense<0.000000e+00> : vector<8x128xf32>
    %119 = tpu.matmul %116, %118, %cst_99 {dimension_numbers = #tpu.dot_dimension_numbers<[1], [0], [0], [1], [0, 0, 1, 1], [], []>} : vector<8x128xbf16>, vector<128x128xbf16>, vector<8x128xf32> -> vector<8x128xf32>
    %120 = arith.addf %115, %119 : vector<8x128xf32>
    %c241 = arith.constant 241 : index
    %c0_100 = arith.constant 0 : index
    %121 = vector.load %arg2[%c241, %c0_100] : memref<528x128xbf16, #tpu.memory_space<vmem>>, vector<8x128xbf16>
    %c24 = arith.constant 24 : index
    %c0_101 = arith.constant 0 : index
    %c0_102 = arith.constant 0 : index
    %122 = vector.load %arg3[%c24, %c0_101, %c0_102] : memref<25x128x128xbf16, #tpu.memory_space<vmem>>, vector<1x128x128xbf16>
    %123 = vector.shape_cast %122 : vector<1x128x128xbf16> to vector<128x128xbf16>
    %cst_103 = arith.constant dense<0.000000e+00> : vector<8x128xf32>
    %124 = tpu.matmul %121, %123, %cst_103 {dimension_numbers = #tpu.dot_dimension_numbers<[1], [0], [0], [1], [0, 0, 1, 1], [], []>} : vector<8x128xbf16>, vector<128x128xbf16>, vector<8x128xf32> -> vector<8x128xf32>
    %125 = arith.addf %120, %124 : vector<8x128xf32>
    %c0_104 = arith.constant 0 : index
    %c0_105 = arith.constant 0 : index
    %126 = vector.load %arg4[%c0_104, %c0_105] : memref<1x128xf32, #tpu.memory_space<vmem>>, vector<1x128xf32>
    %127 = vector.broadcast %126 : vector<1x128xf32> to vector<8x128xf32>
    %128 = arith.addf %125, %127 : vector<8x128xf32>
    %cst_106 = arith.constant 0.000000e+00 : f32
    %129 = vector.broadcast %cst_106 : f32 to vector<8x128xf32>
    %130 = arith.maximumf %128, %129 : vector<8x128xf32>
    %131 = arith.truncf %130 : vector<8x128xf32> to vector<8x128xbf16>
    %c0_107 = arith.constant 0 : index
    %c0_108 = arith.constant 0 : index
    %132 = vector.load %arg9[%c0_107, %c0_108] : memref<8x384xbf16, #tpu.memory_space<vmem>>, vector<8x128xbf16>
    tpu.vector_store %arg9[%c0_107, %c0_108], %131 {strides = array<i32>} : memref<8x384xbf16, #tpu.memory_space<vmem>>, vector<8x128xbf16>,
    %cst_109 = arith.constant 0.000000e+00 : f32
    %133 = vector.broadcast %cst_109 : f32 to vector<8x128xf32>
    %c48_110 = arith.constant 48 : index
    %c0_111 = arith.constant 0 : index
    %134 = vector.load %arg2[%c48_110, %c0_111] : memref<528x128xbf16, #tpu.memory_space<vmem>>, vector<8x128xbf16>
    %c0_112 = arith.constant 0 : index
    %c0_113 = arith.constant 0 : index
    %c0_114 = arith.constant 0 : index
    %135 = vector.load %arg3[%c0_112, %c0_113, %c0_114] : memref<25x128x128xbf16, #tpu.memory_space<vmem>>, vector<1x128x128xbf16>
    %136 = vector.shape_cast %135 : vector<1x128x128xbf16> to vector<128x128xbf16>
    %cst_115 = arith.constant dense<0.000000e+00> : vector<8x128xf32>
    %137 = tpu.matmul %134, %136, %cst_115 {dimension_numbers = #tpu.dot_dimension_numbers<[1], [0], [0], [1], [0, 0, 1, 1], [], []>} : vector<8x128xbf16>, vector<128x128xbf16>, vector<8x128xf32> -> vector<8x128xf32>
    %138 = arith.addf %133, %137 : vector<8x128xf32>
    %c64_116 = arith.constant 64 : index
    %c0_117 = arith.constant 0 : index
    %139 = vector.load %arg2[%c64_116, %c0_117] : memref<528x128xbf16, #tpu.memory_space<vmem>>, vector<8x128xbf16>
    %c1_118 = arith.constant 1 : index
    %c0_119 = arith.constant 0 : index
    %c0_120 = arith.constant 0 : index
    %140 = vector.load %arg3[%c1_118, %c0_119, %c0_120] : memref<25x128x128xbf16, #tpu.memory_space<vmem>>, vector<1x128x128xbf16>
    %141 = vector.shape_cast %140 : vector<1x128x128xbf16> to vector<128x128xbf16>
    %cst_121 = arith.constant dense<0.000000e+00> : vector<8x128xf32>
    %142 = tpu.matmul %139, %141, %cst_121 {dimension_numbers = #tpu.dot_dimension_numbers<[1], [0], [0], [1], [0, 0, 1, 1], [], []>} : vector<8x128xbf16>, vector<128x128xbf16>, vector<8x128xf32> -> vector<8x128xf32>
    %143 = arith.addf %138, %142 : vector<8x128xf32>
    %c80 = arith.constant 80 : index
    %c0_122 = arith.constant 0 : index
    %144 = vector.load %arg2[%c80, %c0_122] : memref<528x128xbf16, #tpu.memory_space<vmem>>, vector<8x128xbf16>
    %c2_123 = arith.constant 2 : index
    %c0_124 = arith.constant 0 : index
    %c0_125 = arith.constant 0 : index
    %145 = vector.load %arg3[%c2_123, %c0_124, %c0_125] : memref<25x128x128xbf16, #tpu.memory_space<vmem>>, vector<1x128x128xbf16>
    %146 = vector.shape_cast %145 : vector<1x128x128xbf16> to vector<128x128xbf16>
    %cst_126 = arith.constant dense<0.000000e+00> : vector<8x128xf32>
    %147 = tpu.matmul %144, %146, %cst_126 {dimension_numbers = #tpu.dot_dimension_numbers<[1], [0], [0], [1], [0, 0, 1, 1], [], []>} : vector<8x128xbf16>, vector<128x128xbf16>, vector<8x128xf32> -> vector<8x128xf32>
    %148 = arith.addf %143, %147 : vector<8x128xf32>
    %c96 = arith.constant 96 : index
    %c0_127 = arith.constant 0 : index
    %149 = vector.load %arg2[%c96, %c0_127] : memref<528x128xbf16, #tpu.memory_space<vmem>>, vector<8x128xbf16>
    %c3_128 = arith.constant 3 : index
    %c0_129 = arith.constant 0 : index
    %c0_130 = arith.constant 0 : index
    %150 = vector.load %arg3[%c3_128, %c0_129, %c0_130] : memref<25x128x128xbf16, #tpu.memory_space<vmem>>, vector<1x128x128xbf16>
    %151 = vector.shape_cast %150 : vector<1x128x128xbf16> to vector<128x128xbf16>
    %cst_131 = arith.constant dense<0.000000e+00> : vector<8x128xf32>
    %152 = tpu.matmul %149, %151, %cst_131 {dimension_numbers = #tpu.dot_dimension_numbers<[1], [0], [0], [1], [0, 0, 1, 1], [], []>} : vector<8x128xbf16>, vector<128x128xbf16>, vector<8x128xf32> -> vector<8x128xf32>
    %153 = arith.addf %148, %152 : vector<8x128xf32>
    %c112 = arith.constant 112 : index
    %c0_132 = arith.constant 0 : index
    %154 = vector.load %arg2[%c112, %c0_132] : memref<528x128xbf16, #tpu.memory_space<vmem>>, vector<8x128xbf16>
    %c4_133 = arith.constant 4 : index
    %c0_134 = arith.constant 0 : index
    %c0_135 = arith.constant 0 : index
    %155 = vector.load %arg3[%c4_133, %c0_134, %c0_135] : memref<25x128x128xbf16, #tpu.memory_space<vmem>>, vector<1x128x128xbf16>
    %156 = vector.shape_cast %155 : vector<1x128x128xbf16> to vector<128x128xbf16>
    %cst_136 = arith.constant dense<0.000000e+00> : vector<8x128xf32>
    %157 = tpu.matmul %154, %156, %cst_136 {dimension_numbers = #tpu.dot_dimension_numbers<[1], [0], [0], [1], [0, 0, 1, 1], [], []>} : vector<8x128xbf16>, vector<128x128xbf16>, vector<8x128xf32> -> vector<8x128xf32>
    %158 = arith.addf %153, %157 : vector<8x128xf32>
    %c224_137 = arith.constant 224 : index
    %c0_138 = arith.constant 0 : index
    %159 = vector.load %arg2[%c224_137, %c0_138] : memref<528x128xbf16, #tpu.memory_space<vmem>>, vector<8x128xbf16>
    %c5_139 = arith.constant 5 : index
    %c0_140 = arith.constant 0 : index
    %c0_141 = arith.constant 0 : index
    %160 = vector.load %arg3[%c5_139, %c0_140, %c0_141] : memref<25x128x128xbf16, #tpu.memory_space<vmem>>, vector<1x128x128xbf16>
    %161 = vector.shape_cast %160 : vector<1x128x128xbf16> to vector<128x128xbf16>
    %cst_142 = arith.constant dense<0.000000e+00> : vector<8x128xf32>
    %162 = tpu.matmul %159, %161, %cst_142 {dimension_numbers = #tpu.dot_dimension_numbers<[1], [0], [0], [1], [0, 0, 1, 1], [], []>} : vector<8x128xbf16>, vector<128x128xbf16>, vector<8x128xf32> -> vector<8x128xf32>
    %163 = arith.addf %158, %162 : vector<8x128xf32>
    %c240_143 = arith.constant 240 : index
    %c0_144 = arith.constant 0 : index
    %164 = vector.load %arg2[%c240_143, %c0_144] : memref<528x128xbf16, #tpu.memory_space<vmem>>, vector<8x128xbf16>
    %c6_145 = arith.constant 6 : index
    %c0_146 = arith.constant 0 : index
    %c0_147 = arith.constant 0 : index
    %165 = vector.load %arg3[%c6_145, %c0_146, %c0_147] : memref<25x128x128xbf16, #tpu.memory_space<vmem>>, vector<1x128x128xbf16>
    %166 = vector.shape_cast %165 : vector<1x128x128xbf16> to vector<128x128xbf16>
    %cst_148 = arith.constant dense<0.000000e+00> : vector<8x128xf32>
    %167 = tpu.matmul %164, %166, %cst_148 {dimension_numbers = #tpu.dot_dimension_numbers<[1], [0], [0], [1], [0, 0, 1, 1], [], []>} : vector<8x128xbf16>, vector<128x128xbf16>, vector<8x128xf32> -> vector<8x128xf32>
    %168 = arith.addf %163, %167 : vector<8x128xf32>
    %c256 = arith.constant 256 : index
    %c0_149 = arith.constant 0 : index
    %169 = vector.load %arg2[%c256, %c0_149] : memref<528x128xbf16, #tpu.memory_space<vmem>>, vector<8x128xbf16>
    %c7_150 = arith.constant 7 : index
    %c0_151 = arith.constant 0 : index
    %c0_152 = arith.constant 0 : index
    %170 = vector.load %arg3[%c7_150, %c0_151, %c0_152] : memref<25x128x128xbf16, #tpu.memory_space<vmem>>, vector<1x128x128xbf16>
    %171 = vector.shape_cast %170 : vector<1x128x128xbf16> to vector<128x128xbf16>
    %cst_153 = arith.constant dense<0.000000e+00> : vector<8x128xf32>
    %172 = tpu.matmul %169, %171, %cst_153 {dimension_numbers = #tpu.dot_dimension_numbers<[1], [0], [0], [1], [0, 0, 1, 1], [], []>} : vector<8x128xbf16>, vector<128x128xbf16>, vector<8x128xf32> -> vector<8x128xf32>
    %173 = arith.addf %168, %172 : vector<8x128xf32>
    %c272 = arith.constant 272 : index
    %c0_154 = arith.constant 0 : index
    %174 = vector.load %arg2[%c272, %c0_154] : memref<528x128xbf16, #tpu.memory_space<vmem>>, vector<8x128xbf16>
    %c8_155 = arith.constant 8 : index
    %c0_156 = arith.constant 0 : index
    %c0_157 = arith.constant 0 : index
    %175 = vector.load %arg3[%c8_155, %c0_156, %c0_157] : memref<25x128x128xbf16, #tpu.memory_space<vmem>>, vector<1x128x128xbf16>
    %176 = vector.shape_cast %175 : vector<1x128x128xbf16> to vector<128x128xbf16>
    %cst_158 = arith.constant dense<0.000000e+00> : vector<8x128xf32>
    %177 = tpu.matmul %174, %176, %cst_158 {dimension_numbers = #tpu.dot_dimension_numbers<[1], [0], [0], [1], [0, 0, 1, 1], [], []>} : vector<8x128xbf16>, vector<128x128xbf16>, vector<8x128xf32> -> vector<8x128xf32>
    %178 = arith.addf %173, %177 : vector<8x128xf32>
    %c288 = arith.constant 288 : index
    %c0_159 = arith.constant 0 : index
    %179 = vector.load %arg2[%c288, %c0_159] : memref<528x128xbf16, #tpu.memory_space<vmem>>, vector<8x128xbf16>
    %c9_160 = arith.constant 9 : index
    %c0_161 = arith.constant 0 : index
    %c0_162 = arith.constant 0 : index
    %180 = vector.load %arg3[%c9_160, %c0_161, %c0_162] : memref<25x128x128xbf16, #tpu.memory_space<vmem>>, vector<1x128x128xbf16>
    %181 = vector.shape_cast %180 : vector<1x128x128xbf16> to vector<128x128xbf16>
    %cst_163 = arith.constant dense<0.000000e+00> : vector<8x128xf32>
    %182 = tpu.matmul %179, %181, %cst_163 {dimension_numbers = #tpu.dot_dimension_numbers<[1], [0], [0], [1], [0, 0, 1, 1], [], []>} : vector<8x128xbf16>, vector<128x128xbf16>, vector<8x128xf32> -> vector<8x128xf32>
    %183 = arith.addf %178, %182 : vector<8x128xf32>
    %c400_164 = arith.constant 400 : index
    %c0_165 = arith.constant 0 : index
    %184 = vector.load %arg2[%c400_164, %c0_165] : memref<528x128xbf16, #tpu.memory_space<vmem>>, vector<8x128xbf16>
    %c10_166 = arith.constant 10 : index
    %c0_167 = arith.constant 0 : index
    %c0_168 = arith.constant 0 : index
    %185 = vector.load %arg3[%c10_166, %c0_167, %c0_168] : memref<25x128x128xbf16, #tpu.memory_space<vmem>>, vector<1x128x128xbf16>
    %186 = vector.shape_cast %185 : vector<1x128x128xbf16> to vector<128x128xbf16>
    %cst_169 = arith.constant dense<0.000000e+00> : vector<8x128xf32>
    %187 = tpu.matmul %184, %186, %cst_169 {dimension_numbers = #tpu.dot_dimension_numbers<[1], [0], [0], [1], [0, 0, 1, 1], [], []>} : vector<8x128xbf16>, vector<128x128xbf16>, vector<8x128xf32> -> vector<8x128xf32>
    %188 = arith.addf %183, %187 : vector<8x128xf32>
    %c416_170 = arith.constant 416 : index
    %c0_171 = arith.constant 0 : index
    %189 = vector.load %arg2[%c416_170, %c0_171] : memref<528x128xbf16, #tpu.memory_space<vmem>>, vector<8x128xbf16>
    %c11_172 = arith.constant 11 : index
    %c0_173 = arith.constant 0 : index
    %c0_174 = arith.constant 0 : index
    %190 = vector.load %arg3[%c11_172, %c0_173, %c0_174] : memref<25x128x128xbf16, #tpu.memory_space<vmem>>, vector<1x128x128xbf16>
    %191 = vector.shape_cast %190 : vector<1x128x128xbf16> to vector<128x128xbf16>
    %cst_175 = arith.constant dense<0.000000e+00> : vector<8x128xf32>
    %192 = tpu.matmul %189, %191, %cst_175 {dimension_numbers = #tpu.dot_dimension_numbers<[1], [0], [0], [1], [0, 0, 1, 1], [], []>} : vector<8x128xbf16>, vector<128x128xbf16>, vector<8x128xf32> -> vector<8x128xf32>
    %193 = arith.addf %188, %192 : vector<8x128xf32>
    %c432 = arith.constant 432 : index
    %c0_176 = arith.constant 0 : index
    %194 = vector.load %arg2[%c432, %c0_176] : memref<528x128xbf16, #tpu.memory_space<vmem>>, vector<8x128xbf16>
    %c12_177 = arith.constant 12 : index
    %c0_178 = arith.constant 0 : index
    %c0_179 = arith.constant 0 : index
    %195 = vector.load %arg3[%c12_177, %c0_178, %c0_179] : memref<25x128x128xbf16, #tpu.memory_space<vmem>>, vector<1x128x128xbf16>
    %196 = vector.shape_cast %195 : vector<1x128x128xbf16> to vector<128x128xbf16>
    %cst_180 = arith.constant dense<0.000000e+00> : vector<8x128xf32>
    %197 = tpu.matmul %194, %196, %cst_180 {dimension_numbers = #tpu.dot_dimension_numbers<[1], [0], [0], [1], [0, 0, 1, 1], [], []>} : vector<8x128xbf16>, vector<128x128xbf16>, vector<8x128xf32> -> vector<8x128xf32>
    %198 = arith.addf %193, %197 : vector<8x128xf32>
    %c448 = arith.constant 448 : index
    %c0_181 = arith.constant 0 : index
    %199 = vector.load %arg2[%c448, %c0_181] : memref<528x128xbf16, #tpu.memory_space<vmem>>, vector<8x128xbf16>
    %c13_182 = arith.constant 13 : index
    %c0_183 = arith.constant 0 : index
    %c0_184 = arith.constant 0 : index
    %200 = vector.load %arg3[%c13_182, %c0_183, %c0_184] : memref<25x128x128xbf16, #tpu.memory_space<vmem>>, vector<1x128x128xbf16>
    %201 = vector.shape_cast %200 : vector<1x128x128xbf16> to vector<128x128xbf16>
    %cst_185 = arith.constant dense<0.000000e+00> : vector<8x128xf32>
    %202 = tpu.matmul %199, %201, %cst_185 {dimension_numbers = #tpu.dot_dimension_numbers<[1], [0], [0], [1], [0, 0, 1, 1], [], []>} : vector<8x128xbf16>, vector<128x128xbf16>, vector<8x128xf32> -> vector<8x128xf32>
    %203 = arith.addf %198, %202 : vector<8x128xf32>
    %c464 = arith.constant 464 : index
    %c0_186 = arith.constant 0 : index
    %204 = vector.load %arg2[%c464, %c0_186] : memref<528x128xbf16, #tpu.memory_space<vmem>>, vector<8x128xbf16>
    %c14_187 = arith.constant 14 : index
    %c0_188 = arith.constant 0 : index
    %c0_189 = arith.constant 0 : index
    %205 = vector.load %arg3[%c14_187, %c0_188, %c0_189] : memref<25x128x128xbf16, #tpu.memory_space<vmem>>, vector<1x128x128xbf16>
    %206 = vector.shape_cast %205 : vector<1x128x128xbf16> to vector<128x128xbf16>
    %cst_190 = arith.constant dense<0.000000e+00> : vector<8x128xf32>
    %207 = tpu.matmul %204, %206, %cst_190 {dimension_numbers = #tpu.dot_dimension_numbers<[1], [0], [0], [1], [0, 0, 1, 1], [], []>} : vector<8x128xbf16>, vector<128x128xbf16>, vector<8x128xf32> -> vector<8x128xf32>
    %208 = arith.addf %203, %207 : vector<8x128xf32>
    %c49_191 = arith.constant 49 : index
    %c0_192 = arith.constant 0 : index
    %209 = vector.load %arg2[%c49_191, %c0_192] : memref<528x128xbf16, #tpu.memory_space<vmem>>, vector<8x128xbf16>
    %c15_193 = arith.constant 15 : index
    %c0_194 = arith.constant 0 : index
    %c0_195 = arith.constant 0 : index
    %210 = vector.load %arg3[%c15_193, %c0_194, %c0_195] : memref<25x128x128xbf16, #tpu.memory_space<vmem>>, vector<1x128x128xbf16>
    %211 = vector.shape_cast %210 : vector<1x128x128xbf16> to vector<128x128xbf16>
    %cst_196 = arith.constant dense<0.000000e+00> : vector<8x128xf32>
    %212 = tpu.matmul %209, %211, %cst_196 {dimension_numbers = #tpu.dot_dimension_numbers<[1], [0], [0], [1], [0, 0, 1, 1], [], []>} : vector<8x128xbf16>, vector<128x128xbf16>, vector<8x128xf32> -> vector<8x128xf32>
    %213 = arith.addf %208, %212 : vector<8x128xf32>
    %c65_197 = arith.constant 65 : index
    %c0_198 = arith.constant 0 : index
    %214 = vector.load %arg2[%c65_197, %c0_198] : memref<528x128xbf16, #tpu.memory_space<vmem>>, vector<8x128xbf16>
    %c16_199 = arith.constant 16 : index
    %c0_200 = arith.constant 0 : index
    %c0_201 = arith.constant 0 : index
    %215 = vector.load %arg3[%c16_199, %c0_200, %c0_201] : memref<25x128x128xbf16, #tpu.memory_space<vmem>>, vector<1x128x128xbf16>
    %216 = vector.shape_cast %215 : vector<1x128x128xbf16> to vector<128x128xbf16>
    %cst_202 = arith.constant dense<0.000000e+00> : vector<8x128xf32>
    %217 = tpu.matmul %214, %216, %cst_202 {dimension_numbers = #tpu.dot_dimension_numbers<[1], [0], [0], [1], [0, 0, 1, 1], [], []>} : vector<8x128xbf16>, vector<128x128xbf16>, vector<8x128xf32> -> vector<8x128xf32>
    %218 = arith.addf %213, %217 : vector<8x128xf32>
    %c81 = arith.constant 81 : index
    %c0_203 = arith.constant 0 : index
    %219 = vector.load %arg2[%c81, %c0_203] : memref<528x128xbf16, #tpu.memory_space<vmem>>, vector<8x128xbf16>
    %c17_204 = arith.constant 17 : index
    %c0_205 = arith.constant 0 : index
    %c0_206 = arith.constant 0 : index
    %220 = vector.load %arg3[%c17_204, %c0_205, %c0_206] : memref<25x128x128xbf16, #tpu.memory_space<vmem>>, vector<1x128x128xbf16>
    %221 = vector.shape_cast %220 : vector<1x128x128xbf16> to vector<128x128xbf16>
    %cst_207 = arith.constant dense<0.000000e+00> : vector<8x128xf32>
    %222 = tpu.matmul %219, %221, %cst_207 {dimension_numbers = #tpu.dot_dimension_numbers<[1], [0], [0], [1], [0, 0, 1, 1], [], []>} : vector<8x128xbf16>, vector<128x128xbf16>, vector<8x128xf32> -> vector<8x128xf32>
    %223 = arith.addf %218, %222 : vector<8x128xf32>
    %c97 = arith.constant 97 : index
    %c0_208 = arith.constant 0 : index
    %224 = vector.load %arg2[%c97, %c0_208] : memref<528x128xbf16, #tpu.memory_space<vmem>>, vector<8x128xbf16>
    %c18_209 = arith.constant 18 : index
    %c0_210 = arith.constant 0 : index
    %c0_211 = arith.constant 0 : index
    %225 = vector.load %arg3[%c18_209, %c0_210, %c0_211] : memref<25x128x128xbf16, #tpu.memory_space<vmem>>, vector<1x128x128xbf16>
    %226 = vector.shape_cast %225 : vector<1x128x128xbf16> to vector<128x128xbf16>
    %cst_212 = arith.constant dense<0.000000e+00> : vector<8x128xf32>
    %227 = tpu.matmul %224, %226, %cst_212 {dimension_numbers = #tpu.dot_dimension_numbers<[1], [0], [0], [1], [0, 0, 1, 1], [], []>} : vector<8x128xbf16>, vector<128x128xbf16>, vector<8x128xf32> -> vector<8x128xf32>
    %228 = arith.addf %223, %227 : vector<8x128xf32>
    %c113 = arith.constant 113 : index
    %c0_213 = arith.constant 0 : index
    %229 = vector.load %arg2[%c113, %c0_213] : memref<528x128xbf16, #tpu.memory_space<vmem>>, vector<8x128xbf16>
    %c19_214 = arith.constant 19 : index
    %c0_215 = arith.constant 0 : index
    %c0_216 = arith.constant 0 : index
    %230 = vector.load %arg3[%c19_214, %c0_215, %c0_216] : memref<25x128x128xbf16, #tpu.memory_space<vmem>>, vector<1x128x128xbf16>
    %231 = vector.shape_cast %230 : vector<1x128x128xbf16> to vector<128x128xbf16>
    %cst_217 = arith.constant dense<0.000000e+00> : vector<8x128xf32>
    %232 = tpu.matmul %229, %231, %cst_217 {dimension_numbers = #tpu.dot_dimension_numbers<[1], [0], [0], [1], [0, 0, 1, 1], [], []>} : vector<8x128xbf16>, vector<128x128xbf16>, vector<8x128xf32> -> vector<8x128xf32>
    %233 = arith.addf %228, %232 : vector<8x128xf32>
    %c225_218 = arith.constant 225 : index
    %c0_219 = arith.constant 0 : index
    %234 = vector.load %arg2[%c225_218, %c0_219] : memref<528x128xbf16, #tpu.memory_space<vmem>>, vector<8x128xbf16>
    %c20_220 = arith.constant 20 : index
    %c0_221 = arith.constant 0 : index
    %c0_222 = arith.constant 0 : index
    %235 = vector.load %arg3[%c20_220, %c0_221, %c0_222] : memref<25x128x128xbf16, #tpu.memory_space<vmem>>, vector<1x128x128xbf16>
    %236 = vector.shape_cast %235 : vector<1x128x128xbf16> to vector<128x128xbf16>
    %cst_223 = arith.constant dense<0.000000e+00> : vector<8x128xf32>
    %237 = tpu.matmul %234, %236, %cst_223 {dimension_numbers = #tpu.dot_dimension_numbers<[1], [0], [0], [1], [0, 0, 1, 1], [], []>} : vector<8x128xbf16>, vector<128x128xbf16>, vector<8x128xf32> -> vector<8x128xf32>
    %238 = arith.addf %233, %237 : vector<8x128xf32>
    %c241_224 = arith.constant 241 : index
    %c0_225 = arith.constant 0 : index
    %239 = vector.load %arg2[%c241_224, %c0_225] : memref<528x128xbf16, #tpu.memory_space<vmem>>, vector<8x128xbf16>
    %c21_226 = arith.constant 21 : index
    %c0_227 = arith.constant 0 : index
    %c0_228 = arith.constant 0 : index
    %240 = vector.load %arg3[%c21_226, %c0_227, %c0_228] : memref<25x128x128xbf16, #tpu.memory_space<vmem>>, vector<1x128x128xbf16>
    %241 = vector.shape_cast %240 : vector<1x128x128xbf16> to vector<128x128xbf16>
    %cst_229 = arith.constant dense<0.000000e+00> : vector<8x128xf32>
    %242 = tpu.matmul %239, %241, %cst_229 {dimension_numbers = #tpu.dot_dimension_numbers<[1], [0], [0], [1], [0, 0, 1, 1], [], []>} : vector<8x128xbf16>, vector<128x128xbf16>, vector<8x128xf32> -> vector<8x128xf32>
    %243 = arith.addf %238, %242 : vector<8x128xf32>
    %c257 = arith.constant 257 : index
    %c0_230 = arith.constant 0 : index
    %244 = vector.load %arg2[%c257, %c0_230] : memref<528x128xbf16, #tpu.memory_space<vmem>>, vector<8x128xbf16>
    %c22_231 = arith.constant 22 : index
    %c0_232 = arith.constant 0 : index
    %c0_233 = arith.constant 0 : index
    %245 = vector.load %arg3[%c22_231, %c0_232, %c0_233] : memref<25x128x128xbf16, #tpu.memory_space<vmem>>, vector<1x128x128xbf16>
    %246 = vector.shape_cast %245 : vector<1x128x128xbf16> to vector<128x128xbf16>
    %cst_234 = arith.constant dense<0.000000e+00> : vector<8x128xf32>
    %247 = tpu.matmul %244, %246, %cst_234 {dimension_numbers = #tpu.dot_dimension_numbers<[1], [0], [0], [1], [0, 0, 1, 1], [], []>} : vector<8x128xbf16>, vector<128x128xbf16>, vector<8x128xf32> -> vector<8x128xf32>
    %248 = arith.addf %243, %247 : vector<8x128xf32>
    %c273 = arith.constant 273 : index
    %c0_235 = arith.constant 0 : index
    %249 = vector.load %arg2[%c273, %c0_235] : memref<528x128xbf16, #tpu.memory_space<vmem>>, vector<8x128xbf16>
    %c23_236 = arith.constant 23 : index
    %c0_237 = arith.constant 0 : index
    %c0_238 = arith.constant 0 : index
    %250 = vector.load %arg3[%c23_236, %c0_237, %c0_238] : memref<25x128x128xbf16, #tpu.memory_space<vmem>>, vector<1x128x128xbf16>
    %251 = vector.shape_cast %250 : vector<1x128x128xbf16> to vector<128x128xbf16>
    %cst_239 = arith.constant dense<0.000000e+00> : vector<8x128xf32>
    %252 = tpu.matmul %249, %251, %cst_239 {dimension_numbers = #tpu.dot_dimension_numbers<[1], [0], [0], [1], [0, 0, 1, 1], [], []>} : vector<8x128xbf16>, vector<128x128xbf16>, vector<8x128xf32> -> vector<8x128xf32>
    %253 = arith.addf %248, %252 : vector<8x128xf32>
    %c289 = arith.constant 289 : index
    %c0_240 = arith.constant 0 : index
    %254 = vector.load %arg2[%c289, %c0_240] : memref<528x128xbf16, #tpu.memory_space<vmem>>, vector<8x128xbf16>
    %c24_241 = arith.constant 24 : index
    %c0_242 = arith.constant 0 : index
    %c0_243 = arith.constant 0 : index
    %255 = vector.load %arg3[%c24_241, %c0_242, %c0_243] : memref<25x128x128xbf16, #tpu.memory_space<vmem>>, vector<1x128x128xbf16>
    %256 = vector.shape_cast %255 : vector<1x128x128xbf16> to vector<128x128xbf16>
    %cst_244 = arith.constant dense<0.000000e+00> : vector<8x128xf32>
    %257 = tpu.matmul %254, %256, %cst_244 {dimension_numbers = #tpu.dot_dimension_numbers<[1], [0], [0], [1], [0, 0, 1, 1], [], []>} : vector<8x128xbf16>, vector<128x128xbf16>, vector<8x128xf32> -> vector<8x128xf32>
    %258 = arith.addf %253, %257 : vector<8x128xf32>
    %c0_245 = arith.constant 0 : index
    %c0_246 = arith.constant 0 : index
    %259 = vector.load %arg4[%c0_245, %c0_246] : memref<1x128xf32, #tpu.memory_space<vmem>>, vector<1x128xf32>
    %260 = vector.broadcast %259 : vector<1x128xf32> to vector<8x128xf32>
    %261 = arith.addf %258, %260 : vector<8x128xf32>
    %cst_247 = arith.constant 0.000000e+00 : f32
    %262 = vector.broadcast %cst_247 : f32 to vector<8x128xf32>
    %263 = arith.maximumf %261, %262 : vector<8x128xf32>
    %264 = arith.truncf %263 : vector<8x128xf32> to vector<8x128xbf16>
    %c0_248 = arith.constant 0 : index
    %c128 = arith.constant 128 : index
    %265 = vector.load %arg9[%c0_248, %c128] : memref<8x384xbf16, #tpu.memory_space<vmem>>, vector<8x128xbf16>
    tpu.vector_store %arg9[%c0_248, %c128], %264 {strides = array<i32>} : memref<8x384xbf16, #tpu.memory_space<vmem>>, vector<8x128xbf16>,
    %cst_249 = arith.constant 0.000000e+00 : f32
    %266 = vector.broadcast %cst_249 : f32 to vector<8x128xf32>
    %c96_250 = arith.constant 96 : index
    %c0_251 = arith.constant 0 : index
    %267 = vector.load %arg2[%c96_250, %c0_251] : memref<528x128xbf16, #tpu.memory_space<vmem>>, vector<8x128xbf16>
    %c0_252 = arith.constant 0 : index
    %c0_253 = arith.constant 0 : index
    %c0_254 = arith.constant 0 : index
    %268 = vector.load %arg3[%c0_252, %c0_253, %c0_254] : memref<25x128x128xbf16, #tpu.memory_space<vmem>>, vector<1x128x128xbf16>
    %269 = vector.shape_cast %268 : vector<1x128x128xbf16> to vector<128x128xbf16>
    %cst_255 = arith.constant dense<0.000000e+00> : vector<8x128xf32>
    %270 = tpu.matmul %267, %269, %cst_255 {dimension_numbers = #tpu.dot_dimension_numbers<[1], [0], [0], [1], [0, 0, 1, 1], [], []>} : vector<8x128xbf16>, vector<128x128xbf16>, vector<8x128xf32> -> vector<8x128xf32>
    %271 = arith.addf %266, %270 : vector<8x128xf32>
    %c112_256 = arith.constant 112 : index
    %c0_257 = arith.constant 0 : index
    %272 = vector.load %arg2[%c112_256, %c0_257] : memref<528x128xbf16, #tpu.memory_space<vmem>>, vector<8x128xbf16>
    %c1_258 = arith.constant 1 : index
    %c0_259 = arith.constant 0 : index
    %c0_260 = arith.constant 0 : index
    %273 = vector.load %arg3[%c1_258, %c0_259, %c0_260] : memref<25x128x128xbf16, #tpu.memory_space<vmem>>, vector<1x128x128xbf16>
    %274 = vector.shape_cast %273 : vector<1x128x128xbf16> to vector<128x128xbf16>
    %cst_261 = arith.constant dense<0.000000e+00> : vector<8x128xf32>
    %275 = tpu.matmul %272, %274, %cst_261 {dimension_numbers = #tpu.dot_dimension_numbers<[1], [0], [0], [1], [0, 0, 1, 1], [], []>} : vector<8x128xbf16>, vector<128x128xbf16>, vector<8x128xf32> -> vector<8x128xf32>
    %276 = arith.addf %271, %275 : vector<8x128xf32>
    %c128_262 = arith.constant 128 : index
    %c0_263 = arith.constant 0 : index
    %277 = vector.load %arg2[%c128_262, %c0_263] : memref<528x128xbf16, #tpu.memory_space<vmem>>, vector<8x128xbf16>
    %c2_264 = arith.constant 2 : index
    %c0_265 = arith.constant 0 : index
    %c0_266 = arith.constant 0 : index
    %278 = vector.load %arg3[%c2_264, %c0_265, %c0_266] : memref<25x128x128xbf16, #tpu.memory_space<vmem>>, vector<1x128x128xbf16>
    %279 = vector.shape_cast %278 : vector<1x128x128xbf16> to vector<128x128xbf16>
    %cst_267 = arith.constant dense<0.000000e+00> : vector<8x128xf32>
    %280 = tpu.matmul %277, %279, %cst_267 {dimension_numbers = #tpu.dot_dimension_numbers<[1], [0], [0], [1], [0, 0, 1, 1], [], []>} : vector<8x128xbf16>, vector<128x128xbf16>, vector<8x128xf32> -> vector<8x128xf32>
    %281 = arith.addf %276, %280 : vector<8x128xf32>
    %c144 = arith.constant 144 : index
    %c0_268 = arith.constant 0 : index
    %282 = vector.load %arg2[%c144, %c0_268] : memref<528x128xbf16, #tpu.memory_space<vmem>>, vector<8x128xbf16>
    %c3_269 = arith.constant 3 : index
    %c0_270 = arith.constant 0 : index
    %c0_271 = arith.constant 0 : index
    %283 = vector.load %arg3[%c3_269, %c0_270, %c0_271] : memref<25x128x128xbf16, #tpu.memory_space<vmem>>, vector<1x128x128xbf16>
    %284 = vector.shape_cast %283 : vector<1x128x128xbf16> to vector<128x128xbf16>
    %cst_272 = arith.constant dense<0.000000e+00> : vector<8x128xf32>
    %285 = tpu.matmul %282, %284, %cst_272 {dimension_numbers = #tpu.dot_dimension_numbers<[1], [0], [0], [1], [0, 0, 1, 1], [], []>} : vector<8x128xbf16>, vector<128x128xbf16>, vector<8x128xf32> -> vector<8x128xf32>
    %286 = arith.addf %281, %285 : vector<8x128xf32>
    %c160 = arith.constant 160 : index
    %c0_273 = arith.constant 0 : index
    %287 = vector.load %arg2[%c160, %c0_273] : memref<528x128xbf16, #tpu.memory_space<vmem>>, vector<8x128xbf16>
    %c4_274 = arith.constant 4 : index
    %c0_275 = arith.constant 0 : index
    %c0_276 = arith.constant 0 : index
    %288 = vector.load %arg3[%c4_274, %c0_275, %c0_276] : memref<25x128x128xbf16, #tpu.memory_space<vmem>>, vector<1x128x128xbf16>
    %289 = vector.shape_cast %288 : vector<1x128x128xbf16> to vector<128x128xbf16>
    %cst_277 = arith.constant dense<0.000000e+00> : vector<8x128xf32>
    %290 = tpu.matmul %287, %289, %cst_277 {dimension_numbers = #tpu.dot_dimension_numbers<[1], [0], [0], [1], [0, 0, 1, 1], [], []>} : vector<8x128xbf16>, vector<128x128xbf16>, vector<8x128xf32> -> vector<8x128xf32>
    %291 = arith.addf %286, %290 : vector<8x128xf32>
    %c272_278 = arith.constant 272 : index
    %c0_279 = arith.constant 0 : index
    %292 = vector.load %arg2[%c272_278, %c0_279] : memref<528x128xbf16, #tpu.memory_space<vmem>>, vector<8x128xbf16>
    %c5_280 = arith.constant 5 : index
    %c0_281 = arith.constant 0 : index
    %c0_282 = arith.constant 0 : index
    %293 = vector.load %arg3[%c5_280, %c0_281, %c0_282] : memref<25x128x128xbf16, #tpu.memory_space<vmem>>, vector<1x128x128xbf16>
    %294 = vector.shape_cast %293 : vector<1x128x128xbf16> to vector<128x128xbf16>
    %cst_283 = arith.constant dense<0.000000e+00> : vector<8x128xf32>
    %295 = tpu.matmul %292, %294, %cst_283 {dimension_numbers = #tpu.dot_dimension_numbers<[1], [0], [0], [1], [0, 0, 1, 1], [], []>} : vector<8x128xbf16>, vector<128x128xbf16>, vector<8x128xf32> -> vector<8x128xf32>
    %296 = arith.addf %291, %295 : vector<8x128xf32>
    %c288_284 = arith.constant 288 : index
    %c0_285 = arith.constant 0 : index
    %297 = vector.load %arg2[%c288_284, %c0_285] : memref<528x128xbf16, #tpu.memory_space<vmem>>, vector<8x128xbf16>
    %c6_286 = arith.constant 6 : index
    %c0_287 = arith.constant 0 : index
    %c0_288 = arith.constant 0 : index
    %298 = vector.load %arg3[%c6_286, %c0_287, %c0_288] : memref<25x128x128xbf16, #tpu.memory_space<vmem>>, vector<1x128x128xbf16>
    %299 = vector.shape_cast %298 : vector<1x128x128xbf16> to vector<128x128xbf16>
    %cst_289 = arith.constant dense<0.000000e+00> : vector<8x128xf32>
    %300 = tpu.matmul %297, %299, %cst_289 {dimension_numbers = #tpu.dot_dimension_numbers<[1], [0], [0], [1], [0, 0, 1, 1], [], []>} : vector<8x128xbf16>, vector<128x128xbf16>, vector<8x128xf32> -> vector<8x128xf32>
    %301 = arith.addf %296, %300 : vector<8x128xf32>
    %c304 = arith.constant 304 : index
    %c0_290 = arith.constant 0 : index
    %302 = vector.load %arg2[%c304, %c0_290] : memref<528x128xbf16, #tpu.memory_space<vmem>>, vector<8x128xbf16>
    %c7_291 = arith.constant 7 : index
    %c0_292 = arith.constant 0 : index
    %c0_293 = arith.constant 0 : index
    %303 = vector.load %arg3[%c7_291, %c0_292, %c0_293] : memref<25x128x128xbf16, #tpu.memory_space<vmem>>, vector<1x128x128xbf16>
    %304 = vector.shape_cast %303 : vector<1x128x128xbf16> to vector<128x128xbf16>
    %cst_294 = arith.constant dense<0.000000e+00> : vector<8x128xf32>
    %305 = tpu.matmul %302, %304, %cst_294 {dimension_numbers = #tpu.dot_dimension_numbers<[1], [0], [0], [1], [0, 0, 1, 1], [], []>} : vector<8x128xbf16>, vector<128x128xbf16>, vector<8x128xf32> -> vector<8x128xf32>
    %306 = arith.addf %301, %305 : vector<8x128xf32>
    %c320 = arith.constant 320 : index
    %c0_295 = arith.constant 0 : index
    %307 = vector.load %arg2[%c320, %c0_295] : memref<528x128xbf16, #tpu.memory_space<vmem>>, vector<8x128xbf16>
    %c8_296 = arith.constant 8 : index
    %c0_297 = arith.constant 0 : index
    %c0_298 = arith.constant 0 : index
    %308 = vector.load %arg3[%c8_296, %c0_297, %c0_298] : memref<25x128x128xbf16, #tpu.memory_space<vmem>>, vector<1x128x128xbf16>
    %309 = vector.shape_cast %308 : vector<1x128x128xbf16> to vector<128x128xbf16>
    %cst_299 = arith.constant dense<0.000000e+00> : vector<8x128xf32>
    %310 = tpu.matmul %307, %309, %cst_299 {dimension_numbers = #tpu.dot_dimension_numbers<[1], [0], [0], [1], [0, 0, 1, 1], [], []>} : vector<8x128xbf16>, vector<128x128xbf16>, vector<8x128xf32> -> vector<8x128xf32>
    %311 = arith.addf %306, %310 : vector<8x128xf32>
    %c336 = arith.constant 336 : index
    %c0_300 = arith.constant 0 : index
    %312 = vector.load %arg2[%c336, %c0_300] : memref<528x128xbf16, #tpu.memory_space<vmem>>, vector<8x128xbf16>
    %c9_301 = arith.constant 9 : index
    %c0_302 = arith.constant 0 : index
    %c0_303 = arith.constant 0 : index
    %313 = vector.load %arg3[%c9_301, %c0_302, %c0_303] : memref<25x128x128xbf16, #tpu.memory_space<vmem>>, vector<1x128x128xbf16>
    %314 = vector.shape_cast %313 : vector<1x128x128xbf16> to vector<128x128xbf16>
    %cst_304 = arith.constant dense<0.000000e+00> : vector<8x128xf32>
    %315 = tpu.matmul %312, %314, %cst_304 {dimension_numbers = #tpu.dot_dimension_numbers<[1], [0], [0], [1], [0, 0, 1, 1], [], []>} : vector<8x128xbf16>, vector<128x128xbf16>, vector<8x128xf32> -> vector<8x128xf32>
    %316 = arith.addf %311, %315 : vector<8x128xf32>
    %c448_305 = arith.constant 448 : index
    %c0_306 = arith.constant 0 : index
    %317 = vector.load %arg2[%c448_305, %c0_306] : memref<528x128xbf16, #tpu.memory_space<vmem>>, vector<8x128xbf16>
    %c10_307 = arith.constant 10 : index
    %c0_308 = arith.constant 0 : index
    %c0_309 = arith.constant 0 : index
    %318 = vector.load %arg3[%c10_307, %c0_308, %c0_309] : memref<25x128x128xbf16, #tpu.memory_space<vmem>>, vector<1x128x128xbf16>
    %319 = vector.shape_cast %318 : vector<1x128x128xbf16> to vector<128x128xbf16>
    %cst_310 = arith.constant dense<0.000000e+00> : vector<8x128xf32>
    %320 = tpu.matmul %317, %319, %cst_310 {dimension_numbers = #tpu.dot_dimension_numbers<[1], [0], [0], [1], [0, 0, 1, 1], [], []>} : vector<8x128xbf16>, vector<128x128xbf16>, vector<8x128xf32> -> vector<8x128xf32>
    %321 = arith.addf %316, %320 : vector<8x128xf32>
    %c464_311 = arith.constant 464 : index
    %c0_312 = arith.constant 0 : index
    %322 = vector.load %arg2[%c464_311, %c0_312] : memref<528x128xbf16, #tpu.memory_space<vmem>>, vector<8x128xbf16>
    %c11_313 = arith.constant 11 : index
    %c0_314 = arith.constant 0 : index
    %c0_315 = arith.constant 0 : index
    %323 = vector.load %arg3[%c11_313, %c0_314, %c0_315] : memref<25x128x128xbf16, #tpu.memory_space<vmem>>, vector<1x128x128xbf16>
    %324 = vector.shape_cast %323 : vector<1x128x128xbf16> to vector<128x128xbf16>
    %cst_316 = arith.constant dense<0.000000e+00> : vector<8x128xf32>
    %325 = tpu.matmul %322, %324, %cst_316 {dimension_numbers = #tpu.dot_dimension_numbers<[1], [0], [0], [1], [0, 0, 1, 1], [], []>} : vector<8x128xbf16>, vector<128x128xbf16>, vector<8x128xf32> -> vector<8x128xf32>
    %326 = arith.addf %321, %325 : vector<8x128xf32>
    %c480 = arith.constant 480 : index
    %c0_317 = arith.constant 0 : index
    %327 = vector.load %arg2[%c480, %c0_317] : memref<528x128xbf16, #tpu.memory_space<vmem>>, vector<8x128xbf16>
    %c12_318 = arith.constant 12 : index
    %c0_319 = arith.constant 0 : index
    %c0_320 = arith.constant 0 : index
    %328 = vector.load %arg3[%c12_318, %c0_319, %c0_320] : memref<25x128x128xbf16, #tpu.memory_space<vmem>>, vector<1x128x128xbf16>
    %329 = vector.shape_cast %328 : vector<1x128x128xbf16> to vector<128x128xbf16>
    %cst_321 = arith.constant dense<0.000000e+00> : vector<8x128xf32>
    %330 = tpu.matmul %327, %329, %cst_321 {dimension_numbers = #tpu.dot_dimension_numbers<[1], [0], [0], [1], [0, 0, 1, 1], [], []>} : vector<8x128xbf16>, vector<128x128xbf16>, vector<8x128xf32> -> vector<8x128xf32>
    %331 = arith.addf %326, %330 : vector<8x128xf32>
    %c496 = arith.constant 496 : index
    %c0_322 = arith.constant 0 : index
    %332 = vector.load %arg2[%c496, %c0_322] : memref<528x128xbf16, #tpu.memory_space<vmem>>, vector<8x128xbf16>
    %c13_323 = arith.constant 13 : index
    %c0_324 = arith.constant 0 : index
    %c0_325 = arith.constant 0 : index
    %333 = vector.load %arg3[%c13_323, %c0_324, %c0_325] : memref<25x128x128xbf16, #tpu.memory_space<vmem>>, vector<1x128x128xbf16>
    %334 = vector.shape_cast %333 : vector<1x128x128xbf16> to vector<128x128xbf16>
    %cst_326 = arith.constant dense<0.000000e+00> : vector<8x128xf32>
    %335 = tpu.matmul %332, %334, %cst_326 {dimension_numbers = #tpu.dot_dimension_numbers<[1], [0], [0], [1], [0, 0, 1, 1], [], []>} : vector<8x128xbf16>, vector<128x128xbf16>, vector<8x128xf32> -> vector<8x128xf32>
    %336 = arith.addf %331, %335 : vector<8x128xf32>
    %c512 = arith.constant 512 : index
    %c0_327 = arith.constant 0 : index
    %337 = vector.load %arg2[%c512, %c0_327] : memref<528x128xbf16, #tpu.memory_space<vmem>>, vector<8x128xbf16>
    %c14_328 = arith.constant 14 : index
    %c0_329 = arith.constant 0 : index
    %c0_330 = arith.constant 0 : index
    %338 = vector.load %arg3[%c14_328, %c0_329, %c0_330] : memref<25x128x128xbf16, #tpu.memory_space<vmem>>, vector<1x128x128xbf16>
    %339 = vector.shape_cast %338 : vector<1x128x128xbf16> to vector<128x128xbf16>
    %cst_331 = arith.constant dense<0.000000e+00> : vector<8x128xf32>
    %340 = tpu.matmul %337, %339, %cst_331 {dimension_numbers = #tpu.dot_dimension_numbers<[1], [0], [0], [1], [0, 0, 1, 1], [], []>} : vector<8x128xbf16>, vector<128x128xbf16>, vector<8x128xf32> -> vector<8x128xf32>
    %341 = arith.addf %336, %340 : vector<8x128xf32>
    %c97_332 = arith.constant 97 : index
    %c0_333 = arith.constant 0 : index
    %342 = vector.load %arg2[%c97_332, %c0_333] : memref<528x128xbf16, #tpu.memory_space<vmem>>, vector<8x128xbf16>
    %c15_334 = arith.constant 15 : index
    %c0_335 = arith.constant 0 : index
    %c0_336 = arith.constant 0 : index
    %343 = vector.load %arg3[%c15_334, %c0_335, %c0_336] : memref<25x128x128xbf16, #tpu.memory_space<vmem>>, vector<1x128x128xbf16>
    %344 = vector.shape_cast %343 : vector<1x128x128xbf16> to vector<128x128xbf16>
    %cst_337 = arith.constant dense<0.000000e+00> : vector<8x128xf32>
    %345 = tpu.matmul %342, %344, %cst_337 {dimension_numbers = #tpu.dot_dimension_numbers<[1], [0], [0], [1], [0, 0, 1, 1], [], []>} : vector<8x128xbf16>, vector<128x128xbf16>, vector<8x128xf32> -> vector<8x128xf32>
    %346 = arith.addf %341, %345 : vector<8x128xf32>
    %c113_338 = arith.constant 113 : index
    %c0_339 = arith.constant 0 : index
    %347 = vector.load %arg2[%c113_338, %c0_339] : memref<528x128xbf16, #tpu.memory_space<vmem>>, vector<8x128xbf16>
    %c16_340 = arith.constant 16 : index
    %c0_341 = arith.constant 0 : index
    %c0_342 = arith.constant 0 : index
    %348 = vector.load %arg3[%c16_340, %c0_341, %c0_342] : memref<25x128x128xbf16, #tpu.memory_space<vmem>>, vector<1x128x128xbf16>
    %349 = vector.shape_cast %348 : vector<1x128x128xbf16> to vector<128x128xbf16>
    %cst_343 = arith.constant dense<0.000000e+00> : vector<8x128xf32>
    %350 = tpu.matmul %347, %349, %cst_343 {dimension_numbers = #tpu.dot_dimension_numbers<[1], [0], [0], [1], [0, 0, 1, 1], [], []>} : vector<8x128xbf16>, vector<128x128xbf16>, vector<8x128xf32> -> vector<8x128xf32>
    %351 = arith.addf %346, %350 : vector<8x128xf32>
    %c129 = arith.constant 129 : index
    %c0_344 = arith.constant 0 : index
    %352 = vector.load %arg2[%c129, %c0_344] : memref<528x128xbf16, #tpu.memory_space<vmem>>, vector<8x128xbf16>
    %c17_345 = arith.constant 17 : index
    %c0_346 = arith.constant 0 : index
    %c0_347 = arith.constant 0 : index
    %353 = vector.load %arg3[%c17_345, %c0_346, %c0_347] : memref<25x128x128xbf16, #tpu.memory_space<vmem>>, vector<1x128x128xbf16>
    %354 = vector.shape_cast %353 : vector<1x128x128xbf16> to vector<128x128xbf16>
    %cst_348 = arith.constant dense<0.000000e+00> : vector<8x128xf32>
    %355 = tpu.matmul %352, %354, %cst_348 {dimension_numbers = #tpu.dot_dimension_numbers<[1], [0], [0], [1], [0, 0, 1, 1], [], []>} : vector<8x128xbf16>, vector<128x128xbf16>, vector<8x128xf32> -> vector<8x128xf32>
    %356 = arith.addf %351, %355 : vector<8x128xf32>
    %c145 = arith.constant 145 : index
    %c0_349 = arith.constant 0 : index
    %357 = vector.load %arg2[%c145, %c0_349] : memref<528x128xbf16, #tpu.memory_space<vmem>>, vector<8x128xbf16>
    %c18_350 = arith.constant 18 : index
    %c0_351 = arith.constant 0 : index
    %c0_352 = arith.constant 0 : index
    %358 = vector.load %arg3[%c18_350, %c0_351, %c0_352] : memref<25x128x128xbf16, #tpu.memory_space<vmem>>, vector<1x128x128xbf16>
    %359 = vector.shape_cast %358 : vector<1x128x128xbf16> to vector<128x128xbf16>
    %cst_353 = arith.constant dense<0.000000e+00> : vector<8x128xf32>
    %360 = tpu.matmul %357, %359, %cst_353 {dimension_numbers = #tpu.dot_dimension_numbers<[1], [0], [0], [1], [0, 0, 1, 1], [], []>} : vector<8x128xbf16>, vector<128x128xbf16>, vector<8x128xf32> -> vector<8x128xf32>
    %361 = arith.addf %356, %360 : vector<8x128xf32>
    %c161 = arith.constant 161 : index
    %c0_354 = arith.constant 0 : index
    %362 = vector.load %arg2[%c161, %c0_354] : memref<528x128xbf16, #tpu.memory_space<vmem>>, vector<8x128xbf16>
    %c19_355 = arith.constant 19 : index
    %c0_356 = arith.constant 0 : index
    %c0_357 = arith.constant 0 : index
    %363 = vector.load %arg3[%c19_355, %c0_356, %c0_357] : memref<25x128x128xbf16, #tpu.memory_space<vmem>>, vector<1x128x128xbf16>
    %364 = vector.shape_cast %363 : vector<1x128x128xbf16> to vector<128x128xbf16>
    %cst_358 = arith.constant dense<0.000000e+00> : vector<8x128xf32>
    %365 = tpu.matmul %362, %364, %cst_358 {dimension_numbers = #tpu.dot_dimension_numbers<[1], [0], [0], [1], [0, 0, 1, 1], [], []>} : vector<8x128xbf16>, vector<128x128xbf16>, vector<8x128xf32> -> vector<8x128xf32>
    %366 = arith.addf %361, %365 : vector<8x128xf32>
    %c273_359 = arith.constant 273 : index
    %c0_360 = arith.constant 0 : index
    %367 = vector.load %arg2[%c273_359, %c0_360] : memref<528x128xbf16, #tpu.memory_space<vmem>>, vector<8x128xbf16>
    %c20_361 = arith.constant 20 : index
    %c0_362 = arith.constant 0 : index
    %c0_363 = arith.constant 0 : index
    %368 = vector.load %arg3[%c20_361, %c0_362, %c0_363] : memref<25x128x128xbf16, #tpu.memory_space<vmem>>, vector<1x128x128xbf16>
    %369 = vector.shape_cast %368 : vector<1x128x128xbf16> to vector<128x128xbf16>
    %cst_364 = arith.constant dense<0.000000e+00> : vector<8x128xf32>
    %370 = tpu.matmul %367, %369, %cst_364 {dimension_numbers = #tpu.dot_dimension_numbers<[1], [0], [0], [1], [0, 0, 1, 1], [], []>} : vector<8x128xbf16>, vector<128x128xbf16>, vector<8x128xf32> -> vector<8x128xf32>
    %371 = arith.addf %366, %370 : vector<8x128xf32>
    %c289_365 = arith.constant 289 : index
    %c0_366 = arith.constant 0 : index
    %372 = vector.load %arg2[%c289_365, %c0_366] : memref<528x128xbf16, #tpu.memory_space<vmem>>, vector<8x128xbf16>
    %c21_367 = arith.constant 21 : index
    %c0_368 = arith.constant 0 : index
    %c0_369 = arith.constant 0 : index
    %373 = vector.load %arg3[%c21_367, %c0_368, %c0_369] : memref<25x128x128xbf16, #tpu.memory_space<vmem>>, vector<1x128x128xbf16>
    %374 = vector.shape_cast %373 : vector<1x128x128xbf16> to vector<128x128xbf16>
    %cst_370 = arith.constant dense<0.000000e+00> : vector<8x128xf32>
    %375 = tpu.matmul %372, %374, %cst_370 {dimension_numbers = #tpu.dot_dimension_numbers<[1], [0], [0], [1], [0, 0, 1, 1], [], []>} : vector<8x128xbf16>, vector<128x128xbf16>, vector<8x128xf32> -> vector<8x128xf32>
    %376 = arith.addf %371, %375 : vector<8x128xf32>
    %c305 = arith.constant 305 : index
    %c0_371 = arith.constant 0 : index
    %377 = vector.load %arg2[%c305, %c0_371] : memref<528x128xbf16, #tpu.memory_space<vmem>>, vector<8x128xbf16>
    %c22_372 = arith.constant 22 : index
    %c0_373 = arith.constant 0 : index
    %c0_374 = arith.constant 0 : index
    %378 = vector.load %arg3[%c22_372, %c0_373, %c0_374] : memref<25x128x128xbf16, #tpu.memory_space<vmem>>, vector<1x128x128xbf16>
    %379 = vector.shape_cast %378 : vector<1x128x128xbf16> to vector<128x128xbf16>
    %cst_375 = arith.constant dense<0.000000e+00> : vector<8x128xf32>
    %380 = tpu.matmul %377, %379, %cst_375 {dimension_numbers = #tpu.dot_dimension_numbers<[1], [0], [0], [1], [0, 0, 1, 1], [], []>} : vector<8x128xbf16>, vector<128x128xbf16>, vector<8x128xf32> -> vector<8x128xf32>
    %381 = arith.addf %376, %380 : vector<8x128xf32>
    %c321 = arith.constant 321 : index
    %c0_376 = arith.constant 0 : index
    %382 = vector.load %arg2[%c321, %c0_376] : memref<528x128xbf16, #tpu.memory_space<vmem>>, vector<8x128xbf16>
    %c23_377 = arith.constant 23 : index
    %c0_378 = arith.constant 0 : index
    %c0_379 = arith.constant 0 : index
    %383 = vector.load %arg3[%c23_377, %c0_378, %c0_379] : memref<25x128x128xbf16, #tpu.memory_space<vmem>>, vector<1x128x128xbf16>
    %384 = vector.shape_cast %383 : vector<1x128x128xbf16> to vector<128x128xbf16>
    %cst_380 = arith.constant dense<0.000000e+00> : vector<8x128xf32>
    %385 = tpu.matmul %382, %384, %cst_380 {dimension_numbers = #tpu.dot_dimension_numbers<[1], [0], [0], [1], [0, 0, 1, 1], [], []>} : vector<8x128xbf16>, vector<128x128xbf16>, vector<8x128xf32> -> vector<8x128xf32>
    %386 = arith.addf %381, %385 : vector<8x128xf32>
    %c337 = arith.constant 337 : index
    %c0_381 = arith.constant 0 : index
    %387 = vector.load %arg2[%c337, %c0_381] : memref<528x128xbf16, #tpu.memory_space<vmem>>, vector<8x128xbf16>
    %c24_382 = arith.constant 24 : index
    %c0_383 = arith.constant 0 : index
    %c0_384 = arith.constant 0 : index
    %388 = vector.load %arg3[%c24_382, %c0_383, %c0_384] : memref<25x128x128xbf16, #tpu.memory_space<vmem>>, vector<1x128x128xbf16>
    %389 = vector.shape_cast %388 : vector<1x128x128xbf16> to vector<128x128xbf16>
    %cst_385 = arith.constant dense<0.000000e+00> : vector<8x128xf32>
    %390 = tpu.matmul %387, %389, %cst_385 {dimension_numbers = #tpu.dot_dimension_numbers<[1], [0], [0], [1], [0, 0, 1, 1], [], []>} : vector<8x128xbf16>, vector<128x128xbf16>, vector<8x128xf32> -> vector<8x128xf32>
    %391 = arith.addf %386, %390 : vector<8x128xf32>
    %c0_386 = arith.constant 0 : index
    %c0_387 = arith.constant 0 : index
    %392 = vector.load %arg4[%c0_386, %c0_387] : memref<1x128xf32, #tpu.memory_space<vmem>>, vector<1x128xf32>
    %393 = vector.broadcast %392 : vector<1x128xf32> to vector<8x128xf32>
    %394 = arith.addf %391, %393 : vector<8x128xf32>
    %cst_388 = arith.constant 0.000000e+00 : f32
    %395 = vector.broadcast %cst_388 : f32 to vector<8x128xf32>
    %396 = arith.maximumf %394, %395 : vector<8x128xf32>
    %397 = arith.truncf %396 : vector<8x128xf32> to vector<8x128xbf16>
    %c0_389 = arith.constant 0 : index
    %c256_390 = arith.constant 256 : index
    %398 = vector.load %arg9[%c0_389, %c256_390] : memref<8x384xbf16, #tpu.memory_space<vmem>>, vector<8x128xbf16>
    tpu.vector_store %arg9[%c0_389, %c256_390], %397 {strides = array<i32>} : memref<8x384xbf16, #tpu.memory_space<vmem>>, vector<8x128xbf16>,
    %c0_391 = arith.constant 0 : index
    %c0_392 = arith.constant 0 : index
    %399 = vector.load %arg9[%c0_391, %c0_392] : memref<8x384xbf16, #tpu.memory_space<vmem>>, vector<8x384xbf16>
    %c0_393 = arith.constant 0 : index
    %c0_394 = arith.constant 0 : index
    %400 = vector.load %arg5[%c0_393, %c0_394] : memref<384x128xbf16, #tpu.memory_space<vmem>>, vector<384x128xbf16>
    %cst_395 = arith.constant dense<0.000000e+00> : vector<8x128xf32>
    %401 = tpu.matmul %399, %400, %cst_395 {dimension_numbers = #tpu.dot_dimension_numbers<[1], [0], [0], [1], [0, 0, 1, 1], [], []>} : vector<8x384xbf16>, vector<384x128xbf16>, vector<8x128xf32> -> vector<8x128xf32>
    %c0_396 = arith.constant 0 : index
    %c0_397 = arith.constant 0 : index
    %402 = vector.load %arg6[%c0_396, %c0_397] : memref<1x128xf32, #tpu.memory_space<vmem>>, vector<1x128xf32>
    %403 = vector.broadcast %402 : vector<1x128xf32> to vector<8x128xf32>
    %404 = arith.addf %401, %403 : vector<8x128xf32>
    %cst_398 = arith.constant 5.65685415 : f32
    %405 = vector.broadcast %cst_398 : f32 to vector<8x128xf32>
    %406 = arith.mulf %404, %405 : vector<8x128xf32>
    %c0_399 = arith.constant 0 : index
    %c0_400 = arith.constant 0 : index
    %407 = vector.load %arg7[%c0_399, %c0_400] : memref<8x128xf32, #tpu.memory_space<vmem>>, vector<8x128xf32>
    %408 = arith.addf %406, %407 : vector<8x128xf32>
    %c0_401 = arith.constant 0 : index
    %c0_402 = arith.constant 0 : index
    %c0_403 = arith.constant 0 : index
    %409 = vector.load %arg8[%c0_401, %c0_402, %c0_403] : memref<1x8x128xf32, #tpu.memory_space<vmem>>, vector<1x8x128xf32>
    %410 = vector.shape_cast %409 : vector<1x8x128xf32> to vector<8x128xf32>
    %411 = vector.shape_cast %408 : vector<8x128xf32> to vector<1x8x128xf32>
    tpu.vector_store %arg8[%c0_401, %c0_402, %c0_403], %411 {strides = array<i32>} : memref<1x8x128xf32, #tpu.memory_space<vmem>>, vector<1x8x128xf32>,
    return
  }
  func.func @transform_0(%arg0: i32, %arg1: i32) -> (i32, i32) {
    %c1_i32 = arith.constant 1 : i32
    %0 = arith.muli %arg0, %c1_i32 : i32
    %1 = arith.addi %0, %arg1 : i32
    %c0_i32 = arith.constant 0 : i32
    %c0_i32_0 = arith.constant 0 : i32
    return %1, %c0_i32 : i32, i32
  }
  func.func @transform_1(%arg0: i32, %arg1: i32) -> (i32, i32, i32) {
    %c0_i32 = arith.constant 0 : i32
    %c0_i32_0 = arith.constant 0 : i32
    %c0_i32_1 = arith.constant 0 : i32
    %c0_i32_2 = arith.constant 0 : i32
    return %c0_i32, %c0_i32_0, %c0_i32_1 : i32, i32, i32
  }
  func.func @transform_2(%arg0: i32, %arg1: i32) -> (i32, i32) {
    %c0_i32 = arith.constant 0 : i32
    %c0_i32_0 = arith.constant 0 : i32
    %c0_i32_1 = arith.constant 0 : i32
    return %c0_i32, %c0_i32_0 : i32, i32
  }
  func.func @transform_3(%arg0: i32, %arg1: i32) -> (i32, i32) {
    %c0_i32 = arith.constant 0 : i32
    %c0_i32_0 = arith.constant 0 : i32
    %c0_i32_1 = arith.constant 0 : i32
    return %c0_i32, %c0_i32_0 : i32, i32
  }
  func.func @transform_4(%arg0: i32, %arg1: i32) -> (i32, i32) {
    %c0_i32 = arith.constant 0 : i32
    %c0_i32_0 = arith.constant 0 : i32
    %c0_i32_1 = arith.constant 0 : i32
    return %c0_i32, %c0_i32_0 : i32, i32
  }
  func.func @transform_5(%arg0: i32, %arg1: i32) -> (i32, i32) {
    %c0_i32 = arith.constant 0 : i32
    %c0_i32_0 = arith.constant 0 : i32
    return %arg1, %c0_i32 : i32, i32
  }
  func.func @transform_6(%arg0: i32, %arg1: i32) -> (i32, i32, i32) {
    %c0_i32 = arith.constant 0 : i32
    %c0_i32_0 = arith.constant 0 : i32
    return %arg0, %arg1, %c0_i32 : i32, i32, i32
  }
}

</mosaic_0001>

<bundles_post_ra>
// kernel: conv2d_subsampling6_forward.2
= control target key start
LH: loop header
LB: loop body
LE: loop exit
PB: predicated region body
PF: predicated region fallthrough
CT: control target
= control target key end

     0   :  { %8 = vsyncpa [#allocation3], 0  ;;  %s4182_s0 = inlined_call_operand.hbm [shape: bf16[2048,9], index: 0, kind: input, shape index: {}]   ;;  %s4183_s1 = inlined_call_operand.hbm [shape: bf16[9,128], index: 1, kind: input, shape index: {}]   ;;  %s4184_s2 = inlined_call_operand.hbm [shape: f32[1,128], index: 2, kind: input, shape index: {}]   ;;  %s4185_s3 = inlined_call_operand.hbm [shape: bf16[2048,128], index: 3, kind: output, shape index: {}]  }
   0x1   :  { %10 = vsyncpa [#allocation3 + $0x1], 0 }
   0x2   :  { %11 = vsyncpa [#allocation6], 0 }
   0x3   :  { %12 = vsyncpa [#allocation4], 0 }
   0x4   :  { %14 = vsyncpa [#allocation4 + $0x1], 0  ;;  %s3610_s12 = smov 0   ;;  %s3612_s13 = smov 0  }
   0x5   :  { %s3614_s14 = smov 0   ;;  %s3616_s15 = smov 0  }
   0x6 LB: > { %s3631_s16 = sadd.s32 4294967295, %s3579_s15   ;;  %s2300_s17 = sadd.s32 4294967294, %s3579_s15   ;;  %s3579_s15 = sphi %s3616_s15, %s4205_s15   ;;  %s3575_s14 = sphi %s3614_s14, %s4204_s14   ;;  %s3571_s13 = sphi %s3612_s13, %s4203_s13   ;;  %s3567_s12 = sphi %s3610_s12, %s4202_s12  }
   0x7   : > { %p40_p0 = scmp.ne.s32.totalorder %s3571_s13, %s3567_s12  ;;  %p4186_p1 = scmp.eq.s32.totalorder %s3631_s16, 0 }
   0x8   : > { %p112_p3 = scmp.eq.s32.totalorder %s2300_s17, 1  ;;  %p2301_p5 = scmp.ge.s32.totalorder %s3579_s15, 1 }
   0x9   : > { %p3640_p4 = por %p4186_p1, %p40_p0  ;;  %p119_p7 = scmp.lt.s32.totalorder %s3579_s15, 3 }
   0xa   : > { %p3645_p6 = por %p112_p3, %p40_p0  ;;  %s3581_s21 = smov [#allocation5]  }
   0xb   : > { %s4189_s18 = scalar_select %p3640_p4, 1, 0 }
   0xc   : > { %s4190_s19 = scalar_select %p3645_p6, 1, 0 }
   0xd   : > { %p3650_p8 = pnand %p2301_p5, %p119_p7  ;;  %s131_s22 = sshll.u32 %s3581_s21, 4  ;;  %s3654_s22 = int_to_ptr.vmem [resolvable:$true] %s131_s22 }
   0xe   : > { %s3582_s24 = smov [#allocation7]   ;;  %s3423_s28 = scalar_lea.hbm %s4183_s1, 128 }
   0xf   : > { %p3298_p9 = pneg %p3650_p8  ;;  %s145_s25 = sshll.u32 %s3582_s24, 4  ;;  %s3665_s25 = int_to_ptr.vmem [resolvable:$true] %s145_s25 }
  0x10   : > { %p3424_p12 = scmp.ne.s32.totalorder %s4183_s1, %s3423_s28  ;;  %p3430_p5 = scmp.lt.u32.totalorder %s3423_s28, %s4183_s1 }
  0x11   : > { %p3661_p11 = pnand %p3298_p9, %p4186_p1 }
  0x13   : > { %p3425_p13 = pneg %p3661_p11 }
  0x15   : > { %p3426_p0 = pnand %p3425_p13, %p3424_p12 }
  0x17   : > { %p3427_p3 = pneg %p3426_p0 }
  0x19   : > { %p3432_p7 = pnand %p3430_p5, %p3427_p3 }
  0x1b   : > { %3435 = shalt.err (!%p3432_p7)
}
  0x1c   : > { %s3436_s6 = scalar_lea.vmem %s3654_s22, 128  ;;  %p3444_p2 = scmp.lt.s32.totalorder %s3654_s22, %s3654_s22 }
  0x1d   : > { %p3437_p9 = scmp.ne.s32.totalorder %s3654_s22, %s3436_s6  ;;  %p3445_p12 = scmp.lt.s32.totalorder %s3436_s6, %s3436_s6 }
  0x1f   : > { %p3439_p10 = pnand %p3437_p9, %p3425_p13  ;;  %p3446_p0 = por %p3445_p12, %p3444_p2 }
  0x21   : > { %p3440_p1 = pneg %p3439_p10 }
  0x23   : > { %p3447_p6 = pnand %p3446_p0, %p3440_p1 }
  0x25   : > { %3450 = shalt.err (!%p3447_p6)
}
  0x26   : > { %s3583_s7 = smov 64   ;;  %s3584_s8 = smov 4  }
  0x27   : > { %3301 = dma.hbm_to_vmem [thread:$0]  (!%p3661_p11), %s4183_s1, 128, %s3654_s22, [#allocation6], %s3583_s7, %s3583_s7, %s3584_s8  }
  0x28   : > { %s3451_s21 = scalar_lea.hbm %s4184_s2, 16 }
  0x29   : > { %p3452_p1 = scmp.ne.s32.totalorder %s4184_s2, %s3451_s21  ;;  %p3458_p10 = scmp.lt.u32.totalorder %s3451_s21, %s4184_s2 }
  0x2b   : > { %p3454_p2 = pnand %p3452_p1, %p3425_p13 }
  0x2d   : > { %p3455_p6 = pneg %p3454_p2 }
  0x2f   : > { %p3460_p3 = pnand %p3458_p10, %p3455_p6 }
  0x31   : > { %3463 = shalt.err (!%p3460_p3)
}
  0x32   : > { %s3464_s22 = scalar_lea.vmem %s3665_s25, 16  ;;  %s3471_s29 = scalar_lea.vmem %s3665_s25, 32 }
  0x33   : > { %p3465_p5 = scmp.ne.s32.totalorder %s3665_s25, %s3464_s22  ;;  %p3472_p12 = scmp.lt.s32.totalorder %s3665_s25, %s3665_s25 }
  0x34   : > { %p3473_p0 = scmp.lt.s32.totalorder %s3471_s29, %s3464_s22 }
  0x35   : > { %p3467_p7 = pnand %p3465_p5, %p3425_p13 }
  0x36   : > { %p3474_p1 = por %p3473_p0, %p3472_p12 }
  0x37   : > { %p3468_p9 = pneg %p3467_p7 }
  0x39   : > { %p3475_p2 = pnand %p3474_p1, %p3468_p9 }
  0x3b   : > { %3478 = shalt.err (!%p3475_p2)
}
  0x3c   : > { %3304 = dma.hbm_to_vmem [thread:$0]  (!%p3661_p11), %s4184_s2, 16, %s3665_s25, [#allocation6]  }
  0x3d   : > { %s3724_s5 = sadd.s32 1, %s3579_s15   ;;  %s27_s23 = sadd.s32 1, %s3575_s14 }
  0x3e   : > { %s24_s6 = ssub.s32 %s3579_s15, %s3724_s5  ;;  %p34_p13 = scmp.ne.s32.totalorder %s3575_s14, %s3571_s13 }
  0x3f   : > { %p25_p6 = scmp.eq.s32.totalorder %s24_s6, 0  ;;  %p35_p10 = scmp.eq.s32.totalorder %s3579_s15, 0 }
  0x40   : > { %p4193_p3 = scmp.eq.s32.totalorder %s3631_s16, 1  ;;  %p3315_p7 = scmp.lt.s32.totalorder %s3579_s15, 2 }
  0x41   : > { %s3740_s10 = scalar_select %p25_p6, %s3575_s14, %s27_s23  }
  0x42   : > { %p3734_p5 = por %p4193_p3, %p34_p13  ;;  %p36_p9 = por %p35_p10, %p34_p13 }
  0x43   : > { %s156_s11 = sand.u32 1, %s3575_s14   ;;  %s2576_s25 = sshll.u32 %s3579_s15, 13 }
  0x44   : > { %s4194_s9 = scalar_select %p3734_p5, 1, 0 }
  0x45   : > { %s2305_s17 = sshll.u32 %s156_s11, 9  ;;  %s3747_s26 = scalar_lea.hbm %s4182_s0, %s2576_s25 }
  0x46   : > { %s160_s27 = scalar_lea.vmem [#allocation2], %s2305_s17  ;;  %p3751_p11 = pnand %p3315_p7, %p36_p9 }
  0x47   : > { %s167_s28 = sshll.u32 %s160_s27, 4  ;;  %s3755_s29 = scalar_lea.sflag [#allocation3], %s156_s11  ;;  %s3749_s28 = int_to_ptr.vmem [resolvable:$true] %s167_s28 }
  0x48   : > { %s3479_s30 = scalar_lea.hbm %s3747_s26, 8192  ;;  %p3481_p0 = pneg %p3751_p11 }
  0x49   : > { %p3480_p12 = scmp.ne.s32.totalorder %s3747_s26, %s3479_s30  ;;  %s3484_s6 = scalar_lea.hbm %s4182_s0, 16384 }
  0x4a   : > { %p3485_p13 = scmp.lt.u32.totalorder %s3747_s26, %s4182_s0  ;;  %p3486_p6 = scmp.lt.u32.totalorder %s3484_s6, %s3479_s30 }
  0x4b   : > { %p3482_p1 = pnand %p3481_p0, %p3480_p12  ;;  %p3488_p3 = scmp.lt.u32.totalorder %s3479_s30, %s3747_s26 }
  0x4c   : > { %p3487_p10 = por %p3486_p6, %p3485_p13 }
  0x4d   : > { %p3483_p2 = pneg %p3482_p1 }
  0x4e   : > { %p3489_p7 = por %p3488_p3, %p3487_p10 }
  0x50   : > { %p3490_p9 = pnand %p3489_p7, %p3483_p2 }
  0x52   : > { %3493 = shalt.err (!%p3490_p9)
}
  0x53   : > { %s3494_s11 = scalar_lea.vmem %s3749_s28, 8192  ;;  %s3585_s21 = smov [#allocation2]  }
  0x54   : > { %p3495_p12 = scmp.ne.s32.totalorder %s3749_s28, %s3494_s11  ;;  %s3499_s24 = sshll.u32 %s3585_s21, 4  ;;  %s3500_s24 = int_to_ptr.vmem [resolvable:$false] %s3499_s24 }
  0x55   : > { %s3501_s27 = scalar_lea.vmem %s3500_s24, 16384  ;;  %p3502_p4 = scmp.lt.s32.totalorder %s3749_s28, %s3500_s24 }
  0x56   : > { %p3497_p1 = pnand %p3495_p12, %p3481_p0  ;;  %p3503_p13 = scmp.lt.s32.totalorder %s3501_s27, %s3494_s11 }
  0x58   : > { %p3498_p5 = pneg %p3497_p1  ;;  %p3504_p6 = por %p3503_p13, %p3502_p4 }
  0x5a   : > { %p3505_p10 = pnand %p3504_p6, %p3498_p5 }
  0x5c   : > { %3508 = shalt.err (!%p3505_p10)
}
  0x5d   : > { %3308 = dma.hbm_to_vmem [thread:$0]  (!%p3751_p11), %s3747_s26, 8192, %s3749_s28, %s3755_s29, %s3583_s7, %s3583_s7, %s3584_s8  }
  0x5e   : > { %179 = sbr.rel (%p3650_p8) target bundleno = 470 (0x1d6), region = 32  ;;  %s3789_s30 = sand.u32 (!%p3650_p8), 1, %s3571_s13  }
  0x5f   : > { %s2309_s4 = sshll.u32 (!%p3650_p8), %s3789_s30, 9  ;;  %s182_s23 = scalar_lea.sflag (!%p3650_p8), [#allocation3], %s3789_s30 }
  0x60   : > { %s3795_s22 = scalar_lea.vmem (!%p3650_p8), [#allocation2], %s2309_s4  ;;  %p4196_p4 = scmp.ne.s32.totalorder (!%p3650_p8), %s4189_s18, 0 }
  0x65   : > { %3554 = dma.done.wait (%p4196_p4), %s182_s23, 8192  }
  0x66   : > { %3556 = vsyncadd (%p4196_p4), %s182_s23, 4294959104  ;;  %p4197_p5 = scmp.eq.s32.totalorder %s3631_s16, 0 }
  0x68   : > { %3558 = dma.done.wait (%p4197_p5), [#allocation6], 144   ;;  %p4198_p8 = pmov %p4197_p5 }
  0x69   : > { %vm874_vm0 = vcmask 1043456   ;;  %vm875_vm1 = vcmask 1044480   ;;  %v3586_v0 = vmov 65535   ;;  %vm681_vm2 = vcmask 72704   ;;  %v3358_v3 = vld [vmem:[#allocation5] sm:$0x1f]  }
  0x6a   : > { %3560 = vsyncadd (%p4198_p8), [#allocation6], 4294967152  ;;  %v876_v1 = vsel %vm874_vm0, 4294967295, %v3586_v0  ;;  %v3359_v4 = vld [vmem:[%s3795_s22] sm:$0xff]   ;;  %v3361_v7 = vld [vmem:[%s3795_s22 + $0x8] sm:$0xff]   ;;  %s3945_s18 = scalar_lea.vmem [#allocation8], %s2309_s4 }
  0x6b   : > { %v877_v2 = vsel %vm875_vm1, %v876_v1, 0  ;;  %v3360_v6 = vld [vmem:[%s3795_s22 + $0x100] sm:$0xff]   ;;  %3156 = vmatprep.mubr.msk.bf16.mxu0 %vm681_vm2, %v3359_v4  ;;  %v3362_v8 = vld [vmem:[%s3795_s22 + $0x108] sm:$0xff]   ;;  %v3363_v9 = vld [vmem:[%s3795_s22 + $0x10] sm:$0xff]   ;;  %s2705_s20 = sshll.u32 %s3631_s16, 13  ;;  %s2208_s7 = sshll.u32 %s3945_s18, 4  ;;  %s4134_s7 = int_to_ptr.vmem [resolvable:$true] %s2208_s7 }
  0x6c   : > { %v879_v5 = vand.u32 %v3358_v3, %v877_v2  ;;  %3220 = vmatprep.mubr.msk.bf16.mxu1 %vm681_vm2, %v3360_v6  ;;  %v3364_v10 = vld [vmem:[%s3795_s22 + $0x110] sm:$0xff]   ;;  %v3365_v11 = vld [vmem:[%s3795_s22 + $0x18] sm:$0xff]   ;;  %v3367_v13 = vld [vmem:[%s3795_s22 + $0x20] sm:$0xff]   ;;  %s4132_s16 = scalar_lea.hbm %s4185_s3, %s2705_s20  ;;  %s2195_s28 = scalar_lea.sflag [#allocation4], %s3789_s30 }
  0x6d   : > { %v3366_v12 = vld [vmem:[%s3795_s22 + $0x118] sm:$0xff]   ;;  %v3368_v14 = vld [vmem:[%s3795_s22 + $0x120] sm:$0xff]   ;;  %v3369_v15 = vld [vmem:[%s3795_s22 + $0x28] sm:$0xff]   ;;  %s3509_s29 = scalar_lea.vmem %s4134_s7, 8192  ;;  %p4199_p0 = scmp.ne.s32.totalorder %s4194_s9, 0 }
  0x6e   : > { %3154 = vmatprep.subr.bf16.mxu0 %v879_v5  ;;  %3284 = vmatprep.subr.bf16.mxu1 %v879_v5  ;;  %v3370_v16 = vld [vmem:[%s3795_s22 + $0x128] sm:$0xff]   ;;  %v3371_v17 = vld [vmem:[%s3795_s22 + $0x30] sm:$0xff]   ;;  %v3373_v19 = vld [vmem:[%s3795_s22 + $0x38] sm:$0xff]   ;;  %p3510_p11 = scmp.ne.s32.totalorder %s4134_s7, %s3509_s29  ;;  %s3587_s6 = smov [#allocation8]  }
  0x6f   : > { %3155 = vmatpush3.bf16.msra.mxu0 %v879_v5  ;;  %3285 = vmatpush3.bf16.msra.mxu1 %v879_v5  ;;  %v3372_v18 = vld [vmem:[%s3795_s22 + $0x130] sm:$0xff]   ;;  %v3374_v20 = vld [vmem:[%s3795_s22 + $0x138] sm:$0xff]   ;;  %v3375_v21 = vld [vmem:[%s3795_s22 + $0x40] sm:$0xff]   ;;  %s3513_s17 = sshll.u32 %s3587_s6, 4  ;;  %s3514_s17 = int_to_ptr.vmem [resolvable:$false] %s3513_s17 }
  0x70   : > { %v3376_v22 = vld [vmem:[%s3795_s22 + $0x140] sm:$0xff]   ;;  %v3377_v23 = vld [vmem:[%s3795_s22 + $0x48] sm:$0xff]   ;;  %v3379_v25 = vld [vmem:[%s3795_s22 + $0x50] sm:$0xff]   ;;  %p3511_p2 = pnand %p3510_p11, %p4199_p0  ;;  %s3515_s25 = scalar_lea.vmem %s3514_s17, 16384 }
  0x71   : > { %v3378_v24 = vld [vmem:[%s3795_s22 + $0x148] sm:$0xff]   ;;  %v3380_v26 = vld [vmem:[%s3795_s22 + $0x150] sm:$0xff]   ;;  %v3381_v27 = vld [vmem:[%s3795_s22 + $0x58] sm:$0xff]   ;;  %p3516_p7 = scmp.lt.s32.totalorder %s4134_s7, %s3514_s17  ;;  %p3517_p9 = scmp.lt.s32.totalorder %s3515_s25, %s3509_s29 }
  0x72   : > { %3157 = vmatmul.mubr.msk.bf16.vlgmr.msra.gmra.mrb[0].mxu0 %vm681_vm2, %v3361_v7  ;;  %3221 = vmatmul.mubr.msk.bf16.vlgmr.msra.gmra.mrb[0].mxu1 %vm681_vm2, %v3362_v8  ;;  %v3382_v28 = vld [vmem:[%s3795_s22 + $0x158] sm:$0xff]   ;;  %v3383_v29 = vld [vmem:[%s3795_s22 + $0x60] sm:$0xff]   ;;  %v3385_v31 = vld [vmem:[%s3795_s22 + $0x68] sm:$0xff]   ;;  %p3512_p3 = pneg %p3511_p2 }
  0x73   : > { %3160 = vmatprep.mubr.msk.bf16.mxu0 %vm681_vm2, %v3363_v9  ;;  %3224 = vmatprep.mubr.msk.bf16.mxu1 %vm681_vm2, %v3364_v10  ;;  %v3384_v30 = vld [vmem:[%s3795_s22 + $0x160] sm:$0xff]   ;;  %v3386_v32 = vld [vmem:[%s3795_s22 + $0x168] sm:$0xff]   ;;  %v3387_v33 = vld [vmem:[%s3795_s22 + $0x70] sm:$0xff]   ;;  %p3518_p12 = por %p3517_p9, %p3516_p7 }
  0x74   : > { %v3388_v34 = vld [vmem:[%s3795_s22 + $0x170] sm:$0xff]   ;;  %v3389_v35 = vld [vmem:[%s3795_s22 + $0x78] sm:$0xff]   ;;  %v3391_v37 = vld [vmem:[%s3795_s22 + $0x80] sm:$0xff]  }
  0x75   : > { %v3390_v36 = vld [vmem:[%s3795_s22 + $0x178] sm:$0xff]   ;;  %v3392_v38 = vld [vmem:[%s3795_s22 + $0x180] sm:$0xff]   ;;  %v3393_v39 = vld [vmem:[%s3795_s22 + $0x88] sm:$0xff]   ;;  %p3519_p1 = pnand %p3518_p12, %p3512_p3 }
  0x76   : > { %v3394_v40 = vld [vmem:[%s3795_s22 + $0x188] sm:$0xff]   ;;  %v3395_v41 = vld [vmem:[%s3795_s22 + $0x90] sm:$0xff]   ;;  %v3397_v43 = vld [vmem:[%s3795_s22 + $0x98] sm:$0xff]  }
  0x77   : > { %v3396_v42 = vld [vmem:[%s3795_s22 + $0x190] sm:$0xff]   ;;  %v3398_v44 = vld [vmem:[%s3795_s22 + $0x198] sm:$0xff]   ;;  %v3399_v45 = vld [vmem:[%s3795_s22 + $0xa0] sm:$0xff]  }
  0x78   : > { %v3400_v46 = vld [vmem:[%s3795_s22 + $0x1a0] sm:$0xff]   ;;  %v3401_v47 = vld [vmem:[%s3795_s22 + $0xa8] sm:$0xff]   ;;  %v3403_v49 = vld [vmem:[%s3795_s22 + $0xb0] sm:$0xff]  }
  0x79   : > { %v3402_v48 = vld [vmem:[%s3795_s22 + $0x1a8] sm:$0xff]   ;;  %v3404_v50 = vld [vmem:[%s3795_s22 + $0x1b0] sm:$0xff]   ;;  %v3405_v51 = vld [vmem:[%s3795_s22 + $0xb8] sm:$0xff]  }
  0x7a   : > { %3161 = vmatmul.mubr.msk.bf16.gmra.mrb[4].mxu0 %vm681_vm2, %v3365_v11  ;;  %3225 = vmatmul.mubr.msk.bf16.gmra.mrb[4].mxu1 %vm681_vm2, %v3366_v12  ;;  %v3406_v52 = vld [vmem:[%s3795_s22 + $0x1b8] sm:$0xff]   ;;  %v3407_v53 = vld [vmem:[%s3795_s22 + $0xc0] sm:$0xff]   ;;  %v3409_v55 = vld [vmem:[%s3795_s22 + $0xc8] sm:$0xff]  }
  0x7b   : > { %3164 = vmatprep.mubr.msk.bf16.mxu0 %vm681_vm2, %v3367_v13  ;;  %3228 = vmatprep.mubr.msk.bf16.mxu1 %vm681_vm2, %v3368_v14  ;;  %v3408_v54 = vld [vmem:[%s3795_s22 + $0x1c0] sm:$0xff]   ;;  %v3410_v56 = vld [vmem:[%s3795_s22 + $0x1c8] sm:$0xff]   ;;  %v3411_v57 = vld [vmem:[%s3795_s22 + $0xd0] sm:$0xff]  }
  0x7c   : > { %v3412_v58 = vld [vmem:[%s3795_s22 + $0x1d0] sm:$0xff]   ;;  %v3413_v59 = vld [vmem:[%s3795_s22 + $0xd8] sm:$0xff]   ;;  %v3415_v61 = vld [vmem:[%s3795_s22 + $0xe0] sm:$0xff]  }
  0x7d   : > { %v3414_v60 = vld [vmem:[%s3795_s22 + $0x1d8] sm:$0xff]   ;;  %v3416_v62 = vld [vmem:[%s3795_s22 + $0x1e0] sm:$0xff]   ;;  %v3417_v63 = vld [vmem:[%s3795_s22 + $0xe8] sm:$0xff]  }
  0x7e   : > { %v3418_v0 = vld [vmem:[%s3795_s22 + $0x1e8] sm:$0xff]   ;;  %v3419_v1 = vld [vmem:[%s3795_s22 + $0xf0] sm:$0xff]   ;;  %v3421_v3 = vld [vmem:[%s3795_s22 + $0xf8] sm:$0xff]  }
  0x7f   : > { %v3420_v2 = vld [vmem:[%s3795_s22 + $0x1f0] sm:$0xff]   ;;  %v3422_v4 = vld [vmem:[%s3795_s22 + $0x1f8] sm:$0xff]   ;;  %v3933_v5 = vld [vmem:[#allocation7] ss:$0 sm:$0xff] }
  0x82   : > { %3165 = vmatmul.mubr.msk.bf16.gmra.mrb[8].mxu0 %vm681_vm2, %v3369_v15  ;;  %3229 = vmatmul.mubr.msk.bf16.gmra.mrb[8].mxu1 %vm681_vm2, %v3370_v16 }
  0x83   : > { %3168 = vmatprep.mubr.msk.bf16.mxu0 %vm681_vm2, %v3371_v17  ;;  %3232 = vmatprep.mubr.msk.bf16.mxu1 %vm681_vm2, %v3372_v18 }
  0x8a   : > { %3169 = vmatmul.mubr.msk.bf16.gmra.mrb[12].mxu0 %vm681_vm2, %v3373_v19  ;;  %3233 = vmatmul.mubr.msk.bf16.gmra.mrb[12].mxu1 %vm681_vm2, %v3374_v20 }
  0x8b   : > { %3172 = vmatprep.mubr.msk.bf16.mxu0 %vm681_vm2, %v3375_v21  ;;  %3236 = vmatprep.mubr.msk.bf16.mxu1 %vm681_vm2, %v3376_v22 }
  0x92   : > { %3173 = vmatmul.mubr.msk.bf16.gmra.mrb[16].mxu0 %vm681_vm2, %v3377_v23  ;;  %3237 = vmatmul.mubr.msk.bf16.gmra.mrb[16].mxu1 %vm681_vm2, %v3378_v24 }
  0x93   : > { %3176 = vmatprep.mubr.msk.bf16.mxu0 %vm681_vm2, %v3379_v25  ;;  %3240 = vmatprep.mubr.msk.bf16.mxu1 %vm681_vm2, %v3380_v26 }
  0x9a   : > { %3177 = vmatmul.mubr.msk.bf16.gmra.mrb[20].mxu0 %vm681_vm2, %v3381_v27  ;;  %3241 = vmatmul.mubr.msk.bf16.gmra.mrb[20].mxu1 %vm681_vm2, %v3382_v28 }
  0x9b   : > { %3180 = vmatprep.mubr.msk.bf16.mxu0 %vm681_vm2, %v3383_v29  ;;  %3244 = vmatprep.mubr.msk.bf16.mxu1 %vm681_vm2, %v3384_v30 }
  0xa2   : > { %3181 = vmatmul.mubr.msk.bf16.gmra.mrb[24].mxu0 %vm681_vm2, %v3385_v31  ;;  %3245 = vmatmul.mubr.msk.bf16.gmra.mrb[24].mxu1 %vm681_vm2, %v3386_v32 }
  0xa3   : > { %3184 = vmatprep.mubr.msk.bf16.mxu0 %vm681_vm2, %v3387_v33  ;;  %3248 = vmatprep.mubr.msk.bf16.mxu1 %vm681_vm2, %v3388_v34 }
  0xaa   : > { %3185 = vmatmul.mubr.msk.bf16.gmra.mrb[28].mxu0 %vm681_vm2, %v3389_v35  ;;  %3249 = vmatmul.mubr.msk.bf16.gmra.mrb[28].mxu1 %vm681_vm2, %v3390_v36 }
  0xab   : > { %3188 = vmatprep.mubr.msk.bf16.mxu0 %vm681_vm2, %v3391_v37  ;;  %3252 = vmatprep.mubr.msk.bf16.mxu1 %vm681_vm2, %v3392_v38 }
  0xb2   : > { %3189 = vmatmul.mubr.msk.bf16.gmra.mrb[32].mxu0 %vm681_vm2, %v3393_v39  ;;  %3253 = vmatmul.mubr.msk.bf16.gmra.mrb[32].mxu1 %vm681_vm2, %v3394_v40 }
  0xb3   : > { %3192 = vmatprep.mubr.msk.bf16.mxu0 %vm681_vm2, %v3395_v41  ;;  %3256 = vmatprep.mubr.msk.bf16.mxu1 %vm681_vm2, %v3396_v42 }
  0xba   : > { %3193 = vmatmul.mubr.msk.bf16.gmra.mrb[36].mxu0 %vm681_vm2, %v3397_v43  ;;  %3257 = vmatmul.mubr.msk.bf16.gmra.mrb[36].mxu1 %vm681_vm2, %v3398_v44 }
  0xbb   : > { %3196 = vmatprep.mubr.msk.bf16.mxu0 %vm681_vm2, %v3399_v45  ;;  %3260 = vmatprep.mubr.msk.bf16.mxu1 %vm681_vm2, %v3400_v46 }
  0xc2   : > { %3197 = vmatmul.mubr.msk.bf16.gmra.mrb[40].mxu0 %vm681_vm2, %v3401_v47  ;;  %3261 = vmatmul.mubr.msk.bf16.gmra.mrb[40].mxu1 %vm681_vm2, %v3402_v48 }
  0xc3   : > { %3200 = vmatprep.mubr.msk.bf16.mxu0 %vm681_vm2, %v3403_v49  ;;  %3264 = vmatprep.mubr.msk.bf16.mxu1 %vm681_vm2, %v3404_v50 }
  0xca   : > { %3201 = vmatmul.mubr.msk.bf16.gmra.mrb[44].mxu0 %vm681_vm2, %v3405_v51  ;;  %3265 = vmatmul.mubr.msk.bf16.gmra.mrb[44].mxu1 %vm681_vm2, %v3406_v52 }
  0xcb   : > { %3204 = vmatprep.mubr.msk.bf16.mxu0 %vm681_vm2, %v3407_v53  ;;  %3268 = vmatprep.mubr.msk.bf16.mxu1 %vm681_vm2, %v3408_v54 }
  0xd2   : > { %3205 = vmatmul.mubr.msk.bf16.gmra.mrb[48].mxu0 %vm681_vm2, %v3409_v55  ;;  %3269 = vmatmul.mubr.msk.bf16.gmra.mrb[48].mxu1 %vm681_vm2, %v3410_v56 }
  0xd3   : > { %3208 = vmatprep.mubr.msk.bf16.mxu0 %vm681_vm2, %v3411_v57  ;;  %3272 = vmatprep.mubr.msk.bf16.mxu1 %vm681_vm2, %v3412_v58 }
  0xda   : > { %3209 = vmatmul.mubr.msk.bf16.gmra.mrb[52].mxu0 %vm681_vm2, %v3413_v59  ;;  %3273 = vmatmul.mubr.msk.bf16.gmra.mrb[52].mxu1 %vm681_vm2, %v3414_v60 }
  0xdb   : > { %3212 = vmatprep.mubr.msk.bf16.mxu0 %vm681_vm2, %v3415_v61  ;;  %3276 = vmatprep.mubr.msk.bf16.mxu1 %vm681_vm2, %v3416_v62 }
  0xe2   : > { %3213 = vmatmul.mubr.msk.bf16.gmra.mrb[56].mxu0 %vm681_vm2, %v3417_v63  ;;  %3277 = vmatmul.mubr.msk.bf16.gmra.mrb[56].mxu1 %vm681_vm2, %v3418_v0 }
  0xe3   : > { %3216 = vmatprep.mubr.msk.bf16.mxu0 %vm681_vm2, %v3419_v1  ;;  %3280 = vmatprep.mubr.msk.bf16.mxu1 %vm681_vm2, %v3420_v2 }
  0xea   : > { %3217 = vmatmul.mubr.msk.bf16.gmra.mrb[60].mxu0 %vm681_vm2, %v3421_v3  ;;  %3281 = vmatmul.mubr.msk.bf16.gmra.mrb[60].mxu1 %vm681_vm2, %v3422_v4 }
 0x145   : > { %v3158_v6 = vpop.f32.mrb[0].mxu0  ;;  %v3222_v7 = vpop.f32.mrb[0].mxu1 }
 0x146   : > { %v924_v8 = vadd.f32 %v3158_v6, %v3933_v5  ;;  %v1180_v9 = vadd.f32 %v3222_v7, %v3933_v5  ;;  %v915_v10 = vpop.f32.mrb[1].mxu0  ;;  %v1171_v11 = vpop.f32.mrb[1].mxu1 }
 0x147   : > { %v916_v12 = vadd.f32 %v3933_v5, %v915_v10  ;;  %v1172_v13 = vadd.f32 %v3933_v5, %v1171_v11  ;;  %v3159_v14 = vpop.f32.mrb[2].mxu0  ;;  %v3223_v15 = vpop.f32.mrb[2].mxu1 }
 0x148   : > { %v927_v16 = vadd.f32 %v3159_v14, %v3933_v5  ;;  %v1183_v17 = vadd.f32 %v3223_v15, %v3933_v5  ;;  %v918_v18 = vpop.f32.mrb[3].mxu0  ;;  %v1174_v19 = vpop.f32.mrb[3].mxu1  ;;  %v1428_v22 = vmax.f32 %v924_v8, 0.0  ;;  %v1492_v23 = vmax.f32 %v1180_v9, 0.0 }
 0x149   : > { %v919_v20 = vadd.f32 %v3933_v5, %v918_v18  ;;  %v1175_v21 = vadd.f32 %v3933_v5, %v1174_v19  ;;  %v1426_v26 = vmax.f32 %v916_v12, 0.0  ;;  %v1490_v27 = vmax.f32 %v1172_v13, 0.0 }
 0x14a   : > { %v1429_v24 = vmax.f32 %v927_v16, 0.0  ;;  %v1493_v25 = vmax.f32 %v1183_v17, 0.0 }
 0x14b   : > { %v1427_v28 = vmax.f32 %v919_v20, 0.0  ;;  %v1491_v29 = vmax.f32 %v1175_v21, 0.0 }
 0x14c   : > { %v2714_v30 = vpack.c.bf16 %v1429_v24, %v1428_v22  ;;  %v2874_v31 = vpack.c.bf16 %v1493_v25, %v1492_v23 }
 0x14d   : > { %v2709_v32 = vpack.c.bf16 %v1427_v28, %v1426_v26  ;;  %v2869_v33 = vpack.c.bf16 %v1491_v29, %v1490_v27  ;;  %v3162_v34 = vpop.f32.mrb[4].mxu0  ;;  %v3226_v35 = vpop.f32.mrb[4].mxu1 }
 0x14e   : > { %3026 = vst [vmem:[%s3945_s18 + $0x8] sm:$0xff] %v2714_v30   ;;  %3058 = vst [vmem:[%s3945_s18 + $0x108] sm:$0xff] %v2874_v31   ;;  %v940_v36 = vadd.f32 %v3162_v34, %v3933_v5  ;;  %v1196_v37 = vadd.f32 %v3226_v35, %v3933_v5  ;;  %v931_v38 = vpop.f32.mrb[5].mxu0  ;;  %v1187_v39 = vpop.f32.mrb[5].mxu1 }
 0x14f   : > { %2710 = vst [vmem:[%s3945_s18] sm:$0xff] %v2709_v32   ;;  %3057 = vst [vmem:[%s3945_s18 + $0x100] sm:$0xff] %v2869_v33   ;;  %v932_v40 = vadd.f32 %v3933_v5, %v931_v38  ;;  %v1188_v41 = vadd.f32 %v3933_v5, %v1187_v39  ;;  %v3163_v42 = vpop.f32.mrb[6].mxu0  ;;  %v3227_v43 = vpop.f32.mrb[6].mxu1 }
 0x150   : > { %v943_v44 = vadd.f32 %v3163_v42, %v3933_v5  ;;  %v1199_v45 = vadd.f32 %v3227_v43, %v3933_v5  ;;  %v934_v46 = vpop.f32.mrb[7].mxu0  ;;  %v1190_v47 = vpop.f32.mrb[7].mxu1  ;;  %v1432_v50 = vmax.f32 %v940_v36, 0.0  ;;  %v1496_v51 = vmax.f32 %v1196_v37, 0.0 }
 0x151   : > { %v935_v48 = vadd.f32 %v3933_v5, %v934_v46  ;;  %v1191_v49 = vadd.f32 %v3933_v5, %v1190_v47  ;;  %v1430_v54 = vmax.f32 %v932_v40, 0.0  ;;  %v1494_v55 = vmax.f32 %v1188_v41, 0.0 }
 0x152   : > { %v1433_v52 = vmax.f32 %v943_v44, 0.0  ;;  %v1497_v53 = vmax.f32 %v1199_v45, 0.0 }
 0x153   : > { %v1431_v56 = vmax.f32 %v935_v48, 0.0  ;;  %v1495_v57 = vmax.f32 %v1191_v49, 0.0 }
 0x154   : > { %v2724_v58 = vpack.c.bf16 %v1433_v52, %v1432_v50  ;;  %v2884_v59 = vpack.c.bf16 %v1497_v53, %v1496_v51 }
 0x155   : > { %v2719_v60 = vpack.c.bf16 %v1431_v56, %v1430_v54  ;;  %v2879_v61 = vpack.c.bf16 %v1495_v57, %v1494_v55  ;;  %v3166_v62 = vpop.f32.mrb[8].mxu0  ;;  %v3230_v63 = vpop.f32.mrb[8].mxu1 }
 0x156   : > { %3028 = vst [vmem:[%s3945_s18 + $0x18] sm:$0xff] %v2724_v58   ;;  %3060 = vst [vmem:[%s3945_s18 + $0x118] sm:$0xff] %v2884_v59   ;;  %v956_v0 = vadd.f32 %v3166_v62, %v3933_v5  ;;  %v1212_v1 = vadd.f32 %v3230_v63, %v3933_v5  ;;  %v947_v2 = vpop.f32.mrb[9].mxu0  ;;  %v1203_v3 = vpop.f32.mrb[9].mxu1 }
 0x157   : > { %3027 = vst [vmem:[%s3945_s18 + $0x10] sm:$0xff] %v2719_v60   ;;  %3059 = vst [vmem:[%s3945_s18 + $0x110] sm:$0xff] %v2879_v61   ;;  %v948_v4 = vadd.f32 %v3933_v5, %v947_v2  ;;  %v1204_v6 = vadd.f32 %v3933_v5, %v1203_v3  ;;  %v3167_v7 = vpop.f32.mrb[10].mxu0  ;;  %v3231_v8 = vpop.f32.mrb[10].mxu1 }
 0x158   : > { %v959_v9 = vadd.f32 %v3167_v7, %v3933_v5  ;;  %v1215_v10 = vadd.f32 %v3231_v8, %v3933_v5  ;;  %v950_v11 = vpop.f32.mrb[11].mxu0  ;;  %v1206_v12 = vpop.f32.mrb[11].mxu1  ;;  %v1436_v15 = vmax.f32 %v956_v0, 0.0  ;;  %v1500_v16 = vmax.f32 %v1212_v1, 0.0 }
 0x159   : > { %v951_v13 = vadd.f32 %v3933_v5, %v950_v11  ;;  %v1207_v14 = vadd.f32 %v3933_v5, %v1206_v12  ;;  %v1434_v19 = vmax.f32 %v948_v4, 0.0  ;;  %v1498_v20 = vmax.f32 %v1204_v6, 0.0 }
 0x15a   : > { %v1437_v17 = vmax.f32 %v959_v9, 0.0  ;;  %v1501_v18 = vmax.f32 %v1215_v10, 0.0 }
 0x15b   : > { %v1435_v21 = vmax.f32 %v951_v13, 0.0  ;;  %v1499_v22 = vmax.f32 %v1207_v14, 0.0 }
 0x15c   : > { %v2734_v23 = vpack.c.bf16 %v1437_v17, %v1436_v15  ;;  %v2894_v24 = vpack.c.bf16 %v1501_v18, %v1500_v16 }
 0x15d   : > { %v2729_v25 = vpack.c.bf16 %v1435_v21, %v1434_v19  ;;  %v2889_v26 = vpack.c.bf16 %v1499_v22, %v1498_v20  ;;  %v3170_v27 = vpop.f32.mrb[12].mxu0  ;;  %v3234_v28 = vpop.f32.mrb[12].mxu1 }
 0x15e   : > { %3030 = vst [vmem:[%s3945_s18 + $0x28] sm:$0xff] %v2734_v23   ;;  %3062 = vst [vmem:[%s3945_s18 + $0x128] sm:$0xff] %v2894_v24   ;;  %v972_v29 = vadd.f32 %v3170_v27, %v3933_v5  ;;  %v1228_v30 = vadd.f32 %v3234_v28, %v3933_v5  ;;  %v963_v31 = vpop.f32.mrb[13].mxu0  ;;  %v1219_v32 = vpop.f32.mrb[13].mxu1 }
 0x15f   : > { %3029 = vst [vmem:[%s3945_s18 + $0x20] sm:$0xff] %v2729_v25   ;;  %3061 = vst [vmem:[%s3945_s18 + $0x120] sm:$0xff] %v2889_v26   ;;  %v964_v33 = vadd.f32 %v3933_v5, %v963_v31  ;;  %v1220_v34 = vadd.f32 %v3933_v5, %v1219_v32  ;;  %v3171_v35 = vpop.f32.mrb[14].mxu0  ;;  %v3235_v36 = vpop.f32.mrb[14].mxu1 }
 0x160   : > { %v975_v37 = vadd.f32 %v3171_v35, %v3933_v5  ;;  %v1231_v38 = vadd.f32 %v3235_v36, %v3933_v5  ;;  %v966_v39 = vpop.f32.mrb[15].mxu0  ;;  %v1222_v40 = vpop.f32.mrb[15].mxu1  ;;  %v1440_v43 = vmax.f32 %v972_v29, 0.0  ;;  %v1504_v44 = vmax.f32 %v1228_v30, 0.0 }
 0x161   : > { %v967_v41 = vadd.f32 %v3933_v5, %v966_v39  ;;  %v1223_v42 = vadd.f32 %v3933_v5, %v1222_v40  ;;  %v1438_v47 = vmax.f32 %v964_v33, 0.0  ;;  %v1502_v48 = vmax.f32 %v1220_v34, 0.0 }
 0x162   : > { %v1441_v45 = vmax.f32 %v975_v37, 0.0  ;;  %v1505_v46 = vmax.f32 %v1231_v38, 0.0 }
 0x163   : > { %v1439_v49 = vmax.f32 %v967_v41, 0.0  ;;  %v1503_v50 = vmax.f32 %v1223_v42, 0.0 }
 0x164   : > { %v2744_v51 = vpack.c.bf16 %v1441_v45, %v1440_v43  ;;  %v2904_v52 = vpack.c.bf16 %v1505_v46, %v1504_v44 }
 0x165   : > { %v2739_v53 = vpack.c.bf16 %v1439_v49, %v1438_v47  ;;  %v2899_v54 = vpack.c.bf16 %v1503_v50, %v1502_v48  ;;  %v3174_v55 = vpop.f32.mrb[16].mxu0  ;;  %v3238_v56 = vpop.f32.mrb[16].mxu1 }
 0x166   : > { %3032 = vst [vmem:[%s3945_s18 + $0x38] sm:$0xff] %v2744_v51   ;;  %3064 = vst [vmem:[%s3945_s18 + $0x138] sm:$0xff] %v2904_v52   ;;  %v988_v57 = vadd.f32 %v3174_v55, %v3933_v5  ;;  %v1244_v58 = vadd.f32 %v3238_v56, %v3933_v5  ;;  %v979_v59 = vpop.f32.mrb[17].mxu0  ;;  %v1235_v60 = vpop.f32.mrb[17].mxu1 }
 0x167   : > { %3031 = vst [vmem:[%s3945_s18 + $0x30] sm:$0xff] %v2739_v53   ;;  %3063 = vst [vmem:[%s3945_s18 + $0x130] sm:$0xff] %v2899_v54   ;;  %v980_v61 = vadd.f32 %v3933_v5, %v979_v59  ;;  %v1236_v62 = vadd.f32 %v3933_v5, %v1235_v60  ;;  %v3175_v63 = vpop.f32.mrb[18].mxu0  ;;  %v3239_v0 = vpop.f32.mrb[18].mxu1 }
 0x168   : > { %v991_v1 = vadd.f32 %v3175_v63, %v3933_v5  ;;  %v1247_v2 = vadd.f32 %v3239_v0, %v3933_v5  ;;  %v982_v3 = vpop.f32.mrb[19].mxu0  ;;  %v1238_v4 = vpop.f32.mrb[19].mxu1  ;;  %v1444_v8 = vmax.f32 %v988_v57, 0.0  ;;  %v1508_v9 = vmax.f32 %v1244_v58, 0.0 }
 0x169   : > { %v983_v6 = vadd.f32 %v3933_v5, %v982_v3  ;;  %v1239_v7 = vadd.f32 %v3933_v5, %v1238_v4  ;;  %v1442_v12 = vmax.f32 %v980_v61, 0.0  ;;  %v1506_v13 = vmax.f32 %v1236_v62, 0.0 }
 0x16a   : > { %v1445_v10 = vmax.f32 %v991_v1, 0.0  ;;  %v1509_v11 = vmax.f32 %v1247_v2, 0.0 }
 0x16b   : > { %v1443_v14 = vmax.f32 %v983_v6, 0.0  ;;  %v1507_v15 = vmax.f32 %v1239_v7, 0.0 }
 0x16c   : > { %v2754_v16 = vpack.c.bf16 %v1445_v10, %v1444_v8  ;;  %v2914_v17 = vpack.c.bf16 %v1509_v11, %v1508_v9 }
 0x16d   : > { %v2749_v18 = vpack.c.bf16 %v1443_v14, %v1442_v12  ;;  %v2909_v19 = vpack.c.bf16 %v1507_v15, %v1506_v13  ;;  %v3178_v20 = vpop.f32.mrb[20].mxu0  ;;  %v3242_v21 = vpop.f32.mrb[20].mxu1 }
 0x16e   : > { %3034 = vst [vmem:[%s3945_s18 + $0x48] sm:$0xff] %v2754_v16   ;;  %3066 = vst [vmem:[%s3945_s18 + $0x148] sm:$0xff] %v2914_v17   ;;  %v1004_v22 = vadd.f32 %v3178_v20, %v3933_v5  ;;  %v1260_v23 = vadd.f32 %v3242_v21, %v3933_v5  ;;  %v995_v24 = vpop.f32.mrb[21].mxu0  ;;  %v1251_v25 = vpop.f32.mrb[21].mxu1 }
 0x16f   : > { %3033 = vst [vmem:[%s3945_s18 + $0x40] sm:$0xff] %v2749_v18   ;;  %3065 = vst [vmem:[%s3945_s18 + $0x140] sm:$0xff] %v2909_v19   ;;  %v996_v26 = vadd.f32 %v3933_v5, %v995_v24  ;;  %v1252_v27 = vadd.f32 %v3933_v5, %v1251_v25  ;;  %v3179_v28 = vpop.f32.mrb[22].mxu0  ;;  %v3243_v29 = vpop.f32.mrb[22].mxu1 }
 0x170   : > { %v1007_v30 = vadd.f32 %v3179_v28, %v3933_v5  ;;  %v1263_v31 = vadd.f32 %v3243_v29, %v3933_v5  ;;  %v998_v32 = vpop.f32.mrb[23].mxu0  ;;  %v1254_v33 = vpop.f32.mrb[23].mxu1  ;;  %v1448_v36 = vmax.f32 %v1004_v22, 0.0  ;;  %v1512_v37 = vmax.f32 %v1260_v23, 0.0 }
 0x171   : > { %v999_v34 = vadd.f32 %v3933_v5, %v998_v32  ;;  %v1255_v35 = vadd.f32 %v3933_v5, %v1254_v33  ;;  %v1446_v40 = vmax.f32 %v996_v26, 0.0  ;;  %v1510_v41 = vmax.f32 %v1252_v27, 0.0 }
 0x172   : > { %v1449_v38 = vmax.f32 %v1007_v30, 0.0  ;;  %v1513_v39 = vmax.f32 %v1263_v31, 0.0 }
 0x173   : > { %v1447_v42 = vmax.f32 %v999_v34, 0.0  ;;  %v1511_v43 = vmax.f32 %v1255_v35, 0.0 }
 0x174   : > { %v2764_v44 = vpack.c.bf16 %v1449_v38, %v1448_v36  ;;  %v2924_v45 = vpack.c.bf16 %v1513_v39, %v1512_v37 }
 0x175   : > { %v2759_v46 = vpack.c.bf16 %v1447_v42, %v1446_v40  ;;  %v2919_v47 = vpack.c.bf16 %v1511_v43, %v1510_v41  ;;  %v3182_v48 = vpop.f32.mrb[24].mxu0  ;;  %v3246_v49 = vpop.f32.mrb[24].mxu1 }
 0x176   : > { %3036 = vst [vmem:[%s3945_s18 + $0x58] sm:$0xff] %v2764_v44   ;;  %3068 = vst [vmem:[%s3945_s18 + $0x158] sm:$0xff] %v2924_v45   ;;  %v1020_v50 = vadd.f32 %v3182_v48, %v3933_v5  ;;  %v1276_v51 = vadd.f32 %v3246_v49, %v3933_v5  ;;  %v1011_v52 = vpop.f32.mrb[25].mxu0  ;;  %v1267_v53 = vpop.f32.mrb[25].mxu1 }
 0x177   : > { %3035 = vst [vmem:[%s3945_s18 + $0x50] sm:$0xff] %v2759_v46   ;;  %3067 = vst [vmem:[%s3945_s18 + $0x150] sm:$0xff] %v2919_v47   ;;  %v1012_v54 = vadd.f32 %v3933_v5, %v1011_v52  ;;  %v1268_v55 = vadd.f32 %v3933_v5, %v1267_v53  ;;  %v3183_v56 = vpop.f32.mrb[26].mxu0  ;;  %v3247_v57 = vpop.f32.mrb[26].mxu1 }
 0x178   : > { %v1023_v58 = vadd.f32 %v3183_v56, %v3933_v5  ;;  %v1279_v59 = vadd.f32 %v3247_v57, %v3933_v5  ;;  %v1014_v60 = vpop.f32.mrb[27].mxu0  ;;  %v1270_v61 = vpop.f32.mrb[27].mxu1  ;;  %v1452_v0 = vmax.f32 %v1020_v50, 0.0  ;;  %v1516_v1 = vmax.f32 %v1276_v51, 0.0 }
 0x179   : > { %v1015_v62 = vadd.f32 %v3933_v5, %v1014_v60  ;;  %v1271_v63 = vadd.f32 %v3933_v5, %v1270_v61  ;;  %v1450_v4 = vmax.f32 %v1012_v54, 0.0  ;;  %v1514_v6 = vmax.f32 %v1268_v55, 0.0 }
 0x17a   : > { %v1453_v2 = vmax.f32 %v1023_v58, 0.0  ;;  %v1517_v3 = vmax.f32 %v1279_v59, 0.0 }
 0x17b   : > { %v1451_v7 = vmax.f32 %v1015_v62, 0.0  ;;  %v1515_v8 = vmax.f32 %v1271_v63, 0.0 }
 0x17c   : > { %v2774_v9 = vpack.c.bf16 %v1453_v2, %v1452_v0  ;;  %v2934_v10 = vpack.c.bf16 %v1517_v3, %v1516_v1 }
 0x17d   : > { %v2769_v11 = vpack.c.bf16 %v1451_v7, %v1450_v4  ;;  %v2929_v12 = vpack.c.bf16 %v1515_v8, %v1514_v6  ;;  %v3186_v13 = vpop.f32.mrb[28].mxu0  ;;  %v3250_v14 = vpop.f32.mrb[28].mxu1 }
 0x17e   : > { %3038 = vst [vmem:[%s3945_s18 + $0x68] sm:$0xff] %v2774_v9   ;;  %3070 = vst [vmem:[%s3945_s18 + $0x168] sm:$0xff] %v2934_v10   ;;  %v1036_v15 = vadd.f32 %v3186_v13, %v3933_v5  ;;  %v1292_v16 = vadd.f32 %v3250_v14, %v3933_v5  ;;  %v1027_v17 = vpop.f32.mrb[29].mxu0  ;;  %v1283_v18 = vpop.f32.mrb[29].mxu1 }
 0x17f   : > { %3037 = vst [vmem:[%s3945_s18 + $0x60] sm:$0xff] %v2769_v11   ;;  %3069 = vst [vmem:[%s3945_s18 + $0x160] sm:$0xff] %v2929_v12   ;;  %v1028_v19 = vadd.f32 %v3933_v5, %v1027_v17  ;;  %v1284_v20 = vadd.f32 %v3933_v5, %v1283_v18  ;;  %v3187_v21 = vpop.f32.mrb[30].mxu0  ;;  %v3251_v22 = vpop.f32.mrb[30].mxu1 }
 0x180   : > { %v1039_v23 = vadd.f32 %v3187_v21, %v3933_v5  ;;  %v1295_v24 = vadd.f32 %v3251_v22, %v3933_v5  ;;  %v1030_v25 = vpop.f32.mrb[31].mxu0  ;;  %v1286_v26 = vpop.f32.mrb[31].mxu1  ;;  %v1456_v29 = vmax.f32 %v1036_v15, 0.0  ;;  %v1520_v30 = vmax.f32 %v1292_v16, 0.0 }
 0x181   : > { %v1031_v27 = vadd.f32 %v3933_v5, %v1030_v25  ;;  %v1287_v28 = vadd.f32 %v3933_v5, %v1286_v26  ;;  %v1454_v33 = vmax.f32 %v1028_v19, 0.0  ;;  %v1518_v34 = vmax.f32 %v1284_v20, 0.0 }
 0x182   : > { %v1457_v31 = vmax.f32 %v1039_v23, 0.0  ;;  %v1521_v32 = vmax.f32 %v1295_v24, 0.0 }
 0x183   : > { %v1455_v35 = vmax.f32 %v1031_v27, 0.0  ;;  %v1519_v36 = vmax.f32 %v1287_v28, 0.0 }
 0x184   : > { %v2784_v37 = vpack.c.bf16 %v1457_v31, %v1456_v29  ;;  %v2944_v38 = vpack.c.bf16 %v1521_v32, %v1520_v30 }
 0x185   : > { %v2779_v39 = vpack.c.bf16 %v1455_v35, %v1454_v33  ;;  %v2939_v40 = vpack.c.bf16 %v1519_v36, %v1518_v34  ;;  %v3190_v41 = vpop.f32.mrb[32].mxu0  ;;  %v3254_v42 = vpop.f32.mrb[32].mxu1 }
 0x186   : > { %3040 = vst [vmem:[%s3945_s18 + $0x78] sm:$0xff] %v2784_v37   ;;  %3072 = vst [vmem:[%s3945_s18 + $0x178] sm:$0xff] %v2944_v38   ;;  %v1052_v43 = vadd.f32 %v3190_v41, %v3933_v5  ;;  %v1308_v44 = vadd.f32 %v3254_v42, %v3933_v5  ;;  %v1043_v45 = vpop.f32.mrb[33].mxu0  ;;  %v1299_v46 = vpop.f32.mrb[33].mxu1 }
 0x187   : > { %3039 = vst [vmem:[%s3945_s18 + $0x70] sm:$0xff] %v2779_v39   ;;  %3071 = vst [vmem:[%s3945_s18 + $0x170] sm:$0xff] %v2939_v40   ;;  %v1044_v47 = vadd.f32 %v3933_v5, %v1043_v45  ;;  %v1300_v48 = vadd.f32 %v3933_v5, %v1299_v46  ;;  %v3191_v49 = vpop.f32.mrb[34].mxu0  ;;  %v3255_v50 = vpop.f32.mrb[34].mxu1 }
 0x188   : > { %v1055_v51 = vadd.f32 %v3191_v49, %v3933_v5  ;;  %v1311_v52 = vadd.f32 %v3255_v50, %v3933_v5  ;;  %v1046_v53 = vpop.f32.mrb[35].mxu0  ;;  %v1302_v54 = vpop.f32.mrb[35].mxu1  ;;  %v1460_v57 = vmax.f32 %v1052_v43, 0.0  ;;  %v1524_v58 = vmax.f32 %v1308_v44, 0.0 }
 0x189   : > { %v1047_v55 = vadd.f32 %v3933_v5, %v1046_v53  ;;  %v1303_v56 = vadd.f32 %v3933_v5, %v1302_v54  ;;  %v1458_v61 = vmax.f32 %v1044_v47, 0.0  ;;  %v1522_v62 = vmax.f32 %v1300_v48, 0.0 }
 0x18a   : > { %v1461_v59 = vmax.f32 %v1055_v51, 0.0  ;;  %v1525_v60 = vmax.f32 %v1311_v52, 0.0 }
 0x18b   : > { %v1459_v63 = vmax.f32 %v1047_v55, 0.0  ;;  %v1523_v0 = vmax.f32 %v1303_v56, 0.0 }
 0x18c   : > { %v2794_v1 = vpack.c.bf16 %v1461_v59, %v1460_v57  ;;  %v2954_v2 = vpack.c.bf16 %v1525_v60, %v1524_v58 }
 0x18d   : > { %v2789_v3 = vpack.c.bf16 %v1459_v63, %v1458_v61  ;;  %v2949_v4 = vpack.c.bf16 %v1523_v0, %v1522_v62  ;;  %v3194_v6 = vpop.f32.mrb[36].mxu0  ;;  %v3258_v7 = vpop.f32.mrb[36].mxu1 }
 0x18e   : > { %3042 = vst [vmem:[%s3945_s18 + $0x88] sm:$0xff] %v2794_v1   ;;  %3074 = vst [vmem:[%s3945_s18 + $0x188] sm:$0xff] %v2954_v2   ;;  %v1068_v8 = vadd.f32 %v3194_v6, %v3933_v5  ;;  %v1324_v9 = vadd.f32 %v3258_v7, %v3933_v5  ;;  %v1059_v10 = vpop.f32.mrb[37].mxu0  ;;  %v1315_v11 = vpop.f32.mrb[37].mxu1 }
 0x18f   : > { %3041 = vst [vmem:[%s3945_s18 + $0x80] sm:$0xff] %v2789_v3   ;;  %3073 = vst [vmem:[%s3945_s18 + $0x180] sm:$0xff] %v2949_v4   ;;  %v1060_v12 = vadd.f32 %v3933_v5, %v1059_v10  ;;  %v1316_v13 = vadd.f32 %v3933_v5, %v1315_v11  ;;  %v3195_v14 = vpop.f32.mrb[38].mxu0  ;;  %v3259_v15 = vpop.f32.mrb[38].mxu1 }
 0x190   : > { %v1071_v16 = vadd.f32 %v3195_v14, %v3933_v5  ;;  %v1327_v17 = vadd.f32 %v3259_v15, %v3933_v5  ;;  %v1062_v18 = vpop.f32.mrb[39].mxu0  ;;  %v1318_v19 = vpop.f32.mrb[39].mxu1  ;;  %v1464_v22 = vmax.f32 %v1068_v8, 0.0  ;;  %v1528_v23 = vmax.f32 %v1324_v9, 0.0 }
 0x191   : > { %v1063_v20 = vadd.f32 %v3933_v5, %v1062_v18  ;;  %v1319_v21 = vadd.f32 %v3933_v5, %v1318_v19  ;;  %v1462_v26 = vmax.f32 %v1060_v12, 0.0  ;;  %v1526_v27 = vmax.f32 %v1316_v13, 0.0 }
 0x192   : > { %v1465_v24 = vmax.f32 %v1071_v16, 0.0  ;;  %v1529_v25 = vmax.f32 %v1327_v17, 0.0 }
 0x193   : > { %v1463_v28 = vmax.f32 %v1063_v20, 0.0  ;;  %v1527_v29 = vmax.f32 %v1319_v21, 0.0 }
 0x194   : > { %v2804_v30 = vpack.c.bf16 %v1465_v24, %v1464_v22  ;;  %v2964_v31 = vpack.c.bf16 %v1529_v25, %v1528_v23 }
 0x195   : > { %v2799_v32 = vpack.c.bf16 %v1463_v28, %v1462_v26  ;;  %v2959_v33 = vpack.c.bf16 %v1527_v29, %v1526_v27  ;;  %v3198_v34 = vpop.f32.mrb[40].mxu0  ;;  %v3262_v35 = vpop.f32.mrb[40].mxu1 }
 0x196   : > { %3044 = vst [vmem:[%s3945_s18 + $0x98] sm:$0xff] %v2804_v30   ;;  %3076 = vst [vmem:[%s3945_s18 + $0x198] sm:$0xff] %v2964_v31   ;;  %v1084_v36 = vadd.f32 %v3198_v34, %v3933_v5  ;;  %v1340_v37 = vadd.f32 %v3262_v35, %v3933_v5  ;;  %v1075_v38 = vpop.f32.mrb[41].mxu0  ;;  %v1331_v39 = vpop.f32.mrb[41].mxu1 }
 0x197   : > { %3043 = vst [vmem:[%s3945_s18 + $0x90] sm:$0xff] %v2799_v32   ;;  %3075 = vst [vmem:[%s3945_s18 + $0x190] sm:$0xff] %v2959_v33   ;;  %v1076_v40 = vadd.f32 %v3933_v5, %v1075_v38  ;;  %v1332_v41 = vadd.f32 %v3933_v5, %v1331_v39  ;;  %v3199_v42 = vpop.f32.mrb[42].mxu0  ;;  %v3263_v43 = vpop.f32.mrb[42].mxu1 }
 0x198   : > { %v1087_v44 = vadd.f32 %v3199_v42, %v3933_v5  ;;  %v1343_v45 = vadd.f32 %v3263_v43, %v3933_v5  ;;  %v1078_v46 = vpop.f32.mrb[43].mxu0  ;;  %v1334_v47 = vpop.f32.mrb[43].mxu1  ;;  %v1468_v50 = vmax.f32 %v1084_v36, 0.0  ;;  %v1532_v51 = vmax.f32 %v1340_v37, 0.0 }
 0x199   : > { %v1079_v48 = vadd.f32 %v3933_v5, %v1078_v46  ;;  %v1335_v49 = vadd.f32 %v3933_v5, %v1334_v47  ;;  %v1466_v54 = vmax.f32 %v1076_v40, 0.0  ;;  %v1530_v55 = vmax.f32 %v1332_v41, 0.0 }
 0x19a   : > { %v1469_v52 = vmax.f32 %v1087_v44, 0.0  ;;  %v1533_v53 = vmax.f32 %v1343_v45, 0.0 }
 0x19b   : > { %v1467_v56 = vmax.f32 %v1079_v48, 0.0  ;;  %v1531_v57 = vmax.f32 %v1335_v49, 0.0 }
 0x19c   : > { %v2814_v58 = vpack.c.bf16 %v1469_v52, %v1468_v50  ;;  %v2974_v59 = vpack.c.bf16 %v1533_v53, %v1532_v51 }
 0x19d   : > { %v2809_v60 = vpack.c.bf16 %v1467_v56, %v1466_v54  ;;  %v2969_v61 = vpack.c.bf16 %v1531_v57, %v1530_v55  ;;  %v3202_v62 = vpop.f32.mrb[44].mxu0  ;;  %v3266_v63 = vpop.f32.mrb[44].mxu1 }
 0x19e   : > { %3046 = vst [vmem:[%s3945_s18 + $0xa8] sm:$0xff] %v2814_v58   ;;  %3078 = vst [vmem:[%s3945_s18 + $0x1a8] sm:$0xff] %v2974_v59   ;;  %v1100_v0 = vadd.f32 %v3202_v62, %v3933_v5  ;;  %v1356_v1 = vadd.f32 %v3266_v63, %v3933_v5  ;;  %v1091_v2 = vpop.f32.mrb[45].mxu0  ;;  %v1347_v3 = vpop.f32.mrb[45].mxu1 }
 0x19f   : > { %3045 = vst [vmem:[%s3945_s18 + $0xa0] sm:$0xff] %v2809_v60   ;;  %3077 = vst [vmem:[%s3945_s18 + $0x1a0] sm:$0xff] %v2969_v61   ;;  %v1092_v4 = vadd.f32 %v3933_v5, %v1091_v2  ;;  %v1348_v6 = vadd.f32 %v3933_v5, %v1347_v3  ;;  %v3203_v7 = vpop.f32.mrb[46].mxu0  ;;  %v3267_v8 = vpop.f32.mrb[46].mxu1 }
 0x1a0   : > { %v1103_v9 = vadd.f32 %v3203_v7, %v3933_v5  ;;  %v1359_v10 = vadd.f32 %v3267_v8, %v3933_v5  ;;  %v1094_v11 = vpop.f32.mrb[47].mxu0  ;;  %v1350_v12 = vpop.f32.mrb[47].mxu1  ;;  %v1472_v15 = vmax.f32 %v1100_v0, 0.0  ;;  %v1536_v16 = vmax.f32 %v1356_v1, 0.0 }
 0x1a1   : > { %v1095_v13 = vadd.f32 %v3933_v5, %v1094_v11  ;;  %v1351_v14 = vadd.f32 %v3933_v5, %v1350_v12  ;;  %v1470_v19 = vmax.f32 %v1092_v4, 0.0  ;;  %v1534_v20 = vmax.f32 %v1348_v6, 0.0 }
 0x1a2   : > { %v1473_v17 = vmax.f32 %v1103_v9, 0.0  ;;  %v1537_v18 = vmax.f32 %v1359_v10, 0.0 }
 0x1a3   : > { %v1471_v21 = vmax.f32 %v1095_v13, 0.0  ;;  %v1535_v22 = vmax.f32 %v1351_v14, 0.0 }
 0x1a4   : > { %v2824_v23 = vpack.c.bf16 %v1473_v17, %v1472_v15  ;;  %v2984_v24 = vpack.c.bf16 %v1537_v18, %v1536_v16 }
 0x1a5   : > { %v2819_v25 = vpack.c.bf16 %v1471_v21, %v1470_v19  ;;  %v2979_v26 = vpack.c.bf16 %v1535_v22, %v1534_v20  ;;  %v3206_v27 = vpop.f32.mrb[48].mxu0  ;;  %v3270_v28 = vpop.f32.mrb[48].mxu1 }
 0x1a6   : > { %3048 = vst [vmem:[%s3945_s18 + $0xb8] sm:$0xff] %v2824_v23   ;;  %3080 = vst [vmem:[%s3945_s18 + $0x1b8] sm:$0xff] %v2984_v24   ;;  %v1116_v29 = vadd.f32 %v3206_v27, %v3933_v5  ;;  %v1372_v30 = vadd.f32 %v3270_v28, %v3933_v5  ;;  %v1107_v31 = vpop.f32.mrb[49].mxu0  ;;  %v1363_v32 = vpop.f32.mrb[49].mxu1 }
 0x1a7   : > { %3047 = vst [vmem:[%s3945_s18 + $0xb0] sm:$0xff] %v2819_v25   ;;  %3079 = vst [vmem:[%s3945_s18 + $0x1b0] sm:$0xff] %v2979_v26   ;;  %v1108_v33 = vadd.f32 %v3933_v5, %v1107_v31  ;;  %v1364_v34 = vadd.f32 %v3933_v5, %v1363_v32  ;;  %v3207_v35 = vpop.f32.mrb[50].mxu0  ;;  %v3271_v36 = vpop.f32.mrb[50].mxu1 }
 0x1a8   : > { %v1119_v37 = vadd.f32 %v3207_v35, %v3933_v5  ;;  %v1375_v38 = vadd.f32 %v3271_v36, %v3933_v5  ;;  %v1110_v39 = vpop.f32.mrb[51].mxu0  ;;  %v1366_v40 = vpop.f32.mrb[51].mxu1  ;;  %v1476_v43 = vmax.f32 %v1116_v29, 0.0  ;;  %v1540_v44 = vmax.f32 %v1372_v30, 0.0 }
 0x1a9   : > { %v1111_v41 = vadd.f32 %v3933_v5, %v1110_v39  ;;  %v1367_v42 = vadd.f32 %v3933_v5, %v1366_v40  ;;  %v1474_v47 = vmax.f32 %v1108_v33, 0.0  ;;  %v1538_v48 = vmax.f32 %v1364_v34, 0.0 }
 0x1aa   : > { %v1477_v45 = vmax.f32 %v1119_v37, 0.0  ;;  %v1541_v46 = vmax.f32 %v1375_v38, 0.0 }
 0x1ab   : > { %v1475_v49 = vmax.f32 %v1111_v41, 0.0  ;;  %v1539_v50 = vmax.f32 %v1367_v42, 0.0 }
 0x1ac   : > { %v2834_v51 = vpack.c.bf16 %v1477_v45, %v1476_v43  ;;  %v2994_v52 = vpack.c.bf16 %v1541_v46, %v1540_v44 }
 0x1ad   : > { %v2829_v53 = vpack.c.bf16 %v1475_v49, %v1474_v47  ;;  %v2989_v54 = vpack.c.bf16 %v1539_v50, %v1538_v48  ;;  %v3210_v55 = vpop.f32.mrb[52].mxu0  ;;  %v3274_v56 = vpop.f32.mrb[52].mxu1 }
 0x1ae   : > { %3050 = vst [vmem:[%s3945_s18 + $0xc8] sm:$0xff] %v2834_v51   ;;  %3082 = vst [vmem:[%s3945_s18 + $0x1c8] sm:$0xff] %v2994_v52   ;;  %v1132_v57 = vadd.f32 %v3210_v55, %v3933_v5  ;;  %v1388_v58 = vadd.f32 %v3274_v56, %v3933_v5  ;;  %v1123_v59 = vpop.f32.mrb[53].mxu0  ;;  %v1379_v60 = vpop.f32.mrb[53].mxu1 }
 0x1af   : > { %3049 = vst [vmem:[%s3945_s18 + $0xc0] sm:$0xff] %v2829_v53   ;;  %3081 = vst [vmem:[%s3945_s18 + $0x1c0] sm:$0xff] %v2989_v54   ;;  %v1124_v61 = vadd.f32 %v3933_v5, %v1123_v59  ;;  %v1380_v62 = vadd.f32 %v3933_v5, %v1379_v60  ;;  %v3211_v63 = vpop.f32.mrb[54].mxu0  ;;  %v3275_v0 = vpop.f32.mrb[54].mxu1 }
 0x1b0   : > { %v1135_v1 = vadd.f32 %v3211_v63, %v3933_v5  ;;  %v1391_v2 = vadd.f32 %v3275_v0, %v3933_v5  ;;  %v1126_v3 = vpop.f32.mrb[55].mxu0  ;;  %v1382_v4 = vpop.f32.mrb[55].mxu1  ;;  %v1480_v8 = vmax.f32 %v1132_v57, 0.0  ;;  %v1544_v9 = vmax.f32 %v1388_v58, 0.0 }
 0x1b1   : > { %v1127_v6 = vadd.f32 %v3933_v5, %v1126_v3  ;;  %v1383_v7 = vadd.f32 %v3933_v5, %v1382_v4  ;;  %v1478_v12 = vmax.f32 %v1124_v61, 0.0  ;;  %v1542_v13 = vmax.f32 %v1380_v62, 0.0 }
 0x1b2   : > { %v1481_v10 = vmax.f32 %v1135_v1, 0.0  ;;  %v1545_v11 = vmax.f32 %v1391_v2, 0.0 }
 0x1b3   : > { %v1479_v14 = vmax.f32 %v1127_v6, 0.0  ;;  %v1543_v15 = vmax.f32 %v1383_v7, 0.0 }
 0x1b4   : > { %v2844_v16 = vpack.c.bf16 %v1481_v10, %v1480_v8  ;;  %v3004_v17 = vpack.c.bf16 %v1545_v11, %v1544_v9 }
 0x1b5   : > { %v2839_v18 = vpack.c.bf16 %v1479_v14, %v1478_v12  ;;  %v2999_v19 = vpack.c.bf16 %v1543_v15, %v1542_v13  ;;  %v3214_v20 = vpop.f32.mrb[56].mxu0  ;;  %v3278_v21 = vpop.f32.mrb[56].mxu1 }
 0x1b6   : > { %3052 = vst [vmem:[%s3945_s18 + $0xd8] sm:$0xff] %v2844_v16   ;;  %3084 = vst [vmem:[%s3945_s18 + $0x1d8] sm:$0xff] %v3004_v17   ;;  %v1148_v22 = vadd.f32 %v3214_v20, %v3933_v5  ;;  %v1404_v23 = vadd.f32 %v3278_v21, %v3933_v5  ;;  %v1139_v24 = vpop.f32.mrb[57].mxu0  ;;  %v1395_v25 = vpop.f32.mrb[57].mxu1 }
 0x1b7   : > { %3051 = vst [vmem:[%s3945_s18 + $0xd0] sm:$0xff] %v2839_v18   ;;  %3083 = vst [vmem:[%s3945_s18 + $0x1d0] sm:$0xff] %v2999_v19   ;;  %v1140_v26 = vadd.f32 %v3933_v5, %v1139_v24  ;;  %v1396_v27 = vadd.f32 %v3933_v5, %v1395_v25  ;;  %v3215_v28 = vpop.f32.mrb[58].mxu0  ;;  %v3279_v29 = vpop.f32.mrb[58].mxu1 }
 0x1b8   : > { %v1151_v30 = vadd.f32 %v3215_v28, %v3933_v5  ;;  %v1407_v31 = vadd.f32 %v3279_v29, %v3933_v5  ;;  %v1142_v32 = vpop.f32.mrb[59].mxu0  ;;  %v1398_v33 = vpop.f32.mrb[59].mxu1  ;;  %v1484_v36 = vmax.f32 %v1148_v22, 0.0  ;;  %v1548_v37 = vmax.f32 %v1404_v23, 0.0 }
 0x1b9   : > { %v1143_v34 = vadd.f32 %v3933_v5, %v1142_v32  ;;  %v1399_v35 = vadd.f32 %v3933_v5, %v1398_v33  ;;  %v1482_v40 = vmax.f32 %v1140_v26, 0.0  ;;  %v1546_v41 = vmax.f32 %v1396_v27, 0.0 }
 0x1ba   : > { %v1485_v38 = vmax.f32 %v1151_v30, 0.0  ;;  %v1549_v39 = vmax.f32 %v1407_v31, 0.0 }
 0x1bb   : > { %v1483_v42 = vmax.f32 %v1143_v34, 0.0  ;;  %v1547_v43 = vmax.f32 %v1399_v35, 0.0 }
 0x1bc   : > { %v2854_v44 = vpack.c.bf16 %v1485_v38, %v1484_v36  ;;  %v3014_v45 = vpack.c.bf16 %v1549_v39, %v1548_v37 }
 0x1bd   : > { %v2849_v46 = vpack.c.bf16 %v1483_v42, %v1482_v40  ;;  %v3009_v47 = vpack.c.bf16 %v1547_v43, %v1546_v41  ;;  %v3218_v48 = vpop.f32.mrb[60].mxu0  ;;  %v3282_v49 = vpop.f32.mrb[60].mxu1 }
 0x1be   : > { %3054 = vst [vmem:[%s3945_s18 + $0xe8] sm:$0xff] %v2854_v44   ;;  %3086 = vst [vmem:[%s3945_s18 + $0x1e8] sm:$0xff] %v3014_v45   ;;  %v1164_v50 = vadd.f32 %v3218_v48, %v3933_v5  ;;  %v1420_v51 = vadd.f32 %v3282_v49, %v3933_v5  ;;  %v1155_v52 = vpop.f32.mrb[61].mxu0  ;;  %v1411_v53 = vpop.f32.mrb[61].mxu1 }
 0x1bf   : > { %3053 = vst [vmem:[%s3945_s18 + $0xe0] sm:$0xff] %v2849_v46   ;;  %3085 = vst [vmem:[%s3945_s18 + $0x1e0] sm:$0xff] %v3009_v47   ;;  %v1156_v54 = vadd.f32 %v3933_v5, %v1155_v52  ;;  %v1412_v55 = vadd.f32 %v3933_v5, %v1411_v53  ;;  %v3219_v56 = vpop.f32.mrb[62].mxu0  ;;  %v3283_v57 = vpop.f32.mrb[62].mxu1 }
 0x1c0   : > { %v1167_v58 = vadd.f32 %v3219_v56, %v3933_v5  ;;  %v1423_v59 = vadd.f32 %v3283_v57, %v3933_v5  ;;  %v1158_v60 = vpop.f32.mrb[63].mxu0  ;;  %v1414_v61 = vpop.f32.mrb[63].mxu1  ;;  %v1488_v0 = vmax.f32 %v1164_v50, 0.0  ;;  %v1552_v1 = vmax.f32 %v1420_v51, 0.0 }
 0x1c1   : > { %v1159_v62 = vadd.f32 %v3933_v5, %v1158_v60  ;;  %v1415_v63 = vadd.f32 %v3933_v5, %v1414_v61  ;;  %v1486_v4 = vmax.f32 %v1156_v54, 0.0  ;;  %v1550_v6 = vmax.f32 %v1412_v55, 0.0 }
 0x1c2   : > { %v1489_v2 = vmax.f32 %v1167_v58, 0.0  ;;  %v1553_v3 = vmax.f32 %v1423_v59, 0.0 }
 0x1c3   : > { %v1487_v7 = vmax.f32 %v1159_v62, 0.0  ;;  %v1551_v8 = vmax.f32 %v1415_v63, 0.0 }
 0x1c4   : > { %v2864_v9 = vpack.c.bf16 %v1489_v2, %v1488_v0  ;;  %v3024_v10 = vpack.c.bf16 %v1553_v3, %v1552_v1 }
 0x1c5   : > { %v2859_v5 = vpack.c.bf16 %v1487_v7, %v1486_v4  ;;  %v3019_v11 = vpack.c.bf16 %v1551_v8, %v1550_v6 }
 0x1c6   : > { %3056 = vst [vmem:[%s3945_s18 + $0xf8] sm:$0xff] %v2864_v9   ;;  %3088 = vst [vmem:[%s3945_s18 + $0x1f8] sm:$0xff] %v3024_v10  }
 0x1c7   : > { %3055 = vst [vmem:[%s3945_s18 + $0xf0] sm:$0xff] %v2859_v5   ;;  %3087 = vst [vmem:[%s3945_s18 + $0x1f0] sm:$0xff] %v3019_v11  }
 0x1c8   : > { %3522 = shalt.err (!%p3519_p1)
}
 0x1c9   : > { %s3523_s11 = scalar_lea.hbm %s4132_s16, 8192  ;;  %s3527_s27 = scalar_lea.hbm %s4185_s3, 16384 }
 0x1ca   : > { %p3524_p13 = scmp.ne.s32.totalorder %s4132_s16, %s3523_s11  ;;  %p3528_p4 = scmp.lt.u32.totalorder %s4132_s16, %s4185_s3 }
 0x1cb   : > { %p3529_p5 = scmp.lt.u32.totalorder %s3527_s27, %s3523_s11  ;;  %p3531_p11 = scmp.lt.u32.totalorder %s3523_s11, %s4132_s16 }
 0x1cc   : > { %p3525_p6 = pnand %p3524_p13, %p4199_p0 }
 0x1cd   : > { %p3530_p8 = por %p3529_p5, %p3528_p4 }
 0x1ce   : > { %p3526_p10 = pneg %p3525_p6 }
 0x1cf   : > { %p3532_p2 = por %p3531_p11, %p3530_p8 }
 0x1d1   : > { %p3533_p3 = pnand %p3532_p2, %p3526_p10 }
 0x1d3   : > { %3536 = shalt.err (!%p3533_p3)
}
 0x1d4   : > { %s3588_s22 = smov 64   ;;  %s3589_s18 = smov 4  }
 0x1d5   : > { %3296 = dma.vmem_to_hbm [thread:$0]  (%p4199_p0), %s4134_s7, 8192, %s4132_s16, %s2195_s28, %s3588_s22, %s3588_s22, %s3589_s18  }
 0x1d6 PF: > { %s2223_s20 = sand.u32 1, %s3567_s12   ;;  %p4200_p7 = scmp.ne.s32.totalorder %s4190_s19, 0 }
 0x1d7   : > { %p4201_p9 = scmp.ge.s32.totalorder %s3579_s15, 2  ;;  %s2224_s8 = scalar_lea.sflag [#allocation4], %s2223_s20 }
 0x1d9   : > { %p3310_p12 = pnand %p4201_p9, %p4200_p7 }
 0x1db   : > { %3562 = dma.done.wait (!%p3310_p12), %s2224_s8, 8192  }
 0x1dc   : > { %3564 = vsyncadd (!%p3310_p12), %s2224_s8, 4294959104  ;;  %p17_p1 = scmp.ge.s32.totalorder %s3724_s5, 4   ;;  %s4202_s12 = smov %s3571_s13 }
 0x1dd   : > { %s4203_s13 = smov %s3575_s14  ;;  %s4204_s14 = smov %s3740_s10 }
 0x1de   : > { %s4205_s15 = smov %s3724_s5  ;;  %19 = sbr.rel (!%p17_p1) target bundleno = 6 (0x6), region = 85 }
 0x1e5   :  { %2229 = vsyncpa [#allocation3], 1 }
 0x1e6   :  { %2231 = vsyncpa [#allocation3 + $0x1], 1 }
 0x1e7   :  { %2232 = vsyncpa [#allocation6], 1 }
 0x1e8   :  { %2233 = vsyncpa [#allocation4], 1 }
 0x1e9   :  { %2235 = vsyncpa [#allocation4 + $0x1], 1 }

// kernel: conv2d_subsampling6_forward.3
= control target key start
LH: loop header
LB: loop body
LE: loop exit
PB: predicated region body
PF: predicated region fallthrough
CT: control target
= control target key end

     0   :  { %s14423_s0 = inlined_call_operand.hbm [shape: bf16[2048,128], index: 0, kind: input, shape index: {}]   ;;  %s14424_s1 = inlined_call_operand.hbm [shape: bf16[25,128,128], index: 1, kind: input, shape index: {}]   ;;  %s14425_s2 = inlined_call_operand.hbm [shape: f32[1,128], index: 2, kind: input, shape index: {}]   ;;  %s14426_s3 = inlined_call_operand.hbm [shape: bf16[384,128], index: 3, kind: input, shape index: {}]   ;;  %s14427_s4 = inlined_call_operand.hbm [shape: f32[1,128], index: 4, kind: input, shape index: {}]   ;;  %s14428_s5 = inlined_call_operand.hbm [shape: f32[8,128], index: 5, kind: input, shape index: {}]   ;;  %s14429_s6 = inlined_call_operand.hbm [shape: f32[2,8,128], index: 6, kind: output, shape index: {}]  }
   0x1   :  { %14441 = sst [smem:[#allocation25_spill]] %s14429_s6 }
   0x2   :  { %11 = vsyncpa [#allocation4], 0 }
   0x3   :  { %13 = vsyncpa [#allocation4 + $0x1], 0 }
   0x4   :  { %14 = vsyncpa [#allocation7], 0 }
   0x5   :  { %15 = vsyncpa [#allocation10], 0 }
   0x6   :  { %16 = vsyncpa [#allocation13], 0 }
   0x7   :  { %17 = vsyncpa [#allocation5], 0 }
   0x8   :  { %19 = vsyncpa [#allocation5 + $0x1], 0  ;;  %s13235_s21 = smov 0   ;;  %s13237_s22 = smov 0  }
   0x9   :  { %s13239_s23 = smov 0   ;;  %s13241_s24 = smov 0  }
   0xa   :  { %s13243_s25 = smov 0   ;;  %s13245_s26 = smov 0  }
   0xb LB: > { %14442 = sst [smem:[#allocation20_spill]] %s13165_s21  ;;  %s9236_s27 = sadd.s32 4294967295, %s13185_s26   ;;  %s13185_s26 = sphi %s13245_s26, %s25_s26   ;;  %s13181_s25 = sphi %s13243_s25, %s14471_s25   ;;  %s13177_s24 = sphi %s13241_s24, %s14470_s24   ;;  %s13173_s23 = sphi %s13239_s23, %s14469_s23   ;;  %s13169_s22 = sphi %s13237_s22, %s14468_s22   ;;  %s13165_s21 = sphi %s13235_s21, %s14467_s21  }
   0xc   : > { %s9237_s28 = sadd.s32 4294967294, %s13185_s26   ;;  %s37_s29 = sadd.s32 1, %s13181_s25 }
   0xd   : > { %s46_s30 = sadd.s32 1, %s13173_s23  ;;  %p39_p0 = scmp.ge.s32.totalorder %s37_s29, 2 }
   0xe   : > { %p53_p1 = scmp.ne.s32.totalorder %s13173_s23, %s13169_s22  ;;  %p54_p2 = scmp.eq.s32.totalorder %s13185_s26, 0 }
   0xf   : > { %p59_p3 = scmp.ne.s32.totalorder %s13169_s22, %s13165_s21  ;;  %s14473_s29 = smov (%p39_p0, %s37_s29), 0 }
  0x10   : > { %14443 = sst [smem:[#allocation21_spill]] %s14473_s29  ;;  %p13276_p4 = por %p54_p2, %p53_p1 }
  0x11   : > { %p13280_p5 = scmp.eq.s32.totalorder %s9236_s27, 0  ;;  %s43_s9 = ssub.s32 %s13181_s25, %s14473_s29 }
  0x12   : > { %s14444_s7 = scalar_select %p13276_p4, 1, 0 }
  0x13   : > { %s14445_s8 = scalar_select %p13280_p5, 1, 0 }
  0x14   : > { %p195_p6 = scmp.eq.s32.totalorder %s9236_s27, 1  ;;  %p44_p7 = scmp.eq.s32.totalorder %s43_s9, 0 }
  0x15   : > { %p13288_p8 = por %p13280_p5, %p59_p3  ;;  %p201_p10 = scmp.eq.s32.totalorder %s9237_s28, 1 }
  0x16   : > { %p13292_p9 = por %p195_p6, %p53_p1  ;;  %p9238_p12 = scmp.ge.s32.totalorder %s13185_s26, 1 }
  0x17   : > { %s14446_s10 = scalar_select %p13288_p8, 1, 0 }
  0x18   : > { %s14447_s11 = scalar_select %p13292_p9, 1, 0 }
  0x19   : > { %s13297_s12 = scalar_select %p44_p7, %s13173_s23, %s46_s30  }
  0x1a   : > { %14448 = sst [smem:[#allocation22_spill]] %s14447_s11  ;;  %p13299_p11 = por %p201_p10, %p59_p3 }
  0x1b   : > { %14449 = sst [smem:[#allocation23_spill]] %s13297_s12  ;;  %p208_p13 = scmp.lt.s32.totalorder %s13185_s26, 3 }
  0x1c   : > { %s14450_s13 = scalar_select %p13299_p11, 1, 0 }
  0x1d   : > { %p13305_p0 = pnand %p9238_p12, %p208_p13  ;;  %s13187_s15 = smov [#allocation6]  }
  0x1e   : > { %14451 = sst [smem:[#allocation24_spill]] %s14450_s13  ;;  %s220_s16 = sshll.u32 %s13187_s15, 4  ;;  %s13309_s16 = int_to_ptr.vmem [resolvable:$true] %s220_s16 }
  0x1f   : > { %s14452_s14 = scalar_select %p13305_p0, 1, 0 }
  0x20   : > { %p12174_p1 = pneg %p13305_p0  ;;  %s13188_s17 = smov [#allocation9]  }
  0x21   : > { %s244_s18 = sshll.u32 %s13188_s17, 4  ;;  %s13189_s20 = smov [#allocation8]   ;;  %s13319_s18 = int_to_ptr.vmem [resolvable:$true] %s244_s18 }
  0x22   : > { %p13315_p2 = pnand %p12174_p1, %p13280_p5  ;;  %s234_s27 = sshll.u32 %s13189_s20, 4  ;;  %s13321_s27 = int_to_ptr.vmem [resolvable:$true] %s234_s27 }
  0x23   : > { %s12921_s9 = scalar_lea.hbm %s14424_s1, 25600 }
  0x24   : > { %p12922_p3 = scmp.ne.s32.totalorder %s14424_s1, %s12921_s9  ;;  %p13331_p6 = pneg %p13315_p2 }
  0x25   : > { %p12928_p12 = scmp.lt.u32.totalorder %s12921_s9, %s14424_s1 }
  0x26   : > { %p12924_p7 = pnand %p13331_p6, %p12922_p3 }
  0x28   : > { %p12925_p10 = pneg %p12924_p7 }
  0x2a   : > { %p12930_p13 = pnand %p12928_p12, %p12925_p10 }
  0x2c   : > { %12933 = shalt.err (!%p12930_p13)
}
  0x2d   : > { %s12934_s29 = scalar_lea.vmem %s13309_s16, 25600  ;;  %p12942_p5 = scmp.lt.s32.totalorder %s13309_s16, %s13309_s16 }
  0x2e   : > { %p12935_p1 = scmp.ne.s32.totalorder %s13309_s16, %s12934_s29  ;;  %p12943_p8 = scmp.lt.s32.totalorder %s12934_s29, %s12934_s29 }
  0x30   : > { %p12937_p11 = pnand %p12935_p1, %p13331_p6  ;;  %p12944_p3 = por %p12943_p8, %p12942_p5 }
  0x32   : > { %p12938_p9 = pneg %p12937_p11 }
  0x34   : > { %p12945_p7 = pnand %p12944_p3, %p12938_p9 }
  0x36   : > { %12948 = shalt.err (!%p12945_p7)
}
  0x37   : > { %s13190_s28 = smov 64   ;;  %s13191_s12 = smov 4  }
  0x38   : > { %12177 = dma.hbm_to_vmem [thread:$0]  (!%p13315_p2), %s14424_s1, 25600, %s13309_s16, [#allocation7], %s13190_s28, %s13190_s28, %s13191_s12  }
  0x39   : > { %s12949_s13 = scalar_lea.hbm %s14426_s3, 3072 }
  0x3a   : > { %p12950_p5 = scmp.ne.s32.totalorder %s14426_s3, %s12949_s13  ;;  %p12956_p11 = scmp.lt.u32.totalorder %s12949_s13, %s14426_s3 }
  0x3c   : > { %p12952_p8 = pnand %p12950_p5, %p13331_p6 }
  0x3e   : > { %p12953_p9 = pneg %p12952_p8 }
  0x40   : > { %p12958_p10 = pnand %p12956_p11, %p12953_p9 }
  0x42   : > { %12961 = shalt.err (!%p12958_p10)
}
  0x43   : > { %s12962_s16 = scalar_lea.vmem %s13319_s18, 3072  ;;  %p12970_p3 = scmp.lt.s32.totalorder %s13319_s18, %s13319_s18 }
  0x44   : > { %p12963_p12 = scmp.ne.s32.totalorder %s13319_s18, %s12962_s16  ;;  %p12971_p7 = scmp.lt.s32.totalorder %s12962_s16, %s12962_s16 }
  0x46   : > { %p12965_p13 = pnand %p12963_p12, %p13331_p6  ;;  %p12972_p5 = por %p12971_p7, %p12970_p3 }
  0x48   : > { %p12966_p1 = pneg %p12965_p13 }
  0x4a   : > { %p12973_p8 = pnand %p12972_p5, %p12966_p1 }
  0x4c   : > { %12976 = shalt.err (!%p12973_p8)
}
  0x4d   : > { %12183 = dma.hbm_to_vmem [thread:$0]  (!%p13315_p2), %s14426_s3, 3072, %s13319_s18, [#allocation10], %s13190_s28, %s13190_s28, %s13191_s12  }
  0x4e   : > { %s12977_s30 = scalar_lea.hbm %s14425_s2, 16 }
  0x4f   : > { %p12978_p9 = scmp.ne.s32.totalorder %s14425_s2, %s12977_s30  ;;  %p12984_p12 = scmp.lt.u32.totalorder %s12977_s30, %s14425_s2 }
  0x51   : > { %p12980_p11 = pnand %p12978_p9, %p13331_p6 }
  0x53   : > { %p12981_p10 = pneg %p12980_p11 }
  0x55   : > { %p12986_p13 = pnand %p12984_p12, %p12981_p10 }
  0x57   : > { %12989 = shalt.err (!%p12986_p13)
}
  0x58   : > { %s12990_s18 = scalar_lea.vmem %s13321_s27, 16  ;;  %s12997_s28 = scalar_lea.vmem %s13321_s27, 32 }
  0x59   : > { %p12991_p1 = scmp.ne.s32.totalorder %s13321_s27, %s12990_s18  ;;  %p12998_p5 = scmp.lt.s32.totalorder %s13321_s27, %s13321_s27 }
  0x5a   : > { %p12999_p8 = scmp.lt.s32.totalorder %s12997_s28, %s12990_s18 }
  0x5b   : > { %p12993_p3 = pnand %p12991_p1, %p13331_p6 }
  0x5c   : > { %p13000_p9 = por %p12999_p8, %p12998_p5 }
  0x5d   : > { %p12994_p7 = pneg %p12993_p3 }
  0x5f   : > { %p13001_p11 = pnand %p13000_p9, %p12994_p7 }
  0x61   : > { %13004 = shalt.err (!%p13001_p11)
}
  0x62   : > { %12180 = dma.hbm_to_vmem [thread:$0]  (!%p13315_p2), %s14425_s2, 16, %s13321_s27, [#allocation7]  }
  0x63   : > { %s13192_s6 = smov [#allocation11]   ;;  %s13193_s11 = smov [#allocation12]  }
  0x64   : > { %s258_s21 = sshll.u32 %s13192_s6, 4  ;;  %s271_s13 = sshll.u32 %s13193_s11, 4  ;;  %s259_s21 = int_to_ptr.vmem [resolvable:$true] %s258_s21  ;;  %s272_s13 = int_to_ptr.vmem [resolvable:$true] %s271_s13 }
  0x65   : > { %s13005_s15 = scalar_lea.hbm %s14427_s4, 16 }
  0x66   : > { %p13006_p10 = scmp.ne.s32.totalorder %s14427_s4, %s13005_s15  ;;  %p13012_p1 = scmp.lt.u32.totalorder %s13005_s15, %s14427_s4 }
  0x68   : > { %p13008_p12 = pnand %p13006_p10, %p13331_p6 }
  0x6a   : > { %p13009_p13 = pneg %p13008_p12 }
  0x6c   : > { %p13014_p3 = pnand %p13012_p1, %p13009_p13 }
  0x6e   : > { %13017 = shalt.err (!%p13014_p3)
}
  0x6f   : > { %s13018_s27 = scalar_lea.vmem %s259_s21, 16  ;;  %s13025_s12 = scalar_lea.vmem %s259_s21, 32 }
  0x70   : > { %p13019_p7 = scmp.ne.s32.totalorder %s259_s21, %s13018_s27  ;;  %p13026_p9 = scmp.lt.s32.totalorder %s259_s21, %s259_s21 }
  0x71   : > { %p13027_p11 = scmp.lt.s32.totalorder %s13025_s12, %s13018_s27 }
  0x72   : > { %p13021_p5 = pnand %p13019_p7, %p13331_p6 }
  0x73   : > { %p13028_p0 = por %p13027_p11, %p13026_p9 }
  0x74   : > { %p13022_p8 = pneg %p13021_p5 }
  0x76   : > { %p13029_p4 = pnand %p13028_p0, %p13022_p8 }
  0x78   : > { %13032 = shalt.err (!%p13029_p4)
}
  0x79   : > { %12186 = dma.hbm_to_vmem [thread:$0]  (!%p13315_p2), %s14427_s4, 16, %s259_s21, [#allocation10]  }
  0x7a   : > { %s13033_s9 = scalar_lea.hbm %s14428_s5, 128 }
  0x7b   : > { %p13034_p10 = scmp.ne.s32.totalorder %s14428_s5, %s13033_s9  ;;  %p13040_p4 = scmp.lt.u32.totalorder %s13033_s9, %s14428_s5 }
  0x7d   : > { %p13036_p12 = pnand %p13034_p10, %p13331_p6 }
  0x7f   : > { %p13037_p0 = pneg %p13036_p12 }
  0x81   : > { %p13042_p13 = pnand %p13040_p4, %p13037_p0 }
  0x83   : > { %13045 = shalt.err (!%p13042_p13)
}
  0x84   : > { %s13046_s28 = scalar_lea.vmem %s272_s13, 128  ;;  %p13054_p5 = scmp.lt.s32.totalorder %s272_s13, %s272_s13 }
  0x85   : > { %p13047_p1 = scmp.ne.s32.totalorder %s272_s13, %s13046_s28  ;;  %p13055_p8 = scmp.lt.s32.totalorder %s13046_s28, %s13046_s28 }
  0x87   : > { %p13049_p3 = pnand %p13047_p1, %p13331_p6  ;;  %p13056_p9 = por %p13055_p8, %p13054_p5 }
  0x89   : > { %p13050_p7 = pneg %p13049_p3 }
  0x8b   : > { %p13057_p11 = pnand %p13056_p9, %p13050_p7 }
  0x8d   : > { %13060 = shalt.err (!%p13057_p11)
}
  0x8e   : > { %12189 = dma.hbm_to_vmem [thread:$0]  (!%p13315_p2), %s14428_s5, 128, %s272_s13, [#allocation13]  }
  0x8f   : > { %p9244_p10 = scmp.ge.s32.totalorder %s13185_s26, 2 }
  0x90   : > { %p14455_p12 = scmp.ne.s32.totalorder (!%p9244_p10), %s14444_s7, 0 }
  0x91   : > { %278 = sbr.rel (%p9244_p10) target bundleno = 179 (0xb3), region = 36 }
  0x98   : > { %281 = sbr.rel (!%p14455_p12) target bundleno = 179 (0xb3), region = 40  ;;  %s282_s17 = sand.u32 (%p14455_p12), 1, %s13173_s23  }
  0x99   : > { %s12149_s12 = smul.u32 (%p14455_p12), 264, %s282_s17  ;;  %s13441_s16 = scalar_lea.sflag (%p14455_p12), [#allocation4], %s282_s17 }
  0x9a   : > { %s9922_s19 = smul.u32 (%p14455_p12), 4224, %s13181_s25  ;;  %s13065_s29 = scalar_lea.hbm (%p14455_p12), %s14423_s0, 16384 }
  0x9b   : > { %s286_s6 = scalar_lea.vmem (%p14455_p12), [#allocation3], %s12149_s12 }
  0x9c   : > { %s300_s11 = sshll.u32 (%p14455_p12), %s286_s6, 4  ;;  %s13447_s13 = scalar_lea.hbm (%p14455_p12), %s14423_s0, %s9922_s19  ;;  %s301_s11 = int_to_ptr.vmem [resolvable:$true] %s300_s11 }
  0x9d   : > { %s13061_s7 = scalar_lea.hbm (%p14455_p12), %s13447_s13, 4224  ;;  %p13066_p6 = scmp.lt.u32.totalorder (%p14455_p12), %s13447_s13, %s14423_s0 }
  0x9e   : > { %p13062_p2 = scmp.ne.s32.totalorder (%p14455_p12), %s13447_s13, %s13061_s7  ;;  %p13067_p0 = scmp.lt.u32.totalorder (%p14455_p12), %s13065_s29, %s13061_s7 }
  0x9f   : > { %p13069_p13 = scmp.lt.u32.totalorder %s13061_s7, %s13447_s13 }
  0xa0   : > { %p13068_p4 = por %p13067_p0, %p13066_p6 }
  0xa2   : > { %p13070_p1 = por %p13069_p13, %p13068_p4 }
  0xa4   : > { %p13071_p3 = pnand %p13070_p1, %p13062_p2 }
  0xa6   : > { %13074 = shalt.err (!%p13071_p3)
}
  0xa7   : > { %s13075_s21 = scalar_lea.vmem %s301_s11, 4224  ;;  %s13194_s27 = smov [#allocation3]  }
  0xa8   : > { %p13076_p7 = scmp.ne.s32.totalorder %s301_s11, %s13075_s21  ;;  %s13079_s17 = sshll.u32 %s13194_s27, 4  ;;  %s13080_s17 = int_to_ptr.vmem [resolvable:$false] %s13079_s17 }
  0xa9   : > { %s13081_s12 = scalar_lea.vmem %s13080_s17, 8448  ;;  %p13082_p5 = scmp.lt.s32.totalorder %s301_s11, %s13080_s17 }
  0xaa   : > { %p13083_p8 = scmp.lt.s32.totalorder %s13081_s12, %s13075_s21 }
  0xac   : > { %p13084_p9 = por %p13083_p8, %p13082_p5 }
  0xae   : > { %p13085_p11 = pnand %p13084_p9, %p13076_p7 }
  0xb0   : > { %13088 = shalt.err (!%p13085_p11)
}
  0xb1   : > { %s13195_s6 = smov 64   ;;  %s13196_s19 = smov 4  }
  0xb2   : > { %306 = dma.hbm_to_vmem [thread:$0]  %s13447_s13, 4224, %s301_s11, %s13441_s16, %s13195_s6, %s13195_s6, %s13196_s19  }
  0xb3 PF: > { %p14456_p12 = scmp.ne.s32.totalorder %s14452_s14, 0 }
  0xb4   : > { %s13464_s30 = sand.u32 (!%p14456_p12), 1, %s13169_s22   ;;  %p14457_p2 = scmp.ne.s32.totalorder (!%p14456_p12), %s14446_s10, 0 }
  0xb5   : > { %312 = sbr.rel (%p14456_p12) target bundleno = 1874 (0x752), region = 44  ;;  %s315_s7 = scalar_lea.sflag (!%p14456_p12), [#allocation4], %s13464_s30 }
  0xb6   : > { %s12150_s9 = smul.u32 (!%p14456_p12), 264, %s13464_s30 }
  0xb8   : > { %s13468_s15 = scalar_lea.vmem (!%p14456_p12), [#allocation3], %s12150_s9 }
  0xbc   : > { %13142 = dma.done.wait (%p14457_p2), %s315_s7, 4224  }
  0xbd   : > { %13144 = vsyncadd (%p14457_p2), %s315_s7, 4294963072  ;;  %p14458_p6 = scmp.ne.s32.totalorder %s14445_s8, 0 }
  0xbf   : > { %13146 = dma.done.wait (%p14458_p6), [#allocation7], 25616  }
  0xc0   : > { %13148 = vsyncadd (%p14458_p6), [#allocation7], 4294941680 }
  0xc1   : > { %13150 = dma.done.wait (%p14458_p6), [#allocation10], 3088  }
  0xc2   : > { %13152 = vsyncadd (%p14458_p6), [#allocation10], 4294964208 }
  0xc3   : > { %13154 = dma.done.wait (%p14458_p6), [#allocation13], 128  }
  0xc4   : > { %13156 = vsyncadd (%p14458_p6), [#allocation13], 4294967168  ;;  %v13197_v0 = vmov 0.0   ;;  %vm13198_vm0 = vmmov 0   ;;  %v12264_v1 = vld [vmem:[#allocation6 + $0x40] sm:$0xff]   ;;  %v12266_v3 = vld [vmem:[#allocation6 + $0x48] sm:$0xff]  }
  0xc5   : > { %10629 = vmatprep.subr.bf16.mxu0 %v13197_v0  ;;  %10649 = vmatprep.subr.bf16.mxu1 %v13197_v0  ;;  %v12265_v2 = vld [vmem:[#allocation6] sm:$0xff]   ;;  %v12267_v4 = vld [vmem:[#allocation6 + $0x8] sm:$0xff]   ;;  %v12268_v5 = vld [vmem:[#allocation6 + $0x50] sm:$0xff]   ;;  %s9256_s8 = sshll.u32 %s13464_s30, 3  ;;  %s14459_s10 = sld [smem:[#allocation22_spill]] }
  0xc6   : > { %10645 = vmatprep.mubr.msk.bf16.mxu0 %vm13198_vm0, %v13197_v0  ;;  %10665 = vmatprep.mubr.msk.bf16.mxu1 %vm13198_vm0, %v13197_v0  ;;  %v12269_v6 = vld [vmem:[#allocation6 + $0x10] sm:$0xff]   ;;  %v12270_v7 = vld [vmem:[#allocation6 + $0x58] sm:$0xff]   ;;  %v12272_v9 = vld [vmem:[#allocation6 + $0x60] sm:$0xff]   ;;  %s9919_s14 = sshll.u32 %s13177_s24, 7  ;;  %s366_s16 = scalar_lea.vmem [#allocation14], %s9256_s8 }
  0xc7   : > { %10630 = vmatpush3.bf16.msra.mxu0 %v12264_v1  ;;  %10650 = vmatpush3.bf16.msra.mxu1 %v12265_v2  ;;  %v12271_v8 = vld [vmem:[#allocation6 + $0x18] sm:$0xff]   ;;  %v12273_v10 = vld [vmem:[#allocation6 + $0x20] sm:$0xff]   ;;  %v12274_v11 = vld [vmem:[#allocation6 + $0x68] sm:$0xff]   ;;  %s9106_s11 = sshll.u32 %s366_s16, 4  ;;  %s14460_s29 = sld [smem:[#allocation25_spill]]  ;;  %s14376_s11 = int_to_ptr.vmem [resolvable:$true] %s9106_s11 }
  0xc8   : > { %10631 = vmatprep.subr.bf16.mxu0 %v13197_v0  ;;  %10651 = vmatprep.subr.bf16.mxu1 %v13197_v0  ;;  %v12275_v12 = vld [vmem:[#allocation6 + $0x28] sm:$0xff]   ;;  %v12276_v13 = vld [vmem:[#allocation6 + $0x70] sm:$0xff]   ;;  %v12278_v15 = vld [vmem:[#allocation6 + $0x78] sm:$0xff]   ;;  %s9092_s28 = scalar_lea.sflag [#allocation5], %s13464_s30  ;;  %s13089_s21 = scalar_lea.vmem %s14376_s11, 128 }
  0xc9   : > { %v12277_v14 = vld [vmem:[#allocation6 + $0x30] sm:$0xff]   ;;  %v12279_v16 = vld [vmem:[#allocation6 + $0x38] sm:$0xff]   ;;  %v12280_v19 = vld [vmem:[#allocation6 + $0x80] sm:$0xff]   ;;  %p13090_p0 = scmp.ne.s32.totalorder %s14376_s11, %s13089_s21  ;;  %s13199_s24 = smov [#allocation14]  }
  0xca   : > { %v391_v17 = vld [vmem:[%s13468_s15 + $0x8] sm:$0xf]  ;;  %v374_v18 = vld [vmem:[%s13468_s15] sm:$0xf]  ;;  %v12282_v21 = vld [vmem:[#allocation6 + $0x88] sm:$0xff]   ;;  %s13093_s27 = sshll.u32 %s13199_s24, 4  ;;  %s13094_s27 = int_to_ptr.vmem [resolvable:$false] %s13093_s27 }
  0xcb   : > { %10632 = vmatpush3.bf16.msra.mxu0 %v12266_v3  ;;  %10652 = vmatpush3.bf16.msra.mxu1 %v12267_v4  ;;  %v12281_v20 = vld [vmem:[#allocation6 + $0xc0] sm:$0xff]   ;;  %v12283_v22 = vld [vmem:[#allocation6 + $0xc8] sm:$0xff]   ;;  %v12284_v23 = vld [vmem:[#allocation6 + $0x90] sm:$0xff]   ;;  %p14461_p4 = scmp.ne.s32.totalorder %s14459_s10, 0  ;;  %s13095_s17 = scalar_lea.vmem %s13094_s27, 256 }
  0xcc   : > { %10633 = vmatprep.subr.bf16.mxu0 %v13197_v0  ;;  %10653 = vmatprep.subr.bf16.mxu1 %v13197_v0  ;;  %v12285_v24 = vld [vmem:[#allocation6 + $0xd0] sm:$0xff]   ;;  %v12286_v25 = vld [vmem:[#allocation6 + $0x98] sm:$0xff]   ;;  %v12288_v27 = vld [vmem:[#allocation6 + $0xa0] sm:$0xff]   ;;  %p13096_p3 = scmp.lt.s32.totalorder %s14376_s11, %s13094_s27  ;;  %p13097_p7 = scmp.lt.s32.totalorder %s13095_s17, %s13089_s21 }
  0xcd   : > { %v12287_v26 = vld [vmem:[#allocation6 + $0xd8] sm:$0xff]   ;;  %v12289_v28 = vld [vmem:[#allocation6 + $0xe0] sm:$0xff]   ;;  %v12290_v29 = vld [vmem:[#allocation6 + $0xa8] sm:$0xff]   ;;  %s14374_s18 = scalar_lea.hbm %s14460_s29, %s9919_s14  ;;  %p13091_p13 = pnand %p13090_p0, %p14461_p4 }
  0xce   : > { %v12291_v30 = vld [vmem:[#allocation6 + $0xe8] sm:$0xff]   ;;  %v12292_v31 = vld [vmem:[#allocation6 + $0xb0] sm:$0xff]   ;;  %v12294_v33 = vld [vmem:[#allocation6 + $0xb8] sm:$0xff]   ;;  %p13098_p5 = por %p13097_p7, %p13096_p3 }
  0xcf   : > { %10634 = vmatpush3.bf16.msra.mxu0 %v12268_v5  ;;  %10654 = vmatpush3.bf16.msra.mxu1 %v12269_v6  ;;  %v12293_v32 = vld [vmem:[#allocation6 + $0xf0] sm:$0xff]   ;;  %v12295_v34 = vld [vmem:[#allocation6 + $0xf8] sm:$0xff]   ;;  %v585_v35 = vld [vmem:[%s13468_s15 + $0x10] sm:$0xf]  ;;  %p13092_p1 = pneg %p13091_p13 }
  0xd0   : > { %10635 = vmatprep.subr.bf16.mxu0 %v13197_v0  ;;  %10655 = vmatprep.subr.bf16.mxu1 %v13197_v0  ;;  %v692_v36 = vld [vmem:[%s13468_s15 + $0x18] sm:$0xf]  ;;  %v12296_v37 = vld [vmem:[#allocation6 + $0x100] sm:$0xff]   ;;  %v12302_v43 = vld [vmem:[#allocation6 + $0x118] sm:$0xff]  }
  0xd1   : > { %v12297_v38 = vld [vmem:[#allocation6 + $0x140] sm:$0xff]   ;;  %v12298_v39 = vld [vmem:[#allocation6 + $0x108] sm:$0xff]   ;;  %v12300_v41 = vld [vmem:[#allocation6 + $0x110] sm:$0xff]   ;;  %p13099_p8 = pnand %p13098_p5, %p13092_p1 }
  0xd2   : > { %v12299_v40 = vld [vmem:[#allocation6 + $0x148] sm:$0xff]   ;;  %v12301_v42 = vld [vmem:[#allocation6 + $0x150] sm:$0xff]   ;;  %v12303_v44 = vld [vmem:[#allocation6 + $0x158] sm:$0xff]  }
  0xd3   : > { %10636 = vmatpush3.bf16.msra.mxu0 %v12270_v7  ;;  %10656 = vmatpush3.bf16.msra.mxu1 %v12271_v8  ;;  %v12304_v45 = vld [vmem:[#allocation6 + $0x120] sm:$0xff]   ;;  %v12306_v47 = vld [vmem:[#allocation6 + $0x128] sm:$0xff]   ;;  %v12308_v49 = vld [vmem:[#allocation6 + $0x130] sm:$0xff]  }
  0xd4   : > { %10637 = vmatprep.subr.bf16.mxu0 %v13197_v0  ;;  %10657 = vmatprep.subr.bf16.mxu1 %v13197_v0  ;;  %v12305_v46 = vld [vmem:[#allocation6 + $0x160] sm:$0xff]   ;;  %v12307_v48 = vld [vmem:[#allocation6 + $0x168] sm:$0xff]   ;;  %v12309_v50 = vld [vmem:[#allocation6 + $0x170] sm:$0xff]  }
  0xd5   : > { %v12310_v51 = vld [vmem:[#allocation6 + $0x138] sm:$0xff]   ;;  %v906_v54 = vld [vmem:[%s13468_s15 + $0x58] sm:$0xf]  ;;  %v12312_v55 = vld [vmem:[#allocation6 + $0x180] sm:$0xff]  }
  0xd6   : > { %v12311_v52 = vld [vmem:[#allocation6 + $0x178] sm:$0xff]   ;;  %v12313_v56 = vld [vmem:[#allocation6 + $0x1c0] sm:$0xff]   ;;  %v12314_v57 = vld [vmem:[#allocation6 + $0x188] sm:$0xff]  }
  0xd7   : > { %10638 = vmatpush3.bf16.msra.mxu0 %v12272_v9  ;;  %10658 = vmatpush3.bf16.msra.mxu1 %v12273_v10  ;;  %v799_v53 = vld [vmem:[%s13468_s15 + $0x20] sm:$0xf]  ;;  %v12315_v58 = vld [vmem:[#allocation6 + $0x1c8] sm:$0xff]   ;;  %v12320_v63 = vld [vmem:[#allocation6 + $0x1a0] sm:$0xff]  }
  0xd8   : > { %10639 = vmatprep.subr.bf16.mxu0 %v13197_v0  ;;  %10659 = vmatprep.subr.bf16.mxu1 %v13197_v0  ;;  %v12316_v59 = vld [vmem:[#allocation6 + $0x190] sm:$0xff]   ;;  %v12318_v61 = vld [vmem:[#allocation6 + $0x198] sm:$0xff]   ;;  %v12321_v1 = vld [vmem:[#allocation6 + $0x1e0] sm:$0xff]  }
  0xd9   : > { %v12317_v60 = vld [vmem:[#allocation6 + $0x1d0] sm:$0xff]   ;;  %v12319_v62 = vld [vmem:[#allocation6 + $0x1d8] sm:$0xff]   ;;  %v12322_v2 = vld [vmem:[#allocation6 + $0x1a8] sm:$0xff]  }
  0xda   : > { %v12323_v3 = vld [vmem:[#allocation6 + $0x1e8] sm:$0xff]   ;;  %v12324_v4 = vld [vmem:[#allocation6 + $0x1b0] sm:$0xff]   ;;  %v12326_v6 = vld [vmem:[#allocation6 + $0x1b8] sm:$0xff]  }
  0xdb   : > { %10640 = vmatpush3.bf16.msra.mxu0 %v12274_v11  ;;  %10660 = vmatpush3.bf16.msra.mxu1 %v12275_v12  ;;  %v12325_v5 = vld [vmem:[#allocation6 + $0x1f0] sm:$0xff]   ;;  %v12327_v7 = vld [vmem:[#allocation6 + $0x1f8] sm:$0xff]   ;;  %v12328_v10 = vld [vmem:[#allocation6 + $0x200] sm:$0xff]  }
  0xdc   : > { %10641 = vmatprep.subr.bf16.mxu0 %v13197_v0  ;;  %10661 = vmatprep.subr.bf16.mxu1 %v13197_v0  ;;  %v1013_v8 = vld [vmem:[%s13468_s15 + $0x60] sm:$0xf]  ;;  %v1120_v9 = vld [vmem:[%s13468_s15 + $0x68] sm:$0xf]  ;;  %v12330_v12 = vld [vmem:[#allocation6 + $0x208] sm:$0xff]  }
  0xdd   : > { %v12329_v11 = vld [vmem:[#allocation6 + $0x240] sm:$0xff]  }
  0xdf   : > { %10642 = vmatpush3.bf16.msra.mxu0 %v12276_v13  ;;  %10662 = vmatpush3.bf16.msra.mxu1 %v12277_v14  ;;  %v12331_v13 = vld [vmem:[#allocation6 + $0x248] sm:$0xff]   ;;  %v12332_v14 = vld [vmem:[#allocation6 + $0x210] sm:$0xff]  }
  0xe0   : > { %10643 = vmatprep.subr.bf16.mxu0 %v13197_v0  ;;  %10663 = vmatprep.subr.bf16.mxu1 %v13197_v0 }
  0xe3   : > { %10644 = vmatpush3.bf16.msra.mxu0 %v12278_v15  ;;  %10664 = vmatpush3.bf16.msra.mxu1 %v12279_v16  ;;  %v12333_v15 = vld [vmem:[#allocation6 + $0x250] sm:$0xff]   ;;  %v12334_v16 = vld [vmem:[#allocation6 + $0x218] sm:$0xff]  }
  0xe4   : > { %10669 = vmatprep.subr.bf16.mxu0 %v13197_v0  ;;  %10689 = vmatprep.subr.bf16.mxu1 %v13197_v0 }
  0xe6   : > { %10646 = vmatmul.mubr.bf16.vlgmr.msra.gmra.mrb[0].mxu0 %v391_v17  ;;  %10666 = vmatmul.mubr.bf16.vlgmr.msra.gmra.mrb[0].mxu1 %v374_v18  ;;  %v12335_v17 = vld [vmem:[#allocation6 + $0x258] sm:$0xff]   ;;  %v12336_v18 = vld [vmem:[#allocation6 + $0x220] sm:$0xff]  }
  0xe7   : > { %10670 = vmatpush3.bf16.msra.mxu0 %v12280_v19  ;;  %10690 = vmatpush3.bf16.msra.mxu1 %v12281_v20  ;;  %v12337_v19 = vld [vmem:[#allocation6 + $0x260] sm:$0xff]   ;;  %v12338_v20 = vld [vmem:[#allocation6 + $0x228] sm:$0xff]  }
  0xe8   : > { %10671 = vmatprep.subr.bf16.mxu0 %v13197_v0  ;;  %10691 = vmatprep.subr.bf16.mxu1 %v13197_v0 }
  0xe9   : > { %10685 = vmatprep.mubr.msk.bf16.mxu0 %vm13198_vm0, %v13197_v0  ;;  %10705 = vmatprep.mubr.msk.bf16.mxu1 %vm13198_vm0, %v13197_v0 }
  0xeb   : > { %10672 = vmatpush3.bf16.msra.mxu0 %v12282_v21  ;;  %10692 = vmatpush3.bf16.msra.mxu1 %v12283_v22  ;;  %v12339_v21 = vld [vmem:[#allocation6 + $0x268] sm:$0xff]   ;;  %v12340_v22 = vld [vmem:[#allocation6 + $0x230] sm:$0xff]  }
  0xec   : > { %10673 = vmatprep.subr.bf16.mxu0 %v13197_v0  ;;  %10693 = vmatprep.subr.bf16.mxu1 %v13197_v0 }
  0xef   : > { %10674 = vmatpush3.bf16.msra.mxu0 %v12284_v23  ;;  %10694 = vmatpush3.bf16.msra.mxu1 %v12285_v24  ;;  %v12341_v23 = vld [vmem:[#allocation6 + $0x270] sm:$0xff]   ;;  %v12342_v24 = vld [vmem:[#allocation6 + $0x238] sm:$0xff]  }
  0xf0   : > { %10675 = vmatprep.subr.bf16.mxu0 %v13197_v0  ;;  %10695 = vmatprep.subr.bf16.mxu1 %v13197_v0 }
  0xf3   : > { %10676 = vmatpush3.bf16.msra.mxu0 %v12286_v25  ;;  %10696 = vmatpush3.bf16.msra.mxu1 %v12287_v26  ;;  %v12343_v25 = vld [vmem:[#allocation6 + $0x278] sm:$0xff]   ;;  %v1227_v26 = vld [vmem:[%s13468_s15 + $0x70] sm:$0xf] }
  0xf4   : > { %10677 = vmatprep.subr.bf16.mxu0 %v13197_v0  ;;  %10697 = vmatprep.subr.bf16.mxu1 %v13197_v0 }
  0xf7   : > { %10678 = vmatpush3.bf16.msra.mxu0 %v12288_v27  ;;  %10698 = vmatpush3.bf16.msra.mxu1 %v12289_v28  ;;  %v1334_v27 = vld [vmem:[%s13468_s15 + $0x78] sm:$0xf]  ;;  %v12344_v28 = vld [vmem:[#allocation6 + $0x280] sm:$0xff]  }
  0xf8   : > { %10679 = vmatprep.subr.bf16.mxu0 %v13197_v0  ;;  %10699 = vmatprep.subr.bf16.mxu1 %v13197_v0 }
  0xfb   : > { %10680 = vmatpush3.bf16.msra.mxu0 %v12290_v29  ;;  %10700 = vmatpush3.bf16.msra.mxu1 %v12291_v30  ;;  %v12345_v29 = vld [vmem:[#allocation6 + $0x2c0] sm:$0xff]   ;;  %v12346_v30 = vld [vmem:[#allocation6 + $0x288] sm:$0xff]  }
  0xfc   : > { %10681 = vmatprep.subr.bf16.mxu0 %v13197_v0  ;;  %10701 = vmatprep.subr.bf16.mxu1 %v13197_v0 }
  0xff   : > { %10682 = vmatpush3.bf16.msra.mxu0 %v12292_v31  ;;  %10702 = vmatpush3.bf16.msra.mxu1 %v12293_v32  ;;  %v12347_v31 = vld [vmem:[#allocation6 + $0x2c8] sm:$0xff]   ;;  %v12348_v32 = vld [vmem:[#allocation6 + $0x290] sm:$0xff]  }
 0x100   : > { %10683 = vmatprep.subr.bf16.mxu0 %v13197_v0  ;;  %10703 = vmatprep.subr.bf16.mxu1 %v13197_v0 }
 0x103   : > { %10684 = vmatpush3.bf16.msra.mxu0 %v12294_v33  ;;  %10704 = vmatpush3.bf16.msra.mxu1 %v12295_v34  ;;  %v12349_v33 = vld [vmem:[#allocation6 + $0x2d0] sm:$0xff]   ;;  %v12350_v34 = vld [vmem:[#allocation6 + $0x298] sm:$0xff]  }
 0x104   : > { %10709 = vmatprep.subr.bf16.mxu0 %v13197_v0  ;;  %10729 = vmatprep.subr.bf16.mxu1 %v13197_v0 }
 0x106   : > { %10686 = vmatmul.mubr.bf16.vlgmr.msra.gmra.mrb[4].mxu0 %v585_v35  ;;  %10706 = vmatmul.mubr.bf16.vlgmr.msra.gmra.mrb[4].mxu1 %v692_v36  ;;  %v12351_v35 = vld [vmem:[#allocation6 + $0x2d8] sm:$0xff]   ;;  %v12352_v36 = vld [vmem:[#allocation6 + $0x2a0] sm:$0xff]  }
 0x107   : > { %10710 = vmatpush3.bf16.msra.mxu0 %v12296_v37  ;;  %10730 = vmatpush3.bf16.msra.mxu1 %v12297_v38  ;;  %v12353_v37 = vld [vmem:[#allocation6 + $0x2e0] sm:$0xff]   ;;  %v12354_v38 = vld [vmem:[#allocation6 + $0x2a8] sm:$0xff]  }
 0x108   : > { %10711 = vmatprep.subr.bf16.mxu0 %v13197_v0  ;;  %10731 = vmatprep.subr.bf16.mxu1 %v13197_v0 }
 0x109   : > { %10725 = vmatprep.mubr.msk.bf16.mxu0 %vm13198_vm0, %v13197_v0  ;;  %10745 = vmatprep.mubr.msk.bf16.mxu1 %vm13198_vm0, %v13197_v0 }
 0x10b   : > { %10712 = vmatpush3.bf16.msra.mxu0 %v12298_v39  ;;  %10732 = vmatpush3.bf16.msra.mxu1 %v12299_v40  ;;  %v12355_v39 = vld [vmem:[#allocation6 + $0x2e8] sm:$0xff]   ;;  %v12356_v40 = vld [vmem:[#allocation6 + $0x2b0] sm:$0xff]  }
 0x10c   : > { %10713 = vmatprep.subr.bf16.mxu0 %v13197_v0  ;;  %10733 = vmatprep.subr.bf16.mxu1 %v13197_v0 }
 0x10f   : > { %10714 = vmatpush3.bf16.msra.mxu0 %v12300_v41  ;;  %10734 = vmatpush3.bf16.msra.mxu1 %v12301_v42  ;;  %v12357_v41 = vld [vmem:[#allocation6 + $0x2f0] sm:$0xff]   ;;  %v12358_v42 = vld [vmem:[#allocation6 + $0x2b8] sm:$0xff]  }
 0x110   : > { %10715 = vmatprep.subr.bf16.mxu0 %v13197_v0  ;;  %10735 = vmatprep.subr.bf16.mxu1 %v13197_v0 }
 0x113   : > { %10716 = vmatpush3.bf16.msra.mxu0 %v12302_v43  ;;  %10736 = vmatpush3.bf16.msra.mxu1 %v12303_v44  ;;  %v12359_v43 = vld [vmem:[#allocation6 + $0x2f8] sm:$0xff]   ;;  %v1441_v44 = vld [vmem:[%s13468_s15 + $0xb0] sm:$0xf] }
 0x114   : > { %10717 = vmatprep.subr.bf16.mxu0 %v13197_v0  ;;  %10737 = vmatprep.subr.bf16.mxu1 %v13197_v0 }
 0x117   : > { %10718 = vmatpush3.bf16.msra.mxu0 %v12304_v45  ;;  %10738 = vmatpush3.bf16.msra.mxu1 %v12305_v46  ;;  %v1548_v45 = vld [vmem:[%s13468_s15 + $0xb8] sm:$0xf]  ;;  %v12360_v46 = vld [vmem:[#allocation6 + $0x300] sm:$0xff]  }
 0x118   : > { %10719 = vmatprep.subr.bf16.mxu0 %v13197_v0  ;;  %10739 = vmatprep.subr.bf16.mxu1 %v13197_v0 }
 0x11b   : > { %10720 = vmatpush3.bf16.msra.mxu0 %v12306_v47  ;;  %10740 = vmatpush3.bf16.msra.mxu1 %v12307_v48  ;;  %v12361_v47 = vld [vmem:[#allocation6 + $0x340] sm:$0xff]   ;;  %v12362_v48 = vld [vmem:[#allocation6 + $0x308] sm:$0xff]  }
 0x11c   : > { %10721 = vmatprep.subr.bf16.mxu0 %v13197_v0  ;;  %10741 = vmatprep.subr.bf16.mxu1 %v13197_v0 }
 0x11f   : > { %10722 = vmatpush3.bf16.msra.mxu0 %v12308_v49  ;;  %10742 = vmatpush3.bf16.msra.mxu1 %v12309_v50  ;;  %v12363_v49 = vld [vmem:[#allocation6 + $0x348] sm:$0xff]   ;;  %v12364_v50 = vld [vmem:[#allocation6 + $0x310] sm:$0xff]  }
 0x120   : > { %10723 = vmatprep.subr.bf16.mxu0 %v13197_v0  ;;  %10743 = vmatprep.subr.bf16.mxu1 %v13197_v0 }
 0x123   : > { %10724 = vmatpush3.bf16.msra.mxu0 %v12310_v51  ;;  %10744 = vmatpush3.bf16.msra.mxu1 %v12311_v52  ;;  %v12365_v51 = vld [vmem:[#allocation6 + $0x350] sm:$0xff]   ;;  %v12366_v52 = vld [vmem:[#allocation6 + $0x318] sm:$0xff]  }
 0x124   : > { %10749 = vmatprep.subr.bf16.mxu0 %v13197_v0  ;;  %10769 = vmatprep.subr.bf16.mxu1 %v13197_v0 }
 0x126   : > { %10726 = vmatmul.mubr.bf16.vlgmr.msra.gmra.mrb[8].mxu0 %v799_v53  ;;  %10746 = vmatmul.mubr.bf16.vlgmr.msra.gmra.mrb[8].mxu1 %v906_v54  ;;  %v12367_v53 = vld [vmem:[#allocation6 + $0x358] sm:$0xff]   ;;  %v12368_v54 = vld [vmem:[#allocation6 + $0x320] sm:$0xff]  }
 0x127   : > { %10750 = vmatpush3.bf16.msra.mxu0 %v12312_v55  ;;  %10770 = vmatpush3.bf16.msra.mxu1 %v12313_v56  ;;  %v12369_v55 = vld [vmem:[#allocation6 + $0x360] sm:$0xff]   ;;  %v12370_v56 = vld [vmem:[#allocation6 + $0x328] sm:$0xff]  }
 0x128   : > { %10751 = vmatprep.subr.bf16.mxu0 %v13197_v0  ;;  %10771 = vmatprep.subr.bf16.mxu1 %v13197_v0 }
 0x129   : > { %10765 = vmatprep.mubr.msk.bf16.mxu0 %vm13198_vm0, %v13197_v0  ;;  %10785 = vmatprep.mubr.msk.bf16.mxu1 %vm13198_vm0, %v13197_v0 }
 0x12b   : > { %10752 = vmatpush3.bf16.msra.mxu0 %v12314_v57  ;;  %10772 = vmatpush3.bf16.msra.mxu1 %v12315_v58  ;;  %v12371_v57 = vld [vmem:[#allocation6 + $0x368] sm:$0xff]   ;;  %v12372_v58 = vld [vmem:[#allocation6 + $0x330] sm:$0xff]  }
 0x12c   : > { %10753 = vmatprep.subr.bf16.mxu0 %v13197_v0  ;;  %10773 = vmatprep.subr.bf16.mxu1 %v13197_v0 }
 0x12f   : > { %10754 = vmatpush3.bf16.msra.mxu0 %v12316_v59  ;;  %10774 = vmatpush3.bf16.msra.mxu1 %v12317_v60  ;;  %v12373_v59 = vld [vmem:[#allocation6 + $0x370] sm:$0xff]   ;;  %v12374_v60 = vld [vmem:[#allocation6 + $0x338] sm:$0xff]  }
 0x130   : > { %10755 = vmatprep.subr.bf16.mxu0 %v13197_v0  ;;  %10775 = vmatprep.subr.bf16.mxu1 %v13197_v0 }
 0x133   : > { %10756 = vmatpush3.bf16.msra.mxu0 %v12318_v61  ;;  %10776 = vmatpush3.bf16.msra.mxu1 %v12319_v62  ;;  %v12375_v61 = vld [vmem:[#allocation6 + $0x378] sm:$0xff]  }
 0x134   : > { %10757 = vmatprep.subr.bf16.mxu0 %v13197_v0  ;;  %10777 = vmatprep.subr.bf16.mxu1 %v13197_v0  ;;  %v1655_v62 = vld [vmem:[%s13468_s15 + $0xc0] sm:$0xf] }
 0x137   : > { %10758 = vmatpush3.bf16.msra.mxu0 %v12320_v63  ;;  %10778 = vmatpush3.bf16.msra.mxu1 %v12321_v1  ;;  %v1762_v63 = vld [vmem:[%s13468_s15 + $0xc8] sm:$0xf] }
 0x138   : > { %10759 = vmatprep.subr.bf16.mxu0 %v13197_v0  ;;  %10779 = vmatprep.subr.bf16.mxu1 %v13197_v0  ;;  %v12376_v1 = vld [vmem:[#allocation6 + $0x380] sm:$0xff]  }
 0x13b   : > { %10760 = vmatpush3.bf16.msra.mxu0 %v12322_v2  ;;  %10780 = vmatpush3.bf16.msra.mxu1 %v12323_v3  ;;  %v12377_v2 = vld [vmem:[#allocation6 + $0x3c0] sm:$0xff]   ;;  %v12378_v3 = vld [vmem:[#allocation6 + $0x388] sm:$0xff]  }
 0x13c   : > { %10761 = vmatprep.subr.bf16.mxu0 %v13197_v0  ;;  %10781 = vmatprep.subr.bf16.mxu1 %v13197_v0 }
 0x13f   : > { %10762 = vmatpush3.bf16.msra.mxu0 %v12324_v4  ;;  %10782 = vmatpush3.bf16.msra.mxu1 %v12325_v5  ;;  %v12379_v4 = vld [vmem:[#allocation6 + $0x3c8] sm:$0xff]   ;;  %v12380_v5 = vld [vmem:[#allocation6 + $0x390] sm:$0xff]  }
 0x140   : > { %10763 = vmatprep.subr.bf16.mxu0 %v13197_v0  ;;  %10783 = vmatprep.subr.bf16.mxu1 %v13197_v0 }
 0x143   : > { %10764 = vmatpush3.bf16.msra.mxu0 %v12326_v6  ;;  %10784 = vmatpush3.bf16.msra.mxu1 %v12327_v7  ;;  %v12381_v6 = vld [vmem:[#allocation6 + $0x3d0] sm:$0xff]   ;;  %v12382_v7 = vld [vmem:[#allocation6 + $0x398] sm:$0xff]  }
 0x144   : > { %10789 = vmatprep.subr.bf16.mxu0 %v13197_v0  ;;  %10809 = vmatprep.subr.bf16.mxu1 %v13197_v0 }
 0x146   : > { %10766 = vmatmul.mubr.bf16.vlgmr.msra.gmra.mrb[12].mxu0 %v1013_v8  ;;  %10786 = vmatmul.mubr.bf16.vlgmr.msra.gmra.mrb[12].mxu1 %v1120_v9  ;;  %v12383_v8 = vld [vmem:[#allocation6 + $0x3d8] sm:$0xff]   ;;  %v12384_v9 = vld [vmem:[#allocation6 + $0x3a0] sm:$0xff]  }
 0x147   : > { %10790 = vmatpush3.bf16.msra.mxu0 %v12328_v10  ;;  %10810 = vmatpush3.bf16.msra.mxu1 %v12329_v11  ;;  %v12385_v10 = vld [vmem:[#allocation6 + $0x3e0] sm:$0xff]   ;;  %v12386_v11 = vld [vmem:[#allocation6 + $0x3a8] sm:$0xff]  }
 0x148   : > { %10791 = vmatprep.subr.bf16.mxu0 %v13197_v0  ;;  %10811 = vmatprep.subr.bf16.mxu1 %v13197_v0 }
 0x149   : > { %10805 = vmatprep.mubr.msk.bf16.mxu0 %vm13198_vm0, %v13197_v0  ;;  %10825 = vmatprep.mubr.msk.bf16.mxu1 %vm13198_vm0, %v13197_v0 }
 0x14b   : > { %10792 = vmatpush3.bf16.msra.mxu0 %v12330_v12  ;;  %10812 = vmatpush3.bf16.msra.mxu1 %v12331_v13  ;;  %v12387_v12 = vld [vmem:[#allocation6 + $0x3e8] sm:$0xff]   ;;  %v12392_v13 = vld [vmem:[%s13468_s15] sm:$0x1f]  }
 0x14c   : > { %10793 = vmatprep.subr.bf16.mxu0 %v13197_v0  ;;  %10813 = vmatprep.subr.bf16.mxu1 %v13197_v0 }
 0x14f   : > { %10794 = vmatpush3.bf16.msra.mxu0 %v12332_v14  ;;  %10814 = vmatpush3.bf16.msra.mxu1 %v12333_v15  ;;  %v12388_v15 = vld [vmem:[#allocation6 + $0x3b0] sm:$0xff]  }
 0x150   : > { %10795 = vmatprep.subr.bf16.mxu0 %v13197_v0  ;;  %10815 = vmatprep.subr.bf16.mxu1 %v13197_v0 }
 0x153   : > { %10796 = vmatpush3.bf16.msra.mxu0 %v12334_v16  ;;  %10816 = vmatpush3.bf16.msra.mxu1 %v12335_v17 }
 0x154   : > { %10797 = vmatprep.subr.bf16.mxu0 %v13197_v0  ;;  %10817 = vmatprep.subr.bf16.mxu1 %v13197_v0 }
 0x157   : > { %10798 = vmatpush3.bf16.msra.mxu0 %v12336_v18  ;;  %10818 = vmatpush3.bf16.msra.mxu1 %v12337_v19  ;;  %v12389_v18 = vld [vmem:[#allocation6 + $0x3f0] sm:$0xff]   ;;  %v2003_v19 = vshll.u32 %v12392_v13, 16 }
 0x158   : > { %10799 = vmatprep.subr.bf16.mxu0 %v13197_v0  ;;  %10819 = vmatprep.subr.bf16.mxu1 %v13197_v0 }
 0x15b   : > { %10800 = vmatpush3.bf16.msra.mxu0 %v12338_v20  ;;  %10820 = vmatpush3.bf16.msra.mxu1 %v12339_v21 }
 0x15c   : > { %10801 = vmatprep.subr.bf16.mxu0 %v13197_v0  ;;  %10821 = vmatprep.subr.bf16.mxu1 %v13197_v0 }
 0x15f   : > { %10802 = vmatpush3.bf16.msra.mxu0 %v12340_v22  ;;  %10822 = vmatpush3.bf16.msra.mxu1 %v12341_v23 }
 0x160   : > { %10803 = vmatprep.subr.bf16.mxu0 %v13197_v0  ;;  %10823 = vmatprep.subr.bf16.mxu1 %v13197_v0 }
 0x163   : > { %10804 = vmatpush3.bf16.msra.mxu0 %v12342_v24  ;;  %10824 = vmatpush3.bf16.msra.mxu1 %v12343_v25 }
 0x164   : > { %10829 = vmatprep.subr.bf16.mxu0 %v13197_v0  ;;  %10849 = vmatprep.subr.bf16.mxu1 %v13197_v0 }
 0x166   : > { %10806 = vmatmul.mubr.bf16.vlgmr.msra.gmra.mrb[16].mxu0 %v1227_v26  ;;  %10826 = vmatmul.mubr.bf16.vlgmr.msra.gmra.mrb[16].mxu1 %v1334_v27  ;;  %v12390_v26 = vld [vmem:[#allocation6 + $0x3b8] sm:$0xff]   ;;  %v2001_v27 = vshrl.u32 %v12392_v13, 16  ;;  %v12419_v13 = vld [vmem:[#allocation6 + $0x4a0] sm:$0xff]  }
 0x167   : > { %10830 = vmatpush3.bf16.msra.mxu0 %v12344_v28  ;;  %10850 = vmatpush3.bf16.msra.mxu1 %v12345_v29  ;;  %v2005_v28 = vrot.slane %v2003_v19, 1  ;;  %v12391_v29 = vld [vmem:[#allocation6 + $0x3f8] sm:$0xff]  }
 0x168   : > { %10831 = vmatprep.subr.bf16.mxu0 %v13197_v0  ;;  %10851 = vmatprep.subr.bf16.mxu1 %v13197_v0 }
 0x169   : > { %10845 = vmatprep.mubr.msk.bf16.mxu0 %vm13198_vm0, %v13197_v0  ;;  %10865 = vmatprep.mubr.msk.bf16.mxu1 %vm13198_vm0, %v13197_v0 }
 0x16b   : > { %10832 = vmatpush3.bf16.msra.mxu0 %v12346_v30  ;;  %10852 = vmatpush3.bf16.msra.mxu1 %v12347_v31  ;;  %v1869_v30 = vld [vmem:[%s13468_s15 + $0xd0] sm:$0xf]  ;;  %v2006_v31 = vor.u32 %v2005_v28, %v2001_v27 }
 0x16c   : > { %10833 = vmatprep.subr.bf16.mxu0 %v13197_v0  ;;  %10853 = vmatprep.subr.bf16.mxu1 %v13197_v0 }
 0x16f   : > { %10834 = vmatpush3.bf16.msra.mxu0 %v12348_v32  ;;  %10854 = vmatpush3.bf16.msra.mxu1 %v12349_v33  ;;  %v12393_v32 = vld [vmem:[#allocation6 + $0x400] sm:$0xff]  }
 0x170   : > { %10835 = vmatprep.subr.bf16.mxu0 %v13197_v0  ;;  %10855 = vmatprep.subr.bf16.mxu1 %v13197_v0  ;;  %v12394_v33 = vld [vmem:[#allocation6 + $0x440] sm:$0xff]  }
 0x173   : > { %10836 = vmatpush3.bf16.msra.mxu0 %v12350_v34  ;;  %10856 = vmatpush3.bf16.msra.mxu1 %v12351_v35  ;;  %v12395_v34 = vld [vmem:[#allocation6 + $0x408] sm:$0xff]  }
 0x174   : > { %10837 = vmatprep.subr.bf16.mxu0 %v13197_v0  ;;  %10857 = vmatprep.subr.bf16.mxu1 %v13197_v0  ;;  %v12396_v35 = vld [vmem:[#allocation6 + $0x448] sm:$0xff]  }
 0x177   : > { %10838 = vmatpush3.bf16.msra.mxu0 %v12352_v36  ;;  %10858 = vmatpush3.bf16.msra.mxu1 %v12353_v37  ;;  %v12397_v36 = vld [vmem:[#allocation6 + $0x410] sm:$0xff]  }
 0x178   : > { %10839 = vmatprep.subr.bf16.mxu0 %v13197_v0  ;;  %10859 = vmatprep.subr.bf16.mxu1 %v13197_v0  ;;  %v12398_v37 = vld [vmem:[#allocation6 + $0x450] sm:$0xff]  }
 0x17b   : > { %10840 = vmatpush3.bf16.msra.mxu0 %v12354_v38  ;;  %10860 = vmatpush3.bf16.msra.mxu1 %v12355_v39  ;;  %v12399_v38 = vld [vmem:[#allocation6 + $0x418] sm:$0xff]  }
 0x17c   : > { %10841 = vmatprep.subr.bf16.mxu0 %v13197_v0  ;;  %10861 = vmatprep.subr.bf16.mxu1 %v13197_v0  ;;  %v12400_v39 = vld [vmem:[#allocation6 + $0x458] sm:$0xff]  }
 0x17f   : > { %10842 = vmatpush3.bf16.msra.mxu0 %v12356_v40  ;;  %10862 = vmatpush3.bf16.msra.mxu1 %v12357_v41  ;;  %v12401_v40 = vld [vmem:[#allocation6 + $0x420] sm:$0xff]  }
 0x180   : > { %10843 = vmatprep.subr.bf16.mxu0 %v13197_v0  ;;  %10863 = vmatprep.subr.bf16.mxu1 %v13197_v0  ;;  %v12402_v41 = vld [vmem:[#allocation6 + $0x460] sm:$0xff]  }
 0x183   : > { %10844 = vmatpush3.bf16.msra.mxu0 %v12358_v42  ;;  %10864 = vmatpush3.bf16.msra.mxu1 %v12359_v43  ;;  %v12403_v42 = vld [vmem:[#allocation6 + $0x428] sm:$0xff]   ;;  %v12409_v43 = vld [vmem:[%s13468_s15 + $0x8] sm:$0x1f]  }
 0x184   : > { %10869 = vmatprep.subr.bf16.mxu0 %v13197_v0  ;;  %10889 = vmatprep.subr.bf16.mxu1 %v13197_v0 }
 0x186   : > { %10846 = vmatmul.mubr.bf16.vlgmr.msra.gmra.mrb[20].mxu0 %v1441_v44  ;;  %10866 = vmatmul.mubr.bf16.vlgmr.msra.gmra.mrb[20].mxu1 %v1548_v45  ;;  %v12404_v44 = vld [vmem:[#allocation6 + $0x468] sm:$0xff]  }
 0x187   : > { %10870 = vmatpush3.bf16.msra.mxu0 %v12360_v46  ;;  %10890 = vmatpush3.bf16.msra.mxu1 %v12361_v47  ;;  %v12410_v45 = vld [vmem:[%s13468_s15 + $0x10] sm:$0x1f]   ;;  %v12405_v47 = vld [vmem:[#allocation6 + $0x430] sm:$0xff]  }
 0x188   : > { %10871 = vmatprep.subr.bf16.mxu0 %v13197_v0  ;;  %10891 = vmatprep.subr.bf16.mxu1 %v13197_v0 }
 0x189   : > { %10885 = vmatprep.mubr.msk.bf16.mxu0 %vm13198_vm0, %v13197_v0  ;;  %10905 = vmatprep.mubr.msk.bf16.mxu1 %vm13198_vm0, %v13197_v0 }
 0x18b   : > { %10872 = vmatpush3.bf16.msra.mxu0 %v12362_v48  ;;  %10892 = vmatpush3.bf16.msra.mxu1 %v12363_v49 }
 0x18c   : > { %10873 = vmatprep.subr.bf16.mxu0 %v13197_v0  ;;  %10893 = vmatprep.subr.bf16.mxu1 %v13197_v0 }
 0x18f   : > { %10874 = vmatpush3.bf16.msra.mxu0 %v12364_v50  ;;  %10894 = vmatpush3.bf16.msra.mxu1 %v12365_v51  ;;  %v12406_v51 = vld [vmem:[#allocation6 + $0x470] sm:$0xff]  }
 0x190   : > { %10875 = vmatprep.subr.bf16.mxu0 %v13197_v0  ;;  %10895 = vmatprep.subr.bf16.mxu1 %v13197_v0 }
 0x193   : > { %10876 = vmatpush3.bf16.msra.mxu0 %v12366_v52  ;;  %10896 = vmatpush3.bf16.msra.mxu1 %v12367_v53  ;;  %v2124_v52 = vshll.u32 %v12409_v43, 16  ;;  %v2245_v53 = vshll.u32 %v12410_v45, 16 }
 0x194   : > { %10877 = vmatprep.subr.bf16.mxu0 %v13197_v0  ;;  %10897 = vmatprep.subr.bf16.mxu1 %v13197_v0 }
 0x197   : > { %10878 = vmatpush3.bf16.msra.mxu0 %v12368_v54  ;;  %10898 = vmatpush3.bf16.msra.mxu1 %v12369_v55 }
 0x198   : > { %10879 = vmatprep.subr.bf16.mxu0 %v13197_v0  ;;  %10899 = vmatprep.subr.bf16.mxu1 %v13197_v0 }
 0x19b   : > { %10880 = vmatpush3.bf16.msra.mxu0 %v12370_v56  ;;  %10900 = vmatpush3.bf16.msra.mxu1 %v12371_v57 }
 0x19c   : > { %10881 = vmatprep.subr.bf16.mxu0 %v13197_v0  ;;  %10901 = vmatprep.subr.bf16.mxu1 %v13197_v0 }
 0x19f   : > { %10882 = vmatpush3.bf16.msra.mxu0 %v12372_v58  ;;  %10902 = vmatpush3.bf16.msra.mxu1 %v12373_v59  ;;  %v12407_v59 = vld [vmem:[#allocation6 + $0x438] sm:$0xff]  }
 0x1a0   : > { %10883 = vmatprep.subr.bf16.mxu0 %v13197_v0  ;;  %10903 = vmatprep.subr.bf16.mxu1 %v13197_v0 }
 0x1a3   : > { %10884 = vmatpush3.bf16.msra.mxu0 %v12374_v60  ;;  %10904 = vmatpush3.bf16.msra.mxu1 %v12375_v61  ;;  %v12408_v61 = vld [vmem:[#allocation6 + $0x478] sm:$0xff]  }
 0x1a4   : > { %10909 = vmatprep.subr.bf16.mxu0 %v13197_v0  ;;  %10929 = vmatprep.subr.bf16.mxu1 %v13197_v0 }
 0x1a6   : > { %10886 = vmatmul.mubr.bf16.vlgmr.msra.gmra.mrb[24].mxu0 %v1655_v62  ;;  %10906 = vmatmul.mubr.bf16.vlgmr.msra.gmra.mrb[24].mxu1 %v1762_v63  ;;  %v2122_v62 = vshrl.u32 %v12409_v43, 16  ;;  %v2126_v63 = vrot.slane %v2124_v52, 1  ;;  %v12431_v43 = vld [vmem:[#allocation6 + $0x508] sm:$0xff]  }
 0x1a7   : > { %10910 = vmatpush3.bf16.msra.mxu0 %v12376_v1  ;;  %10930 = vmatpush3.bf16.msra.mxu1 %v12377_v2  ;;  %v2243_v1 = vshrl.u32 %v12410_v45, 16  ;;  %v2247_v2 = vrot.slane %v2245_v53, 1  ;;  %v12433_v45 = vld [vmem:[#allocation6 + $0x510] sm:$0xff]   ;;  %v12440_v53 = vld [vmem:[#allocation6 + $0x568] sm:$0xff]  }
 0x1a8   : > { %10911 = vmatprep.subr.bf16.mxu0 %v13197_v0  ;;  %10931 = vmatprep.subr.bf16.mxu1 %v13197_v0  ;;  %v12445_v52 = vld [vmem:[%s13468_s15 + $0x58] sm:$0x1f]  }
 0x1a9   : > { %10925 = vmatprep.mubr.msk.bf16.mxu0 %vm13198_vm0, %v13197_v0  ;;  %10945 = vmatprep.mubr.msk.bf16.mxu1 %vm13198_vm0, %v13197_v0 }
 0x1ab   : > { %10912 = vmatpush3.bf16.msra.mxu0 %v12378_v3  ;;  %10932 = vmatpush3.bf16.msra.mxu1 %v12379_v4  ;;  %v2127_v3 = vor.u32 %v2126_v63, %v2122_v62  ;;  %v12411_v4 = vld [vmem:[#allocation6 + $0x480] sm:$0xff]   ;;  %v2606_v62 = vshrl.u32 %v12445_v52, 16 }
 0x1ac   : > { %10913 = vmatprep.subr.bf16.mxu0 %v13197_v0  ;;  %10933 = vmatprep.subr.bf16.mxu1 %v13197_v0 }
 0x1af   : > { %10914 = vmatpush3.bf16.msra.mxu0 %v12380_v5  ;;  %10934 = vmatpush3.bf16.msra.mxu1 %v12381_v6  ;;  %v2248_v5 = vor.u32 %v2247_v2, %v2243_v1  ;;  %v12412_v6 = vld [vmem:[#allocation6 + $0x4c0] sm:$0xff]  }
 0x1b0   : > { %10915 = vmatprep.subr.bf16.mxu0 %v13197_v0  ;;  %10935 = vmatprep.subr.bf16.mxu1 %v13197_v0 }
 0x1b3   : > { %10916 = vmatpush3.bf16.msra.mxu0 %v12382_v7  ;;  %10936 = vmatpush3.bf16.msra.mxu1 %v12383_v8  ;;  %v12413_v7 = vld [vmem:[#allocation6 + $0x488] sm:$0xff]  }
 0x1b4   : > { %10917 = vmatprep.subr.bf16.mxu0 %v13197_v0  ;;  %10937 = vmatprep.subr.bf16.mxu1 %v13197_v0  ;;  %v12414_v8 = vld [vmem:[#allocation6 + $0x4c8] sm:$0xff]  }
 0x1b7   : > { %10918 = vmatpush3.bf16.msra.mxu0 %v12384_v9  ;;  %10938 = vmatpush3.bf16.msra.mxu1 %v12385_v10  ;;  %v12415_v9 = vld [vmem:[#allocation6 + $0x490] sm:$0xff]  }
 0x1b8   : > { %10919 = vmatprep.subr.bf16.mxu0 %v13197_v0  ;;  %10939 = vmatprep.subr.bf16.mxu1 %v13197_v0  ;;  %v12416_v10 = vld [vmem:[#allocation6 + $0x4d0] sm:$0xff]  }
 0x1b9   : > { %v491_v14 = vpop.f32.mrb[0].mxu0  ;;  %v579_v17 = vpop.f32.mrb[0].mxu1 }
 0x1ba   : > { %v10647_v16 = vpop.f32.mrb[1].mxu0  ;;  %v13657_v20 = vadd.f32 %v579_v17, %v491_v14  ;;  %v10667_v22 = vpop.f32.mrb[1].mxu1  ;;  %v12420_v14 = vld [vmem:[#allocation6 + $0x4e0] sm:$0xff]   ;;  %v12422_v17 = vld [vmem:[#allocation6 + $0x4e8] sm:$0xff]  }
 0x1bb   : > { %v494_v21 = vpop.f32.mrb[2].mxu0  ;;  %10920 = vmatpush3.bf16.msra.mxu0 %v12386_v11  ;;  %10940 = vmatpush3.bf16.msra.mxu1 %v12387_v12  ;;  %v582_v24 = vpop.f32.mrb[2].mxu1  ;;  %v12417_v11 = vld [vmem:[#allocation6 + $0x498] sm:$0xff]   ;;  %v12427_v16 = vld [vmem:[%s13468_s15 + $0x18] sm:$0x1f]  }
 0x1bc   : > { %v10648_v23 = vpop.f32.mrb[3].mxu0  ;;  %10921 = vmatprep.subr.bf16.mxu0 %v13197_v0  ;;  %10941 = vmatprep.subr.bf16.mxu1 %v13197_v0  ;;  %v10668_v25 = vpop.f32.mrb[3].mxu1  ;;  %v12418_v12 = vld [vmem:[#allocation6 + $0x4d8] sm:$0xff]   ;;  %v2366_v21 = vshll.u32 %v12427_v16, 16 }
 0x1bd   : > { %v12424_v25 = vld [vmem:[#allocation6 + $0x4f0] sm:$0xff]  }
 0x1bf   : > { %10922 = vmatpush3.bf16.msra.mxu0 %v12388_v15  ;;  %10942 = vmatpush3.bf16.msra.mxu1 %v12389_v18  ;;  %v12421_v15 = vld [vmem:[#allocation6 + $0x4a8] sm:$0xff]   ;;  %v12428_v18 = vld [vmem:[%s13468_s15 + $0x20] sm:$0x1f]  }
 0x1c0   : > { %10923 = vmatprep.subr.bf16.mxu0 %v13197_v0  ;;  %10943 = vmatprep.subr.bf16.mxu1 %v13197_v0  ;;  %v2487_v27 = vshll.u32 %v12428_v18, 16 }
 0x1c3   : > { %10924 = vmatpush3.bf16.msra.mxu0 %v12390_v26  ;;  %10944 = vmatpush3.bf16.msra.mxu1 %v12391_v29  ;;  %v2364_v26 = vshrl.u32 %v12427_v16, 16  ;;  %v12449_v16 = vld [vmem:[#allocation6 + $0x588] sm:$0xff]  }
 0x1c4   : > { %10949 = vmatprep.subr.bf16.mxu0 %v13197_v0  ;;  %10969 = vmatprep.subr.bf16.mxu1 %v13197_v0 }
 0x1c6   : > { %10926 = vmatmul.mubr.bf16.vlgmr.msra.gmra.mrb[28].mxu0 %v1869_v30  ;;  %10946 = vmatmul.mubr.bf16.vlgmr.msra.gmra.mrb[28].mxu1 %v2006_v31 }
 0x1c7   : > { %10950 = vmatpush3.bf16.msra.mxu0 %v12393_v32  ;;  %10970 = vmatpush3.bf16.msra.mxu1 %v12394_v33  ;;  %v12425_v33 = vld [vmem:[#allocation6 + $0x4b8] sm:$0xff]  }
 0x1c8   : > { %10951 = vmatprep.subr.bf16.mxu0 %v13197_v0  ;;  %10971 = vmatprep.subr.bf16.mxu1 %v13197_v0 }
 0x1c9   : > { %10965 = vmatprep.mubr.msk.bf16.mxu0 %vm13198_vm0, %v13197_v0  ;;  %10985 = vmatprep.mubr.msk.bf16.mxu1 %vm13198_vm0, %v13197_v0 }
 0x1cb   : > { %10952 = vmatpush3.bf16.msra.mxu0 %v12395_v34  ;;  %10972 = vmatpush3.bf16.msra.mxu1 %v12396_v35  ;;  %v2368_v34 = vrot.slane %v2366_v21, 1  ;;  %v12454_v21 = vld [vmem:[#allocation6 + $0x5d8] sm:$0xff]  }
 0x1cc   : > { %10953 = vmatprep.subr.bf16.mxu0 %v13197_v0  ;;  %10973 = vmatprep.subr.bf16.mxu1 %v13197_v0 }
 0x1cf   : > { %10954 = vmatpush3.bf16.msra.mxu0 %v12397_v36  ;;  %10974 = vmatpush3.bf16.msra.mxu1 %v12398_v37  ;;  %v12426_v36 = vld [vmem:[#allocation6 + $0x4f8] sm:$0xff]   ;;  %v2485_v37 = vshrl.u32 %v12428_v18, 16  ;;  %v12451_v18 = vld [vmem:[#allocation6 + $0x590] sm:$0xff]  }
 0x1d0   : > { %10955 = vmatprep.subr.bf16.mxu0 %v13197_v0  ;;  %10975 = vmatprep.subr.bf16.mxu1 %v13197_v0 }
 0x1d3   : > { %10956 = vmatpush3.bf16.msra.mxu0 %v12399_v38  ;;  %10976 = vmatpush3.bf16.msra.mxu1 %v12400_v39  ;;  %v2489_v38 = vrot.slane %v2487_v27, 1  ;;  %v2369_v39 = vor.u32 %v2368_v34, %v2364_v26  ;;  %v12458_v26 = vld [vmem:[#allocation6 + $0x5e8] sm:$0xff]   ;;  %v12460_v34 = vld [vmem:[#allocation6 + $0x5f0] sm:$0xff]  }
 0x1d4   : > { %10957 = vmatprep.subr.bf16.mxu0 %v13197_v0  ;;  %10977 = vmatprep.subr.bf16.mxu1 %v13197_v0  ;;  %v12464_v27 = vld [vmem:[%s13468_s15 + $0x70] sm:$0x1f]  }
 0x1d7   : > { %10958 = vmatpush3.bf16.msra.mxu0 %v12401_v40  ;;  %10978 = vmatpush3.bf16.msra.mxu1 %v12402_v41  ;;  %v12429_v40 = vld [vmem:[#allocation6 + $0x500] sm:$0xff]   ;;  %v2490_v41 = vor.u32 %v2489_v38, %v2485_v37 }
 0x1d8   : > { %10959 = vmatprep.subr.bf16.mxu0 %v13197_v0  ;;  %10979 = vmatprep.subr.bf16.mxu1 %v13197_v0 }
 0x1d9   : > { %v685_v46 = vpop.f32.mrb[4].mxu0  ;;  %v792_v50 = vpop.f32.mrb[4].mxu1 }
 0x1da   : > { %v691_v48 = vadd.f32 %v685_v46, %v13657_v20  ;;  %v10687_v49 = vpop.f32.mrb[5].mxu0  ;;  %v10707_v55 = vpop.f32.mrb[5].mxu1  ;;  %v12423_v20 = vld [vmem:[#allocation6 + $0x4b0] sm:$0xff]  }
 0x1db   : > { %v688_v54 = vpop.f32.mrb[6].mxu0  ;;  %10960 = vmatpush3.bf16.msra.mxu0 %v12403_v42  ;;  %10980 = vmatpush3.bf16.msra.mxu1 %v12404_v44  ;;  %v795_v58 = vpop.f32.mrb[6].mxu1  ;;  %v12430_v42 = vld [vmem:[#allocation6 + $0x540] sm:$0xff]   ;;  %v12432_v44 = vld [vmem:[#allocation6 + $0x548] sm:$0xff]   ;;  %v12434_v46 = vld [vmem:[#allocation6 + $0x550] sm:$0xff]  }
 0x1dc   : > { %v13683_v56 = vadd.f32 %v792_v50, %v691_v48  ;;  %v10688_v57 = vpop.f32.mrb[7].mxu0  ;;  %10961 = vmatprep.subr.bf16.mxu0 %v13197_v0  ;;  %10981 = vmatprep.subr.bf16.mxu1 %v13197_v0  ;;  %v10708_v60 = vpop.f32.mrb[7].mxu1  ;;  %v12436_v48 = vld [vmem:[#allocation6 + $0x558] sm:$0xff]   ;;  %v12437_v49 = vld [vmem:[#allocation6 + $0x520] sm:$0xff]  }
 0x1dd   : > { %v12438_v50 = vld [vmem:[#allocation6 + $0x560] sm:$0xff]   ;;  %v12446_v54 = vld [vmem:[%s13468_s15 + $0x60] sm:$0x1f]   ;;  %v2608_v57 = vshll.u32 %v12445_v52, 16  ;;  %v12467_v52 = vld [vmem:[#allocation6 + $0x608] sm:$0xff]  }
 0x1de   : > { %v2729_v63 = vshll.u32 %v12446_v54, 16 }
 0x1df   : > { %10962 = vmatpush3.bf16.msra.mxu0 %v12405_v47  ;;  %10982 = vmatpush3.bf16.msra.mxu1 %v12406_v51  ;;  %v12435_v47 = vld [vmem:[#allocation6 + $0x518] sm:$0xff]   ;;  %v12439_v51 = vld [vmem:[#allocation6 + $0x528] sm:$0xff]  }
 0x1e0   : > { %10963 = vmatprep.subr.bf16.mxu0 %v13197_v0  ;;  %10983 = vmatprep.subr.bf16.mxu1 %v13197_v0 }
 0x1e3   : > { %10964 = vmatpush3.bf16.msra.mxu0 %v12407_v59  ;;  %10984 = vmatpush3.bf16.msra.mxu1 %v12408_v61  ;;  %v12442_v61 = vld [vmem:[#allocation6 + $0x570] sm:$0xff]  }
 0x1e4   : > { %10989 = vmatprep.subr.bf16.mxu0 %v13197_v0  ;;  %11009 = vmatprep.subr.bf16.mxu1 %v13197_v0 }
 0x1e6   : > { %10966 = vmatmul.mubr.bf16.vlgmr.msra.gmra.mrb[32].mxu0 %v2127_v3  ;;  %10986 = vmatmul.mubr.bf16.vlgmr.msra.gmra.mrb[32].mxu1 %v2248_v5 }
 0x1e7   : > { %10990 = vmatpush3.bf16.msra.mxu0 %v12411_v4  ;;  %11010 = vmatpush3.bf16.msra.mxu1 %v12412_v6  ;;  %v12443_v6 = vld [vmem:[#allocation6 + $0x538] sm:$0xff]  }
 0x1e8   : > { %10991 = vmatprep.subr.bf16.mxu0 %v13197_v0  ;;  %11011 = vmatprep.subr.bf16.mxu1 %v13197_v0 }
 0x1e9   : > { %11005 = vmatprep.mubr.msk.bf16.mxu0 %vm13198_vm0, %v13197_v0  ;;  %11025 = vmatprep.mubr.msk.bf16.mxu1 %vm13198_vm0, %v13197_v0 }
 0x1eb   : > { %10992 = vmatpush3.bf16.msra.mxu0 %v12413_v7  ;;  %11012 = vmatpush3.bf16.msra.mxu1 %v12414_v8  ;;  %v2610_v7 = vrot.slane %v2608_v57, 1  ;;  %v12472_v57 = vld [vmem:[#allocation6 + $0x58] sm:$0xff]  }
 0x1ec   : > { %10993 = vmatprep.subr.bf16.mxu0 %v13197_v0  ;;  %11013 = vmatprep.subr.bf16.mxu1 %v13197_v0 }
 0x1ef   : > { %10994 = vmatpush3.bf16.msra.mxu0 %v12415_v9  ;;  %11014 = vmatpush3.bf16.msra.mxu1 %v12416_v10  ;;  %v12444_v9 = vld [vmem:[#allocation6 + $0x578] sm:$0xff]   ;;  %v2727_v10 = vshrl.u32 %v12446_v54, 16  ;;  %v12469_v54 = vld [vmem:[#allocation6 + $0x610] sm:$0xff]  }
 0x1f0   : > { %10995 = vmatprep.subr.bf16.mxu0 %v13197_v0  ;;  %11015 = vmatprep.subr.bf16.mxu1 %v13197_v0 }
 0x1f3   : > { %10996 = vmatpush3.bf16.msra.mxu0 %v12417_v11  ;;  %11016 = vmatpush3.bf16.msra.mxu1 %v12418_v12  ;;  %v2731_v11 = vrot.slane %v2729_v63, 1  ;;  %v2611_v12 = vor.u32 %v2610_v7, %v2606_v62  ;;  %v12481_v62 = vld [vmem:[%s13468_s15 + $0x78] sm:$0x1f]  }
 0x1f4   : > { %10997 = vmatprep.subr.bf16.mxu0 %v13197_v0  ;;  %11017 = vmatprep.subr.bf16.mxu1 %v13197_v0 }
 0x1f7   : > { %10998 = vmatpush3.bf16.msra.mxu0 %v12419_v13  ;;  %11018 = vmatpush3.bf16.msra.mxu1 %v12420_v14  ;;  %v12447_v13 = vld [vmem:[#allocation6 + $0x580] sm:$0xff]   ;;  %v2732_v14 = vor.u32 %v2731_v11, %v2727_v10 }
 0x1f8   : > { %10999 = vmatprep.subr.bf16.mxu0 %v13197_v0  ;;  %11019 = vmatprep.subr.bf16.mxu1 %v13197_v0 }
 0x1f9   : > { %v899_v19 = vpop.f32.mrb[8].mxu0  ;;  %v1006_v24 = vpop.f32.mrb[8].mxu1 }
 0x1fa   : > { %v905_v22 = vadd.f32 %v899_v19, %v13683_v56  ;;  %v10727_v23 = vpop.f32.mrb[9].mxu0  ;;  %v10747_v29 = vpop.f32.mrb[9].mxu1  ;;  %v12441_v56 = vld [vmem:[#allocation6 + $0x530] sm:$0xff]  }
 0x1fb   : > { %v902_v28 = vpop.f32.mrb[10].mxu0  ;;  %11000 = vmatpush3.bf16.msra.mxu0 %v12421_v15  ;;  %11020 = vmatpush3.bf16.msra.mxu1 %v12422_v17  ;;  %v1009_v32 = vpop.f32.mrb[10].mxu1  ;;  %v12448_v15 = vld [vmem:[#allocation6 + $0x5c0] sm:$0xff]   ;;  %v12450_v17 = vld [vmem:[#allocation6 + $0x5c8] sm:$0xff]   ;;  %v12452_v19 = vld [vmem:[#allocation6 + $0x5d0] sm:$0xff]  }
 0x1fc   : > { %v13708_v30 = vadd.f32 %v1006_v24, %v905_v22  ;;  %v10728_v31 = vpop.f32.mrb[11].mxu0  ;;  %11001 = vmatprep.subr.bf16.mxu0 %v13197_v0  ;;  %11021 = vmatprep.subr.bf16.mxu1 %v13197_v0  ;;  %v10748_v35 = vpop.f32.mrb[11].mxu1  ;;  %v12455_v22 = vld [vmem:[#allocation6 + $0x5a0] sm:$0xff]   ;;  %v12457_v24 = vld [vmem:[#allocation6 + $0x5a8] sm:$0xff]   ;;  %v12459_v29 = vld [vmem:[#allocation6 + $0x5b0] sm:$0xff]  }
 0x1fd   : > { %v12456_v23 = vld [vmem:[#allocation6 + $0x5e0] sm:$0xff]  }
 0x1ff   : > { %11002 = vmatpush3.bf16.msra.mxu0 %v12423_v20  ;;  %11022 = vmatpush3.bf16.msra.mxu1 %v12424_v25  ;;  %v12453_v20 = vld [vmem:[#allocation6 + $0x598] sm:$0xff]  }
 0x200   : > { %11003 = vmatprep.subr.bf16.mxu0 %v13197_v0  ;;  %11023 = vmatprep.subr.bf16.mxu1 %v13197_v0  ;;  %v12463_v25 = vld [vmem:[%s13468_s15 + $0x68] sm:$0x1f]  }
 0x201   : > { %v2848_v35 = vshrl.u32 %v12463_v25, 16 }
 0x203   : > { %11004 = vmatpush3.bf16.msra.mxu0 %v12425_v33  ;;  %11024 = vmatpush3.bf16.msra.mxu1 %v12426_v36  ;;  %v2971_v36 = vshll.u32 %v12464_v27, 16 }
 0x204   : > { %11029 = vmatprep.subr.bf16.mxu0 %v13197_v0  ;;  %11049 = vmatprep.subr.bf16.mxu1 %v13197_v0 }
 0x206   : > { %11006 = vmatmul.mubr.bf16.vlgmr.msra.gmra.mrb[36].mxu0 %v2369_v39  ;;  %11026 = vmatmul.mubr.bf16.vlgmr.msra.gmra.mrb[36].mxu1 %v2490_v41 }
 0x207   : > { %11030 = vmatpush3.bf16.msra.mxu0 %v12429_v40  ;;  %11050 = vmatpush3.bf16.msra.mxu1 %v12430_v42  ;;  %v12461_v42 = vld [vmem:[#allocation6 + $0x5b8] sm:$0xff]  }
 0x208   : > { %11031 = vmatprep.subr.bf16.mxu0 %v13197_v0  ;;  %11051 = vmatprep.subr.bf16.mxu1 %v13197_v0 }
 0x209   : > { %11045 = vmatprep.mubr.msk.bf16.mxu0 %vm13198_vm0, %v13197_v0  ;;  %11065 = vmatprep.mubr.msk.bf16.mxu1 %vm13198_vm0, %v13197_v0 }
 0x20b   : > { %11032 = vmatpush3.bf16.msra.mxu0 %v12431_v43  ;;  %11052 = vmatpush3.bf16.msra.mxu1 %v12432_v44 }
 0x20c   : > { %11033 = vmatprep.subr.bf16.mxu0 %v13197_v0  ;;  %11053 = vmatprep.subr.bf16.mxu1 %v13197_v0 }
 0x20f   : > { %11034 = vmatpush3.bf16.msra.mxu0 %v12433_v45  ;;  %11054 = vmatpush3.bf16.msra.mxu1 %v12434_v46  ;;  %v12462_v45 = vld [vmem:[#allocation6 + $0x5f8] sm:$0xff]   ;;  %v2969_v46 = vshrl.u32 %v12464_v27, 16  ;;  %v12490_v27 = vld [vmem:[#allocation6 + $0x20] sm:$0xff]  }
 0x210   : > { %11035 = vmatprep.subr.bf16.mxu0 %v13197_v0  ;;  %11055 = vmatprep.subr.bf16.mxu1 %v13197_v0 }
 0x213   : > { %11036 = vmatpush3.bf16.msra.mxu0 %v12435_v47  ;;  %11056 = vmatpush3.bf16.msra.mxu1 %v12436_v48  ;;  %v2973_v47 = vrot.slane %v2971_v36, 1  ;;  %v12495_v36 = vld [vmem:[#allocation6 + $0xb0] sm:$0xff]  }
 0x214   : > { %11037 = vmatprep.subr.bf16.mxu0 %v13197_v0  ;;  %11057 = vmatprep.subr.bf16.mxu1 %v13197_v0 }
 0x217   : > { %11038 = vmatpush3.bf16.msra.mxu0 %v12437_v49  ;;  %11058 = vmatpush3.bf16.msra.mxu1 %v12438_v50  ;;  %v12465_v49 = vld [vmem:[#allocation6 + $0x600] sm:$0xff]   ;;  %v2974_v50 = vor.u32 %v2973_v47, %v2969_v46 }
 0x218   : > { %11039 = vmatprep.subr.bf16.mxu0 %v13197_v0  ;;  %11059 = vmatprep.subr.bf16.mxu1 %v13197_v0  ;;  %v3407_v46 = vld [vmem:[%s13468_s15 + $0x28] sm:$0xf] }
 0x219   : > { %v1113_v55 = vpop.f32.mrb[12].mxu0  ;;  %v1220_v60 = vpop.f32.mrb[12].mxu1  ;;  %v12498_v47 = vld [vmem:[#allocation6 + $0xc0] sm:$0xff]  }
 0x21a   : > { %v1119_v58 = vadd.f32 %v1113_v55, %v13708_v30  ;;  %v10767_v59 = vpop.f32.mrb[13].mxu0  ;;  %v10787_v2 = vpop.f32.mrb[13].mxu1  ;;  %v2850_v30 = vshll.u32 %v12463_v25, 16  ;;  %v12470_v55 = vld [vmem:[#allocation6 + $0x50] sm:$0xff]   ;;  %v12488_v25 = vld [vmem:[#allocation6 + $0x18] sm:$0xff]  }
 0x21b   : > { %v1116_v1 = vpop.f32.mrb[14].mxu0  ;;  %11040 = vmatpush3.bf16.msra.mxu0 %v12439_v51  ;;  %11060 = vmatpush3.bf16.msra.mxu1 %v12440_v53  ;;  %v1223_v5 = vpop.f32.mrb[14].mxu1  ;;  %v12466_v51 = vld [vmem:[#allocation6 + $0x40] sm:$0xff]   ;;  %v12468_v53 = vld [vmem:[#allocation6 + $0x48] sm:$0xff]  }
 0x21c   : > { %v13733_v3 = vadd.f32 %v1220_v60, %v1119_v58  ;;  %v10768_v4 = vpop.f32.mrb[15].mxu0  ;;  %11041 = vmatprep.subr.bf16.mxu0 %v13197_v0  ;;  %11061 = vmatprep.subr.bf16.mxu1 %v13197_v0  ;;  %v10788_v8 = vpop.f32.mrb[15].mxu1  ;;  %v2852_v43 = vrot.slane %v2850_v30, 1  ;;  %v12473_v58 = vld [vmem:[#allocation6 + $0x620] sm:$0xff]   ;;  %v12475_v60 = vld [vmem:[#allocation6 + $0x628] sm:$0xff]   ;;  %v12477_v1 = vld [vmem:[#allocation6 + $0x630] sm:$0xff]  }
 0x21d   : > { %v12474_v59 = vld [vmem:[#allocation6 + $0x60] sm:$0xff]   ;;  %v12478_v5 = vld [vmem:[#allocation6 + $0x70] sm:$0xff]   ;;  %v12493_v30 = vld [vmem:[#allocation6 + $0xa8] sm:$0xff]  }
 0x21e   : > { %v2853_v48 = vor.u32 %v2852_v43, %v2848_v35  ;;  %v12494_v35 = vld [vmem:[#allocation6 + $0x30] sm:$0xff]  }
 0x21f   : > { %11042 = vmatpush3.bf16.msra.mxu0 %v12441_v56  ;;  %11062 = vmatpush3.bf16.msra.mxu1 %v12442_v61  ;;  %v12471_v56 = vld [vmem:[#allocation6 + $0x618] sm:$0xff]   ;;  %v12476_v61 = vld [vmem:[#allocation6 + $0x68] sm:$0xff]  }
 0x220   : > { %11043 = vmatprep.subr.bf16.mxu0 %v13197_v0  ;;  %11063 = vmatprep.subr.bf16.mxu1 %v13197_v0 }
 0x223   : > { %11044 = vmatpush3.bf16.msra.mxu0 %v12443_v6  ;;  %11064 = vmatpush3.bf16.msra.mxu1 %v12444_v9  ;;  %v3092_v6 = vshll.u32 %v12481_v62, 16 }
 0x224   : > { %11069 = vmatprep.subr.bf16.mxu0 %v13197_v0  ;;  %11089 = vmatprep.subr.bf16.mxu1 %v13197_v0 }
 0x226   : > { %11046 = vmatmul.mubr.bf16.vlgmr.msra.gmra.mrb[40].mxu0 %v2611_v12  ;;  %11066 = vmatmul.mubr.bf16.vlgmr.msra.gmra.mrb[40].mxu1 %v2732_v14  ;;  %v12479_v12 = vld [vmem:[#allocation6 + $0x638] sm:$0xff]  }
 0x227   : > { %11070 = vmatpush3.bf16.msra.mxu0 %v12447_v13  ;;  %11090 = vmatpush3.bf16.msra.mxu1 %v12448_v15  ;;  %v12480_v14 = vld [vmem:[#allocation6 + $0x78] sm:$0xff]   ;;  %v3090_v15 = vshrl.u32 %v12481_v62, 16 }
 0x228   : > { %11071 = vmatprep.subr.bf16.mxu0 %v13197_v0  ;;  %11091 = vmatprep.subr.bf16.mxu1 %v13197_v0 }
 0x229   : > { %11085 = vmatprep.mubr.msk.bf16.mxu0 %vm13198_vm0, %v13197_v0  ;;  %11105 = vmatprep.mubr.msk.bf16.mxu1 %vm13198_vm0, %v13197_v0 }
 0x22b   : > { %11072 = vmatpush3.bf16.msra.mxu0 %v12449_v16  ;;  %11092 = vmatpush3.bf16.msra.mxu1 %v12450_v17  ;;  %v3094_v16 = vrot.slane %v3092_v6, 1 }
 0x22c   : > { %11073 = vmatprep.subr.bf16.mxu0 %v13197_v0  ;;  %11093 = vmatprep.subr.bf16.mxu1 %v13197_v0 }
 0x22d   : > { %v3095_v17 = vor.u32 %v3094_v16, %v3090_v15  ;;  %v12517_v15 = vld [vmem:[#allocation6 + $0x188] sm:$0xff]   ;;  %v12518_v16 = vld [vmem:[#allocation6 + $0x150] sm:$0xff]  }
 0x22f   : > { %11074 = vmatpush3.bf16.msra.mxu0 %v12451_v18  ;;  %11094 = vmatpush3.bf16.msra.mxu1 %v12452_v19  ;;  %v3214_v18 = vld [vmem:[%s13468_s15 + $0x20] sm:$0xf]  ;;  %v12482_v19 = vld [vmem:[#allocation6] sm:$0xff]  }
 0x230   : > { %11075 = vmatprep.subr.bf16.mxu0 %v13197_v0  ;;  %11095 = vmatprep.subr.bf16.mxu1 %v13197_v0 }
 0x233   : > { %11076 = vmatpush3.bf16.msra.mxu0 %v12453_v20  ;;  %11096 = vmatpush3.bf16.msra.mxu1 %v12454_v21  ;;  %v12483_v20 = vld [vmem:[#allocation6 + $0x80] sm:$0xff]   ;;  %v12484_v21 = vld [vmem:[#allocation6 + $0x8] sm:$0xff]  }
 0x234   : > { %11077 = vmatprep.subr.bf16.mxu0 %v13197_v0  ;;  %11097 = vmatprep.subr.bf16.mxu1 %v13197_v0 }
 0x237   : > { %11078 = vmatpush3.bf16.msra.mxu0 %v12455_v22  ;;  %11098 = vmatpush3.bf16.msra.mxu1 %v12456_v23  ;;  %v12485_v22 = vld [vmem:[#allocation6 + $0x88] sm:$0xff]   ;;  %v12486_v23 = vld [vmem:[#allocation6 + $0x10] sm:$0xff]  }
 0x238   : > { %11079 = vmatprep.subr.bf16.mxu0 %v13197_v0  ;;  %11099 = vmatprep.subr.bf16.mxu1 %v13197_v0 }
 0x239   : > { %v1327_v28 = vpop.f32.mrb[16].mxu0  ;;  %v1434_v33 = vpop.f32.mrb[16].mxu1 }
 0x23a   : > { %v1333_v31 = vadd.f32 %v1327_v28, %v13733_v3  ;;  %v10807_v32 = vpop.f32.mrb[17].mxu0  ;;  %v10827_v38 = vpop.f32.mrb[17].mxu1  ;;  %v12491_v28 = vld [vmem:[#allocation6 + $0xa0] sm:$0xff]  }
 0x23b   : > { %v1330_v37 = vpop.f32.mrb[18].mxu0  ;;  %11080 = vmatpush3.bf16.msra.mxu0 %v12457_v24  ;;  %11100 = vmatpush3.bf16.msra.mxu1 %v12458_v26  ;;  %v1437_v41 = vpop.f32.mrb[18].mxu1  ;;  %v12487_v24 = vld [vmem:[#allocation6 + $0x90] sm:$0xff]   ;;  %v12489_v26 = vld [vmem:[#allocation6 + $0x98] sm:$0xff]  }
 0x23c   : > { %v1440_v39 = vadd.f32 %v1434_v33, %v1333_v31  ;;  %v10808_v40 = vpop.f32.mrb[19].mxu0  ;;  %11081 = vmatprep.subr.bf16.mxu0 %v13197_v0  ;;  %11101 = vmatprep.subr.bf16.mxu1 %v13197_v0  ;;  %v10828_v44 = vpop.f32.mrb[19].mxu1 }
 0x23d   : > { %v12497_v44 = vld [vmem:[#allocation6 + $0xb8] sm:$0xff]  }
 0x23f   : > { %11082 = vmatpush3.bf16.msra.mxu0 %v12459_v29  ;;  %11102 = vmatpush3.bf16.msra.mxu1 %v12460_v34  ;;  %v12492_v29 = vld [vmem:[#allocation6 + $0x28] sm:$0xff]  }
 0x240   : > { %11083 = vmatprep.subr.bf16.mxu0 %v13197_v0  ;;  %11103 = vmatprep.subr.bf16.mxu1 %v13197_v0 }
 0x243   : > { %11084 = vmatpush3.bf16.msra.mxu0 %v12461_v42  ;;  %11104 = vmatpush3.bf16.msra.mxu1 %v12462_v45  ;;  %v12496_v42 = vld [vmem:[#allocation6 + $0x38] sm:$0xff]   ;;  %v3197_v45 = vld [vmem:[%s13468_s15 + $0x18] sm:$0xf] }
 0x244   : > { %11109 = vmatprep.subr.bf16.mxu0 %v13197_v0  ;;  %11129 = vmatprep.subr.bf16.mxu1 %v13197_v0 }
 0x246   : > { %11086 = vmatmul.mubr.bf16.vlgmr.msra.gmra.mrb[44].mxu0 %v2853_v48  ;;  %11106 = vmatmul.mubr.bf16.vlgmr.msra.gmra.mrb[44].mxu1 %v2974_v50  ;;  %v12499_v48 = vld [vmem:[#allocation6 + $0x100] sm:$0xff]   ;;  %v12501_v50 = vld [vmem:[#allocation6 + $0x108] sm:$0xff]  }
 0x247   : > { %11110 = vmatpush3.bf16.msra.mxu0 %v12465_v49  ;;  %11130 = vmatpush3.bf16.msra.mxu1 %v12466_v51  ;;  %v12500_v49 = vld [vmem:[#allocation6 + $0xc8] sm:$0xff]   ;;  %v12502_v51 = vld [vmem:[#allocation6 + $0xd0] sm:$0xff]  }
 0x248   : > { %11111 = vmatprep.subr.bf16.mxu0 %v13197_v0  ;;  %11131 = vmatprep.subr.bf16.mxu1 %v13197_v0 }
 0x249   : > { %11125 = vmatprep.mubr.msk.bf16.mxu0 %vm13198_vm0, %v13197_v0  ;;  %11145 = vmatprep.mubr.msk.bf16.mxu1 %vm13198_vm0, %v13197_v0 }
 0x24b   : > { %11112 = vmatpush3.bf16.msra.mxu0 %v12467_v52  ;;  %11132 = vmatpush3.bf16.msra.mxu1 %v12468_v53  ;;  %v12503_v52 = vld [vmem:[#allocation6 + $0x110] sm:$0xff]   ;;  %v12504_v53 = vld [vmem:[#allocation6 + $0xd8] sm:$0xff]  }
 0x24c   : > { %11113 = vmatprep.subr.bf16.mxu0 %v13197_v0  ;;  %11133 = vmatprep.subr.bf16.mxu1 %v13197_v0 }
 0x24f   : > { %11114 = vmatpush3.bf16.msra.mxu0 %v12469_v54  ;;  %11134 = vmatpush3.bf16.msra.mxu1 %v12470_v55  ;;  %v12505_v54 = vld [vmem:[#allocation6 + $0x118] sm:$0xff]   ;;  %v12506_v55 = vld [vmem:[#allocation6 + $0xe0] sm:$0xff]  }
 0x250   : > { %11115 = vmatprep.subr.bf16.mxu0 %v13197_v0  ;;  %11135 = vmatprep.subr.bf16.mxu1 %v13197_v0 }
 0x253   : > { %11116 = vmatpush3.bf16.msra.mxu0 %v12471_v56  ;;  %11136 = vmatpush3.bf16.msra.mxu1 %v12472_v57  ;;  %v12507_v56 = vld [vmem:[#allocation6 + $0x120] sm:$0xff]   ;;  %v12508_v57 = vld [vmem:[#allocation6 + $0xe8] sm:$0xff]  }
 0x254   : > { %11117 = vmatprep.subr.bf16.mxu0 %v13197_v0  ;;  %11137 = vmatprep.subr.bf16.mxu1 %v13197_v0 }
 0x257   : > { %11118 = vmatpush3.bf16.msra.mxu0 %v12473_v58  ;;  %11138 = vmatpush3.bf16.msra.mxu1 %v12474_v59  ;;  %v12509_v58 = vld [vmem:[#allocation6 + $0x128] sm:$0xff]  }
 0x258   : > { %11119 = vmatprep.subr.bf16.mxu0 %v13197_v0  ;;  %11139 = vmatprep.subr.bf16.mxu1 %v13197_v0 }
 0x259   : > { %v1541_v63 = vpop.f32.mrb[20].mxu0  ;;  %v1648_v4 = vpop.f32.mrb[20].mxu1 }
 0x25a   : > { %v1547_v2 = vadd.f32 %v1541_v63, %v1440_v39  ;;  %v10847_v3 = vpop.f32.mrb[21].mxu0  ;;  %v10867_v8 = vpop.f32.mrb[21].mxu1  ;;  %v12510_v63 = vld [vmem:[#allocation6 + $0xf0] sm:$0xff]  }
 0x25b   : > { %v1544_v7 = vpop.f32.mrb[22].mxu0  ;;  %11120 = vmatpush3.bf16.msra.mxu0 %v12475_v60  ;;  %11140 = vmatpush3.bf16.msra.mxu1 %v12476_v61  ;;  %v1651_v11 = vpop.f32.mrb[22].mxu1 }
 0x25c   : > { %v1654_v9 = vadd.f32 %v1648_v4, %v1547_v2  ;;  %v10848_v10 = vpop.f32.mrb[23].mxu0  ;;  %11121 = vmatprep.subr.bf16.mxu0 %v13197_v0  ;;  %11141 = vmatprep.subr.bf16.mxu1 %v13197_v0  ;;  %v10868_v13 = vpop.f32.mrb[23].mxu1  ;;  %v12512_v7 = vld [vmem:[#allocation6 + $0xf8] sm:$0xff]   ;;  %v3619_v11 = vld [vmem:[%s13468_s15 + $0x38] sm:$0xf] }
 0x25d   : > { %v3513_v10 = vld [vmem:[%s13468_s15 + $0x30] sm:$0xf] }
 0x25e   : > { %v12515_v13 = vld [vmem:[#allocation6 + $0x180] sm:$0xff]  }
 0x25f   : > { %11122 = vmatpush3.bf16.msra.mxu0 %v12477_v1  ;;  %11142 = vmatpush3.bf16.msra.mxu1 %v12478_v5  ;;  %v12511_v1 = vld [vmem:[#allocation6 + $0x130] sm:$0xff]  }
 0x260   : > { %11123 = vmatprep.subr.bf16.mxu0 %v13197_v0  ;;  %11143 = vmatprep.subr.bf16.mxu1 %v13197_v0 }
 0x263   : > { %11124 = vmatpush3.bf16.msra.mxu0 %v12479_v12  ;;  %11144 = vmatpush3.bf16.msra.mxu1 %v12480_v14  ;;  %v12514_v12 = vld [vmem:[#allocation6 + $0x140] sm:$0xff]   ;;  %v12516_v14 = vld [vmem:[#allocation6 + $0x148] sm:$0xff]  }
 0x264   : > { %11149 = vmatprep.subr.bf16.mxu0 %v13197_v0  ;;  %11169 = vmatprep.subr.bf16.mxu1 %v13197_v0 }
 0x266   : > { %11126 = vmatmul.mubr.bf16.vlgmr.msra.gmra.mrb[48].mxu0 %v3095_v17  ;;  %11146 = vmatmul.mubr.bf16.vlgmr.msra.gmra.mrb[48].mxu1 %v3214_v18  ;;  %v12519_v17 = vld [vmem:[#allocation6 + $0x190] sm:$0xff]   ;;  %v12520_v18 = vld [vmem:[#allocation6 + $0x158] sm:$0xff]  }
 0x267   : > { %11150 = vmatpush3.bf16.msra.mxu0 %v12482_v19  ;;  %11170 = vmatpush3.bf16.msra.mxu1 %v12483_v20  ;;  %v12521_v19 = vld [vmem:[#allocation6 + $0x198] sm:$0xff]   ;;  %v12522_v20 = vld [vmem:[#allocation6 + $0x160] sm:$0xff]  }
 0x268   : > { %11151 = vmatprep.subr.bf16.mxu0 %v13197_v0  ;;  %11171 = vmatprep.subr.bf16.mxu1 %v13197_v0 }
 0x269   : > { %11165 = vmatprep.mubr.msk.bf16.mxu0 %vm13198_vm0, %v13197_v0  ;;  %11185 = vmatprep.mubr.msk.bf16.mxu1 %vm13198_vm0, %v13197_v0 }
 0x26b   : > { %11152 = vmatpush3.bf16.msra.mxu0 %v12484_v21  ;;  %11172 = vmatpush3.bf16.msra.mxu1 %v12485_v22  ;;  %v12523_v21 = vld [vmem:[#allocation6 + $0x1a0] sm:$0xff]   ;;  %v12524_v22 = vld [vmem:[#allocation6 + $0x168] sm:$0xff]  }
 0x26c   : > { %11153 = vmatprep.subr.bf16.mxu0 %v13197_v0  ;;  %11173 = vmatprep.subr.bf16.mxu1 %v13197_v0 }
 0x26f   : > { %11154 = vmatpush3.bf16.msra.mxu0 %v12486_v23  ;;  %11174 = vmatpush3.bf16.msra.mxu1 %v12487_v24  ;;  %v12525_v23 = vld [vmem:[#allocation6 + $0x1a8] sm:$0xff]  }
 0x270   : > { %11155 = vmatprep.subr.bf16.mxu0 %v13197_v0  ;;  %11175 = vmatprep.subr.bf16.mxu1 %v13197_v0 }
 0x273   : > { %11156 = vmatpush3.bf16.msra.mxu0 %v12488_v25  ;;  %11176 = vmatpush3.bf16.msra.mxu1 %v12489_v26 }
 0x274   : > { %11157 = vmatprep.subr.bf16.mxu0 %v13197_v0  ;;  %11177 = vmatprep.subr.bf16.mxu1 %v13197_v0 }
 0x277   : > { %11158 = vmatpush3.bf16.msra.mxu0 %v12490_v27  ;;  %11178 = vmatpush3.bf16.msra.mxu1 %v12491_v28  ;;  %v12526_v28 = vld [vmem:[#allocation6 + $0x170] sm:$0xff]  }
 0x278   : > { %11159 = vmatprep.subr.bf16.mxu0 %v13197_v0  ;;  %11179 = vmatprep.subr.bf16.mxu1 %v13197_v0 }
 0x279   : > { %v1755_v31 = vpop.f32.mrb[24].mxu0  ;;  %v1862_v34 = vpop.f32.mrb[24].mxu1 }
 0x27a   : > { %v1761_v32 = vadd.f32 %v1755_v31, %v1654_v9  ;;  %v10887_v33 = vpop.f32.mrb[25].mxu0  ;;  %v10907_v38 = vpop.f32.mrb[25].mxu1  ;;  %v12513_v9 = vld [vmem:[#allocation6 + $0x138] sm:$0xff]  }
 0x27b   : > { %v1758_v37 = vpop.f32.mrb[26].mxu0  ;;  %11160 = vmatpush3.bf16.msra.mxu0 %v12492_v29  ;;  %11180 = vmatpush3.bf16.msra.mxu1 %v12493_v30  ;;  %v1865_v41 = vpop.f32.mrb[26].mxu1  ;;  %v12527_v29 = vld [vmem:[#allocation6 + $0x1b0] sm:$0xff]   ;;  %v3725_v38 = vld [vmem:[%s13468_s15 + $0x70] sm:$0xf] }
 0x27c   : > { %v1868_v39 = vadd.f32 %v1862_v34, %v1761_v32  ;;  %v10888_v40 = vpop.f32.mrb[27].mxu0  ;;  %11161 = vmatprep.subr.bf16.mxu0 %v13197_v0  ;;  %11181 = vmatprep.subr.bf16.mxu1 %v13197_v0  ;;  %v10908_v43 = vpop.f32.mrb[27].mxu1  ;;  %v12529_v37 = vld [vmem:[#allocation6 + $0x1b8] sm:$0xff]   ;;  %v12531_v41 = vld [vmem:[#allocation6 + $0x200] sm:$0xff]  }
 0x27d   : > { %v12530_v40 = vld [vmem:[#allocation6 + $0x1c0] sm:$0xff]   ;;  %v12533_v43 = vld [vmem:[#allocation6 + $0x208] sm:$0xff]  }
 0x27f   : > { %11162 = vmatpush3.bf16.msra.mxu0 %v12494_v35  ;;  %11182 = vmatpush3.bf16.msra.mxu1 %v12495_v36  ;;  %v12528_v36 = vld [vmem:[#allocation6 + $0x178] sm:$0xff]  }
 0x280   : > { %11163 = vmatprep.subr.bf16.mxu0 %v13197_v0  ;;  %11183 = vmatprep.subr.bf16.mxu1 %v13197_v0 }
 0x283   : > { %11164 = vmatpush3.bf16.msra.mxu0 %v12496_v42  ;;  %11184 = vmatpush3.bf16.msra.mxu1 %v12497_v44  ;;  %v12532_v42 = vld [vmem:[#allocation6 + $0x1c8] sm:$0xff]   ;;  %v12534_v44 = vld [vmem:[#allocation6 + $0x1d0] sm:$0xff]  }
 0x284   : > { %11189 = vmatprep.subr.bf16.mxu0 %v13197_v0  ;;  %11209 = vmatprep.subr.bf16.mxu1 %v13197_v0 }
 0x286   : > { %11166 = vmatmul.mubr.bf16.vlgmr.msra.gmra.mrb[52].mxu0 %v3197_v45  ;;  %11186 = vmatmul.mubr.bf16.vlgmr.msra.gmra.mrb[52].mxu1 %v3407_v46  ;;  %v12535_v45 = vld [vmem:[#allocation6 + $0x210] sm:$0xff]   ;;  %v12536_v46 = vld [vmem:[#allocation6 + $0x1d8] sm:$0xff]  }
 0x287   : > { %11190 = vmatpush3.bf16.msra.mxu0 %v12498_v47  ;;  %11210 = vmatpush3.bf16.msra.mxu1 %v12499_v48  ;;  %v12537_v47 = vld [vmem:[#allocation6 + $0x218] sm:$0xff]   ;;  %v12538_v48 = vld [vmem:[#allocation6 + $0x1e0] sm:$0xff]  }
 0x288   : > { %11191 = vmatprep.subr.bf16.mxu0 %v13197_v0  ;;  %11211 = vmatprep.subr.bf16.mxu1 %v13197_v0 }
 0x289   : > { %11205 = vmatprep.mubr.msk.bf16.mxu0 %vm13198_vm0, %v13197_v0  ;;  %11225 = vmatprep.mubr.msk.bf16.mxu1 %vm13198_vm0, %v13197_v0 }
 0x28b   : > { %11192 = vmatpush3.bf16.msra.mxu0 %v12500_v49  ;;  %11212 = vmatpush3.bf16.msra.mxu1 %v12501_v50  ;;  %v12539_v49 = vld [vmem:[#allocation6 + $0x220] sm:$0xff]   ;;  %v12540_v50 = vld [vmem:[#allocation6 + $0x1e8] sm:$0xff]  }
 0x28c   : > { %11193 = vmatprep.subr.bf16.mxu0 %v13197_v0  ;;  %11213 = vmatprep.subr.bf16.mxu1 %v13197_v0 }
 0x28f   : > { %11194 = vmatpush3.bf16.msra.mxu0 %v12502_v51  ;;  %11214 = vmatpush3.bf16.msra.mxu1 %v12503_v52  ;;  %v12541_v51 = vld [vmem:[#allocation6 + $0x228] sm:$0xff]  }
 0x290   : > { %11195 = vmatprep.subr.bf16.mxu0 %v13197_v0  ;;  %11215 = vmatprep.subr.bf16.mxu1 %v13197_v0 }
 0x293   : > { %11196 = vmatpush3.bf16.msra.mxu0 %v12504_v53  ;;  %11216 = vmatpush3.bf16.msra.mxu1 %v12505_v54 }
 0x294   : > { %11197 = vmatprep.subr.bf16.mxu0 %v13197_v0  ;;  %11217 = vmatprep.subr.bf16.mxu1 %v13197_v0 }
 0x297   : > { %11198 = vmatpush3.bf16.msra.mxu0 %v12506_v55  ;;  %11218 = vmatpush3.bf16.msra.mxu1 %v12507_v56  ;;  %v12542_v56 = vld [vmem:[#allocation6 + $0x1f0] sm:$0xff]  }
 0x298   : > { %11199 = vmatprep.subr.bf16.mxu0 %v13197_v0  ;;  %11219 = vmatprep.subr.bf16.mxu1 %v13197_v0 }
 0x299   : > { %v1969_v59 = vpop.f32.mrb[28].mxu0  ;;  %v2090_v62 = vpop.f32.mrb[28].mxu1 }
 0x29a   : > { %v1975_v60 = vadd.f32 %v1969_v59, %v1868_v39  ;;  %v10927_v61 = vpop.f32.mrb[29].mxu0  ;;  %v10947_v3 = vpop.f32.mrb[29].mxu1  ;;  %v3831_v39 = vld [vmem:[%s13468_s15 + $0x78] sm:$0xf] }
 0x29b   : > { %v1972_v2 = vpop.f32.mrb[30].mxu0  ;;  %11200 = vmatpush3.bf16.msra.mxu0 %v12508_v57  ;;  %11220 = vmatpush3.bf16.msra.mxu1 %v12509_v58  ;;  %v2093_v6 = vpop.f32.mrb[30].mxu1  ;;  %v12543_v57 = vld [vmem:[#allocation6 + $0x230] sm:$0xff]  }
 0x29c   : > { %v2096_v4 = vadd.f32 %v2090_v62, %v1975_v60  ;;  %v10928_v5 = vpop.f32.mrb[31].mxu0  ;;  %11201 = vmatprep.subr.bf16.mxu0 %v13197_v0  ;;  %11221 = vmatprep.subr.bf16.mxu1 %v13197_v0  ;;  %v10948_v8 = vpop.f32.mrb[31].mxu1  ;;  %v12545_v2 = vld [vmem:[#allocation6 + $0x238] sm:$0xff]   ;;  %v12547_v6 = vld [vmem:[#allocation6 + $0x280] sm:$0xff]  }
 0x29d   : > { %v3937_v3 = vld [vmem:[%s13468_s15 + $0x80] sm:$0xf]  ;;  %v12546_v5 = vld [vmem:[#allocation6 + $0x240] sm:$0xff]   ;;  %v12549_v8 = vld [vmem:[#allocation6 + $0x288] sm:$0xff]  }
 0x29f   : > { %11202 = vmatpush3.bf16.msra.mxu0 %v12510_v63  ;;  %11222 = vmatpush3.bf16.msra.mxu1 %v12511_v1  ;;  %v12544_v1 = vld [vmem:[#allocation6 + $0x1f8] sm:$0xff]  }
 0x2a0   : > { %11203 = vmatprep.subr.bf16.mxu0 %v13197_v0  ;;  %11223 = vmatprep.subr.bf16.mxu1 %v13197_v0 }
 0x2a3   : > { %11204 = vmatpush3.bf16.msra.mxu0 %v12512_v7  ;;  %11224 = vmatpush3.bf16.msra.mxu1 %v12513_v9  ;;  %v12548_v7 = vld [vmem:[#allocation6 + $0x248] sm:$0xff]   ;;  %v12550_v9 = vld [vmem:[#allocation6 + $0x250] sm:$0xff]  }
 0x2a4   : > { %11229 = vmatprep.subr.bf16.mxu0 %v13197_v0  ;;  %11249 = vmatprep.subr.bf16.mxu1 %v13197_v0 }
 0x2a6   : > { %11206 = vmatmul.mubr.bf16.vlgmr.msra.gmra.mrb[56].mxu0 %v3513_v10  ;;  %11226 = vmatmul.mubr.bf16.vlgmr.msra.gmra.mrb[56].mxu1 %v3619_v11  ;;  %v12551_v10 = vld [vmem:[#allocation6 + $0x290] sm:$0xff]   ;;  %v12552_v11 = vld [vmem:[#allocation6 + $0x258] sm:$0xff]  }
 0x2a7   : > { %11230 = vmatpush3.bf16.msra.mxu0 %v12514_v12  ;;  %11250 = vmatpush3.bf16.msra.mxu1 %v12515_v13  ;;  %v12553_v12 = vld [vmem:[#allocation6 + $0x298] sm:$0xff]   ;;  %v12554_v13 = vld [vmem:[#allocation6 + $0x260] sm:$0xff]  }
 0x2a8   : > { %11231 = vmatprep.subr.bf16.mxu0 %v13197_v0  ;;  %11251 = vmatprep.subr.bf16.mxu1 %v13197_v0 }
 0x2a9   : > { %11245 = vmatprep.mubr.msk.bf16.mxu0 %vm13198_vm0, %v13197_v0  ;;  %11265 = vmatprep.mubr.msk.bf16.mxu1 %vm13198_vm0, %v13197_v0 }
 0x2ab   : > { %11232 = vmatpush3.bf16.msra.mxu0 %v12516_v14  ;;  %11252 = vmatpush3.bf16.msra.mxu1 %v12517_v15  ;;  %v12555_v14 = vld [vmem:[#allocation6 + $0x2a0] sm:$0xff]   ;;  %v12556_v15 = vld [vmem:[#allocation6 + $0x268] sm:$0xff]  }
 0x2ac   : > { %11233 = vmatprep.subr.bf16.mxu0 %v13197_v0  ;;  %11253 = vmatprep.subr.bf16.mxu1 %v13197_v0 }
 0x2af   : > { %11234 = vmatpush3.bf16.msra.mxu0 %v12518_v16  ;;  %11254 = vmatpush3.bf16.msra.mxu1 %v12519_v17  ;;  %v12557_v16 = vld [vmem:[#allocation6 + $0x2a8] sm:$0xff]  }
 0x2b0   : > { %11235 = vmatprep.subr.bf16.mxu0 %v13197_v0  ;;  %11255 = vmatprep.subr.bf16.mxu1 %v13197_v0 }
 0x2b3   : > { %11236 = vmatpush3.bf16.msra.mxu0 %v12520_v18  ;;  %11256 = vmatpush3.bf16.msra.mxu1 %v12521_v19 }
 0x2b4   : > { %11237 = vmatprep.subr.bf16.mxu0 %v13197_v0  ;;  %11257 = vmatprep.subr.bf16.mxu1 %v13197_v0 }
 0x2b7   : > { %11238 = vmatpush3.bf16.msra.mxu0 %v12522_v20  ;;  %11258 = vmatpush3.bf16.msra.mxu1 %v12523_v21  ;;  %v12558_v21 = vld [vmem:[#allocation6 + $0x270] sm:$0xff]  }
 0x2b8   : > { %11239 = vmatprep.subr.bf16.mxu0 %v13197_v0  ;;  %11259 = vmatprep.subr.bf16.mxu1 %v13197_v0 }
 0x2b9   : > { %v2211_v24 = vpop.f32.mrb[32].mxu0  ;;  %v2332_v27 = vpop.f32.mrb[32].mxu1 }
 0x2ba   : > { %v2217_v25 = vadd.f32 %v2211_v24, %v2096_v4  ;;  %v10967_v26 = vpop.f32.mrb[33].mxu0  ;;  %v10987_v31 = vpop.f32.mrb[33].mxu1  ;;  %v4043_v4 = vld [vmem:[%s13468_s15 + $0x88] sm:$0xf] }
 0x2bb   : > { %v2214_v30 = vpop.f32.mrb[34].mxu0  ;;  %11240 = vmatpush3.bf16.msra.mxu0 %v12524_v22  ;;  %11260 = vmatpush3.bf16.msra.mxu1 %v12525_v23  ;;  %v2335_v34 = vpop.f32.mrb[34].mxu1  ;;  %v12559_v22 = vld [vmem:[#allocation6 + $0x2b0] sm:$0xff]   ;;  %v4149_v31 = vld [vmem:[%s13468_s15 + $0x90] sm:$0xf] }
 0x2bc   : > { %v2338_v32 = vadd.f32 %v2332_v27, %v2217_v25  ;;  %v10968_v33 = vpop.f32.mrb[35].mxu0  ;;  %11241 = vmatprep.subr.bf16.mxu0 %v13197_v0  ;;  %11261 = vmatprep.subr.bf16.mxu1 %v13197_v0  ;;  %v10988_v35 = vpop.f32.mrb[35].mxu1  ;;  %v12561_v30 = vld [vmem:[#allocation6 + $0x2b8] sm:$0xff]   ;;  %v12563_v34 = vld [vmem:[#allocation6 + $0x300] sm:$0xff]  }
 0x2bd   : > { %v12562_v33 = vld [vmem:[#allocation6 + $0x2c0] sm:$0xff]   ;;  %v12564_v35 = vld [vmem:[#allocation6 + $0x2c8] sm:$0xff]  }
 0x2bf   : > { %11242 = vmatpush3.bf16.msra.mxu0 %v12526_v28  ;;  %11262 = vmatpush3.bf16.msra.mxu1 %v12527_v29  ;;  %v12560_v29 = vld [vmem:[#allocation6 + $0x278] sm:$0xff]  }
 0x2c0   : > { %11243 = vmatprep.subr.bf16.mxu0 %v13197_v0  ;;  %11263 = vmatprep.subr.bf16.mxu1 %v13197_v0 }
 0x2c3   : > { %11244 = vmatpush3.bf16.msra.mxu0 %v12528_v36  ;;  %11264 = vmatpush3.bf16.msra.mxu1 %v12529_v37  ;;  %v12565_v36 = vld [vmem:[#allocation6 + $0x308] sm:$0xff]   ;;  %v12566_v37 = vld [vmem:[#allocation6 + $0x2d0] sm:$0xff]  }
 0x2c4   : > { %11269 = vmatprep.subr.bf16.mxu0 %v13197_v0  ;;  %11289 = vmatprep.subr.bf16.mxu1 %v13197_v0 }
 0x2c6   : > { %11246 = vmatmul.mubr.bf16.vlgmr.msra.gmra.mrb[60].mxu0 %v3725_v38  ;;  %11266 = vmatmul.mubr.bf16.vlgmr.msra.gmra.mrb[60].mxu1 %v3831_v39  ;;  %v12567_v38 = vld [vmem:[#allocation6 + $0x310] sm:$0xff]   ;;  %v12568_v39 = vld [vmem:[#allocation6 + $0x2d8] sm:$0xff]  }
 0x2c7   : > { %11270 = vmatpush3.bf16.msra.mxu0 %v12530_v40  ;;  %11290 = vmatpush3.bf16.msra.mxu1 %v12531_v41  ;;  %v12569_v40 = vld [vmem:[#allocation6 + $0x318] sm:$0xff]   ;;  %v12570_v41 = vld [vmem:[#allocation6 + $0x2e0] sm:$0xff]  }
 0x2c8   : > { %11271 = vmatprep.subr.bf16.mxu0 %v13197_v0  ;;  %11291 = vmatprep.subr.bf16.mxu1 %v13197_v0 }
 0x2c9   : > { %11285 = vmatprep.mubr.msk.bf16.mxu0 %vm13198_vm0, %v13197_v0  ;;  %11305 = vmatprep.mubr.msk.bf16.mxu1 %vm13198_vm0, %v13197_v0 }
 0x2cb   : > { %11272 = vmatpush3.bf16.msra.mxu0 %v12532_v42  ;;  %11292 = vmatpush3.bf16.msra.mxu1 %v12533_v43  ;;  %v12571_v42 = vld [vmem:[#allocation6 + $0x320] sm:$0xff]   ;;  %v12572_v43 = vld [vmem:[#allocation6 + $0x2e8] sm:$0xff]  }
 0x2cc   : > { %11273 = vmatprep.subr.bf16.mxu0 %v13197_v0  ;;  %11293 = vmatprep.subr.bf16.mxu1 %v13197_v0 }
 0x2cf   : > { %11274 = vmatpush3.bf16.msra.mxu0 %v12534_v44  ;;  %11294 = vmatpush3.bf16.msra.mxu1 %v12535_v45  ;;  %v12573_v44 = vld [vmem:[#allocation6 + $0x328] sm:$0xff]  }
 0x2d0   : > { %11275 = vmatprep.subr.bf16.mxu0 %v13197_v0  ;;  %11295 = vmatprep.subr.bf16.mxu1 %v13197_v0 }
 0x2d3   : > { %11276 = vmatpush3.bf16.msra.mxu0 %v12536_v46  ;;  %11296 = vmatpush3.bf16.msra.mxu1 %v12537_v47 }
 0x2d4   : > { %11277 = vmatprep.subr.bf16.mxu0 %v13197_v0  ;;  %11297 = vmatprep.subr.bf16.mxu1 %v13197_v0 }
 0x2d7   : > { %11278 = vmatpush3.bf16.msra.mxu0 %v12538_v48  ;;  %11298 = vmatpush3.bf16.msra.mxu1 %v12539_v49 }
 0x2d8   : > { %11279 = vmatprep.subr.bf16.mxu0 %v13197_v0  ;;  %11299 = vmatprep.subr.bf16.mxu1 %v13197_v0 }
 0x2d9   : > { %v2453_v52 = vpop.f32.mrb[36].mxu0  ;;  %v2574_v55 = vpop.f32.mrb[36].mxu1 }
 0x2da   : > { %v2459_v53 = vadd.f32 %v2453_v52, %v2338_v32  ;;  %v11007_v54 = vpop.f32.mrb[37].mxu0  ;;  %v11027_v59 = vpop.f32.mrb[37].mxu1  ;;  %v4255_v32 = vld [vmem:[%s13468_s15 + $0xc8] sm:$0xf] }
 0x2db   : > { %v2456_v58 = vpop.f32.mrb[38].mxu0  ;;  %11280 = vmatpush3.bf16.msra.mxu0 %v12540_v50  ;;  %11300 = vmatpush3.bf16.msra.mxu1 %v12541_v51  ;;  %v2577_v62 = vpop.f32.mrb[38].mxu1  ;;  %v12574_v50 = vld [vmem:[#allocation6 + $0x2f0] sm:$0xff]   ;;  %v4361_v59 = vld [vmem:[%s13468_s15 + $0xd0] sm:$0xf] }
 0x2dc   : > { %v2580_v60 = vadd.f32 %v2574_v55, %v2459_v53  ;;  %v11008_v61 = vpop.f32.mrb[39].mxu0  ;;  %11281 = vmatprep.subr.bf16.mxu0 %v13197_v0  ;;  %11301 = vmatprep.subr.bf16.mxu1 %v13197_v0  ;;  %v11028_v63 = vpop.f32.mrb[39].mxu1  ;;  %v12575_v54 = vld [vmem:[#allocation6 + $0x330] sm:$0xff]   ;;  %v12577_v58 = vld [vmem:[#allocation6 + $0x338] sm:$0xff]   ;;  %v12579_v62 = vld [vmem:[#allocation6 + $0x380] sm:$0xff]  }
 0x2dd   : > { %v4467_v61 = vld [vmem:[%s13468_s15 + $0xd8] sm:$0xf] }
 0x2de   : > { %v12580_v63 = vld [vmem:[#allocation6 + $0x348] sm:$0xff]  }
 0x2df   : > { %11282 = vmatpush3.bf16.msra.mxu0 %v12542_v56  ;;  %11302 = vmatpush3.bf16.msra.mxu1 %v12543_v57  ;;  %v12576_v57 = vld [vmem:[#allocation6 + $0x2f8] sm:$0xff]  }
 0x2e0   : > { %11283 = vmatprep.subr.bf16.mxu0 %v13197_v0  ;;  %11303 = vmatprep.subr.bf16.mxu1 %v13197_v0 }
 0x2e3   : > { %11284 = vmatpush3.bf16.msra.mxu0 %v12544_v1  ;;  %11304 = vmatpush3.bf16.msra.mxu1 %v12545_v2  ;;  %v12581_v1 = vld [vmem:[#allocation6 + $0x388] sm:$0xff]   ;;  %v12582_v2 = vld [vmem:[#allocation6 + $0x350] sm:$0xff]  }
 0x2e4   : > { %11309 = vmatprep.subr.bf16.mxu0 %v13197_v0  ;;  %11329 = vmatprep.subr.bf16.mxu1 %v13197_v0 }
 0x2e6   : > { %11286 = vmatmul.mubr.bf16.vlgmr.msra.gmra.mrb[64].mxu0 %v3937_v3  ;;  %11306 = vmatmul.mubr.bf16.vlgmr.msra.gmra.mrb[64].mxu1 %v4043_v4  ;;  %v12583_v3 = vld [vmem:[#allocation6 + $0x390] sm:$0xff]   ;;  %v12584_v4 = vld [vmem:[#allocation6 + $0x358] sm:$0xff]  }
 0x2e7   : > { %11310 = vmatpush3.bf16.msra.mxu0 %v12546_v5  ;;  %11330 = vmatpush3.bf16.msra.mxu1 %v12547_v6  ;;  %v12585_v5 = vld [vmem:[#allocation6 + $0x398] sm:$0xff]   ;;  %v12586_v6 = vld [vmem:[#allocation6 + $0x360] sm:$0xff]  }
 0x2e8   : > { %11311 = vmatprep.subr.bf16.mxu0 %v13197_v0  ;;  %11331 = vmatprep.subr.bf16.mxu1 %v13197_v0 }
 0x2e9   : > { %11325 = vmatprep.mubr.msk.bf16.mxu0 %vm13198_vm0, %v13197_v0  ;;  %11345 = vmatprep.mubr.msk.bf16.mxu1 %vm13198_vm0, %v13197_v0 }
 0x2eb   : > { %11312 = vmatpush3.bf16.msra.mxu0 %v12548_v7  ;;  %11332 = vmatpush3.bf16.msra.mxu1 %v12549_v8  ;;  %v12587_v7 = vld [vmem:[#allocation6 + $0x3a0] sm:$0xff]   ;;  %v12588_v8 = vld [vmem:[#allocation6 + $0x368] sm:$0xff]  }
 0x2ec   : > { %11313 = vmatprep.subr.bf16.mxu0 %v13197_v0  ;;  %11333 = vmatprep.subr.bf16.mxu1 %v13197_v0 }
 0x2ef   : > { %11314 = vmatpush3.bf16.msra.mxu0 %v12550_v9  ;;  %11334 = vmatpush3.bf16.msra.mxu1 %v12551_v10  ;;  %v12589_v9 = vld [vmem:[#allocation6 + $0x3a8] sm:$0xff]  }
 0x2f0   : > { %11315 = vmatprep.subr.bf16.mxu0 %v13197_v0  ;;  %11335 = vmatprep.subr.bf16.mxu1 %v13197_v0 }
 0x2f3   : > { %11316 = vmatpush3.bf16.msra.mxu0 %v12552_v11  ;;  %11336 = vmatpush3.bf16.msra.mxu1 %v12553_v12  ;;  %v9467_v11 = vld [vmem:[#allocation8] ss:$0 sm:$0xff] }
 0x2f4   : > { %11317 = vmatprep.subr.bf16.mxu0 %v13197_v0  ;;  %11337 = vmatprep.subr.bf16.mxu1 %v13197_v0 }
 0x2f7   : > { %11318 = vmatpush3.bf16.msra.mxu0 %v12554_v13  ;;  %11338 = vmatpush3.bf16.msra.mxu1 %v12555_v14 }
 0x2f8   : > { %11319 = vmatprep.subr.bf16.mxu0 %v13197_v0  ;;  %11339 = vmatprep.subr.bf16.mxu1 %v13197_v0 }
 0x2f9   : > { %v2695_v17 = vpop.f32.mrb[40].mxu0  ;;  %v2816_v20 = vpop.f32.mrb[40].mxu1 }
 0x2fa   : > { %v2701_v18 = vadd.f32 %v2695_v17, %v2580_v60  ;;  %v11047_v19 = vpop.f32.mrb[41].mxu0  ;;  %v11067_v24 = vpop.f32.mrb[41].mxu1  ;;  %v12578_v60 = vld [vmem:[#allocation6 + $0x340] sm:$0xff]  }
 0x2fb   : > { %v2698_v23 = vpop.f32.mrb[42].mxu0  ;;  %11320 = vmatpush3.bf16.msra.mxu0 %v12556_v15  ;;  %11340 = vmatpush3.bf16.msra.mxu1 %v12557_v16  ;;  %v2819_v27 = vpop.f32.mrb[42].mxu1  ;;  %v12590_v16 = vld [vmem:[#allocation6 + $0x370] sm:$0xff]   ;;  %v12592_v24 = vld [vmem:[#allocation6 + $0x378] sm:$0xff]  }
 0x2fc   : > { %v2822_v25 = vadd.f32 %v2816_v20, %v2701_v18  ;;  %v11048_v26 = vpop.f32.mrb[43].mxu0  ;;  %11321 = vmatprep.subr.bf16.mxu0 %v13197_v0  ;;  %11341 = vmatprep.subr.bf16.mxu1 %v13197_v0  ;;  %v11068_v28 = vpop.f32.mrb[43].mxu1  ;;  %v12591_v20 = vld [vmem:[#allocation6 + $0x3b0] sm:$0xff]  }
 0x2fd   : > { %v12593_v26 = vld [vmem:[#allocation6 + $0x3b8] sm:$0xff]   ;;  %v12594_v28 = vld [vmem:[#allocation6 + $0x3c0] sm:$0xff]  }
 0x2fe   : > { %v4573_v27 = vld [vmem:[%s13468_s15 + $0xe0] sm:$0xf] }
 0x2ff   : > { %11322 = vmatpush3.bf16.msra.mxu0 %v12558_v21  ;;  %11342 = vmatpush3.bf16.msra.mxu1 %v12559_v22 }
 0x300   : > { %11323 = vmatprep.subr.bf16.mxu0 %v13197_v0  ;;  %11343 = vmatprep.subr.bf16.mxu1 %v13197_v0 }
 0x303   : > { %11324 = vmatpush3.bf16.msra.mxu0 %v12560_v29  ;;  %11344 = vmatpush3.bf16.msra.mxu1 %v12561_v30  ;;  %v4679_v29 = vld [vmem:[%s13468_s15 + $0xe8] sm:$0xf] }
 0x304   : > { %11349 = vmatprep.subr.bf16.mxu0 %v13197_v0  ;;  %11369 = vmatprep.subr.bf16.mxu1 %v13197_v0  ;;  %v12595_v30 = vld [vmem:[#allocation6 + $0x400] sm:$0xff]  }
 0x306   : > { %11326 = vmatmul.mubr.bf16.vlgmr.msra.gmra.mrb[68].mxu0 %v4149_v31  ;;  %11346 = vmatmul.mubr.bf16.vlgmr.msra.gmra.mrb[68].mxu1 %v4255_v32  ;;  %v12596_v31 = vld [vmem:[#allocation6 + $0x3c8] sm:$0xff]  }
 0x307   : > { %11350 = vmatpush3.bf16.msra.mxu0 %v12562_v33  ;;  %11370 = vmatpush3.bf16.msra.mxu1 %v12563_v34  ;;  %v12597_v32 = vld [vmem:[#allocation6 + $0x408] sm:$0xff]   ;;  %v12598_v33 = vld [vmem:[#allocation6 + $0x3d0] sm:$0xff]  }
 0x308   : > { %11351 = vmatprep.subr.bf16.mxu0 %v13197_v0  ;;  %11371 = vmatprep.subr.bf16.mxu1 %v13197_v0  ;;  %v12599_v34 = vld [vmem:[#allocation6 + $0x410] sm:$0xff]  }
 0x309   : > { %11365 = vmatprep.mubr.msk.bf16.mxu0 %vm13198_vm0, %v13197_v0  ;;  %11385 = vmatprep.mubr.msk.bf16.mxu1 %vm13198_vm0, %v13197_v0 }
 0x30b   : > { %11352 = vmatpush3.bf16.msra.mxu0 %v12564_v35  ;;  %11372 = vmatpush3.bf16.msra.mxu1 %v12565_v36  ;;  %v12600_v35 = vld [vmem:[#allocation6 + $0x3d8] sm:$0xff]  }
 0x30c   : > { %11353 = vmatprep.subr.bf16.mxu0 %v13197_v0  ;;  %11373 = vmatprep.subr.bf16.mxu1 %v13197_v0  ;;  %v12601_v36 = vld [vmem:[#allocation6 + $0x418] sm:$0xff]  }
 0x30f   : > { %11354 = vmatpush3.bf16.msra.mxu0 %v12566_v37  ;;  %11374 = vmatpush3.bf16.msra.mxu1 %v12567_v38  ;;  %v12602_v37 = vld [vmem:[#allocation6 + $0x3e0] sm:$0xff]  }
 0x310   : > { %11355 = vmatprep.subr.bf16.mxu0 %v13197_v0  ;;  %11375 = vmatprep.subr.bf16.mxu1 %v13197_v0  ;;  %v12603_v38 = vld [vmem:[#allocation6 + $0x420] sm:$0xff]  }
 0x313   : > { %11356 = vmatpush3.bf16.msra.mxu0 %v12568_v39  ;;  %11376 = vmatpush3.bf16.msra.mxu1 %v12569_v40  ;;  %v12610_v39 = vld [vmem:[%s13468_s15 + $0x18] sm:$0x1f]  }
 0x314   : > { %11357 = vmatprep.subr.bf16.mxu0 %v13197_v0  ;;  %11377 = vmatprep.subr.bf16.mxu1 %v13197_v0  ;;  %v12604_v40 = vld [vmem:[#allocation6 + $0x3e8] sm:$0xff]  }
 0x317   : > { %11358 = vmatpush3.bf16.msra.mxu0 %v12570_v41  ;;  %11378 = vmatpush3.bf16.msra.mxu1 %v12571_v42  ;;  %v12611_v41 = vld [vmem:[%s13468_s15 + $0x20] sm:$0x1f]   ;;  %v12605_v42 = vld [vmem:[#allocation6 + $0x428] sm:$0xff]  }
 0x318   : > { %11359 = vmatprep.subr.bf16.mxu0 %v13197_v0  ;;  %11379 = vmatprep.subr.bf16.mxu1 %v13197_v0 }
 0x319   : > { %v2937_v45 = vpop.f32.mrb[44].mxu0  ;;  %v3058_v48 = vpop.f32.mrb[44].mxu1 }
 0x31a   : > { %v2943_v46 = vadd.f32 %v2937_v45, %v2822_v25  ;;  %v11087_v47 = vpop.f32.mrb[45].mxu0  ;;  %v11107_v51 = vpop.f32.mrb[45].mxu1 }
 0x31b   : > { %v2940_v49 = vpop.f32.mrb[46].mxu0  ;;  %11360 = vmatpush3.bf16.msra.mxu0 %v12572_v43  ;;  %11380 = vmatpush3.bf16.msra.mxu1 %v12573_v44  ;;  %v3061_v55 = vpop.f32.mrb[46].mxu1  ;;  %v4811_v47 = vshll.u32 %v12610_v39, 16 }
 0x31c   : > { %v3064_v52 = vadd.f32 %v3058_v48, %v2943_v46  ;;  %v11088_v53 = vpop.f32.mrb[47].mxu0  ;;  %11361 = vmatprep.subr.bf16.mxu0 %v13197_v0  ;;  %11381 = vmatprep.subr.bf16.mxu1 %v13197_v0  ;;  %v11108_v56 = vpop.f32.mrb[47].mxu1  ;;  %v12606_v49 = vld [vmem:[#allocation6 + $0x3f0] sm:$0xff]  }
 0x31f   : > { %11362 = vmatpush3.bf16.msra.mxu0 %v12574_v50  ;;  %11382 = vmatpush3.bf16.msra.mxu1 %v12575_v54  ;;  %v4931_v50 = vshll.u32 %v12611_v41, 16  ;;  %v12607_v54 = vld [vmem:[#allocation6 + $0x430] sm:$0xff]  }
 0x320   : > { %11363 = vmatprep.subr.bf16.mxu0 %v13197_v0  ;;  %11383 = vmatprep.subr.bf16.mxu1 %v13197_v0 }
 0x323   : > { %11364 = vmatpush3.bf16.msra.mxu0 %v12576_v57  ;;  %11384 = vmatpush3.bf16.msra.mxu1 %v12577_v58  ;;  %v4809_v57 = vshrl.u32 %v12610_v39, 16  ;;  %v4813_v58 = vrot.slane %v4811_v47, 1  ;;  %v12631_v39 = vld [vmem:[#allocation6 + $0x500] sm:$0xff]  }
 0x324   : > { %11389 = vmatprep.subr.bf16.mxu0 %v13197_v0  ;;  %11409 = vmatprep.subr.bf16.mxu1 %v13197_v0  ;;  %v12639_v47 = vld [vmem:[#allocation6 + $0x520] sm:$0xff]  }
 0x326   : > { %11366 = vmatmul.mubr.bf16.vlgmr.msra.gmra.mrb[72].mxu0 %v4361_v59  ;;  %11386 = vmatmul.mubr.bf16.vlgmr.msra.gmra.mrb[72].mxu1 %v4467_v61  ;;  %v12608_v59 = vld [vmem:[#allocation6 + $0x3f8] sm:$0xff]   ;;  %v4933_v61 = vrot.slane %v4931_v50, 1  ;;  %v12647_v50 = vld [vmem:[%s13468_s15 + $0x70] sm:$0x1f]  }
 0x327   : > { %11390 = vmatpush3.bf16.msra.mxu0 %v12578_v60  ;;  %11410 = vmatpush3.bf16.msra.mxu1 %v12579_v62  ;;  %v4929_v60 = vshrl.u32 %v12611_v41, 16  ;;  %v12609_v62 = vld [vmem:[#allocation6 + $0x438] sm:$0xff]   ;;  %v12633_v41 = vld [vmem:[#allocation6 + $0x508] sm:$0xff]  }
 0x328   : > { %11391 = vmatprep.subr.bf16.mxu0 %v13197_v0  ;;  %11411 = vmatprep.subr.bf16.mxu1 %v13197_v0 }
 0x329   : > { %11405 = vmatprep.mubr.msk.bf16.mxu0 %vm13198_vm0, %v13197_v0  ;;  %11425 = vmatprep.mubr.msk.bf16.mxu1 %vm13198_vm0, %v13197_v0 }
 0x32b   : > { %11392 = vmatpush3.bf16.msra.mxu0 %v12580_v63  ;;  %11412 = vmatpush3.bf16.msra.mxu1 %v12581_v1  ;;  %v4814_v63 = vor.u32 %v4813_v58, %v4809_v57  ;;  %v4934_v1 = vor.u32 %v4933_v61, %v4929_v60  ;;  %v12642_v58 = vld [vmem:[#allocation6 + $0x4f0] sm:$0xff]  }
 0x32c   : > { %11393 = vmatprep.subr.bf16.mxu0 %v13197_v0  ;;  %11413 = vmatprep.subr.bf16.mxu1 %v13197_v0 }
 0x32f   : > { %11394 = vmatpush3.bf16.msra.mxu0 %v12582_v2  ;;  %11414 = vmatpush3.bf16.msra.mxu1 %v12583_v3  ;;  %v12612_v2 = vld [vmem:[#allocation6 + $0x440] sm:$0xff]  }
 0x330   : > { %11395 = vmatprep.subr.bf16.mxu0 %v13197_v0  ;;  %11415 = vmatprep.subr.bf16.mxu1 %v13197_v0  ;;  %v12613_v3 = vld [vmem:[#allocation6 + $0x480] sm:$0xff]  }
 0x333   : > { %11396 = vmatpush3.bf16.msra.mxu0 %v12584_v4  ;;  %11416 = vmatpush3.bf16.msra.mxu1 %v12585_v5  ;;  %v12614_v4 = vld [vmem:[#allocation6 + $0x448] sm:$0xff]  }
 0x334   : > { %11397 = vmatprep.subr.bf16.mxu0 %v13197_v0  ;;  %11417 = vmatprep.subr.bf16.mxu1 %v13197_v0  ;;  %v12615_v5 = vld [vmem:[#allocation6 + $0x488] sm:$0xff]  }
 0x337   : > { %11398 = vmatpush3.bf16.msra.mxu0 %v12586_v6  ;;  %11418 = vmatpush3.bf16.msra.mxu1 %v12587_v7  ;;  %v12616_v6 = vld [vmem:[#allocation6 + $0x450] sm:$0xff]  }
 0x338   : > { %11399 = vmatprep.subr.bf16.mxu0 %v13197_v0  ;;  %11419 = vmatprep.subr.bf16.mxu1 %v13197_v0  ;;  %v12617_v7 = vld [vmem:[#allocation6 + $0x490] sm:$0xff]  }
 0x339   : > { %v3179_v10 = vpop.f32.mrb[48].mxu0  ;;  %v13932_v14 = vpop.f32.mrb[48].mxu1 }
 0x33a   : > { %v3185_v12 = vadd.f32 %v3179_v10, %v3064_v52  ;;  %v11127_v13 = vpop.f32.mrb[49].mxu0  ;;  %v11147_v17 = vpop.f32.mrb[49].mxu1  ;;  %v12620_v10 = vld [vmem:[#allocation6 + $0x460] sm:$0xff]  }
 0x33b   : > { %v3182_v15 = vpop.f32.mrb[50].mxu0  ;;  %11400 = vmatpush3.bf16.msra.mxu0 %v12588_v8  ;;  %11420 = vmatpush3.bf16.msra.mxu1 %v12589_v9  ;;  %v3316_v21 = vpop.f32.mrb[50].mxu1  ;;  %v12618_v8 = vld [vmem:[#allocation6 + $0x458] sm:$0xff]   ;;  %v12622_v13 = vld [vmem:[#allocation6 + $0x468] sm:$0xff]  }
 0x33c   : > { %v3193_v18 = vadd.f32 %v9467_v11, %v3185_v12  ;;  %v11128_v19 = vpop.f32.mrb[51].mxu0  ;;  %11401 = vmatprep.subr.bf16.mxu0 %v13197_v0  ;;  %11421 = vmatprep.subr.bf16.mxu1 %v13197_v0  ;;  %v11148_v22 = vpop.f32.mrb[51].mxu1  ;;  %v12619_v9 = vld [vmem:[#allocation6 + $0x498] sm:$0xff]   ;;  %v12621_v11 = vld [vmem:[#allocation6 + $0x4a0] sm:$0xff]   ;;  %v12623_v15 = vld [vmem:[#allocation6 + $0x4a8] sm:$0xff]  }
 0x33d   : > { %v12628_v12 = vld [vmem:[%s13468_s15 + $0x28] sm:$0x1f]   ;;  %v12624_v22 = vld [vmem:[#allocation6 + $0x470] sm:$0xff]  }
 0x33e   : > { %v3194_v23 = vmax.f32 %v3193_v18, 0.0 }
 0x33f   : > { %11402 = vmatpush3.bf16.msra.mxu0 %v12590_v16  ;;  %11422 = vmatpush3.bf16.msra.mxu1 %v12591_v20  ;;  %v5051_v20 = vshll.u32 %v12628_v12, 16 }
 0x340   : > { %v3195_v25 = vpack.c.bf16 %v3194_v23, %v3194_v23  ;;  %11403 = vmatprep.subr.bf16.mxu0 %v13197_v0  ;;  %11423 = vmatprep.subr.bf16.mxu1 %v13197_v0 }
 0x342   : > { %3196 = vst [vmem:[#allocation2] sm:$0xf] %v3195_v25 }
 0x343   : > { %11404 = vmatpush3.bf16.msra.mxu0 %v12592_v24  ;;  %11424 = vmatpush3.bf16.msra.mxu1 %v12593_v26 }
 0x344   : > { %11429 = vmatprep.subr.bf16.mxu0 %v13197_v0  ;;  %11449 = vmatprep.subr.bf16.mxu1 %v13197_v0 }
 0x346   : > { %11406 = vmatmul.mubr.bf16.vlgmr.msra.gmra.mrb[76].mxu0 %v4573_v27  ;;  %11426 = vmatmul.mubr.bf16.vlgmr.msra.gmra.mrb[76].mxu1 %v4679_v29  ;;  %v12625_v27 = vld [vmem:[#allocation6 + $0x4b0] sm:$0xff]  }
 0x347   : > { %11430 = vmatpush3.bf16.msra.mxu0 %v12594_v28  ;;  %11450 = vmatpush3.bf16.msra.mxu1 %v12595_v30  ;;  %v5049_v30 = vshrl.u32 %v12628_v12, 16  ;;  %v12649_v12 = vld [vmem:[#allocation6 + $0x580] sm:$0xff]  }
 0x348   : > { %11431 = vmatprep.subr.bf16.mxu0 %v13197_v0  ;;  %11451 = vmatprep.subr.bf16.mxu1 %v13197_v0 }
 0x349   : > { %11445 = vmatprep.mubr.msk.bf16.mxu0 %vm13198_vm0, %v13197_v0  ;;  %11465 = vmatprep.mubr.msk.bf16.mxu1 %vm13198_vm0, %v13197_v0 }
 0x34b   : > { %11432 = vmatpush3.bf16.msra.mxu0 %v12596_v31  ;;  %11452 = vmatpush3.bf16.msra.mxu1 %v12597_v32  ;;  %v5053_v31 = vrot.slane %v5051_v20, 1  ;;  %v12626_v32 = vld [vmem:[#allocation6 + $0x478] sm:$0xff]   ;;  %v12657_v20 = vld [vmem:[#allocation6 + $0x5a0] sm:$0xff]  }
 0x34c   : > { %11433 = vmatprep.subr.bf16.mxu0 %v13197_v0  ;;  %11453 = vmatprep.subr.bf16.mxu1 %v13197_v0 }
 0x34f   : > { %11434 = vmatpush3.bf16.msra.mxu0 %v12598_v33  ;;  %11454 = vmatpush3.bf16.msra.mxu1 %v12599_v34 }
 0x350   : > { %11435 = vmatprep.subr.bf16.mxu0 %v13197_v0  ;;  %11455 = vmatprep.subr.bf16.mxu1 %v13197_v0 }
 0x353   : > { %11436 = vmatpush3.bf16.msra.mxu0 %v12600_v35  ;;  %11456 = vmatpush3.bf16.msra.mxu1 %v12601_v36  ;;  %v12627_v35 = vld [vmem:[#allocation6 + $0x4b8] sm:$0xff]   ;;  %v5054_v36 = vor.u32 %v5053_v31, %v5049_v30  ;;  %v12660_v31 = vld [vmem:[#allocation6 + $0x570] sm:$0xff]  }
 0x354   : > { %11437 = vmatprep.subr.bf16.mxu0 %v13197_v0  ;;  %11457 = vmatprep.subr.bf16.mxu1 %v13197_v0 }
 0x357   : > { %11438 = vmatpush3.bf16.msra.mxu0 %v12602_v37  ;;  %11458 = vmatpush3.bf16.msra.mxu1 %v12603_v38  ;;  %v12630_v38 = vld [vmem:[#allocation6 + $0x4c0] sm:$0xff]  }
 0x358   : > { %11439 = vmatprep.subr.bf16.mxu0 %v13197_v0  ;;  %11459 = vmatprep.subr.bf16.mxu1 %v13197_v0 }
 0x359   : > { %v3401_v43 = vpop.f32.mrb[52].mxu0  ;;  %v3506_v46 = vpop.f32.mrb[52].mxu1 }
 0x35a   : > { %v3402_v44 = vadd.f32 %v3401_v43, %v13932_v14  ;;  %v11167_v45 = vpop.f32.mrb[53].mxu0  ;;  %v11187_v51 = vpop.f32.mrb[53].mxu1  ;;  %v12629_v14 = vld [vmem:[%s13468_s15 + $0x30] sm:$0x1f]   ;;  %v12635_v43 = vld [vmem:[#allocation6 + $0x510] sm:$0xff]  }
 0x35b   : > { %v3404_v48 = vpop.f32.mrb[54].mxu0  ;;  %11440 = vmatpush3.bf16.msra.mxu0 %v12604_v40  ;;  %11460 = vmatpush3.bf16.msra.mxu1 %v12605_v42  ;;  %v3509_v55 = vpop.f32.mrb[54].mxu1  ;;  %v5171_v23 = vshll.u32 %v12629_v14, 16  ;;  %v5169_v33 = vshrl.u32 %v12629_v14, 16  ;;  %v12632_v40 = vld [vmem:[#allocation6 + $0x4c8] sm:$0xff]   ;;  %v12634_v42 = vld [vmem:[#allocation6 + $0x4d0] sm:$0xff]  }
 0x35c   : > { %v13959_v52 = vadd.f32 %v3506_v46, %v3402_v44  ;;  %v11168_v53 = vpop.f32.mrb[55].mxu0  ;;  %11441 = vmatprep.subr.bf16.mxu0 %v13197_v0  ;;  %11461 = vmatprep.subr.bf16.mxu1 %v13197_v0  ;;  %v11188_v56 = vpop.f32.mrb[55].mxu1  ;;  %v12636_v44 = vld [vmem:[#allocation6 + $0x4d8] sm:$0xff]   ;;  %v12638_v46 = vld [vmem:[#allocation6 + $0x4e0] sm:$0xff]   ;;  %v12646_v48 = vld [vmem:[%s13468_s15 + $0x38] sm:$0x1f]  }
 0x35d   : > { %v5173_v34 = vrot.slane %v5171_v23, 1  ;;  %v12637_v45 = vld [vmem:[#allocation6 + $0x518] sm:$0xff]   ;;  %v12641_v51 = vld [vmem:[#allocation6 + $0x528] sm:$0xff]   ;;  %v5291_v56 = vshll.u32 %v12646_v48, 16 }
 0x35e   : > { %v12651_v14 = vld [vmem:[#allocation6 + $0x588] sm:$0xff]   ;;  %v12665_v23 = vld [vmem:[%s13468_s15 + $0x80] sm:$0x1f]  }
 0x35f   : > { %11442 = vmatpush3.bf16.msra.mxu0 %v12606_v49  ;;  %11462 = vmatpush3.bf16.msra.mxu1 %v12607_v54  ;;  %v5174_v37 = vor.u32 %v5173_v34, %v5169_v33  ;;  %v12640_v49 = vld [vmem:[#allocation6 + $0x4e8] sm:$0xff]  }
 0x360   : > { %11443 = vmatprep.subr.bf16.mxu0 %v13197_v0  ;;  %11463 = vmatprep.subr.bf16.mxu1 %v13197_v0 }
 0x363   : > { %11444 = vmatpush3.bf16.msra.mxu0 %v12608_v59  ;;  %11464 = vmatpush3.bf16.msra.mxu1 %v12609_v62  ;;  %v5411_v59 = vshll.u32 %v12647_v50, 16 }
 0x364   : > { %11469 = vmatprep.subr.bf16.mxu0 %v13197_v0  ;;  %11489 = vmatprep.subr.bf16.mxu1 %v13197_v0 }
 0x366   : > { %11446 = vmatmul.mubr.bf16.vlgmr.msra.gmra.mrb[80].mxu0 %v4814_v63  ;;  %11466 = vmatmul.mubr.bf16.vlgmr.msra.gmra.mrb[80].mxu1 %v4934_v1  ;;  %v12643_v63 = vld [vmem:[#allocation6 + $0x530] sm:$0xff]  }
 0x367   : > { %11470 = vmatpush3.bf16.msra.mxu0 %v12612_v2  ;;  %11490 = vmatpush3.bf16.msra.mxu1 %v12613_v3  ;;  %v5289_v3 = vshrl.u32 %v12646_v48, 16  ;;  %v12667_v48 = vld [vmem:[#allocation6 + $0x600] sm:$0xff]  }
 0x368   : > { %11471 = vmatprep.subr.bf16.mxu0 %v13197_v0  ;;  %11491 = vmatprep.subr.bf16.mxu1 %v13197_v0 }
 0x369   : > { %11485 = vmatprep.mubr.msk.bf16.mxu0 %vm13198_vm0, %v13197_v0  ;;  %11505 = vmatprep.mubr.msk.bf16.mxu1 %vm13198_vm0, %v13197_v0 }
 0x36b   : > { %11472 = vmatpush3.bf16.msra.mxu0 %v12614_v4  ;;  %11492 = vmatpush3.bf16.msra.mxu1 %v12615_v5  ;;  %v5293_v4 = vrot.slane %v5291_v56, 1  ;;  %v12644_v5 = vld [vmem:[#allocation6 + $0x4f8] sm:$0xff]   ;;  %v12675_v56 = vld [vmem:[#allocation6 + $0x620] sm:$0xff]  }
 0x36c   : > { %11473 = vmatprep.subr.bf16.mxu0 %v13197_v0  ;;  %11493 = vmatprep.subr.bf16.mxu1 %v13197_v0 }
 0x36f   : > { %11474 = vmatpush3.bf16.msra.mxu0 %v12616_v6  ;;  %11494 = vmatpush3.bf16.msra.mxu1 %v12617_v7  ;;  %v5409_v6 = vshrl.u32 %v12647_v50, 16  ;;  %v5413_v7 = vrot.slane %v5411_v59, 1  ;;  %v12669_v50 = vld [vmem:[#allocation6 + $0x608] sm:$0xff]  }
 0x370   : > { %11475 = vmatprep.subr.bf16.mxu0 %v13197_v0  ;;  %11495 = vmatprep.subr.bf16.mxu1 %v13197_v0  ;;  %v12683_v59 = vld [vmem:[%s13468_s15 + $0x90] sm:$0x1f]  }
 0x373   : > { %11476 = vmatpush3.bf16.msra.mxu0 %v12618_v8  ;;  %11496 = vmatpush3.bf16.msra.mxu1 %v12619_v9  ;;  %v12645_v8 = vld [vmem:[#allocation6 + $0x538] sm:$0xff]   ;;  %v5294_v9 = vor.u32 %v5293_v4, %v5289_v3  ;;  %v12678_v4 = vld [vmem:[#allocation6 + $0x5f0] sm:$0xff]  }
 0x374   : > { %11477 = vmatprep.subr.bf16.mxu0 %v13197_v0  ;;  %11497 = vmatprep.subr.bf16.mxu1 %v13197_v0 }
 0x377   : > { %11478 = vmatpush3.bf16.msra.mxu0 %v12620_v10  ;;  %11498 = vmatpush3.bf16.msra.mxu1 %v12621_v11  ;;  %v5414_v10 = vor.u32 %v5413_v7, %v5409_v6  ;;  %v12648_v11 = vld [vmem:[#allocation6 + $0x540] sm:$0xff]  }
 0x378   : > { %11479 = vmatprep.subr.bf16.mxu0 %v13197_v0  ;;  %11499 = vmatprep.subr.bf16.mxu1 %v13197_v0 }
 0x379   : > { %v3612_v16 = vpop.f32.mrb[56].mxu0  ;;  %v3718_v19 = vpop.f32.mrb[56].mxu1 }
 0x37a   : > { %v3618_v17 = vadd.f32 %v3612_v16, %v13959_v52  ;;  %v11207_v18 = vpop.f32.mrb[57].mxu0  ;;  %v11227_v24 = vpop.f32.mrb[57].mxu1  ;;  %v12653_v16 = vld [vmem:[#allocation6 + $0x590] sm:$0xff]  }
 0x37b   : > { %v3615_v21 = vpop.f32.mrb[58].mxu0  ;;  %11480 = vmatpush3.bf16.msra.mxu0 %v12622_v13  ;;  %11500 = vmatpush3.bf16.msra.mxu1 %v12623_v15  ;;  %v3721_v28 = vpop.f32.mrb[58].mxu1  ;;  %v12650_v13 = vld [vmem:[#allocation6 + $0x548] sm:$0xff]   ;;  %v12652_v15 = vld [vmem:[#allocation6 + $0x550] sm:$0xff]   ;;  %v12655_v18 = vld [vmem:[#allocation6 + $0x598] sm:$0xff]  }
 0x37c   : > { %v13984_v25 = vadd.f32 %v3718_v19, %v3618_v17  ;;  %v11208_v26 = vpop.f32.mrb[59].mxu0  ;;  %11481 = vmatprep.subr.bf16.mxu0 %v13197_v0  ;;  %11501 = vmatprep.subr.bf16.mxu1 %v13197_v0  ;;  %v11228_v29 = vpop.f32.mrb[59].mxu1  ;;  %v12654_v17 = vld [vmem:[#allocation6 + $0x558] sm:$0xff]   ;;  %v12656_v19 = vld [vmem:[#allocation6 + $0x560] sm:$0xff]   ;;  %v12664_v21 = vld [vmem:[%s13468_s15 + $0x78] sm:$0x1f]  }
 0x37d   : > { %v12659_v24 = vld [vmem:[#allocation6 + $0x5a8] sm:$0xff]   ;;  %v5531_v29 = vshll.u32 %v12664_v21, 16 }
 0x37f   : > { %11482 = vmatpush3.bf16.msra.mxu0 %v12624_v22  ;;  %11502 = vmatpush3.bf16.msra.mxu1 %v12625_v27  ;;  %v12658_v22 = vld [vmem:[#allocation6 + $0x568] sm:$0xff]  }
 0x380   : > { %11483 = vmatprep.subr.bf16.mxu0 %v13197_v0  ;;  %11503 = vmatprep.subr.bf16.mxu1 %v13197_v0 }
 0x383   : > { %11484 = vmatpush3.bf16.msra.mxu0 %v12626_v32  ;;  %11504 = vmatpush3.bf16.msra.mxu1 %v12627_v35  ;;  %v5651_v32 = vshll.u32 %v12665_v23, 16 }
 0x384   : > { %11509 = vmatprep.subr.bf16.mxu0 %v13197_v0  ;;  %11529 = vmatprep.subr.bf16.mxu1 %v13197_v0 }
 0x386   : > { %11486 = vmatmul.mubr.bf16.vlgmr.msra.gmra.mrb[84].mxu0 %v5054_v36  ;;  %11506 = vmatmul.mubr.bf16.vlgmr.msra.gmra.mrb[84].mxu1 %v5174_v37  ;;  %v12661_v36 = vld [vmem:[#allocation6 + $0x5b0] sm:$0xff]  }
 0x387   : > { %11510 = vmatpush3.bf16.msra.mxu0 %v12630_v38  ;;  %11530 = vmatpush3.bf16.msra.mxu1 %v12631_v39  ;;  %v5529_v39 = vshrl.u32 %v12664_v21, 16  ;;  %v12685_v21 = vld [vmem:[#allocation6] sm:$0xff]  }
 0x388   : > { %11511 = vmatprep.subr.bf16.mxu0 %v13197_v0  ;;  %11531 = vmatprep.subr.bf16.mxu1 %v13197_v0 }
 0x389   : > { %11525 = vmatprep.mubr.msk.bf16.mxu0 %vm13198_vm0, %v13197_v0  ;;  %11545 = vmatprep.mubr.msk.bf16.mxu1 %vm13198_vm0, %v13197_v0 }
 0x38b   : > { %11512 = vmatpush3.bf16.msra.mxu0 %v12632_v40  ;;  %11532 = vmatpush3.bf16.msra.mxu1 %v12633_v41  ;;  %v5533_v40 = vrot.slane %v5531_v29, 1  ;;  %v12662_v41 = vld [vmem:[#allocation6 + $0x578] sm:$0xff]   ;;  %v12693_v29 = vld [vmem:[#allocation6 + $0x20] sm:$0xff]  }
 0x38c   : > { %11513 = vmatprep.subr.bf16.mxu0 %v13197_v0  ;;  %11533 = vmatprep.subr.bf16.mxu1 %v13197_v0 }
 0x38f   : > { %11514 = vmatpush3.bf16.msra.mxu0 %v12634_v42  ;;  %11534 = vmatpush3.bf16.msra.mxu1 %v12635_v43  ;;  %v5649_v42 = vshrl.u32 %v12665_v23, 16  ;;  %v5653_v43 = vrot.slane %v5651_v32, 1  ;;  %v12687_v23 = vld [vmem:[#allocation6 + $0x8] sm:$0xff]  }
 0x390   : > { %11515 = vmatprep.subr.bf16.mxu0 %v13197_v0  ;;  %11535 = vmatprep.subr.bf16.mxu1 %v13197_v0 }
 0x393   : > { %11516 = vmatpush3.bf16.msra.mxu0 %v12636_v44  ;;  %11536 = vmatpush3.bf16.msra.mxu1 %v12637_v45  ;;  %v12663_v44 = vld [vmem:[#allocation6 + $0x5b8] sm:$0xff]   ;;  %v5534_v45 = vor.u32 %v5533_v40, %v5529_v39 }
 0x394   : > { %11517 = vmatprep.subr.bf16.mxu0 %v13197_v0  ;;  %11537 = vmatprep.subr.bf16.mxu1 %v13197_v0 }
 0x397   : > { %11518 = vmatpush3.bf16.msra.mxu0 %v12638_v46  ;;  %11538 = vmatpush3.bf16.msra.mxu1 %v12639_v47  ;;  %v5654_v46 = vor.u32 %v5653_v43, %v5649_v42  ;;  %v12666_v47 = vld [vmem:[#allocation6 + $0x5c0] sm:$0xff]  }
 0x398   : > { %11519 = vmatprep.subr.bf16.mxu0 %v13197_v0  ;;  %11539 = vmatprep.subr.bf16.mxu1 %v13197_v0 }
 0x399   : > { %v3824_v52 = vpop.f32.mrb[60].mxu0  ;;  %v3930_v55 = vpop.f32.mrb[60].mxu1 }
 0x39a   : > { %v3830_v53 = vadd.f32 %v3824_v52, %v13984_v25  ;;  %v11247_v54 = vpop.f32.mrb[61].mxu0  ;;  %v11267_v60 = vpop.f32.mrb[61].mxu1  ;;  %v12671_v52 = vld [vmem:[#allocation6 + $0x610] sm:$0xff]  }
 0x39b   : > { %v3827_v57 = vpop.f32.mrb[62].mxu0  ;;  %11520 = vmatpush3.bf16.msra.mxu0 %v12640_v49  ;;  %11540 = vmatpush3.bf16.msra.mxu1 %v12641_v51  ;;  %v3933_v1 = vpop.f32.mrb[62].mxu1  ;;  %v12668_v49 = vld [vmem:[#allocation6 + $0x5c8] sm:$0xff]   ;;  %v12670_v51 = vld [vmem:[#allocation6 + $0x5d0] sm:$0xff]   ;;  %v12673_v54 = vld [vmem:[#allocation6 + $0x618] sm:$0xff]  }
 0x39c   : > { %v14009_v61 = vadd.f32 %v3930_v55, %v3830_v53  ;;  %v11248_v62 = vpop.f32.mrb[63].mxu0  ;;  %11521 = vmatprep.subr.bf16.mxu0 %v13197_v0  ;;  %11541 = vmatprep.subr.bf16.mxu1 %v13197_v0  ;;  %v11268_v2 = vpop.f32.mrb[63].mxu1  ;;  %v12672_v53 = vld [vmem:[#allocation6 + $0x5d8] sm:$0xff]   ;;  %v12674_v55 = vld [vmem:[#allocation6 + $0x5e0] sm:$0xff]   ;;  %v12677_v60 = vld [vmem:[#allocation6 + $0x628] sm:$0xff]  }
 0x39d   : > { %v12682_v57 = vld [vmem:[%s13468_s15 + $0x88] sm:$0x1f]  }
 0x39e   : > { %v5771_v2 = vshll.u32 %v12682_v57, 16 }
 0x39f   : > { %11522 = vmatpush3.bf16.msra.mxu0 %v12642_v58  ;;  %11542 = vmatpush3.bf16.msra.mxu1 %v12643_v63  ;;  %v12676_v58 = vld [vmem:[#allocation6 + $0x5e8] sm:$0xff]  }
 0x3a0   : > { %11523 = vmatprep.subr.bf16.mxu0 %v13197_v0  ;;  %11543 = vmatprep.subr.bf16.mxu1 %v13197_v0 }
 0x3a3   : > { %11524 = vmatpush3.bf16.msra.mxu0 %v12644_v5  ;;  %11544 = vmatpush3.bf16.msra.mxu1 %v12645_v8  ;;  %v5891_v5 = vshll.u32 %v12683_v59, 16 }
 0x3a4   : > { %11549 = vmatprep.subr.bf16.mxu0 %v13197_v0  ;;  %11569 = vmatprep.subr.bf16.mxu1 %v13197_v0 }
 0x3a6   : > { %11526 = vmatmul.mubr.bf16.vlgmr.msra.gmra.mrb[88].mxu0 %v5294_v9  ;;  %11546 = vmatmul.mubr.bf16.vlgmr.msra.gmra.mrb[88].mxu1 %v5414_v10  ;;  %v12679_v9 = vld [vmem:[#allocation6 + $0x630] sm:$0xff]  }
 0x3a7   : > { %11550 = vmatpush3.bf16.msra.mxu0 %v12648_v11  ;;  %11570 = vmatpush3.bf16.msra.mxu1 %v12649_v12  ;;  %v5769_v12 = vshrl.u32 %v12682_v57, 16  ;;  %v12709_v57 = vld [vmem:[#allocation6 + $0xe0] sm:$0xff]  }
 0x3a8   : > { %11551 = vmatprep.subr.bf16.mxu0 %v13197_v0  ;;  %11571 = vmatprep.subr.bf16.mxu1 %v13197_v0 }
 0x3a9   : > { %11565 = vmatprep.mubr.msk.bf16.mxu0 %vm13198_vm0, %v13197_v0  ;;  %11585 = vmatprep.mubr.msk.bf16.mxu1 %vm13198_vm0, %v13197_v0 }
 0x3ab   : > { %11552 = vmatpush3.bf16.msra.mxu0 %v12650_v13  ;;  %11572 = vmatpush3.bf16.msra.mxu1 %v12651_v14  ;;  %v5773_v13 = vrot.slane %v5771_v2, 1  ;;  %v12680_v14 = vld [vmem:[#allocation6 + $0x5f8] sm:$0xff]   ;;  %v12712_v2 = vld [vmem:[#allocation6 + $0xb0] sm:$0xff]  }
 0x3ac   : > { %11553 = vmatprep.subr.bf16.mxu0 %v13197_v0  ;;  %11573 = vmatprep.subr.bf16.mxu1 %v13197_v0 }
 0x3af   : > { %11554 = vmatpush3.bf16.msra.mxu0 %v12652_v15  ;;  %11574 = vmatpush3.bf16.msra.mxu1 %v12653_v16  ;;  %v5889_v15 = vshrl.u32 %v12683_v59, 16  ;;  %v5893_v16 = vrot.slane %v5891_v5, 1  ;;  %v12711_v59 = vld [vmem:[#allocation6 + $0xe8] sm:$0xff]  }
 0x3b0   : > { %11555 = vmatprep.subr.bf16.mxu0 %v13197_v0  ;;  %11575 = vmatprep.subr.bf16.mxu1 %v13197_v0 }
 0x3b3   : > { %11556 = vmatpush3.bf16.msra.mxu0 %v12654_v17  ;;  %11576 = vmatpush3.bf16.msra.mxu1 %v12655_v18  ;;  %v12681_v17 = vld [vmem:[#allocation6 + $0x638] sm:$0xff]   ;;  %v5774_v18 = vor.u32 %v5773_v13, %v5769_v12  ;;  %v12716_v12 = vld [vmem:[#allocation6 + $0x100] sm:$0xff]  }
 0x3b4   : > { %11557 = vmatprep.subr.bf16.mxu0 %v13197_v0  ;;  %11577 = vmatprep.subr.bf16.mxu1 %v13197_v0  ;;  %v6312_v13 = vld [vmem:[%s13468_s15 + $0x48] sm:$0xf] }
 0x3b7   : > { %11558 = vmatpush3.bf16.msra.mxu0 %v12656_v19  ;;  %11578 = vmatpush3.bf16.msra.mxu1 %v12657_v20  ;;  %v5894_v19 = vor.u32 %v5893_v16, %v5889_v15  ;;  %v12684_v20 = vld [vmem:[#allocation6 + $0x40] sm:$0xff]   ;;  %v12718_v15 = vld [vmem:[#allocation6 + $0x108] sm:$0xff]  }
 0x3b8   : > { %11559 = vmatprep.subr.bf16.mxu0 %v13197_v0  ;;  %11579 = vmatprep.subr.bf16.mxu1 %v13197_v0  ;;  %v12719_v16 = vld [vmem:[#allocation6 + $0x148] sm:$0xff]  }
 0x3b9   : > { %v4036_v25 = vpop.f32.mrb[64].mxu0  ;;  %v4142_v28 = vpop.f32.mrb[64].mxu1 }
 0x3ba   : > { %v4042_v26 = vadd.f32 %v4036_v25, %v14009_v61  ;;  %v11287_v27 = vpop.f32.mrb[65].mxu0  ;;  %v11307_v33 = vpop.f32.mrb[65].mxu1  ;;  %v12689_v25 = vld [vmem:[#allocation6 + $0x10] sm:$0xff]  }
 0x3bb   : > { %v4039_v30 = vpop.f32.mrb[66].mxu0  ;;  %11560 = vmatpush3.bf16.msra.mxu0 %v12658_v22  ;;  %11580 = vmatpush3.bf16.msra.mxu1 %v12659_v24  ;;  %v4145_v37 = vpop.f32.mrb[66].mxu1  ;;  %v12686_v22 = vld [vmem:[#allocation6 + $0x48] sm:$0xff]   ;;  %v12688_v24 = vld [vmem:[#allocation6 + $0x50] sm:$0xff]   ;;  %v12691_v27 = vld [vmem:[#allocation6 + $0x18] sm:$0xff]  }
 0x3bc   : > { %v14034_v34 = vadd.f32 %v4142_v28, %v4042_v26  ;;  %v11288_v35 = vpop.f32.mrb[67].mxu0  ;;  %11561 = vmatprep.subr.bf16.mxu0 %v13197_v0  ;;  %11581 = vmatprep.subr.bf16.mxu1 %v13197_v0  ;;  %v11308_v38 = vpop.f32.mrb[67].mxu1  ;;  %v12690_v26 = vld [vmem:[#allocation6 + $0x58] sm:$0xff]   ;;  %v12692_v28 = vld [vmem:[#allocation6 + $0x60] sm:$0xff]   ;;  %v12694_v30 = vld [vmem:[#allocation6 + $0x68] sm:$0xff]  }
 0x3bd   : > { %v12696_v37 = vld [vmem:[#allocation6 + $0x70] sm:$0xff]  }
 0x3bf   : > { %11562 = vmatpush3.bf16.msra.mxu0 %v12660_v31  ;;  %11582 = vmatpush3.bf16.msra.mxu1 %v12661_v36  ;;  %v12695_v31 = vld [vmem:[#allocation6 + $0x28] sm:$0xff]  }
 0x3c0   : > { %11563 = vmatprep.subr.bf16.mxu0 %v13197_v0  ;;  %11583 = vmatprep.subr.bf16.mxu1 %v13197_v0 }
 0x3c3   : > { %11564 = vmatpush3.bf16.msra.mxu0 %v12662_v41  ;;  %11584 = vmatpush3.bf16.msra.mxu1 %v12663_v44  ;;  %v12697_v41 = vld [vmem:[#allocation6 + $0x30] sm:$0xff]   ;;  %v12698_v44 = vld [vmem:[#allocation6 + $0x78] sm:$0xff]  }
 0x3c4   : > { %11589 = vmatprep.subr.bf16.mxu0 %v13197_v0  ;;  %11609 = vmatprep.subr.bf16.mxu1 %v13197_v0 }
 0x3c6   : > { %11566 = vmatmul.mubr.bf16.vlgmr.msra.gmra.mrb[92].mxu0 %v5534_v45  ;;  %11586 = vmatmul.mubr.bf16.vlgmr.msra.gmra.mrb[92].mxu1 %v5654_v46  ;;  %v12699_v45 = vld [vmem:[#allocation6 + $0x38] sm:$0xff]   ;;  %v6013_v46 = vld [vmem:[%s13468_s15 + $0x38] sm:$0xf] }
 0x3c7   : > { %11590 = vmatpush3.bf16.msra.mxu0 %v12666_v47  ;;  %11610 = vmatpush3.bf16.msra.mxu1 %v12667_v48  ;;  %v12700_v47 = vld [vmem:[#allocation6 + $0x80] sm:$0xff]  }
 0x3c8   : > { %11591 = vmatprep.subr.bf16.mxu0 %v13197_v0  ;;  %11611 = vmatprep.subr.bf16.mxu1 %v13197_v0  ;;  %v5996_v48 = vld [vmem:[%s13468_s15 + $0x30] sm:$0xf] }
 0x3c9   : > { %11605 = vmatprep.mubr.msk.bf16.mxu0 %vm13198_vm0, %v13197_v0  ;;  %11625 = vmatprep.mubr.msk.bf16.mxu1 %vm13198_vm0, %v13197_v0 }
 0x3cb   : > { %11592 = vmatpush3.bf16.msra.mxu0 %v12668_v49  ;;  %11612 = vmatpush3.bf16.msra.mxu1 %v12669_v50  ;;  %v12701_v49 = vld [vmem:[#allocation6 + $0xc0] sm:$0xff]   ;;  %v12702_v50 = vld [vmem:[#allocation6 + $0x88] sm:$0xff]  }
 0x3cc   : > { %11593 = vmatprep.subr.bf16.mxu0 %v13197_v0  ;;  %11613 = vmatprep.subr.bf16.mxu1 %v13197_v0 }
 0x3cf   : > { %11594 = vmatpush3.bf16.msra.mxu0 %v12670_v51  ;;  %11614 = vmatpush3.bf16.msra.mxu1 %v12671_v52  ;;  %v12703_v51 = vld [vmem:[#allocation6 + $0xc8] sm:$0xff]   ;;  %v12704_v52 = vld [vmem:[#allocation6 + $0x90] sm:$0xff]  }
 0x3d0   : > { %11595 = vmatprep.subr.bf16.mxu0 %v13197_v0  ;;  %11615 = vmatprep.subr.bf16.mxu1 %v13197_v0 }
 0x3d3   : > { %11596 = vmatpush3.bf16.msra.mxu0 %v12672_v53  ;;  %11616 = vmatpush3.bf16.msra.mxu1 %v12673_v54  ;;  %v12705_v53 = vld [vmem:[#allocation6 + $0xd0] sm:$0xff]   ;;  %v12706_v54 = vld [vmem:[#allocation6 + $0x98] sm:$0xff]  }
 0x3d4   : > { %11597 = vmatprep.subr.bf16.mxu0 %v13197_v0  ;;  %11617 = vmatprep.subr.bf16.mxu1 %v13197_v0 }
 0x3d7   : > { %11598 = vmatpush3.bf16.msra.mxu0 %v12674_v55  ;;  %11618 = vmatpush3.bf16.msra.mxu1 %v12675_v56  ;;  %v12707_v55 = vld [vmem:[#allocation6 + $0xd8] sm:$0xff]   ;;  %v12708_v56 = vld [vmem:[#allocation6 + $0xa0] sm:$0xff]  }
 0x3d8   : > { %11599 = vmatprep.subr.bf16.mxu0 %v13197_v0  ;;  %11619 = vmatprep.subr.bf16.mxu1 %v13197_v0 }
 0x3d9   : > { %v4248_v61 = vpop.f32.mrb[68].mxu0  ;;  %v4354_v1 = vpop.f32.mrb[68].mxu1 }
 0x3da   : > { %v4254_v62 = vadd.f32 %v4248_v61, %v14034_v34  ;;  %v11327_v63 = vpop.f32.mrb[69].mxu0  ;;  %v11347_v6 = vpop.f32.mrb[69].mxu1 }
 0x3db   : > { %v4251_v3 = vpop.f32.mrb[70].mxu0  ;;  %11600 = vmatpush3.bf16.msra.mxu0 %v12676_v58  ;;  %11620 = vmatpush3.bf16.msra.mxu1 %v12677_v60  ;;  %v4357_v10 = vpop.f32.mrb[70].mxu1  ;;  %v12710_v58 = vld [vmem:[#allocation6 + $0xa8] sm:$0xff]   ;;  %v12713_v6 = vld [vmem:[#allocation6 + $0xf0] sm:$0xff]  }
 0x3dc   : > { %v4360_v7 = vadd.f32 %v4354_v1, %v4254_v62  ;;  %v11328_v8 = vpop.f32.mrb[71].mxu0  ;;  %11601 = vmatprep.subr.bf16.mxu0 %v13197_v0  ;;  %11621 = vmatprep.subr.bf16.mxu1 %v13197_v0  ;;  %v11348_v11 = vpop.f32.mrb[71].mxu1  ;;  %v12715_v10 = vld [vmem:[#allocation6 + $0xf8] sm:$0xff]  }
 0x3dd   : > { %v6206_v11 = vld [vmem:[%s13468_s15 + $0x40] sm:$0xf] }
 0x3df   : > { %11602 = vmatpush3.bf16.msra.mxu0 %v12678_v4  ;;  %11622 = vmatpush3.bf16.msra.mxu1 %v12679_v9  ;;  %v12714_v9 = vld [vmem:[#allocation6 + $0xb8] sm:$0xff]  }
 0x3e0   : > { %11603 = vmatprep.subr.bf16.mxu0 %v13197_v0  ;;  %11623 = vmatprep.subr.bf16.mxu1 %v13197_v0 }
 0x3e3   : > { %11604 = vmatpush3.bf16.msra.mxu0 %v12680_v14  ;;  %11624 = vmatpush3.bf16.msra.mxu1 %v12681_v17  ;;  %v12717_v14 = vld [vmem:[#allocation6 + $0x140] sm:$0xff]   ;;  %v12720_v17 = vld [vmem:[#allocation6 + $0x110] sm:$0xff]  }
 0x3e4   : > { %11629 = vmatprep.subr.bf16.mxu0 %v13197_v0  ;;  %11649 = vmatprep.subr.bf16.mxu1 %v13197_v0 }
 0x3e6   : > { %11606 = vmatmul.mubr.bf16.vlgmr.msra.gmra.mrb[96].mxu0 %v5774_v18  ;;  %11626 = vmatmul.mubr.bf16.vlgmr.msra.gmra.mrb[96].mxu1 %v5894_v19  ;;  %v12721_v18 = vld [vmem:[#allocation6 + $0x150] sm:$0xff]   ;;  %v12722_v19 = vld [vmem:[#allocation6 + $0x118] sm:$0xff]  }
 0x3e7   : > { %11630 = vmatpush3.bf16.msra.mxu0 %v12684_v20  ;;  %11650 = vmatpush3.bf16.msra.mxu1 %v12685_v21  ;;  %v12723_v20 = vld [vmem:[#allocation6 + $0x158] sm:$0xff]   ;;  %v12724_v21 = vld [vmem:[#allocation6 + $0x120] sm:$0xff]  }
 0x3e8   : > { %11631 = vmatprep.subr.bf16.mxu0 %v13197_v0  ;;  %11651 = vmatprep.subr.bf16.mxu1 %v13197_v0 }
 0x3e9   : > { %11645 = vmatprep.mubr.msk.bf16.mxu0 %vm13198_vm0, %v13197_v0  ;;  %11665 = vmatprep.mubr.msk.bf16.mxu1 %vm13198_vm0, %v13197_v0 }
 0x3eb   : > { %11632 = vmatpush3.bf16.msra.mxu0 %v12686_v22  ;;  %11652 = vmatpush3.bf16.msra.mxu1 %v12687_v23  ;;  %v12725_v22 = vld [vmem:[#allocation6 + $0x160] sm:$0xff]   ;;  %v12726_v23 = vld [vmem:[#allocation6 + $0x128] sm:$0xff]  }
 0x3ec   : > { %11633 = vmatprep.subr.bf16.mxu0 %v13197_v0  ;;  %11653 = vmatprep.subr.bf16.mxu1 %v13197_v0 }
 0x3ef   : > { %11634 = vmatpush3.bf16.msra.mxu0 %v12688_v24  ;;  %11654 = vmatpush3.bf16.msra.mxu1 %v12689_v25  ;;  %v12727_v24 = vld [vmem:[#allocation6 + $0x168] sm:$0xff]  }
 0x3f0   : > { %11635 = vmatprep.subr.bf16.mxu0 %v13197_v0  ;;  %11655 = vmatprep.subr.bf16.mxu1 %v13197_v0 }
 0x3f3   : > { %11636 = vmatpush3.bf16.msra.mxu0 %v12690_v26  ;;  %11656 = vmatpush3.bf16.msra.mxu1 %v12691_v27 }
 0x3f4   : > { %11637 = vmatprep.subr.bf16.mxu0 %v13197_v0  ;;  %11657 = vmatprep.subr.bf16.mxu1 %v13197_v0 }
 0x3f7   : > { %11638 = vmatpush3.bf16.msra.mxu0 %v12692_v28  ;;  %11658 = vmatpush3.bf16.msra.mxu1 %v12693_v29 }
 0x3f8   : > { %11639 = vmatprep.subr.bf16.mxu0 %v13197_v0  ;;  %11659 = vmatprep.subr.bf16.mxu1 %v13197_v0 }
 0x3f9   : > { %v4460_v32 = vpop.f32.mrb[72].mxu0  ;;  %v4566_v35 = vpop.f32.mrb[72].mxu1 }
 0x3fa   : > { %v4466_v33 = vadd.f32 %v4460_v32, %v4360_v7  ;;  %v11367_v34 = vpop.f32.mrb[73].mxu0  ;;  %v11387_v38 = vpop.f32.mrb[73].mxu1 }
 0x3fb   : > { %v4463_v36 = vpop.f32.mrb[74].mxu0  ;;  %11640 = vmatpush3.bf16.msra.mxu0 %v12694_v30  ;;  %11660 = vmatpush3.bf16.msra.mxu1 %v12695_v31  ;;  %v4569_v42 = vpop.f32.mrb[74].mxu1  ;;  %v12728_v30 = vld [vmem:[#allocation6 + $0x130] sm:$0xff]   ;;  %v12731_v38 = vld [vmem:[#allocation6 + $0x178] sm:$0xff]  }
 0x3fc   : > { %v4572_v39 = vadd.f32 %v4566_v35, %v4466_v33  ;;  %v11368_v40 = vpop.f32.mrb[75].mxu0  ;;  %11641 = vmatprep.subr.bf16.mxu0 %v13197_v0  ;;  %11661 = vmatprep.subr.bf16.mxu1 %v13197_v0  ;;  %v11388_v43 = vpop.f32.mrb[75].mxu1  ;;  %v12729_v34 = vld [vmem:[#allocation6 + $0x170] sm:$0xff]   ;;  %v12733_v42 = vld [vmem:[#allocation6 + $0x1c0] sm:$0xff]  }
 0x3fd   : > { %v12732_v40 = vld [vmem:[#allocation6 + $0x180] sm:$0xff]   ;;  %v12734_v43 = vld [vmem:[#allocation6 + $0x188] sm:$0xff]  }
 0x3ff   : > { %11642 = vmatpush3.bf16.msra.mxu0 %v12696_v37  ;;  %11662 = vmatpush3.bf16.msra.mxu1 %v12697_v41  ;;  %v12730_v37 = vld [vmem:[#allocation6 + $0x138] sm:$0xff]  }
 0x400   : > { %11643 = vmatprep.subr.bf16.mxu0 %v13197_v0  ;;  %11663 = vmatprep.subr.bf16.mxu1 %v13197_v0  ;;  %v6524_v41 = vld [vmem:[%s13468_s15 + $0x88] sm:$0xf] }
 0x403   : > { %11644 = vmatpush3.bf16.msra.mxu0 %v12698_v44  ;;  %11664 = vmatpush3.bf16.msra.mxu1 %v12699_v45  ;;  %v12735_v44 = vld [vmem:[#allocation6 + $0x1c8] sm:$0xff]   ;;  %v12736_v45 = vld [vmem:[#allocation6 + $0x190] sm:$0xff]  }
 0x404   : > { %11669 = vmatprep.subr.bf16.mxu0 %v13197_v0  ;;  %11689 = vmatprep.subr.bf16.mxu1 %v13197_v0 }
 0x406   : > { %11646 = vmatmul.mubr.bf16.vlgmr.msra.gmra.mrb[100].mxu0 %v6013_v46  ;;  %11666 = vmatmul.mubr.bf16.vlgmr.msra.gmra.mrb[100].mxu1 %v5996_v48  ;;  %v12737_v46 = vld [vmem:[#allocation6 + $0x1d0] sm:$0xff]   ;;  %v12739_v48 = vld [vmem:[#allocation6 + $0x1d8] sm:$0xff]  }
 0x407   : > { %11670 = vmatpush3.bf16.msra.mxu0 %v12700_v47  ;;  %11690 = vmatpush3.bf16.msra.mxu1 %v12701_v49  ;;  %v12738_v47 = vld [vmem:[#allocation6 + $0x198] sm:$0xff]   ;;  %v12740_v49 = vld [vmem:[#allocation6 + $0x1a0] sm:$0xff]  }
 0x408   : > { %11671 = vmatprep.subr.bf16.mxu0 %v13197_v0  ;;  %11691 = vmatprep.subr.bf16.mxu1 %v13197_v0 }
 0x409   : > { %11685 = vmatprep.mubr.msk.bf16.mxu0 %vm13198_vm0, %v13197_v0  ;;  %11705 = vmatprep.mubr.msk.bf16.mxu1 %vm13198_vm0, %v13197_v0 }
 0x40b   : > { %11672 = vmatpush3.bf16.msra.mxu0 %v12702_v50  ;;  %11692 = vmatpush3.bf16.msra.mxu1 %v12703_v51  ;;  %v12741_v50 = vld [vmem:[#allocation6 + $0x1e0] sm:$0xff]   ;;  %v12742_v51 = vld [vmem:[#allocation6 + $0x1a8] sm:$0xff]  }
 0x40c   : > { %11673 = vmatprep.subr.bf16.mxu0 %v13197_v0  ;;  %11693 = vmatprep.subr.bf16.mxu1 %v13197_v0 }
 0x40f   : > { %11674 = vmatpush3.bf16.msra.mxu0 %v12704_v52  ;;  %11694 = vmatpush3.bf16.msra.mxu1 %v12705_v53  ;;  %v12743_v52 = vld [vmem:[#allocation6 + $0x1e8] sm:$0xff]  }
 0x410   : > { %11675 = vmatprep.subr.bf16.mxu0 %v13197_v0  ;;  %11695 = vmatprep.subr.bf16.mxu1 %v13197_v0 }
 0x413   : > { %11676 = vmatpush3.bf16.msra.mxu0 %v12706_v54  ;;  %11696 = vmatpush3.bf16.msra.mxu1 %v12707_v55 }
 0x414   : > { %11677 = vmatprep.subr.bf16.mxu0 %v13197_v0  ;;  %11697 = vmatprep.subr.bf16.mxu1 %v13197_v0 }
 0x417   : > { %11678 = vmatpush3.bf16.msra.mxu0 %v12708_v56  ;;  %11698 = vmatpush3.bf16.msra.mxu1 %v12709_v57 }
 0x418   : > { %11679 = vmatprep.subr.bf16.mxu0 %v13197_v0  ;;  %11699 = vmatprep.subr.bf16.mxu1 %v13197_v0 }
 0x419   : > { %v4672_v60 = vpop.f32.mrb[76].mxu0  ;;  %v4778_v63 = vpop.f32.mrb[76].mxu1 }
 0x41a   : > { %v4678_v61 = vadd.f32 %v4672_v60, %v4572_v39  ;;  %v11407_v62 = vpop.f32.mrb[77].mxu0  ;;  %v11427_v3 = vpop.f32.mrb[77].mxu1  ;;  %v6418_v39 = vld [vmem:[%s13468_s15 + $0x50] sm:$0xf] }
 0x41b   : > { %v4675_v1 = vpop.f32.mrb[78].mxu0  ;;  %11680 = vmatpush3.bf16.msra.mxu0 %v12710_v58  ;;  %11700 = vmatpush3.bf16.msra.mxu1 %v12711_v59  ;;  %v4781_v7 = vpop.f32.mrb[78].mxu1  ;;  %v12744_v58 = vld [vmem:[#allocation6 + $0x1b0] sm:$0xff]   ;;  %v12747_v3 = vld [vmem:[#allocation6 + $0x1f8] sm:$0xff]  }
 0x41c   : > { %v4784_v4 = vadd.f32 %v4778_v63, %v4678_v61  ;;  %v11408_v5 = vpop.f32.mrb[79].mxu0  ;;  %11681 = vmatprep.subr.bf16.mxu0 %v13197_v0  ;;  %11701 = vmatprep.subr.bf16.mxu1 %v13197_v0  ;;  %v11428_v8 = vpop.f32.mrb[79].mxu1  ;;  %v12745_v62 = vld [vmem:[#allocation6 + $0x1f0] sm:$0xff]   ;;  %v12749_v7 = vld [vmem:[#allocation6 + $0x240] sm:$0xff]  }
 0x41d   : > { %v12748_v5 = vld [vmem:[#allocation6 + $0x200] sm:$0xff]   ;;  %v12750_v8 = vld [vmem:[#allocation6 + $0x208] sm:$0xff]  }
 0x41f   : > { %11682 = vmatpush3.bf16.msra.mxu0 %v12712_v2  ;;  %11702 = vmatpush3.bf16.msra.mxu1 %v12713_v6  ;;  %v12746_v2 = vld [vmem:[#allocation6 + $0x1b8] sm:$0xff]   ;;  %v6736_v6 = vld [vmem:[%s13468_s15 + $0x98] sm:$0xf] }
 0x420   : > { %11683 = vmatprep.subr.bf16.mxu0 %v13197_v0  ;;  %11703 = vmatprep.subr.bf16.mxu1 %v13197_v0 }
 0x423   : > { %11684 = vmatpush3.bf16.msra.mxu0 %v12714_v9  ;;  %11704 = vmatpush3.bf16.msra.mxu1 %v12715_v10  ;;  %v12751_v9 = vld [vmem:[#allocation6 + $0x248] sm:$0xff]   ;;  %v12752_v10 = vld [vmem:[#allocation6 + $0x210] sm:$0xff]  }
 0x424   : > { %11709 = vmatprep.subr.bf16.mxu0 %v13197_v0  ;;  %11729 = vmatprep.subr.bf16.mxu1 %v13197_v0 }
 0x426   : > { %11686 = vmatmul.mubr.bf16.vlgmr.msra.gmra.mrb[104].mxu0 %v6206_v11  ;;  %11706 = vmatmul.mubr.bf16.vlgmr.msra.gmra.mrb[104].mxu1 %v6312_v13  ;;  %v12753_v11 = vld [vmem:[#allocation6 + $0x250] sm:$0xff]   ;;  %v12755_v13 = vld [vmem:[#allocation6 + $0x258] sm:$0xff]  }
 0x427   : > { %11710 = vmatpush3.bf16.msra.mxu0 %v12716_v12  ;;  %11730 = vmatpush3.bf16.msra.mxu1 %v12717_v14  ;;  %v12754_v12 = vld [vmem:[#allocation6 + $0x218] sm:$0xff]   ;;  %v12756_v14 = vld [vmem:[#allocation6 + $0x220] sm:$0xff]  }
 0x428   : > { %11711 = vmatprep.subr.bf16.mxu0 %v13197_v0  ;;  %11731 = vmatprep.subr.bf16.mxu1 %v13197_v0 }
 0x429   : > { %11725 = vmatprep.mubr.msk.bf16.mxu0 %vm13198_vm0, %v13197_v0  ;;  %11745 = vmatprep.mubr.msk.bf16.mxu1 %vm13198_vm0, %v13197_v0 }
 0x42b   : > { %11712 = vmatpush3.bf16.msra.mxu0 %v12718_v15  ;;  %11732 = vmatpush3.bf16.msra.mxu1 %v12719_v16  ;;  %v12757_v15 = vld [vmem:[#allocation6 + $0x260] sm:$0xff]   ;;  %v12758_v16 = vld [vmem:[#allocation6 + $0x228] sm:$0xff]  }
 0x42c   : > { %11713 = vmatprep.subr.bf16.mxu0 %v13197_v0  ;;  %11733 = vmatprep.subr.bf16.mxu1 %v13197_v0 }
 0x42f   : > { %11714 = vmatpush3.bf16.msra.mxu0 %v12720_v17  ;;  %11734 = vmatpush3.bf16.msra.mxu1 %v12721_v18  ;;  %v12759_v17 = vld [vmem:[#allocation6 + $0x268] sm:$0xff]  }
 0x430   : > { %11715 = vmatprep.subr.bf16.mxu0 %v13197_v0  ;;  %11735 = vmatprep.subr.bf16.mxu1 %v13197_v0 }
 0x433   : > { %11716 = vmatpush3.bf16.msra.mxu0 %v12722_v19  ;;  %11736 = vmatpush3.bf16.msra.mxu1 %v12723_v20 }
 0x434   : > { %11717 = vmatprep.subr.bf16.mxu0 %v13197_v0  ;;  %11737 = vmatprep.subr.bf16.mxu1 %v13197_v0 }
 0x437   : > { %11718 = vmatpush3.bf16.msra.mxu0 %v12724_v21  ;;  %11738 = vmatpush3.bf16.msra.mxu1 %v12725_v22 }
 0x438   : > { %11719 = vmatprep.subr.bf16.mxu0 %v13197_v0  ;;  %11739 = vmatprep.subr.bf16.mxu1 %v13197_v0 }
 0x439   : > { %v4898_v25 = vpop.f32.mrb[80].mxu0  ;;  %v5018_v28 = vpop.f32.mrb[80].mxu1 }
 0x43a   : > { %v4904_v26 = vadd.f32 %v4898_v25, %v4784_v4  ;;  %v11447_v27 = vpop.f32.mrb[81].mxu0  ;;  %v11467_v31 = vpop.f32.mrb[81].mxu1  ;;  %v6630_v4 = vld [vmem:[%s13468_s15 + $0x90] sm:$0xf] }
 0x43b   : > { %v4901_v29 = vpop.f32.mrb[82].mxu0  ;;  %11720 = vmatpush3.bf16.msra.mxu0 %v12726_v23  ;;  %11740 = vmatpush3.bf16.msra.mxu1 %v12727_v24  ;;  %v5021_v35 = vpop.f32.mrb[82].mxu1  ;;  %v12760_v23 = vld [vmem:[#allocation6 + $0x230] sm:$0xff]   ;;  %v12763_v31 = vld [vmem:[#allocation6 + $0x278] sm:$0xff]  }
 0x43c   : > { %v5024_v32 = vadd.f32 %v5018_v28, %v4904_v26  ;;  %v11448_v33 = vpop.f32.mrb[83].mxu0  ;;  %11721 = vmatprep.subr.bf16.mxu0 %v13197_v0  ;;  %11741 = vmatprep.subr.bf16.mxu1 %v13197_v0  ;;  %v11468_v36 = vpop.f32.mrb[83].mxu1  ;;  %v12761_v27 = vld [vmem:[#allocation6 + $0x270] sm:$0xff]   ;;  %v12765_v35 = vld [vmem:[#allocation6 + $0x2c0] sm:$0xff]  }
 0x43d   : > { %v12764_v33 = vld [vmem:[#allocation6 + $0x280] sm:$0xff]   ;;  %v12766_v36 = vld [vmem:[#allocation6 + $0x288] sm:$0xff]  }
 0x43f   : > { %11722 = vmatpush3.bf16.msra.mxu0 %v12728_v30  ;;  %11742 = vmatpush3.bf16.msra.mxu1 %v12729_v34  ;;  %v12762_v30 = vld [vmem:[#allocation6 + $0x238] sm:$0xff]  }
 0x440   : > { %11723 = vmatprep.subr.bf16.mxu0 %v13197_v0  ;;  %11743 = vmatprep.subr.bf16.mxu1 %v13197_v0  ;;  %v6948_v34 = vld [vmem:[%s13468_s15 + $0xa8] sm:$0xf] }
 0x443   : > { %11724 = vmatpush3.bf16.msra.mxu0 %v12730_v37  ;;  %11744 = vmatpush3.bf16.msra.mxu1 %v12731_v38  ;;  %v12767_v37 = vld [vmem:[#allocation6 + $0x2c8] sm:$0xff]   ;;  %v12768_v38 = vld [vmem:[#allocation6 + $0x290] sm:$0xff]  }
 0x444   : > { %11749 = vmatprep.subr.bf16.mxu0 %v13197_v0  ;;  %11769 = vmatprep.subr.bf16.mxu1 %v13197_v0 }
 0x446   : > { %11726 = vmatmul.mubr.bf16.vlgmr.msra.gmra.mrb[108].mxu0 %v6418_v39  ;;  %11746 = vmatmul.mubr.bf16.vlgmr.msra.gmra.mrb[108].mxu1 %v6524_v41  ;;  %v12769_v39 = vld [vmem:[#allocation6 + $0x2d0] sm:$0xff]   ;;  %v12771_v41 = vld [vmem:[#allocation6 + $0x2d8] sm:$0xff]  }
 0x447   : > { %11750 = vmatpush3.bf16.msra.mxu0 %v12732_v40  ;;  %11770 = vmatpush3.bf16.msra.mxu1 %v12733_v42  ;;  %v12770_v40 = vld [vmem:[#allocation6 + $0x298] sm:$0xff]   ;;  %v12772_v42 = vld [vmem:[#allocation6 + $0x2a0] sm:$0xff]  }
 0x448   : > { %11751 = vmatprep.subr.bf16.mxu0 %v13197_v0  ;;  %11771 = vmatprep.subr.bf16.mxu1 %v13197_v0 }
 0x449   : > { %11765 = vmatprep.mubr.msk.bf16.mxu0 %vm13198_vm0, %v13197_v0  ;;  %11785 = vmatprep.mubr.msk.bf16.mxu1 %vm13198_vm0, %v13197_v0 }
 0x44b   : > { %11752 = vmatpush3.bf16.msra.mxu0 %v12734_v43  ;;  %11772 = vmatpush3.bf16.msra.mxu1 %v12735_v44  ;;  %v12773_v43 = vld [vmem:[#allocation6 + $0x2e0] sm:$0xff]   ;;  %v12774_v44 = vld [vmem:[#allocation6 + $0x2a8] sm:$0xff]  }
 0x44c   : > { %11753 = vmatprep.subr.bf16.mxu0 %v13197_v0  ;;  %11773 = vmatprep.subr.bf16.mxu1 %v13197_v0 }
 0x44f   : > { %11754 = vmatpush3.bf16.msra.mxu0 %v12736_v45  ;;  %11774 = vmatpush3.bf16.msra.mxu1 %v12737_v46  ;;  %v12775_v45 = vld [vmem:[#allocation6 + $0x2e8] sm:$0xff]  }
 0x450   : > { %11755 = vmatprep.subr.bf16.mxu0 %v13197_v0  ;;  %11775 = vmatprep.subr.bf16.mxu1 %v13197_v0 }
 0x453   : > { %11756 = vmatpush3.bf16.msra.mxu0 %v12738_v47  ;;  %11776 = vmatpush3.bf16.msra.mxu1 %v12739_v48 }
 0x454   : > { %11757 = vmatprep.subr.bf16.mxu0 %v13197_v0  ;;  %11777 = vmatprep.subr.bf16.mxu1 %v13197_v0 }
 0x457   : > { %11758 = vmatpush3.bf16.msra.mxu0 %v12740_v49  ;;  %11778 = vmatpush3.bf16.msra.mxu1 %v12741_v50 }
 0x458   : > { %11759 = vmatprep.subr.bf16.mxu0 %v13197_v0  ;;  %11779 = vmatprep.subr.bf16.mxu1 %v13197_v0 }
 0x459   : > { %v5138_v53 = vpop.f32.mrb[84].mxu0  ;;  %v5258_v56 = vpop.f32.mrb[84].mxu1 }
 0x45a   : > { %v5144_v54 = vadd.f32 %v5138_v53, %v5024_v32  ;;  %v11487_v55 = vpop.f32.mrb[85].mxu0  ;;  %v11507_v59 = vpop.f32.mrb[85].mxu1  ;;  %v6842_v32 = vld [vmem:[%s13468_s15 + $0xa0] sm:$0xf] }
 0x45b   : > { %v5141_v57 = vpop.f32.mrb[86].mxu0  ;;  %11760 = vmatpush3.bf16.msra.mxu0 %v12742_v51  ;;  %11780 = vmatpush3.bf16.msra.mxu1 %v12743_v52  ;;  %v5261_v63 = vpop.f32.mrb[86].mxu1  ;;  %v12776_v51 = vld [vmem:[#allocation6 + $0x2b0] sm:$0xff]   ;;  %v12779_v59 = vld [vmem:[#allocation6 + $0x2f8] sm:$0xff]  }
 0x45c   : > { %v5264_v60 = vadd.f32 %v5258_v56, %v5144_v54  ;;  %v11488_v61 = vpop.f32.mrb[87].mxu0  ;;  %11761 = vmatprep.subr.bf16.mxu0 %v13197_v0  ;;  %11781 = vmatprep.subr.bf16.mxu1 %v13197_v0  ;;  %v11508_v1 = vpop.f32.mrb[87].mxu1  ;;  %v12777_v55 = vld [vmem:[#allocation6 + $0x2f0] sm:$0xff]   ;;  %v12781_v63 = vld [vmem:[#allocation6 + $0x340] sm:$0xff]  }
 0x45d   : > { %v12780_v61 = vld [vmem:[#allocation6 + $0x300] sm:$0xff]   ;;  %v12782_v1 = vld [vmem:[#allocation6 + $0x308] sm:$0xff]  }
 0x45f   : > { %11762 = vmatpush3.bf16.msra.mxu0 %v12744_v58  ;;  %11782 = vmatpush3.bf16.msra.mxu1 %v12745_v62  ;;  %v12778_v58 = vld [vmem:[#allocation6 + $0x2b8] sm:$0xff]  }
 0x460   : > { %11763 = vmatprep.subr.bf16.mxu0 %v13197_v0  ;;  %11783 = vmatprep.subr.bf16.mxu1 %v13197_v0  ;;  %v7160_v62 = vld [vmem:[%s13468_s15 + $0xe8] sm:$0xf] }
 0x463   : > { %11764 = vmatpush3.bf16.msra.mxu0 %v12746_v2  ;;  %11784 = vmatpush3.bf16.msra.mxu1 %v12747_v3  ;;  %v12783_v2 = vld [vmem:[#allocation6 + $0x348] sm:$0xff]   ;;  %v12784_v3 = vld [vmem:[#allocation6 + $0x310] sm:$0xff]  }
 0x464   : > { %11789 = vmatprep.subr.bf16.mxu0 %v13197_v0  ;;  %11809 = vmatprep.subr.bf16.mxu1 %v13197_v0 }
 0x466   : > { %11766 = vmatmul.mubr.bf16.vlgmr.msra.gmra.mrb[112].mxu0 %v6630_v4  ;;  %11786 = vmatmul.mubr.bf16.vlgmr.msra.gmra.mrb[112].mxu1 %v6736_v6  ;;  %v12785_v4 = vld [vmem:[#allocation6 + $0x350] sm:$0xff]   ;;  %v12787_v6 = vld [vmem:[#allocation6 + $0x358] sm:$0xff]  }
 0x467   : > { %11790 = vmatpush3.bf16.msra.mxu0 %v12748_v5  ;;  %11810 = vmatpush3.bf16.msra.mxu1 %v12749_v7  ;;  %v12786_v5 = vld [vmem:[#allocation6 + $0x318] sm:$0xff]   ;;  %v12788_v7 = vld [vmem:[#allocation6 + $0x320] sm:$0xff]  }
 0x468   : > { %11791 = vmatprep.subr.bf16.mxu0 %v13197_v0  ;;  %11811 = vmatprep.subr.bf16.mxu1 %v13197_v0 }
 0x469   : > { %11805 = vmatprep.mubr.msk.bf16.mxu0 %vm13198_vm0, %v13197_v0  ;;  %11825 = vmatprep.mubr.msk.bf16.mxu1 %vm13198_vm0, %v13197_v0 }
 0x46b   : > { %11792 = vmatpush3.bf16.msra.mxu0 %v12750_v8  ;;  %11812 = vmatpush3.bf16.msra.mxu1 %v12751_v9  ;;  %v12789_v8 = vld [vmem:[#allocation6 + $0x360] sm:$0xff]   ;;  %v12790_v9 = vld [vmem:[#allocation6 + $0x328] sm:$0xff]  }
 0x46c   : > { %11793 = vmatprep.subr.bf16.mxu0 %v13197_v0  ;;  %11813 = vmatprep.subr.bf16.mxu1 %v13197_v0 }
 0x46f   : > { %11794 = vmatpush3.bf16.msra.mxu0 %v12752_v10  ;;  %11814 = vmatpush3.bf16.msra.mxu1 %v12753_v11  ;;  %v12791_v10 = vld [vmem:[#allocation6 + $0x368] sm:$0xff]  }
 0x470   : > { %11795 = vmatprep.subr.bf16.mxu0 %v13197_v0  ;;  %11815 = vmatprep.subr.bf16.mxu1 %v13197_v0 }
 0x473   : > { %11796 = vmatpush3.bf16.msra.mxu0 %v12754_v12  ;;  %11816 = vmatpush3.bf16.msra.mxu1 %v12755_v13 }
 0x474   : > { %11797 = vmatprep.subr.bf16.mxu0 %v13197_v0  ;;  %11817 = vmatprep.subr.bf16.mxu1 %v13197_v0 }
 0x477   : > { %11798 = vmatpush3.bf16.msra.mxu0 %v12756_v14  ;;  %11818 = vmatpush3.bf16.msra.mxu1 %v12757_v15 }
 0x478   : > { %11799 = vmatprep.subr.bf16.mxu0 %v13197_v0  ;;  %11819 = vmatprep.subr.bf16.mxu1 %v13197_v0 }
 0x479   : > { %v5378_v18 = vpop.f32.mrb[88].mxu0  ;;  %v5498_v21 = vpop.f32.mrb[88].mxu1 }
 0x47a   : > { %v5384_v19 = vadd.f32 %v5378_v18, %v5264_v60  ;;  %v11527_v20 = vpop.f32.mrb[89].mxu0  ;;  %v11547_v24 = vpop.f32.mrb[89].mxu1  ;;  %v7054_v60 = vld [vmem:[%s13468_s15 + $0xe0] sm:$0xf] }
 0x47b   : > { %v5381_v22 = vpop.f32.mrb[90].mxu0  ;;  %11800 = vmatpush3.bf16.msra.mxu0 %v12758_v16  ;;  %11820 = vmatpush3.bf16.msra.mxu1 %v12759_v17  ;;  %v5501_v28 = vpop.f32.mrb[90].mxu1  ;;  %v9678_v16 = vld [vmem:[#allocation8] ss:$0 sm:$0xff]  ;;  %v12792_v17 = vld [vmem:[#allocation6 + $0x330] sm:$0xff]  }
 0x47c   : > { %v5504_v25 = vadd.f32 %v5498_v21, %v5384_v19  ;;  %v11528_v26 = vpop.f32.mrb[91].mxu0  ;;  %11801 = vmatprep.subr.bf16.mxu0 %v13197_v0  ;;  %11821 = vmatprep.subr.bf16.mxu1 %v13197_v0  ;;  %v11548_v29 = vpop.f32.mrb[91].mxu1  ;;  %v12793_v21 = vld [vmem:[#allocation6 + $0x370] sm:$0xff]  }
 0x47d   : > { %v7266_v29 = vld [vmem:[%s13468_s15 + $0xf0] sm:$0xf] }
 0x47f   : > { %11802 = vmatpush3.bf16.msra.mxu0 %v12760_v23  ;;  %11822 = vmatpush3.bf16.msra.mxu1 %v12761_v27  ;;  %v12795_v27 = vld [vmem:[#allocation6 + $0x378] sm:$0xff]  }
 0x480   : > { %11803 = vmatprep.subr.bf16.mxu0 %v13197_v0  ;;  %11823 = vmatprep.subr.bf16.mxu1 %v13197_v0 }
 0x483   : > { %11804 = vmatpush3.bf16.msra.mxu0 %v12762_v30  ;;  %11824 = vmatpush3.bf16.msra.mxu1 %v12763_v31  ;;  %v12796_v30 = vld [vmem:[#allocation6 + $0x380] sm:$0xff]   ;;  %v7372_v31 = vld [vmem:[%s13468_s15 + $0xf8] sm:$0xf] }
 0x484   : > { %11829 = vmatprep.subr.bf16.mxu0 %v13197_v0  ;;  %11849 = vmatprep.subr.bf16.mxu1 %v13197_v0 }
 0x486   : > { %11806 = vmatmul.mubr.bf16.vlgmr.msra.gmra.mrb[116].mxu0 %v6842_v32  ;;  %11826 = vmatmul.mubr.bf16.vlgmr.msra.gmra.mrb[116].mxu1 %v6948_v34  ;;  %v12797_v32 = vld [vmem:[#allocation6 + $0x3c0] sm:$0xff]   ;;  %v12799_v34 = vld [vmem:[#allocation6 + $0x3c8] sm:$0xff]  }
 0x487   : > { %11830 = vmatpush3.bf16.msra.mxu0 %v12764_v33  ;;  %11850 = vmatpush3.bf16.msra.mxu1 %v12765_v35  ;;  %v12798_v33 = vld [vmem:[#allocation6 + $0x388] sm:$0xff]   ;;  %v12800_v35 = vld [vmem:[#allocation6 + $0x390] sm:$0xff]  }
 0x488   : > { %11831 = vmatprep.subr.bf16.mxu0 %v13197_v0  ;;  %11851 = vmatprep.subr.bf16.mxu1 %v13197_v0 }
 0x489   : > { %11845 = vmatprep.mubr.msk.bf16.mxu0 %vm13198_vm0, %v13197_v0  ;;  %11865 = vmatprep.mubr.msk.bf16.mxu1 %vm13198_vm0, %v13197_v0 }
 0x48b   : > { %11832 = vmatpush3.bf16.msra.mxu0 %v12766_v36  ;;  %11852 = vmatpush3.bf16.msra.mxu1 %v12767_v37  ;;  %v12801_v36 = vld [vmem:[#allocation6 + $0x3d0] sm:$0xff]   ;;  %v12802_v37 = vld [vmem:[#allocation6 + $0x398] sm:$0xff]  }
 0x48c   : > { %11833 = vmatprep.subr.bf16.mxu0 %v13197_v0  ;;  %11853 = vmatprep.subr.bf16.mxu1 %v13197_v0 }
 0x48f   : > { %11834 = vmatpush3.bf16.msra.mxu0 %v12768_v38  ;;  %11854 = vmatpush3.bf16.msra.mxu1 %v12769_v39  ;;  %v12803_v38 = vld [vmem:[#allocation6 + $0x3d8] sm:$0xff]   ;;  %v12804_v39 = vld [vmem:[#allocation6 + $0x3a0] sm:$0xff]  }
 0x490   : > { %11835 = vmatprep.subr.bf16.mxu0 %v13197_v0  ;;  %11855 = vmatprep.subr.bf16.mxu1 %v13197_v0 }
 0x493   : > { %11836 = vmatpush3.bf16.msra.mxu0 %v12770_v40  ;;  %11856 = vmatpush3.bf16.msra.mxu1 %v12771_v41  ;;  %v12805_v40 = vld [vmem:[#allocation6 + $0x3e0] sm:$0xff]   ;;  %v12806_v41 = vld [vmem:[#allocation6 + $0x3a8] sm:$0xff]  }
 0x494   : > { %11837 = vmatprep.subr.bf16.mxu0 %v13197_v0  ;;  %11857 = vmatprep.subr.bf16.mxu1 %v13197_v0 }
 0x497   : > { %11838 = vmatpush3.bf16.msra.mxu0 %v12772_v42  ;;  %11858 = vmatpush3.bf16.msra.mxu1 %v12773_v43  ;;  %v12812_v42 = vld [vmem:[%s13468_s15 + $0x30] sm:$0x1f]  }
 0x498   : > { %11839 = vmatprep.subr.bf16.mxu0 %v13197_v0  ;;  %11859 = vmatprep.subr.bf16.mxu1 %v13197_v0  ;;  %v12807_v43 = vld [vmem:[#allocation6 + $0x3e8] sm:$0xff]  }
 0x499   : > { %v5618_v46 = vpop.f32.mrb[92].mxu0  ;;  %v5738_v49 = vpop.f32.mrb[92].mxu1 }
 0x49a   : > { %v5624_v47 = vadd.f32 %v5618_v46, %v5504_v25  ;;  %v11567_v48 = vpop.f32.mrb[93].mxu0  ;;  %v11587_v52 = vpop.f32.mrb[93].mxu1  ;;  %v12794_v25 = vld [vmem:[#allocation6 + $0x338] sm:$0xff]  }
 0x49b   : > { %v5621_v50 = vpop.f32.mrb[94].mxu0  ;;  %11840 = vmatpush3.bf16.msra.mxu0 %v12774_v44  ;;  %11860 = vmatpush3.bf16.msra.mxu1 %v12775_v45  ;;  %v5741_v56 = vpop.f32.mrb[94].mxu1 }
 0x49c   : > { %v5744_v53 = vadd.f32 %v5738_v49, %v5624_v47  ;;  %v11568_v54 = vpop.f32.mrb[95].mxu0  ;;  %11841 = vmatprep.subr.bf16.mxu0 %v13197_v0  ;;  %11861 = vmatprep.subr.bf16.mxu1 %v13197_v0  ;;  %v11588_v57 = vpop.f32.mrb[95].mxu1  ;;  %v12808_v49 = vld [vmem:[#allocation6 + $0x3b0] sm:$0xff]   ;;  %v7610_v50 = vshll.u32 %v12812_v42, 16  ;;  %v12810_v56 = vld [vmem:[#allocation6 + $0x3b8] sm:$0xff]  }
 0x49d   : > { %v7608_v57 = vshrl.u32 %v12812_v42, 16  ;;  %v12838_v42 = vld [vmem:[#allocation6 + $0x4d8] sm:$0xff]  }
 0x49f   : > { %11842 = vmatpush3.bf16.msra.mxu0 %v12776_v51  ;;  %11862 = vmatpush3.bf16.msra.mxu1 %v12777_v55 }
 0x4a0   : > { %11843 = vmatprep.subr.bf16.mxu0 %v13197_v0  ;;  %11863 = vmatprep.subr.bf16.mxu1 %v13197_v0 }
 0x4a3   : > { %11844 = vmatpush3.bf16.msra.mxu0 %v12778_v58  ;;  %11864 = vmatpush3.bf16.msra.mxu1 %v12779_v59  ;;  %v7612_v58 = vrot.slane %v7610_v50, 1  ;;  %v12811_v59 = vld [vmem:[#allocation6 + $0x3f8] sm:$0xff]  }
 0x4a4   : > { %11869 = vmatprep.subr.bf16.mxu0 %v13197_v0  ;;  %11889 = vmatprep.subr.bf16.mxu1 %v13197_v0 }
 0x4a6   : > { %11846 = vmatmul.mubr.bf16.vlgmr.msra.gmra.mrb[120].mxu0 %v7054_v60  ;;  %11866 = vmatmul.mubr.bf16.vlgmr.msra.gmra.mrb[120].mxu1 %v7160_v62  ;;  %v7478_v60 = vld [vmem:[%s13468_s15 + $0x100] sm:$0xf]  ;;  %v12813_v62 = vld [vmem:[#allocation6 + $0x400] sm:$0xff]  }
 0x4a7   : > { %11870 = vmatpush3.bf16.msra.mxu0 %v12780_v61  ;;  %11890 = vmatpush3.bf16.msra.mxu1 %v12781_v63  ;;  %v7613_v61 = vor.u32 %v7612_v58, %v7608_v57  ;;  %v12814_v63 = vld [vmem:[#allocation6 + $0x440] sm:$0xff]  }
 0x4a8   : > { %11871 = vmatprep.subr.bf16.mxu0 %v13197_v0  ;;  %11891 = vmatprep.subr.bf16.mxu1 %v13197_v0 }
 0x4a9   : > { %11885 = vmatprep.mubr.msk.bf16.mxu0 %vm13198_vm0, %v13197_v0  ;;  %11905 = vmatprep.mubr.msk.bf16.mxu1 %vm13198_vm0, %v13197_v0 }
 0x4ab   : > { %11872 = vmatpush3.bf16.msra.mxu0 %v12782_v1  ;;  %11892 = vmatpush3.bf16.msra.mxu1 %v12783_v2  ;;  %v12815_v1 = vld [vmem:[#allocation6 + $0x408] sm:$0xff]  }
 0x4ac   : > { %11873 = vmatprep.subr.bf16.mxu0 %v13197_v0  ;;  %11893 = vmatprep.subr.bf16.mxu1 %v13197_v0  ;;  %v12816_v2 = vld [vmem:[#allocation6 + $0x448] sm:$0xff]  }
 0x4af   : > { %11874 = vmatpush3.bf16.msra.mxu0 %v12784_v3  ;;  %11894 = vmatpush3.bf16.msra.mxu1 %v12785_v4  ;;  %v12817_v3 = vld [vmem:[#allocation6 + $0x410] sm:$0xff]  }
 0x4b0   : > { %11875 = vmatprep.subr.bf16.mxu0 %v13197_v0  ;;  %11895 = vmatprep.subr.bf16.mxu1 %v13197_v0  ;;  %v12818_v4 = vld [vmem:[#allocation6 + $0x450] sm:$0xff]  }
 0x4b3   : > { %11876 = vmatpush3.bf16.msra.mxu0 %v12786_v5  ;;  %11896 = vmatpush3.bf16.msra.mxu1 %v12787_v6  ;;  %v12819_v5 = vld [vmem:[#allocation6 + $0x418] sm:$0xff]  }
 0x4b4   : > { %11877 = vmatprep.subr.bf16.mxu0 %v13197_v0  ;;  %11897 = vmatprep.subr.bf16.mxu1 %v13197_v0  ;;  %v12820_v6 = vld [vmem:[#allocation6 + $0x458] sm:$0xff]  }
 0x4b7   : > { %11878 = vmatpush3.bf16.msra.mxu0 %v12788_v7  ;;  %11898 = vmatpush3.bf16.msra.mxu1 %v12789_v8  ;;  %v12821_v7 = vld [vmem:[#allocation6 + $0x420] sm:$0xff]  }
 0x4b8   : > { %11879 = vmatprep.subr.bf16.mxu0 %v13197_v0  ;;  %11899 = vmatprep.subr.bf16.mxu1 %v13197_v0  ;;  %v12822_v8 = vld [vmem:[#allocation6 + $0x460] sm:$0xff]  }
 0x4b9   : > { %v5858_v11 = vpop.f32.mrb[96].mxu0  ;;  %v5978_v14 = vpop.f32.mrb[96].mxu1 }
 0x4ba   : > { %v5864_v12 = vadd.f32 %v5858_v11, %v5744_v53  ;;  %v11607_v13 = vpop.f32.mrb[97].mxu0  ;;  %v11627_v18 = vpop.f32.mrb[97].mxu1  ;;  %v12809_v53 = vld [vmem:[#allocation6 + $0x3f0] sm:$0xff]  }
 0x4bb   : > { %v5861_v15 = vpop.f32.mrb[98].mxu0  ;;  %11880 = vmatpush3.bf16.msra.mxu0 %v12790_v9  ;;  %11900 = vmatpush3.bf16.msra.mxu1 %v12791_v10  ;;  %v5981_v22 = vpop.f32.mrb[98].mxu1  ;;  %v12829_v9 = vld [vmem:[%s13468_s15 + $0x38] sm:$0x1f]   ;;  %v12830_v11 = vld [vmem:[%s13468_s15 + $0x40] sm:$0x1f]  }
 0x4bc   : > { %v5984_v19 = vadd.f32 %v5978_v14, %v5864_v12  ;;  %v11608_v20 = vpop.f32.mrb[99].mxu0  ;;  %11881 = vmatprep.subr.bf16.mxu0 %v13197_v0  ;;  %11901 = vmatprep.subr.bf16.mxu1 %v13197_v0  ;;  %v11628_v23 = vpop.f32.mrb[99].mxu1  ;;  %v12823_v10 = vld [vmem:[#allocation6 + $0x428] sm:$0xff]  }
 0x4bd   : > { %v12824_v12 = vld [vmem:[#allocation6 + $0x468] sm:$0xff]   ;;  %v7850_v20 = vshll.u32 %v12830_v11, 16 }
 0x4be   : > { %v5992_v24 = vadd.f32 %v9678_v16, %v5984_v19  ;;  %v12825_v19 = vld [vmem:[#allocation6 + $0x430] sm:$0xff]  }
 0x4bf   : > { %11882 = vmatpush3.bf16.msra.mxu0 %v12792_v17  ;;  %11902 = vmatpush3.bf16.msra.mxu1 %v12793_v21  ;;  %v7730_v17 = vshll.u32 %v12829_v9, 16 }
 0x4c0   : > { %v5993_v26 = vmax.f32 %v5992_v24, 0.0  ;;  %11883 = vmatprep.subr.bf16.mxu0 %v13197_v0  ;;  %11903 = vmatprep.subr.bf16.mxu1 %v13197_v0  ;;  %v12826_v24 = vld [vmem:[#allocation6 + $0x470] sm:$0xff]  }
 0x4c2   : > { %v5994_v28 = vpack.c.bf16 %v5993_v26, %v5993_v26 }
 0x4c3   : > { %11884 = vmatpush3.bf16.msra.mxu0 %v12794_v25  ;;  %11904 = vmatpush3.bf16.msra.mxu1 %v12795_v27  ;;  %v7728_v27 = vshrl.u32 %v12829_v9, 16  ;;  %v12850_v9 = vld [vmem:[#allocation6 + $0x540] sm:$0xff]  }
 0x4c4   : > { %5995 = vst [vmem:[#allocation2 + $0x4] sm:$0xf] %v5994_v28  ;;  %11909 = vmatprep.subr.bf16.mxu0 %v13197_v0  ;;  %11929 = vmatprep.subr.bf16.mxu1 %v13197_v0  ;;  %v7732_v28 = vrot.slane %v7730_v17, 1  ;;  %v12858_v17 = vld [vmem:[#allocation6 + $0x560] sm:$0xff]  }
 0x4c6   : > { %11886 = vmatmul.mubr.bf16.vlgmr.msra.gmra.mrb[124].mxu0 %v7266_v29  ;;  %11906 = vmatmul.mubr.bf16.vlgmr.msra.gmra.mrb[124].mxu1 %v7372_v31  ;;  %v12827_v29 = vld [vmem:[#allocation6 + $0x438] sm:$0xff]   ;;  %v7852_v31 = vrot.slane %v7850_v20, 1  ;;  %v12866_v20 = vld [vmem:[%s13468_s15 + $0x90] sm:$0x1f]  }
 0x4c7   : > { %11910 = vmatpush3.bf16.msra.mxu0 %v12796_v30  ;;  %11930 = vmatpush3.bf16.msra.mxu1 %v12797_v32  ;;  %v7848_v30 = vshrl.u32 %v12830_v11, 16  ;;  %v12828_v32 = vld [vmem:[#allocation6 + $0x478] sm:$0xff]   ;;  %v12852_v11 = vld [vmem:[#allocation6 + $0x548] sm:$0xff]  }
 0x4c8   : > { %11911 = vmatprep.subr.bf16.mxu0 %v13197_v0  ;;  %11931 = vmatprep.subr.bf16.mxu1 %v13197_v0 }
 0x4c9   : > { %11925 = vmatprep.mubr.msk.bf16.mxu0 %vm13198_vm0, %v13197_v0  ;;  %11945 = vmatprep.mubr.msk.bf16.mxu1 %vm13198_vm0, %v13197_v0 }
 0x4cb   : > { %11912 = vmatpush3.bf16.msra.mxu0 %v12798_v33  ;;  %11932 = vmatpush3.bf16.msra.mxu1 %v12799_v34  ;;  %v7733_v33 = vor.u32 %v7732_v28, %v7728_v27  ;;  %v7853_v34 = vor.u32 %v7852_v31, %v7848_v30  ;;  %v12861_v28 = vld [vmem:[#allocation6 + $0x530] sm:$0xff]  }
 0x4cc   : > { %11913 = vmatprep.subr.bf16.mxu0 %v13197_v0  ;;  %11933 = vmatprep.subr.bf16.mxu1 %v13197_v0 }
 0x4cf   : > { %11914 = vmatpush3.bf16.msra.mxu0 %v12800_v35  ;;  %11934 = vmatpush3.bf16.msra.mxu1 %v12801_v36  ;;  %v12831_v35 = vld [vmem:[#allocation6 + $0x480] sm:$0xff]  }
 0x4d0   : > { %11915 = vmatprep.subr.bf16.mxu0 %v13197_v0  ;;  %11935 = vmatprep.subr.bf16.mxu1 %v13197_v0  ;;  %v12832_v36 = vld [vmem:[#allocation6 + $0x4c0] sm:$0xff]  }
 0x4d3   : > { %11916 = vmatpush3.bf16.msra.mxu0 %v12802_v37  ;;  %11936 = vmatpush3.bf16.msra.mxu1 %v12803_v38  ;;  %v12833_v37 = vld [vmem:[#allocation6 + $0x488] sm:$0xff]  }
 0x4d4   : > { %11917 = vmatprep.subr.bf16.mxu0 %v13197_v0  ;;  %11937 = vmatprep.subr.bf16.mxu1 %v13197_v0  ;;  %v12834_v38 = vld [vmem:[#allocation6 + $0x4c8] sm:$0xff]  }
 0x4d7   : > { %11918 = vmatpush3.bf16.msra.mxu0 %v12804_v39  ;;  %11938 = vmatpush3.bf16.msra.mxu1 %v12805_v40  ;;  %v12835_v39 = vld [vmem:[#allocation6 + $0x490] sm:$0xff]  }
 0x4d8   : > { %11919 = vmatprep.subr.bf16.mxu0 %v13197_v0  ;;  %11939 = vmatprep.subr.bf16.mxu1 %v13197_v0  ;;  %v12836_v40 = vld [vmem:[#allocation6 + $0x4d0] sm:$0xff]  }
 0x4d9   : > { %v6112_v44 = vpop.f32.mrb[100].mxu0  ;;  %v6200_v46 = vpop.f32.mrb[100].mxu1 }
 0x4da   : > { %v11647_v45 = vpop.f32.mrb[101].mxu0  ;;  %v14234_v47 = vadd.f32 %v6200_v46, %v6112_v44  ;;  %v11667_v51 = vpop.f32.mrb[101].mxu1  ;;  %v12840_v44 = vld [vmem:[#allocation6 + $0x4e0] sm:$0xff]   ;;  %v12841_v46 = vld [vmem:[#allocation6 + $0x4a8] sm:$0xff]  }
 0x4db   : > { %v6115_v48 = vpop.f32.mrb[102].mxu0  ;;  %11920 = vmatpush3.bf16.msra.mxu0 %v12806_v41  ;;  %11940 = vmatpush3.bf16.msra.mxu1 %v12807_v43  ;;  %v6203_v54 = vpop.f32.mrb[102].mxu1  ;;  %v12837_v41 = vld [vmem:[#allocation6 + $0x498] sm:$0xff]   ;;  %v12839_v43 = vld [vmem:[#allocation6 + $0x4a0] sm:$0xff]  }
 0x4dc   : > { %v11648_v52 = vpop.f32.mrb[103].mxu0  ;;  %11921 = vmatprep.subr.bf16.mxu0 %v13197_v0  ;;  %11941 = vmatprep.subr.bf16.mxu1 %v13197_v0  ;;  %v11668_v55 = vpop.f32.mrb[103].mxu1  ;;  %v12847_v45 = vld [vmem:[%s13468_s15 + $0x48] sm:$0x1f]   ;;  %v12842_v48 = vld [vmem:[#allocation6 + $0x4e8] sm:$0xff]  }
 0x4dd   : > { %v12843_v55 = vld [vmem:[#allocation6 + $0x4b0] sm:$0xff]  }
 0x4df   : > { %11922 = vmatpush3.bf16.msra.mxu0 %v12808_v49  ;;  %11942 = vmatpush3.bf16.msra.mxu1 %v12809_v53  ;;  %v7970_v53 = vshll.u32 %v12847_v45, 16 }
 0x4e0   : > { %11923 = vmatprep.subr.bf16.mxu0 %v13197_v0  ;;  %11943 = vmatprep.subr.bf16.mxu1 %v13197_v0 }
 0x4e3   : > { %11924 = vmatpush3.bf16.msra.mxu0 %v12810_v56  ;;  %11944 = vmatpush3.bf16.msra.mxu1 %v12811_v59 }
 0x4e4   : > { %11949 = vmatprep.subr.bf16.mxu0 %v13197_v0  ;;  %11969 = vmatprep.subr.bf16.mxu1 %v13197_v0 }
 0x4e6   : > { %11926 = vmatmul.mubr.bf16.vlgmr.msra.gmra.mrb[128].mxu0 %v7478_v60  ;;  %11946 = vmatmul.mubr.bf16.vlgmr.msra.gmra.mrb[128].mxu1 %v7613_v61  ;;  %v12844_v60 = vld [vmem:[#allocation6 + $0x4f0] sm:$0xff]  }
 0x4e7   : > { %11950 = vmatpush3.bf16.msra.mxu0 %v12813_v62  ;;  %11970 = vmatpush3.bf16.msra.mxu1 %v12814_v63  ;;  %v7968_v63 = vshrl.u32 %v12847_v45, 16  ;;  %v12868_v45 = vld [vmem:[#allocation6 + $0x5c0] sm:$0xff]  }
 0x4e8   : > { %11951 = vmatprep.subr.bf16.mxu0 %v13197_v0  ;;  %11971 = vmatprep.subr.bf16.mxu1 %v13197_v0 }
 0x4e9   : > { %11965 = vmatprep.mubr.msk.bf16.mxu0 %vm13198_vm0, %v13197_v0  ;;  %11985 = vmatprep.mubr.msk.bf16.mxu1 %vm13198_vm0, %v13197_v0 }
 0x4eb   : > { %11952 = vmatpush3.bf16.msra.mxu0 %v12815_v1  ;;  %11972 = vmatpush3.bf16.msra.mxu1 %v12816_v2  ;;  %v7972_v1 = vrot.slane %v7970_v53, 1  ;;  %v12845_v2 = vld [vmem:[#allocation6 + $0x4b8] sm:$0xff]   ;;  %v12876_v53 = vld [vmem:[#allocation6 + $0x5e0] sm:$0xff]  }
 0x4ec   : > { %11953 = vmatprep.subr.bf16.mxu0 %v13197_v0  ;;  %11973 = vmatprep.subr.bf16.mxu1 %v13197_v0 }
 0x4ef   : > { %11954 = vmatpush3.bf16.msra.mxu0 %v12817_v3  ;;  %11974 = vmatpush3.bf16.msra.mxu1 %v12818_v4 }
 0x4f0   : > { %11955 = vmatprep.subr.bf16.mxu0 %v13197_v0  ;;  %11975 = vmatprep.subr.bf16.mxu1 %v13197_v0 }
 0x4f3   : > { %11956 = vmatpush3.bf16.msra.mxu0 %v12819_v5  ;;  %11976 = vmatpush3.bf16.msra.mxu1 %v12820_v6  ;;  %v12846_v5 = vld [vmem:[#allocation6 + $0x4f8] sm:$0xff]   ;;  %v7973_v6 = vor.u32 %v7972_v1, %v7968_v63  ;;  %v12879_v1 = vld [vmem:[#allocation6 + $0x5b0] sm:$0xff]  }
 0x4f4   : > { %11957 = vmatprep.subr.bf16.mxu0 %v13197_v0  ;;  %11977 = vmatprep.subr.bf16.mxu1 %v13197_v0 }
 0x4f7   : > { %11958 = vmatpush3.bf16.msra.mxu0 %v12821_v7  ;;  %11978 = vmatpush3.bf16.msra.mxu1 %v12822_v8  ;;  %v12849_v8 = vld [vmem:[#allocation6 + $0x500] sm:$0xff]  }
 0x4f8   : > { %11959 = vmatprep.subr.bf16.mxu0 %v13197_v0  ;;  %11979 = vmatprep.subr.bf16.mxu1 %v13197_v0 }
 0x4f9   : > { %v6305_v13 = vpop.f32.mrb[104].mxu0  ;;  %v6411_v16 = vpop.f32.mrb[104].mxu1 }
 0x4fa   : > { %v6311_v14 = vadd.f32 %v6305_v13, %v14234_v47  ;;  %v11687_v15 = vpop.f32.mrb[105].mxu0  ;;  %v11707_v21 = vpop.f32.mrb[105].mxu1  ;;  %v12848_v47 = vld [vmem:[%s13468_s15 + $0x50] sm:$0x1f]   ;;  %v12854_v13 = vld [vmem:[#allocation6 + $0x550] sm:$0xff]  }
 0x4fb   : > { %v6308_v18 = vpop.f32.mrb[106].mxu0  ;;  %11960 = vmatpush3.bf16.msra.mxu0 %v12823_v10  ;;  %11980 = vmatpush3.bf16.msra.mxu1 %v12824_v12  ;;  %v6414_v25 = vpop.f32.mrb[106].mxu1  ;;  %v8090_v56 = vshll.u32 %v12848_v47, 16  ;;  %v8088_v3 = vshrl.u32 %v12848_v47, 16  ;;  %v12851_v10 = vld [vmem:[#allocation6 + $0x508] sm:$0xff]   ;;  %v12853_v12 = vld [vmem:[#allocation6 + $0x510] sm:$0xff]  }
 0x4fc   : > { %v14260_v22 = vadd.f32 %v6411_v16, %v6311_v14  ;;  %v11688_v23 = vpop.f32.mrb[107].mxu0  ;;  %11961 = vmatprep.subr.bf16.mxu0 %v13197_v0  ;;  %11981 = vmatprep.subr.bf16.mxu1 %v13197_v0  ;;  %v11708_v26 = vpop.f32.mrb[107].mxu1  ;;  %v12855_v14 = vld [vmem:[#allocation6 + $0x518] sm:$0xff]   ;;  %v12857_v16 = vld [vmem:[#allocation6 + $0x520] sm:$0xff]   ;;  %v12860_v21 = vld [vmem:[#allocation6 + $0x568] sm:$0xff]  }
 0x4fd   : > { %v8092_v4 = vrot.slane %v8090_v56, 1  ;;  %v12856_v15 = vld [vmem:[#allocation6 + $0x558] sm:$0xff]   ;;  %v12870_v47 = vld [vmem:[#allocation6 + $0x5c8] sm:$0xff]  }
 0x4fe   : > { %v12865_v18 = vld [vmem:[%s13468_s15 + $0x88] sm:$0x1f]   ;;  %v12884_v56 = vld [vmem:[%s13468_s15 + $0xa0] sm:$0x1f]  }
 0x4ff   : > { %11962 = vmatpush3.bf16.msra.mxu0 %v12825_v19  ;;  %11982 = vmatpush3.bf16.msra.mxu1 %v12826_v24  ;;  %v8093_v7 = vor.u32 %v8092_v4, %v8088_v3  ;;  %v12859_v19 = vld [vmem:[#allocation6 + $0x528] sm:$0xff]   ;;  %v8210_v26 = vshll.u32 %v12865_v18, 16 }
 0x500   : > { %11963 = vmatprep.subr.bf16.mxu0 %v13197_v0  ;;  %11983 = vmatprep.subr.bf16.mxu1 %v13197_v0 }
 0x503   : > { %11964 = vmatpush3.bf16.msra.mxu0 %v12827_v29  ;;  %11984 = vmatpush3.bf16.msra.mxu1 %v12828_v32  ;;  %v8330_v29 = vshll.u32 %v12866_v20, 16 }
 0x504   : > { %11989 = vmatprep.subr.bf16.mxu0 %v13197_v0  ;;  %12009 = vmatprep.subr.bf16.mxu1 %v13197_v0 }
 0x506   : > { %11966 = vmatmul.mubr.bf16.vlgmr.msra.gmra.mrb[132].mxu0 %v7733_v33  ;;  %11986 = vmatmul.mubr.bf16.vlgmr.msra.gmra.mrb[132].mxu1 %v7853_v34  ;;  %v12862_v33 = vld [vmem:[#allocation6 + $0x570] sm:$0xff]  }
 0x507   : > { %11990 = vmatpush3.bf16.msra.mxu0 %v12831_v35  ;;  %12010 = vmatpush3.bf16.msra.mxu1 %v12832_v36  ;;  %v8208_v36 = vshrl.u32 %v12865_v18, 16  ;;  %v12886_v18 = vld [vmem:[#allocation6 + $0x600] sm:$0xff]  }
 0x508   : > { %11991 = vmatprep.subr.bf16.mxu0 %v13197_v0  ;;  %12011 = vmatprep.subr.bf16.mxu1 %v13197_v0 }
 0x509   : > { %12005 = vmatprep.mubr.msk.bf16.mxu0 %vm13198_vm0, %v13197_v0  ;;  %12025 = vmatprep.mubr.msk.bf16.mxu1 %vm13198_vm0, %v13197_v0 }
 0x50b   : > { %11992 = vmatpush3.bf16.msra.mxu0 %v12833_v37  ;;  %12012 = vmatpush3.bf16.msra.mxu1 %v12834_v38  ;;  %v8212_v37 = vrot.slane %v8210_v26, 1  ;;  %v12863_v38 = vld [vmem:[#allocation6 + $0x538] sm:$0xff]   ;;  %v12894_v26 = vld [vmem:[#allocation6 + $0x610] sm:$0xff]  }
 0x50c   : > { %11993 = vmatprep.subr.bf16.mxu0 %v13197_v0  ;;  %12013 = vmatprep.subr.bf16.mxu1 %v13197_v0 }
 0x50f   : > { %11994 = vmatpush3.bf16.msra.mxu0 %v12835_v39  ;;  %12014 = vmatpush3.bf16.msra.mxu1 %v12836_v40  ;;  %v8328_v39 = vshrl.u32 %v12866_v20, 16  ;;  %v8332_v40 = vrot.slane %v8330_v29, 1  ;;  %v12887_v20 = vld [vmem:[#allocation9] sm:$0xff]   ;;  %v12897_v29 = vld [vmem:[#allocation6 + $0x618] sm:$0xff]  }
 0x510   : > { %11995 = vmatprep.subr.bf16.mxu0 %v13197_v0  ;;  %12015 = vmatprep.subr.bf16.mxu1 %v13197_v0 }
 0x513   : > { %11996 = vmatpush3.bf16.msra.mxu0 %v12837_v41  ;;  %12016 = vmatpush3.bf16.msra.mxu1 %v12838_v42  ;;  %v12864_v41 = vld [vmem:[#allocation6 + $0x578] sm:$0xff]   ;;  %v8213_v42 = vor.u32 %v8212_v37, %v8208_v36  ;;  %v12903_v36 = vld [vmem:[#allocation6 + $0x628] sm:$0xff]  }
 0x514   : > { %11997 = vmatprep.subr.bf16.mxu0 %v13197_v0  ;;  %12017 = vmatprep.subr.bf16.mxu1 %v13197_v0  ;;  %v12904_v37 = vld [vmem:[#allocation9 + $0x28] sm:$0xff]  }
 0x517   : > { %11998 = vmatpush3.bf16.msra.mxu0 %v12839_v43  ;;  %12018 = vmatpush3.bf16.msra.mxu1 %v12840_v44  ;;  %v8333_v43 = vor.u32 %v8332_v40, %v8328_v39  ;;  %v12867_v44 = vld [vmem:[#allocation6 + $0x580] sm:$0xff]   ;;  %v12905_v39 = vld [vmem:[#allocation9 + $0x70] sm:$0xff]  }
 0x518   : > { %11999 = vmatprep.subr.bf16.mxu0 %v13197_v0  ;;  %12019 = vmatprep.subr.bf16.mxu1 %v13197_v0 }
 0x519   : > { %v6517_v49 = vpop.f32.mrb[108].mxu0  ;;  %v6623_v52 = vpop.f32.mrb[108].mxu1 }
 0x51a   : > { %v6523_v50 = vadd.f32 %v6517_v49, %v14260_v22  ;;  %v11727_v51 = vpop.f32.mrb[109].mxu0  ;;  %v11747_v57 = vpop.f32.mrb[109].mxu1  ;;  %v12872_v49 = vld [vmem:[#allocation6 + $0x5d0] sm:$0xff]  }
 0x51b   : > { %v6520_v54 = vpop.f32.mrb[110].mxu0  ;;  %12000 = vmatpush3.bf16.msra.mxu0 %v12841_v46  ;;  %12020 = vmatpush3.bf16.msra.mxu1 %v12842_v48  ;;  %v6626_v61 = vpop.f32.mrb[110].mxu1  ;;  %v12869_v46 = vld [vmem:[#allocation6 + $0x588] sm:$0xff]   ;;  %v12871_v48 = vld [vmem:[#allocation6 + $0x590] sm:$0xff]   ;;  %v12874_v51 = vld [vmem:[#allocation6 + $0x5d8] sm:$0xff]  }
 0x51c   : > { %v14285_v58 = vadd.f32 %v6623_v52, %v6523_v50  ;;  %v11728_v59 = vpop.f32.mrb[111].mxu0  ;;  %12001 = vmatprep.subr.bf16.mxu0 %v13197_v0  ;;  %12021 = vmatprep.subr.bf16.mxu1 %v13197_v0  ;;  %v11748_v62 = vpop.f32.mrb[111].mxu1  ;;  %v12873_v50 = vld [vmem:[#allocation6 + $0x598] sm:$0xff]   ;;  %v12875_v52 = vld [vmem:[#allocation6 + $0x5a0] sm:$0xff]   ;;  %v12883_v54 = vld [vmem:[%s13468_s15 + $0x98] sm:$0x1f]  }
 0x51d   : > { %v12878_v57 = vld [vmem:[#allocation6 + $0x5e8] sm:$0xff]   ;;  %v8450_v62 = vshll.u32 %v12883_v54, 16 }
 0x51f   : > { %12002 = vmatpush3.bf16.msra.mxu0 %v12843_v55  ;;  %12022 = vmatpush3.bf16.msra.mxu1 %v12844_v60  ;;  %v12877_v55 = vld [vmem:[#allocation6 + $0x5a8] sm:$0xff]  }
 0x520   : > { %12003 = vmatprep.subr.bf16.mxu0 %v13197_v0  ;;  %12023 = vmatprep.subr.bf16.mxu1 %v13197_v0 }
 0x523   : > { %12004 = vmatpush3.bf16.msra.mxu0 %v12845_v2  ;;  %12024 = vmatpush3.bf16.msra.mxu1 %v12846_v5  ;;  %v8570_v2 = vshll.u32 %v12884_v56, 16 }
 0x524   : > { %12029 = vmatprep.subr.bf16.mxu0 %v13197_v0  ;;  %12049 = vmatprep.subr.bf16.mxu1 %v13197_v0 }
 0x526   : > { %12006 = vmatmul.mubr.bf16.vlgmr.msra.gmra.mrb[136].mxu0 %v7973_v6  ;;  %12026 = vmatmul.mubr.bf16.vlgmr.msra.gmra.mrb[136].mxu1 %v8093_v7  ;;  %v12880_v6 = vld [vmem:[#allocation6 + $0x5f0] sm:$0xff]  }
 0x527   : > { %12030 = vmatpush3.bf16.msra.mxu0 %v12849_v8  ;;  %12050 = vmatpush3.bf16.msra.mxu1 %v12850_v9  ;;  %v8448_v9 = vshrl.u32 %v12883_v54, 16 }
 0x528   : > { %12031 = vmatprep.subr.bf16.mxu0 %v13197_v0  ;;  %12051 = vmatprep.subr.bf16.mxu1 %v13197_v0 }
 0x529   : > { %12045 = vmatprep.mubr.msk.bf16.mxu0 %vm13198_vm0, %v13197_v0  ;;  %12065 = vmatprep.mubr.msk.bf16.mxu1 %vm13198_vm0, %v13197_v0 }
 0x52b   : > { %12032 = vmatpush3.bf16.msra.mxu0 %v12851_v10  ;;  %12052 = vmatpush3.bf16.msra.mxu1 %v12852_v11  ;;  %v8452_v10 = vrot.slane %v8450_v62, 1  ;;  %v12881_v11 = vld [vmem:[#allocation6 + $0x5b8] sm:$0xff]  }
 0x52c   : > { %12033 = vmatprep.subr.bf16.mxu0 %v13197_v0  ;;  %12053 = vmatprep.subr.bf16.mxu1 %v13197_v0 }
 0x52f   : > { %12034 = vmatpush3.bf16.msra.mxu0 %v12853_v12  ;;  %12054 = vmatpush3.bf16.msra.mxu1 %v12854_v13  ;;  %v8568_v12 = vshrl.u32 %v12884_v56, 16  ;;  %v8572_v13 = vrot.slane %v8570_v2, 1  ;;  %v12910_v56 = vld [vmem:[#allocation9 + $0x38] sm:$0xff]  }
 0x530   : > { %12035 = vmatprep.subr.bf16.mxu0 %v13197_v0  ;;  %12055 = vmatprep.subr.bf16.mxu1 %v13197_v0 }
 0x533   : > { %12036 = vmatpush3.bf16.msra.mxu0 %v12855_v14  ;;  %12056 = vmatpush3.bf16.msra.mxu1 %v12856_v15  ;;  %v12882_v14 = vld [vmem:[#allocation6 + $0x5f8] sm:$0xff]   ;;  %v12885_v15 = vld [vmem:[#allocation9 + $0x40] sm:$0xff]  }
 0x534   : > { %12037 = vmatprep.subr.bf16.mxu0 %v13197_v0  ;;  %12057 = vmatprep.subr.bf16.mxu1 %v13197_v0 }
 0x537   : > { %12038 = vmatpush3.bf16.msra.mxu0 %v12857_v16  ;;  %12058 = vmatpush3.bf16.msra.mxu1 %v12858_v17  ;;  %v8453_v16 = vor.u32 %v8452_v10, %v8448_v9  ;;  %v8573_v17 = vor.u32 %v8572_v13, %v8568_v12 }
 0x538   : > { %12039 = vmatprep.subr.bf16.mxu0 %v13197_v0  ;;  %12059 = vmatprep.subr.bf16.mxu1 %v13197_v0 }
 0x539   : > { %v6729_v22 = vpop.f32.mrb[112].mxu0  ;;  %v6835_v25 = vpop.f32.mrb[112].mxu1 }
 0x53a   : > { %v6735_v23 = vadd.f32 %v6729_v22, %v14285_v58  ;;  %v11767_v24 = vpop.f32.mrb[113].mxu0  ;;  %v11787_v30 = vpop.f32.mrb[113].mxu1 }
 0x53b   : > { %v6732_v27 = vpop.f32.mrb[114].mxu0  ;;  %12040 = vmatpush3.bf16.msra.mxu0 %v12859_v19  ;;  %12060 = vmatpush3.bf16.msra.mxu1 %v12860_v21  ;;  %v6838_v34 = vpop.f32.mrb[114].mxu1  ;;  %v14341_v19 = vld [vmem:[#allocation2] sm:$0xff]  ;;  %v12898_v30 = vld [vmem:[#allocation9 + $0x18] sm:$0xff]  }
 0x53c   : > { %v14310_v31 = vadd.f32 %v6835_v25, %v6735_v23  ;;  %v11768_v32 = vpop.f32.mrb[115].mxu0  ;;  %12041 = vmatprep.subr.bf16.mxu0 %v13197_v0  ;;  %12061 = vmatprep.subr.bf16.mxu1 %v13197_v0  ;;  %v11788_v35 = vpop.f32.mrb[115].mxu1  ;;  %v12890_v21 = vld [vmem:[#allocation9 + $0x48] sm:$0xff]   ;;  %v9892_v22 = vcombine.high %v14341_v19, %v14341_v19  ;;  %v12893_v25 = vld [vmem:[#allocation9 + $0x50] sm:$0xff]  }
 0x53d   : > { %v12891_v23 = vld [vmem:[#allocation6 + $0x608] sm:$0xff]   ;;  %v12895_v27 = vld [vmem:[#allocation9 + $0x10] sm:$0xff]   ;;  %v12900_v32 = vld [vmem:[#allocation6 + $0x620] sm:$0xff]  }
 0x53e   : > { %v12892_v24 = vld [vmem:[#allocation9 + $0x8] sm:$0xff]   ;;  %v12911_v35 = vld [vmem:[%s13468_s15 + $0xa8] sm:$0x1f]  }
 0x53f   : > { %12042 = vmatpush3.bf16.msra.mxu0 %v12861_v28  ;;  %12062 = vmatpush3.bf16.msra.mxu1 %v12862_v33  ;;  %v12896_v28 = vld [vmem:[#allocation9 + $0x58] sm:$0xff]   ;;  %v12901_v33 = vld [vmem:[#allocation9 + $0x20] sm:$0xff]   ;;  %v12902_v34 = vld [vmem:[#allocation9 + $0x68] sm:$0xff]  }
 0x540   : > { %12043 = vmatprep.subr.bf16.mxu0 %v13197_v0  ;;  %12063 = vmatprep.subr.bf16.mxu1 %v13197_v0 }
 0x543   : > { %12044 = vmatpush3.bf16.msra.mxu0 %v12863_v38  ;;  %12064 = vmatpush3.bf16.msra.mxu1 %v12864_v41 }
 0x544   : > { %12069 = vmatprep.subr.bf16.mxu0 %v13197_v0  ;;  %12089 = vmatprep.subr.bf16.mxu1 %v13197_v0 }
 0x546   : > { %12046 = vmatmul.mubr.bf16.vlgmr.msra.gmra.mrb[140].mxu0 %v8213_v42  ;;  %12066 = vmatmul.mubr.bf16.vlgmr.msra.gmra.mrb[140].mxu1 %v8333_v43  ;;  %v8690_v43 = vshll.u32 %v12911_v35, 16 }
 0x547   : > { %12070 = vmatpush3.bf16.msra.mxu0 %v12867_v44  ;;  %12090 = vmatpush3.bf16.msra.mxu1 %v12868_v45  ;;  %v12906_v45 = vld [vmem:[#allocation6 + $0x630] sm:$0xff]  }
 0x548   : > { %12071 = vmatprep.subr.bf16.mxu0 %v13197_v0  ;;  %12091 = vmatprep.subr.bf16.mxu1 %v13197_v0  ;;  %v8692_v54 = vrot.slane %v8690_v43, 1 }
 0x549   : > { %12085 = vmatprep.mubr.msk.bf16.mxu0 %vm13198_vm0, %v13197_v0  ;;  %12105 = vmatprep.mubr.msk.bf16.mxu1 %vm13198_vm0, %v13197_v0 }
 0x54b   : > { %12072 = vmatpush3.bf16.msra.mxu0 %v12869_v46  ;;  %12092 = vmatpush3.bf16.msra.mxu1 %v12870_v47 }
 0x54c   : > { %12073 = vmatprep.subr.bf16.mxu0 %v13197_v0  ;;  %12093 = vmatprep.subr.bf16.mxu1 %v13197_v0 }
 0x54f   : > { %12074 = vmatpush3.bf16.msra.mxu0 %v12871_v48  ;;  %12094 = vmatpush3.bf16.msra.mxu1 %v12872_v49  ;;  %v12907_v49 = vld [vmem:[#allocation9 + $0x30] sm:$0xff]  }
 0x550   : > { %12075 = vmatprep.subr.bf16.mxu0 %v13197_v0  ;;  %12095 = vmatprep.subr.bf16.mxu1 %v13197_v0 }
 0x553   : > { %12076 = vmatpush3.bf16.msra.mxu0 %v12873_v50  ;;  %12096 = vmatpush3.bf16.msra.mxu1 %v12874_v51  ;;  %v12908_v51 = vld [vmem:[#allocation9 + $0x78] sm:$0xff]  }
 0x554   : > { %12077 = vmatprep.subr.bf16.mxu0 %v13197_v0  ;;  %12097 = vmatprep.subr.bf16.mxu1 %v13197_v0 }
 0x557   : > { %12078 = vmatpush3.bf16.msra.mxu0 %v12875_v52  ;;  %12098 = vmatpush3.bf16.msra.mxu1 %v12876_v53  ;;  %v8688_v53 = vshrl.u32 %v12911_v35, 16 }
 0x558   : > { %12079 = vmatprep.subr.bf16.mxu0 %v13197_v0  ;;  %12099 = vmatprep.subr.bf16.mxu1 %v13197_v0 }
 0x559   : > { %v6941_v58 = vpop.f32.mrb[116].mxu0  ;;  %v7047_v61 = vpop.f32.mrb[116].mxu1 }
 0x55a   : > { %v6947_v59 = vadd.f32 %v6941_v58, %v14310_v31  ;;  %v11807_v60 = vpop.f32.mrb[117].mxu0  ;;  %v11827_v3 = vpop.f32.mrb[117].mxu1  ;;  %v12899_v31 = vld [vmem:[#allocation9 + $0x60] sm:$0xff]   ;;  %v9891_v58 = vcombine.low %v14341_v19, %v14341_v19  ;;  %v12915_v19 = vld [vmem:[#allocation9 + $0x98] sm:$0xff]  }
 0x55b   : > { %v6944_v63 = vpop.f32.mrb[118].mxu0  ;;  %12080 = vmatpush3.bf16.msra.mxu0 %v12877_v55  ;;  %12100 = vmatpush3.bf16.msra.mxu1 %v12878_v57  ;;  %v7050_v7 = vpop.f32.mrb[118].mxu1  ;;  %v12909_v55 = vld [vmem:[#allocation6 + $0x638] sm:$0xff]   ;;  %v8693_v57 = vor.u32 %v8692_v54, %v8688_v53 }
 0x55c   : > { %v14335_v4 = vadd.f32 %v7047_v61, %v6947_v59  ;;  %v11808_v5 = vpop.f32.mrb[119].mxu0  ;;  %12081 = vmatprep.subr.bf16.mxu0 %v13197_v0  ;;  %12101 = vmatprep.subr.bf16.mxu1 %v13197_v0  ;;  %v11828_v8 = vpop.f32.mrb[119].mxu1 }
 0x55f   : > { %12082 = vmatpush3.bf16.msra.mxu0 %v12879_v1  ;;  %12102 = vmatpush3.bf16.msra.mxu1 %v12880_v6 }
 0x560   : > { %12083 = vmatprep.subr.bf16.mxu0 %v13197_v0  ;;  %12103 = vmatprep.subr.bf16.mxu1 %v13197_v0 }
 0x563   : > { %12084 = vmatpush3.bf16.msra.mxu0 %v12881_v11  ;;  %12104 = vmatpush3.bf16.msra.mxu1 %v12882_v14 }
 0x564   : > { %12109 = vmatprep.subr.bf16.mxu0 %v13197_v0  ;;  %10598 = vmatprep.subr.bf16.mxu1 %v12885_v15  ;;  %v12912_v15 = vld [vmem:[#allocation9 + $0x80] sm:$0xff]  }
 0x566   : > { %12086 = vmatmul.mubr.bf16.vlgmr.msra.gmra.mrb[144].mxu0 %v8453_v16  ;;  %12106 = vmatmul.mubr.bf16.vlgmr.msra.gmra.mrb[144].mxu1 %v8573_v17  ;;  %v12913_v17 = vld [vmem:[#allocation9 + $0x88] sm:$0xff]  }
 0x567   : > { %12110 = vmatpush3.bf16.msra.mxu0 %v12886_v18  ;;  %10599 = vmatpush3.bf16.msra.mxu1 %v12887_v20  ;;  %v12914_v18 = vld [vmem:[#allocation9 + $0x90] sm:$0xff]  }
 0x568   : > { %9039 = vmatprep.mubr.bf16.mxu1 %v9892_v22  ;;  %12111 = vmatprep.subr.bf16.mxu0 %v13197_v0 }
 0x569   : > { %10600 = vmatprep.subr.bf16.mxu1 %v12890_v21  ;;  %12125 = vmatprep.mubr.msk.bf16.mxu0 %vm13198_vm0, %v13197_v0 }
 0x56b   : > { %12112 = vmatpush3.bf16.msra.mxu0 %v12891_v23  ;;  %10601 = vmatpush3.bf16.msra.mxu1 %v12892_v24 }
 0x56c   : > { %12113 = vmatprep.subr.bf16.mxu0 %v13197_v0  ;;  %10602 = vmatprep.subr.bf16.mxu1 %v12893_v25 }
 0x56f   : > { %12114 = vmatpush3.bf16.msra.mxu0 %v12894_v26  ;;  %10603 = vmatpush3.bf16.msra.mxu1 %v12895_v27  ;;  %v12916_v26 = vld [vmem:[#allocation9 + $0xa0] sm:$0xff]  }
 0x570   : > { %12115 = vmatprep.subr.bf16.mxu0 %v13197_v0  ;;  %10604 = vmatprep.subr.bf16.mxu1 %v12896_v28 }
 0x573   : > { %12116 = vmatpush3.bf16.msra.mxu0 %v12897_v29  ;;  %10605 = vmatpush3.bf16.msra.mxu1 %v12898_v30 }
 0x574   : > { %12117 = vmatprep.subr.bf16.mxu0 %v13197_v0  ;;  %10606 = vmatprep.subr.bf16.mxu1 %v12899_v31  ;;  %v12917_v31 = vld [vmem:[#allocation9 + $0xa8] sm:$0xff]  }
 0x577   : > { %12118 = vmatpush3.bf16.msra.mxu0 %v12900_v32  ;;  %10607 = vmatpush3.bf16.msra.mxu1 %v12901_v33  ;;  %v12918_v32 = vld [vmem:[#allocation9 + $0xb0] sm:$0xff]   ;;  %v12919_v33 = vld [vmem:[#allocation9 + $0xb8] sm:$0xff]  }
 0x578   : > { %12119 = vmatprep.subr.bf16.mxu0 %v13197_v0  ;;  %10608 = vmatprep.subr.bf16.mxu1 %v12902_v34 }
 0x579   : > { %v7153_v38 = vpop.f32.mrb[120].mxu0  ;;  %v7259_v42 = vpop.f32.mrb[120].mxu1 }
 0x57a   : > { %v7159_v40 = vadd.f32 %v7153_v38, %v14335_v4  ;;  %v11847_v41 = vpop.f32.mrb[121].mxu0  ;;  %v11867_v46 = vpop.f32.mrb[121].mxu1 }
 0x57b   : > { %v7156_v44 = vpop.f32.mrb[122].mxu0  ;;  %12120 = vmatpush3.bf16.msra.mxu0 %v12903_v36  ;;  %10609 = vmatpush3.bf16.msra.mxu1 %v12904_v37  ;;  %v7262_v50 = vpop.f32.mrb[122].mxu1 }
 0x57c   : > { %v7265_v47 = vadd.f32 %v7259_v42, %v7159_v40  ;;  %v11848_v48 = vpop.f32.mrb[123].mxu0  ;;  %12121 = vmatprep.subr.bf16.mxu0 %v13197_v0  ;;  %10610 = vmatprep.subr.bf16.mxu1 %v12905_v39  ;;  %v11868_v52 = vpop.f32.mrb[123].mxu1 }
 0x57f   : > { %12122 = vmatpush3.bf16.msra.mxu0 %v12906_v45  ;;  %10611 = vmatpush3.bf16.msra.mxu1 %v12907_v49 }
 0x580   : > { %12123 = vmatprep.subr.bf16.mxu0 %v13197_v0  ;;  %10612 = vmatprep.subr.bf16.mxu1 %v12908_v51 }
 0x583   : > { %12124 = vmatpush3.bf16.msra.mxu0 %v12909_v55  ;;  %10613 = vmatpush3.bf16.msra.mxu1 %v12910_v56 }
 0x584   : > { %12129 = vmatprep.subr.bf16.mxu0 %v13197_v0 }
 0x586   : > { %12126 = vmatmul.mubr.bf16.vlgmr.msra.gmra.mrb[148].mxu0 %v8693_v57  ;;  %9040 = vmatmul.mubr.bf16.vlgmr.msra.gmra.mrb[148].mxu1 %v9891_v58 }
 0x587   : > { %12145 = vmatprep.mubr.msk.bf16.mxu0 %vm13198_vm0, %v13197_v0  ;;  %12130 = vmatpush3.bf16.msra.mxu0 %v12912_v15  ;;  %v9890_v15 = vld [vmem:[#allocation11] ss:$0 sm:$0xff] }
 0x588   : > { %12131 = vmatprep.subr.bf16.mxu0 %v13197_v0 }
 0x58b   : > { %12132 = vmatpush3.bf16.msra.mxu0 %v12913_v17 }
 0x58c   : > { %12133 = vmatprep.subr.bf16.mxu0 %v13197_v0 }
 0x58f   : > { %12134 = vmatpush3.bf16.msra.mxu0 %v12914_v18 }
 0x590   : > { %12135 = vmatprep.subr.bf16.mxu0 %v13197_v0 }
 0x593   : > { %12136 = vmatpush3.bf16.msra.mxu0 %v12915_v19 }
 0x594   : > { %12137 = vmatprep.subr.bf16.mxu0 %v13197_v0 }
 0x597   : > { %12138 = vmatpush3.bf16.msra.mxu0 %v12916_v26 }
 0x598   : > { %12139 = vmatprep.subr.bf16.mxu0 %v13197_v0 }
 0x599   : > { %v7365_v59 = vpop.f32.mrb[124].mxu0  ;;  %v7471_v62 = vpop.f32.mrb[124].mxu1 }
 0x59a   : > { %v7371_v60 = vadd.f32 %v7365_v59, %v7265_v47  ;;  %v11887_v61 = vpop.f32.mrb[125].mxu0  ;;  %v11907_v1 = vpop.f32.mrb[125].mxu1 }
 0x59b   : > { %v7368_v63 = vpop.f32.mrb[126].mxu0  ;;  %v7474_v4 = vpop.f32.mrb[126].mxu1  ;;  %12140 = vmatpush3.bf16.msra.mxu0 %v12917_v31  ;;  %v9889_v1 = vld [vmem:[#allocation8] ss:$0 sm:$0xff] }
 0x59c   : > { %v7477_v2 = vadd.f32 %v7471_v62, %v7371_v60  ;;  %v11888_v3 = vpop.f32.mrb[127].mxu0  ;;  %v11908_v5 = vpop.f32.mrb[127].mxu1  ;;  %12141 = vmatprep.subr.bf16.mxu0 %v13197_v0 }
 0x59f   : > { %12142 = vmatpush3.bf16.msra.mxu0 %v12918_v32 }
 0x5a0   : > { %12143 = vmatprep.subr.bf16.mxu0 %v13197_v0 }
 0x5a3   : > { %12144 = vmatpush3.bf16.msra.mxu0 %v12919_v33 }
 0x5b9   : > { %v7577_v6 = vpop.f32.mrb[128].mxu0  ;;  %v7697_v9 = vpop.f32.mrb[128].mxu1 }
 0x5ba   : > { %v7583_v7 = vadd.f32 %v7577_v6, %v7477_v2  ;;  %v11927_v8 = vpop.f32.mrb[129].mxu0  ;;  %v11947_v11 = vpop.f32.mrb[129].mxu1 }
 0x5bb   : > { %v7580_v10 = vpop.f32.mrb[130].mxu0  ;;  %v7700_v14 = vpop.f32.mrb[130].mxu1 }
 0x5bc   : > { %v7703_v12 = vadd.f32 %v7697_v9, %v7583_v7  ;;  %v11928_v13 = vpop.f32.mrb[131].mxu0  ;;  %v11948_v16 = vpop.f32.mrb[131].mxu1 }
 0x5d9   : > { %v7817_v20 = vpop.f32.mrb[132].mxu0  ;;  %v7937_v23 = vpop.f32.mrb[132].mxu1 }
 0x5da   : > { %v7823_v21 = vadd.f32 %v7817_v20, %v7703_v12  ;;  %v11967_v22 = vpop.f32.mrb[133].mxu0  ;;  %v11987_v25 = vpop.f32.mrb[133].mxu1  ;;  %v9088_v20 = vld [vmem:[#allocation12] sm:$0xff] }
 0x5db   : > { %v7820_v24 = vpop.f32.mrb[134].mxu0  ;;  %v7940_v29 = vpop.f32.mrb[134].mxu1 }
 0x5dc   : > { %v7943_v27 = vadd.f32 %v7937_v23, %v7823_v21  ;;  %v11968_v28 = vpop.f32.mrb[135].mxu0  ;;  %v11988_v30 = vpop.f32.mrb[135].mxu1 }
 0x5f9   : > { %v8057_v34 = vpop.f32.mrb[136].mxu0  ;;  %v8177_v37 = vpop.f32.mrb[136].mxu1 }
 0x5fa   : > { %v8063_v35 = vadd.f32 %v8057_v34, %v7943_v27  ;;  %v12007_v36 = vpop.f32.mrb[137].mxu0  ;;  %v12027_v39 = vpop.f32.mrb[137].mxu1 }
 0x5fb   : > { %v8060_v38 = vpop.f32.mrb[138].mxu0  ;;  %v8180_v42 = vpop.f32.mrb[138].mxu1 }
 0x5fc   : > { %v8183_v40 = vadd.f32 %v8177_v37, %v8063_v35  ;;  %v12008_v41 = vpop.f32.mrb[139].mxu0  ;;  %v12028_v43 = vpop.f32.mrb[139].mxu1 }
 0x619   : > { %v8297_v44 = vpop.f32.mrb[140].mxu0  ;;  %v8417_v47 = vpop.f32.mrb[140].mxu1 }
 0x61a   : > { %v8303_v45 = vadd.f32 %v8297_v44, %v8183_v40  ;;  %v12047_v46 = vpop.f32.mrb[141].mxu0  ;;  %v12067_v49 = vpop.f32.mrb[141].mxu1 }
 0x61b   : > { %v8300_v48 = vpop.f32.mrb[142].mxu0  ;;  %v8420_v0 = vpop.f32.mrb[142].mxu1 }
 0x61c   : > { %v8423_v50 = vadd.f32 %v8417_v47, %v8303_v45  ;;  %v12048_v51 = vpop.f32.mrb[143].mxu0  ;;  %v12068_v52 = vpop.f32.mrb[143].mxu1 }
 0x639   : > { %v8537_v53 = vpop.f32.mrb[144].mxu0  ;;  %v8657_v56 = vpop.f32.mrb[144].mxu1 }
 0x63a   : > { %v8543_v54 = vadd.f32 %v8537_v53, %v8423_v50  ;;  %v12087_v55 = vpop.f32.mrb[145].mxu0  ;;  %v12107_v58 = vpop.f32.mrb[145].mxu1 }
 0x63b   : > { %v8540_v57 = vpop.f32.mrb[146].mxu0  ;;  %v8660_v61 = vpop.f32.mrb[146].mxu1 }
 0x63c   : > { %v8663_v59 = vadd.f32 %v8657_v56, %v8543_v54  ;;  %v12088_v60 = vpop.f32.mrb[147].mxu0  ;;  %v12108_v62 = vpop.f32.mrb[147].mxu1 }
 0x659   : > { %v8777_v63 = vpop.f32.mrb[148].mxu0  ;;  %v10614_v3 = vpop.f32.mrb[148].mxu1 }
 0x65a   : > { %v8783_v2 = vadd.f32 %v8777_v63, %v8663_v59  ;;  %v12127_v4 = vpop.f32.mrb[149].mxu0  ;;  %v10615_v5 = vpop.f32.mrb[149].mxu1 }
 0x65b   : > { %v8780_v6 = vpop.f32.mrb[150].mxu0  ;;  %v10616_v8 = vadd.f32 %v10615_v5, %v10614_v3  ;;  %v10617_v9 = vpop.f32.mrb[150].mxu1 }
 0x65c   : > { %v8791_v7 = vadd.f32 %v9889_v1, %v8783_v2  ;;  %v12128_v10 = vpop.f32.mrb[151].mxu0  ;;  %v10618_v11 = vpop.f32.mrb[151].mxu1 }
 0x65d   : > { %v9042_v16 = vadd.f32 %v10616_v8, %v9890_v15 }
 0x65e   : > { %v8792_v12 = vmax.f32 %v8791_v7, 0.0 }
 0x660   : > { %v8793_v13 = vpack.c.bf16 %v8792_v12, %v8792_v12 }
 0x662   : > { %8794 = vst [vmem:[#allocation2 + $0x8] sm:$0xf] %v8793_v13 }
 0x669   : > { %v12920_v14 = vld [vmem:[#allocation2 + $0x8] ss:$0 sps:$4 sm:$0xff]  }
 0x66a   : > { %12146 = vmatmul.mubr.bf16.vlgmr.msra.gmra.mrb[152].mxu0 %v12920_v14 }
 0x73d   : > { %v9081_v17 = vpop.f32.mrb[152].mxu0 }
 0x73e   : > { %v9082_v18 = vadd.f32 %v9081_v17, %v9042_v16  ;;  %v12147_v19 = vpop.f32.mrb[153].mxu0 }
 0x73f   : > { %v9084_v21 = vpop.f32.mrb[154].mxu0 }
 0x740   : > { %v9087_v22 = vmul.f32 5.656854, %v9082_v18  ;;  %v12148_v23 = vpop.f32.mrb[155].mxu0 }
 0x742   : > { %v9089_v24 = vadd.f32 %v9088_v20, %v9087_v22 }
 0x744   : > { %9090 = vst [vmem:[%s366_s16] sm:$0xff] %v9089_v24 }
 0x745   : > { %13102 = shalt.err (!%p13099_p8)
}
 0x746   : > { %s13103_s12 = scalar_lea.hbm %s14374_s18, 128  ;;  %s13107_s30 = scalar_lea.hbm %s14460_s29, 256 }
 0x747   : > { %p13104_p9 = scmp.ne.s32.totalorder %s14374_s18, %s13103_s12  ;;  %p13108_p2 = scmp.lt.u32.totalorder %s14374_s18, %s14460_s29 }
 0x748   : > { %p13109_p6 = scmp.lt.u32.totalorder %s13107_s30, %s13103_s12  ;;  %p13111_p13 = scmp.lt.u32.totalorder %s13103_s12, %s14374_s18 }
 0x749   : > { %p13105_p11 = pnand %p13104_p9, %p14461_p4 }
 0x74a   : > { %p13110_p0 = por %p13109_p6, %p13108_p2 }
 0x74b   : > { %p13106_p12 = pneg %p13105_p11 }
 0x74c   : > { %p13112_p1 = por %p13111_p13, %p13110_p0 }
 0x74e   : > { %p13113_p3 = pnand %p13112_p1, %p13106_p12 }
 0x750   : > { %13116 = shalt.err (!%p13113_p3)
}
 0x751   : > { %12172 = dma.vmem_to_hbm [thread:$0]  (%p14461_p4), %s14376_s11, 128, %s14374_s18, %s9092_s28  }
 0x752 PF: > { %s14462_s15 = sld [smem:[#allocation20_spill]]  ;;  %s14463_s8 = sld [smem:[#allocation24_spill]] }
 0x758   : > { %s9118_s14 = sand.u32 1, %s14462_s15   ;;  %p14464_p7 = scmp.ne.s32.totalorder %s14463_s8, 0 }
 0x759   : > { %s9119_s16 = scalar_lea.sflag [#allocation5], %s9118_s14 }
 0x75a   : > { %p12191_p5 = pnand %p9244_p10, %p14464_p7 }
 0x75c   : > { %13158 = dma.done.wait (!%p12191_p5), %s9119_s16, 128  }
 0x75d   : > { %13160 = vsyncadd (!%p12191_p5), %s9119_s16, 4294967168  ;;  %s25_s26 = sadd.s32 1, %s13185_s26   ;;  %s14465_s10 = sld [smem:[#allocation23_spill]] }
 0x75e   : > { %p22_p8 = scmp.ge.s32.totalorder %s25_s26, 4   ;;  %s14466_s13 = sld [smem:[#allocation21_spill]] }
 0x75f   : > { %s14467_s21 = smov %s13169_s22  ;;  %s14468_s22 = smov %s13173_s23 }
 0x760   : > { %s14470_s24 = smov %s13181_s25  ;;  %24 = sbr.rel (!%p22_p8) target bundleno = 11 (0xb), region = 134 }
 0x763   : > { %s14469_s23 = smov %s14465_s10 }
 0x764   : > { %s14471_s25 = smov %s14466_s13 }
 0x767   :  { %9124 = vsyncpa [#allocation4], 1 }
 0x768   :  { %9126 = vsyncpa [#allocation4 + $0x1], 1 }
 0x769   :  { %9127 = vsyncpa [#allocation7], 1 }
 0x76a   :  { %9128 = vsyncpa [#allocation10], 1 }
 0x76b   :  { %9129 = vsyncpa [#allocation13], 1 }
 0x76c   :  { %9130 = vsyncpa [#allocation5], 1 }
 0x76d   :  { %9132 = vsyncpa [#allocation5 + $0x1], 1 }

</bundles_post_ra>
